<compile_context>
chip_gen: v7x
topology: tpu7x:2x2x1
jax: 0.10.0
libtpu: 0.0.40
codegen_flags: <defaults>
</compile_context>

<pallas_src>
import functools

import jax
import jax.numpy as jnp
import numpy as np
from jax import lax
from jax.experimental import pallas as pl
from jax.experimental.pallas import tpu as pltpu


def _round_up(n, m):
    return (n + m - 1) // m * m


# --------------------------------- kernel -------------------------------------


def _gru(xp_s, whh_ref, bn_ref, out_s, h_ref, n_steps, unroll):
    """PyTorch-semantics GRU recurrence over `n_steps` time steps.

    xp_s    : (Tc, Bt, 3H) scratch holding  x_t @ W_ih^T + b_ih (+ b_hh for r,z)
    whh_ref : (H, 3H) ref  (W_hh transposed; f32 or bf16)
    bn_ref  : (1, H) ref   (b_hh of the n-gate only)
    out_s   : (Tc, Bt, H) scratch receiving the output sequence
    h_ref   : (Bt, H) f32 scratch carrying the hidden state across time chunks
    Gate order (PyTorch): [r | z | n].
    """
    Bt, H = out_s.shape[1], out_s.shape[2]
    wdt = whh_ref.dtype
    whh = whh_ref[...]
    # Hoist the (1,H)->(Bt,H) broadcast out of the serial loop (JAX does not
    # CSE broadcast_in_dim, so leaving it inside re-emits it every step).
    bnb = jnp.broadcast_to(bn_ref[...], (Bt, H))

    # TODO(synk): for tiny Bt, keep whh resident on the MXU across the
    # recurrence via pltpu.matmul_push_rhs/matmul_acc_lhs/matmul_pop instead of
    # re-streaming it with jnp.dot every step.
    def step(t, h_prev):
        gx = xp_s[t]                                                # (Bt, 3H)
        # NOTE: with bf16 weights the LHS is cast to bf16 too; the carry itself
        # stays f32.  For very long T / tight accuracy, keep this matmul f32.
        gh = jnp.dot(h_prev.astype(wdt), whh,
                     preferred_element_type=jnp.float32)            # (Bt, 3H)
        r = jax.nn.sigmoid(gx[:, :H] + gh[:, :H])
        z = jax.nn.sigmoid(gx[:, H:2 * H] + gh[:, H:2 * H])
        n = jnp.tanh(gx[:, 2 * H:] + r * (gh[:, 2 * H:] + bnb))
        h_new = (1.0 - z) * n + z * h_prev
        out_s[t] = h_new.astype(out_s.dtype)
        return h_new

    h_final = lax.fori_loop(0, n_steps, step, h_ref[...], unroll=unroll)
    h_ref[...] = h_final


def dynamic_nsnet2_kernel(
    x_ref,                                    # (Tc, Bt, F)
    w1_ref, b1_ref,                           # (F, H), (1, H)
    wih1_ref, whh1_ref, bx1_ref, bn1_ref,     # (H, 3H), (H, 3H), (1, 3H), (1, H)
    wih2_ref, whh2_ref, bx2_ref, bn2_ref,
    w2_ref, b2_ref,                           # (H, F), (1, F)
    we0_ref, be0_ref,                         # (F, F), (1, F)
    we1_ref, be1_ref,
    we2_ref, be2_ref,
    m0_ref, m1_ref, m2_ref,                   # (Tc, Bt, F) each
    xp_s, g1_s, g2_s, h1_s, h2_s,             # scratch
    *, unroll,
):
    Tc, Bt, F = x_ref.shape
    H = w1_ref.shape[1]
    wdt = w1_ref.dtype

    # New batch tile -> reset the carried GRU hidden states.
    @pl.when(pl.program_id(1) == 0)
    def _():
        h1_s[...] = jnp.zeros_like(h1_s)
        h2_s[...] = jnp.zeros_like(h2_s)

    def mm(a, w_ref, b_ref=None):
        out = jnp.dot(a.astype(wdt), w_ref[...],
                      preferred_element_type=jnp.float32)
        if b_ref is not None:
            out = out + b_ref[...]
        return out

    x2d = x_ref[...].reshape(Tc * Bt, F)

    # fc1 + relu: one big MXU matmul over the whole (Tc*Bt) slab.
    h1 = jnp.maximum(mm(x2d, w1_ref, b1_ref), 0.0)                  # (Tc*Bt, H)

    # GRU1: hoist input projections out of the recurrence, then recur.
    xp_s[...] = mm(h1, wih1_ref, bx1_ref).reshape(Tc, Bt, 3 * H)
    _gru(xp_s, whh1_ref, bn1_ref, g1_s, h1_s, Tc, unroll)
    g1 = g1_s[...].reshape(Tc * Bt, H)

    # mask0 = sigmoid(exit0(fc2(gru1_out)))
    # TODO(synk): interleave these independent matmuls into the GRU2 time loop
    # to fill its MXU dependency-stall cycles at small Bt.
    f2a = mm(g1, w2_ref, b2_ref)
    m0_ref[...] = jax.nn.sigmoid(mm(f2a, we0_ref, be0_ref)).reshape(Tc, Bt, F)

    # GRU2
    xp_s[...] = mm(g1, wih2_ref, bx2_ref).reshape(Tc, Bt, 3 * H)
    _gru(xp_s, whh2_ref, bn2_ref, g2_s, h2_s, Tc, unroll)
    g2 = g2_s[...].reshape(Tc * Bt, H)

    # mask1 = sigmoid(exit1(fc2(gru2_out)))
    f2b = mm(g2, w2_ref, b2_ref)
    m1_ref[...] = jax.nn.sigmoid(mm(f2b, we1_ref, be1_ref)).reshape(Tc, Bt, F)

    # mask2 = sigmoid(exit2(relu(fc2(gru2_out))))
    m2_ref[...] = jax.nn.sigmoid(
        mm(jnp.maximum(f2b, 0.0), we2_ref, be2_ref)).reshape(Tc, Bt, F)


# ----------------------------- parameter packing ------------------------------


def _pad_rows(a, rows):
    return jnp.pad(a, ((0, rows - a.shape[0]), (0, 0)))


def _pad_cols(a, cols):
    return jnp.pad(a, ((0, 0), (0, cols - a.shape[1])))


def _pad_vec(a, n):
    return jnp.pad(a, (0, n - a.shape[0]))


def _pad_gate_rows(w, H, Hp):
    # (3H, K) -> (3Hp, K), padding each of the r/z/n gate blocks separately so
    # gate slices stay lane-aligned at multiples of Hp inside the kernel.
    return jnp.concatenate(
        [_pad_rows(w[g * H:(g + 1) * H], Hp) for g in range(3)], axis=0)


def _pad_gate_vec(b, H, Hp):
    return jnp.concatenate(
        [_pad_vec(b[g * H:(g + 1) * H], Hp) for g in range(3)])


def _prep_gru(wih, whh, bih, bhh, H, Hp, wdtype):
    """Returns (wih^T, whh^T, folded input-side bias, bhh_n), padded to Hp."""
    wih_p = _pad_cols(_pad_gate_rows(wih, H, Hp), Hp)     # (3Hp, Hp)
    whh_p = _pad_cols(_pad_gate_rows(whh, H, Hp), Hp)     # (3Hp, Hp)
    # Fold the recurrent bias of the r/z gates into the precomputed input
    # projection; only the n-gate recurrent bias stays inside the serial loop.
    bx = bih + jnp.concatenate([bhh[:2 * H], jnp.zeros((H,), bhh.dtype)])
    bx_p = _pad_gate_vec(bx, H, Hp).reshape(1, -1)        # (1, 3Hp)
    bn_p = _pad_vec(bhh[2 * H:], Hp).reshape(1, -1)       # (1, Hp)
    return (wih_p.T.astype(wdtype), whh_p.T.astype(wdtype),
            bx_p.astype(jnp.float32), bn_p.astype(jnp.float32))


# --------------------------------- wrapper -------------------------------------


def _const_spec(shape):
    """Grid-invariant weight/bias spec: full-array block, single-buffered."""
    index_map = lambda b, t: (0,) * len(shape)
    try:
        return pl.BlockSpec(shape, index_map, pipeline_mode=pl.Buffered(1))
    except (TypeError, ValueError):   # older jax without pipeline_mode support
        return pl.BlockSpec(shape, index_map)


def dynamic_nsnet2(x, p, *, b_tile=None, t_chunk=None,
                   weight_dtype=jnp.bfloat16, vmem_limit_bytes=None):
    """x: (B, num_features, T) -> (mask0, mask1, mask2), each (B, T, num_features)."""
    B, F, T = x.shape
    H = p["w1"].shape[0]

    Fp = _round_up(F, 128)            # lane-align features (257 -> 384)
    Hp = _round_up(H, 128)            # lane-align hidden   (400 -> 512)

    # ---- batch tile: big enough to feed the MXU, >= 2 tiles when B permits ---
    if b_tile is None:
        Bt = min(128, _round_up(B, 8))
        Bp = _round_up(B, Bt)
        if Bp // Bt < 2 and B >= 16:          # keep both v7x TCs busy
            Bt = _round_up(-(-Bp // 2), 8)
            Bp = _round_up(B, Bt)
    else:
        Bt = max(int(b_tile), 1)
        Bp = _round_up(B, Bt)
        if Bt % 8 != 0 and Bt != Bp:
            raise ValueError("b_tile must be a multiple of 8 or cover the whole batch")

    # ---- time chunk: bounds per-tile VMEM slabs and restores DMA overlap -----
    Tc = min(T, 128) if t_chunk is None else max(int(t_chunk), 1)
    Tc = min(Tc, T)
    Tp = _round_up(T, Tc)

    wdt = weight_dtype
    act_dt = jnp.bfloat16 if jnp.dtype(wdt) == jnp.dtype(jnp.bfloat16) else jnp.float32

    xt = jnp.transpose(x.astype(jnp.float32), (2, 0, 1))             # (T, B, F)
    xt = jnp.pad(xt, ((0, Tp - T), (0, Bp - B), (0, Fp - F)))        # (Tp, Bp, Fp)

    def lin(w, b, in_p, out_p):       # torch Linear (out,in) -> padded (in_p,out_p)
        wp = jnp.pad(w, ((0, out_p - w.shape[0]), (0, in_p - w.shape[1])))
        return wp.T.astype(wdt), _pad_vec(b, out_p).reshape(1, -1).astype(jnp.float32)

    w1, b1 = lin(p["w1"], p["b1"], Fp, Hp)
    w2, b2 = lin(p["w2"], p["b2"], Hp, Fp)
    we0, be0 = lin(p["we0"], p["be0"], Fp, Fp)
    we1, be1 = lin(p["we1"], p["be1"], Fp, Fp)
    we2, be2 = lin(p["we2"], p["be2"], Fp, Fp)
    wih1, whh1, bx1, bn1 = _prep_gru(p["wih1"], p["whh1"], p["bih1"], p["bhh1"],
                                     H, Hp, wdt)
    wih2, whh2, bx2, bn2 = _prep_gru(p["wih2"], p["whh2"], p["bih2"], p["bhh2"],
                                     H, Hp, wdt)

    args = (xt,
            w1, b1,
            wih1, whh1, bx1, bn1,
            wih2, whh2, bx2, bn2,
            w2, b2,
            we0, be0, we1, be1, we2, be2)

    # ---- explicit VMEM budget ------------------------------------------------
    if vmem_limit_bytes is None:
        act_isz = jnp.dtype(act_dt).itemsize
        weight_bytes = sum(int(np.prod(a.shape)) * jnp.dtype(a.dtype).itemsize
                           for a in args[1:])                       # single-buffered
        io_bytes = 2 * 4 * Tc * Bt * Fp * 4                         # x + 3 masks, 2x buf
        scratch_bytes = (Tc * Bt * (3 * Hp * 4 + 2 * Hp * act_isz)
                         + 2 * Bt * Hp * 4)
        interm_bytes = Tc * Bt * (Hp + 2 * Fp) * 4                  # h1, f2a, f2b
        total = weight_bytes + io_bytes + scratch_bytes + interm_bytes
        vmem_limit_bytes = min(max(int(1.25 * total) + (4 << 20), 32 << 20),
                               100 << 20)

    # x / outputs are tiled over (time chunk, batch tile); weights are constant
    # full-array blocks, single-buffered (see _const_spec).
    x_spec = pl.BlockSpec((Tc, Bt, Fp), lambda b, t: (t, b, 0))
    w_specs = [_const_spec(a.shape) for a in args[1:]]
    out_spec = pl.BlockSpec((Tc, Bt, Fp), lambda b, t: (t, b, 0))
    out_shape = jax.ShapeDtypeStruct((Tp, Bp, Fp), jnp.float32)

    grid_spec = pltpu.PrefetchScalarGridSpec(
        num_scalar_prefetch=0,
        grid=(Bp // Bt, Tp // Tc),
        in_specs=[x_spec] + w_specs,
        out_specs=[out_spec, out_spec, out_spec],
        scratch_shapes=[
            pltpu.VMEM((Tc, Bt, 3 * Hp), jnp.float32),  # xp_s (input projections)
            pltpu.VMEM((Tc, Bt, Hp), act_dt),           # g1_s (GRU1 output seq)
            pltpu.VMEM((Tc, Bt, Hp), act_dt),           # g2_s (GRU2 output seq)
            pltpu.VMEM((Bt, Hp), jnp.float32),          # h1 carry across chunks
            pltpu.VMEM((Bt, Hp), jnp.float32),          # h2 carry across chunks
        ],
    )

    # Full unroll for short chunks, partial unroll (LLO visibility) otherwise.
    unroll = True if Tc <= 16 else 8
    kernel = functools.partial(dynamic_nsnet2_kernel, unroll=unroll)

    m0, m1, m2 = pl.pallas_call(
        kernel,
        out_shape=(out_shape, out_shape, out_shape),
        grid_spec=grid_spec,
        compiler_params=pltpu.CompilerParams(
            dimension_semantics=("parallel", "arbitrary"),
            vmem_limit_bytes=vmem_limit_bytes),
    )(*args)

    def unpack(m):                               # (Tp, Bp, Fp) -> (B, T, F)
        return jnp.transpose(m[:T, :B, :F], (1, 0, 2))

    return unpack(m0), unpack(m1), unpack(m2)


# ----------------------------- pure-JAX reference ------------------------------


def _hp(a, b):
    return jnp.dot(a, b, precision=lax.Precision.HIGHEST)


def _ref_gru(x_seq, wih, whh, bih, bhh):
    H = whh.shape[1]

    def step(h_prev, x_t):
        gx = _hp(x_t, wih.T) + bih
        gh = _hp(h_prev, whh.T) + bhh
        r = jax.nn.sigmoid(gx[:, :H] + gh[:, :H])
        z = jax.nn.sigmoid(gx[:, H:2 * H] + gh[:, H:2 * H])
        n = jnp.tanh(gx[:, 2 * H:] + r * gh[:, 2 * H:])
        h_new = (1.0 - z) * n + z * h_prev
        return h_new, h_new

    h0 = jnp.zeros((x_seq.shape[0], H), jnp.float32)
    _, ys = lax.scan(step, h0, jnp.transpose(x_seq, (1, 0, 2)))
    return jnp.transpose(ys, (1, 0, 2))


def ref_forward(x, p):
    xt = jnp.transpose(x, (0, 2, 1))
    h = jax.nn.relu(_hp(xt, p["w1"].T) + p["b1"])
    g1 = _ref_gru(h, p["wih1"], p["whh1"], p["bih1"], p["bhh1"])
    mask0 = jax.nn.sigmoid(_hp(_hp(g1, p["w2"].T) + p["b2"], p["we0"].T) + p["be0"])
    g2 = _ref_gru(g1, p["wih2"], p["whh2"], p["bih2"], p["bhh2"])
    f2 = _hp(g2, p["w2"].T) + p["b2"]
    mask1 = jax.nn.sigmoid(_hp(f2, p["we1"].T) + p["be1"])
    mask2 = jax.nn.sigmoid(_hp(jax.nn.relu(f2), p["we2"].T) + p["be2"])
    return mask0, mask1, mask2


# ------------------------------ parameter init ---------------------------------


def init_params(key, F, H):
    keys = jax.random.split(key, 18)

    def u(k, shape, fan_in):
        bound = 1.0 / np.sqrt(fan_in)
        return jax.random.uniform(k, shape, jnp.float32, -bound, bound)

    return dict(
        w1=u(keys[0], (H, F), F), b1=u(keys[1], (H,), F),
        wih1=u(keys[2], (3 * H, H), H), whh1=u(keys[3], (3 * H, H), H),
        bih1=u(keys[4], (3 * H,), H), bhh1=u(keys[5], (3 * H,), H),
        wih2=u(keys[6], (3 * H, H), H), whh2=u(keys[7], (3 * H, H), H),
        bih2=u(keys[8], (3 * H,), H), bhh2=u(keys[9], (3 * H,), H),
        w2=u(keys[10], (F, H), H), b2=u(keys[11], (F,), H),
        we0=u(keys[12], (F, F), F), be0=u(keys[13], (F,), F),
        we1=u(keys[14], (F, F), F), be1=u(keys[15], (F,), F),
        we2=u(keys[16], (F, F), F), be2=u(keys[17], (F,), F),
    )


if __name__ == "__main__":
    key = jax.random.PRNGKey(0)
    kx, kp, kx2, kp2, kx3 = jax.random.split(key, 5)

    # 1) lane/sublane-aligned small config (stand-in for F=257, H=400).
    B, F, H, T = 8, 128, 128, 16
    x = jax.random.normal(kx, (B, F, T), jnp.float32)
    params = init_params(kp, F, H)
    ref = ref_forward(x, params)

    # default path: bf16 weights / f32 activations & carry.
    got_bf16 = jax.block_until_ready(dynamic_nsnet2(x, params))
    for g, r in zip(got_bf16, ref):
        assert g.shape == (B, T, F) and g.dtype == jnp.float32
        np.testing.assert_allclose(np.asarray(g), np.asarray(r), atol=5e-2, rtol=0)

    # full-precision f32 path.
    got_f32 = jax.block_until_ready(
        dynamic_nsnet2(x, params, weight_dtype=jnp.float32))
    for g, r in zip(got_f32, ref):
        np.testing.assert_allclose(np.asarray(g), np.asarray(r), atol=1e-2, rtol=0)

    # 2) multi-tile config: 2 batch tiles (auto Bt) x 3 time chunks, exercising
    #    the carried hidden-state / pl.when(t==0) re-init path.
    B3, T3 = 16, 12
    x3 = jax.random.normal(kx3, (B3, F, T3), jnp.float32)
    ref3 = ref_forward(x3, params)
    got3 = jax.block_until_ready(
        dynamic_nsnet2(x3, params, weight_dtype=jnp.float32, t_chunk=4))
    for g, r in zip(got3, ref3):
        assert g.shape == (B3, T3, F)
        np.testing.assert_allclose(np.asarray(g), np.asarray(r), atol=1e-2, rtol=0)

    # 3) unaligned config exercising the F/H/B/T padding path (stand-in for the
    #    real num_features=257, hidden=400, odd batch).
    B2, F2, H2, T2 = 3, 72, 48, 10
    x2 = jax.random.normal(kx2, (B2, F2, T2), jnp.float32)
    params2 = init_params(kp2, F2, H2)
    got2 = jax.block_until_ready(
        dynamic_nsnet2(x2, params2, weight_dtype=jnp.float32))
    ref2 = ref_forward(x2, params2)
    for g, r in zip(got2, ref2):
        assert g.shape == (B2, T2, F2)
        np.testing.assert_allclose(np.asarray(g), np.asarray(r), atol=1e-2, rtol=0)

    print("KERNEL_OK")
</pallas_src>

<mosaic_0001>
module attributes {stable_mosaic.version = 11 : i64} {
  func.func @dynamic_nsnet2_kernel(%arg0: i32, %arg1: i32, %arg2: memref<16x8x128xf32, #tpu.memory_space<vmem>>, %arg3: memref<128x128xbf16, #tpu.memory_space<vmem>>, %arg4: memref<1x128xf32, #tpu.memory_space<vmem>>, %arg5: memref<128x384xbf16, #tpu.memory_space<vmem>>, %arg6: memref<128x384xbf16, #tpu.memory_space<vmem>>, %arg7: memref<1x384xf32, #tpu.memory_space<vmem>>, %arg8: memref<1x128xf32, #tpu.memory_space<vmem>>, %arg9: memref<128x384xbf16, #tpu.memory_space<vmem>>, %arg10: memref<128x384xbf16, #tpu.memory_space<vmem>>, %arg11: memref<1x384xf32, #tpu.memory_space<vmem>>, %arg12: memref<1x128xf32, #tpu.memory_space<vmem>>, %arg13: memref<128x128xbf16, #tpu.memory_space<vmem>>, %arg14: memref<1x128xf32, #tpu.memory_space<vmem>>, %arg15: memref<128x128xbf16, #tpu.memory_space<vmem>>, %arg16: memref<1x128xf32, #tpu.memory_space<vmem>>, %arg17: memref<128x128xbf16, #tpu.memory_space<vmem>>, %arg18: memref<1x128xf32, #tpu.memory_space<vmem>>, %arg19: memref<128x128xbf16, #tpu.memory_space<vmem>>, %arg20: memref<1x128xf32, #tpu.memory_space<vmem>>, %arg21: memref<16x8x128xf32, #tpu.memory_space<vmem>>, %arg22: memref<16x8x128xf32, #tpu.memory_space<vmem>>, %arg23: memref<16x8x128xf32, #tpu.memory_space<vmem>>, %arg24: memref<16x8x384xf32, #tpu.memory_space<vmem>>, %arg25: memref<16x8x128xbf16, #tpu.memory_space<vmem>>, %arg26: memref<16x8x128xbf16, #tpu.memory_space<vmem>>, %arg27: memref<8x128xf32, #tpu.memory_space<vmem>>, %arg28: memref<8x128xf32, #tpu.memory_space<vmem>>) attributes {dimension_semantics = [#tpu.dimension_semantics<parallel>, #tpu.dimension_semantics<arbitrary>], iteration_bounds = array<i64: 1, 1>, scalar_prefetch = 0 : i64, scratch_operands = 5 : i64, tpu.core_type = #tpu.core_type<tc>, window_params = [{transform_indices = @transform_0, window_bounds = array<i64: 16, 8, 128>}, {pipeline_mode = #tpu.pipeline_mode<synchronous>, transform_indices = @transform_1, window_bounds = array<i64: 128, 128>}, {pipeline_mode = #tpu.pipeline_mode<synchronous>, transform_indices = @transform_2, window_bounds = array<i64: 1, 128>}, {pipeline_mode = #tpu.pipeline_mode<synchronous>, transform_indices = @transform_3, window_bounds = array<i64: 128, 384>}, {pipeline_mode = #tpu.pipeline_mode<synchronous>, transform_indices = @transform_4, window_bounds = array<i64: 128, 384>}, {pipeline_mode = #tpu.pipeline_mode<synchronous>, transform_indices = @transform_5, window_bounds = array<i64: 1, 384>}, {pipeline_mode = #tpu.pipeline_mode<synchronous>, transform_indices = @transform_6, window_bounds = array<i64: 1, 128>}, {pipeline_mode = #tpu.pipeline_mode<synchronous>, transform_indices = @transform_7, window_bounds = array<i64: 128, 384>}, {pipeline_mode = #tpu.pipeline_mode<synchronous>, transform_indices = @transform_8, window_bounds = array<i64: 128, 384>}, {pipeline_mode = #tpu.pipeline_mode<synchronous>, transform_indices = @transform_9, window_bounds = array<i64: 1, 384>}, {pipeline_mode = #tpu.pipeline_mode<synchronous>, transform_indices = @transform_10, window_bounds = array<i64: 1, 128>}, {pipeline_mode = #tpu.pipeline_mode<synchronous>, transform_indices = @transform_11, window_bounds = array<i64: 128, 128>}, {pipeline_mode = #tpu.pipeline_mode<synchronous>, transform_indices = @transform_12, window_bounds = array<i64: 1, 128>}, {pipeline_mode = #tpu.pipeline_mode<synchronous>, transform_indices = @transform_13, window_bounds = array<i64: 128, 128>}, {pipeline_mode = #tpu.pipeline_mode<synchronous>, transform_indices = @transform_14, window_bounds = array<i64: 1, 128>}, {pipeline_mode = #tpu.pipeline_mode<synchronous>, transform_indices = @transform_15, window_bounds = array<i64: 128, 128>}, {pipeline_mode = #tpu.pipeline_mode<synchronous>, transform_indices = @transform_16, window_bounds = array<i64: 1, 128>}, {pipeline_mode = #tpu.pipeline_mode<synchronous>, transform_indices = @transform_17, window_bounds = array<i64: 128, 128>}, {pipeline_mode = #tpu.pipeline_mode<synchronous>, transform_indices = @transform_18, window_bounds = array<i64: 1, 128>}, {transform_indices = @transform_19, window_bounds = array<i64: 16, 8, 128>}, {transform_indices = @transform_20, window_bounds = array<i64: 16, 8, 128>}, {transform_indices = @transform_21, window_bounds = array<i64: 16, 8, 128>}]} {
    %c0_i32 = arith.constant 0 : i32
    %0 = arith.cmpi eq, %arg1, %c0_i32 : i32
    %1 = arith.extui %0 : i1 to i32
    %c0_i32_0 = arith.constant 0 : i32
    %2 = arith.cmpi ne, %1, %c0_i32_0 : i32
    scf.if %2 {
      %cst_358 = arith.constant 0.000000e+00 : f32
      %1279 = vector.broadcast %cst_358 : f32 to vector<8x128xf32>
      %c0_359 = arith.constant 0 : index
      %c0_360 = arith.constant 0 : index
      %1280 = vector.load %arg27[%c0_359, %c0_360] : memref<8x128xf32, #tpu.memory_space<vmem>>, vector<8x128xf32>
      tpu.vector_store %arg27[%c0_359, %c0_360], %1279 {strides = array<i32>} : memref<8x128xf32, #tpu.memory_space<vmem>>, vector<8x128xf32>,
      %cst_361 = arith.constant 0.000000e+00 : f32
      %1281 = vector.broadcast %cst_361 : f32 to vector<8x128xf32>
      %c0_362 = arith.constant 0 : index
      %c0_363 = arith.constant 0 : index
      %1282 = vector.load %arg28[%c0_362, %c0_363] : memref<8x128xf32, #tpu.memory_space<vmem>>, vector<8x128xf32>
      tpu.vector_store %arg28[%c0_362, %c0_363], %1281 {strides = array<i32>} : memref<8x128xf32, #tpu.memory_space<vmem>>, vector<8x128xf32>,
    } else {
    }
    %c0 = arith.constant 0 : index
    %c0_1 = arith.constant 0 : index
    %c0_2 = arith.constant 0 : index
    %3 = vector.load %arg2[%c0, %c0_1, %c0_2] : memref<16x8x128xf32, #tpu.memory_space<vmem>>, vector<16x8x128xf32>
    %4 = vector.shape_cast %3 : vector<16x8x128xf32> to vector<128x128xf32>
    %5 = arith.truncf %4 : vector<128x128xf32> to vector<128x128xbf16>
    %c0_3 = arith.constant 0 : index
    %c0_4 = arith.constant 0 : index
    %6 = vector.load %arg3[%c0_3, %c0_4] : memref<128x128xbf16, #tpu.memory_space<vmem>>, vector<128x128xbf16>
    %cst = arith.constant dense<0.000000e+00> : vector<128x128xf32>
    %7 = tpu.matmul %5, %6, %cst {dimension_numbers = #tpu.dot_dimension_numbers<[1], [0], [0], [1], [0, 0, 1, 1], [], []>} : vector<128x128xbf16>, vector<128x128xbf16>, vector<128x128xf32> -> vector<128x128xf32>
    %c0_5 = arith.constant 0 : index
    %c0_6 = arith.constant 0 : index
    %8 = vector.load %arg4[%c0_5, %c0_6] : memref<1x128xf32, #tpu.memory_space<vmem>>, vector<1x128xf32>
    %9 = vector.broadcast %8 : vector<1x128xf32> to vector<128x128xf32>
    %10 = arith.addf %7, %9 : vector<128x128xf32>
    %cst_7 = arith.constant 0.000000e+00 : f32
    %11 = vector.broadcast %cst_7 : f32 to vector<128x128xf32>
    %12 = arith.maximumf %10, %11 : vector<128x128xf32>
    %13 = arith.truncf %12 : vector<128x128xf32> to vector<128x128xbf16>
    %c0_8 = arith.constant 0 : index
    %c0_9 = arith.constant 0 : index
    %14 = vector.load %arg5[%c0_8, %c0_9] : memref<128x384xbf16, #tpu.memory_space<vmem>>, vector<128x384xbf16>
    %cst_10 = arith.constant dense<0.000000e+00> : vector<128x384xf32>
    %15 = tpu.matmul %13, %14, %cst_10 {dimension_numbers = #tpu.dot_dimension_numbers<[1], [0], [0], [1], [0, 0, 1, 1], [], []>} : vector<128x128xbf16>, vector<128x384xbf16>, vector<128x384xf32> -> vector<128x384xf32>
    %c0_11 = arith.constant 0 : index
    %c0_12 = arith.constant 0 : index
    %16 = vector.load %arg7[%c0_11, %c0_12] : memref<1x384xf32, #tpu.memory_space<vmem>>, vector<1x384xf32>
    %17 = vector.broadcast %16 : vector<1x384xf32> to vector<128x384xf32>
    %18 = arith.addf %15, %17 : vector<128x384xf32>
    %19 = vector.shape_cast %18 : vector<128x384xf32> to vector<16x8x384xf32>
    %c0_13 = arith.constant 0 : index
    %c0_14 = arith.constant 0 : index
    %c0_15 = arith.constant 0 : index
    %20 = vector.load %arg24[%c0_13, %c0_14, %c0_15] : memref<16x8x384xf32, #tpu.memory_space<vmem>>, vector<16x8x384xf32>
    tpu.vector_store %arg24[%c0_13, %c0_14, %c0_15], %19 {strides = array<i32>} : memref<16x8x384xf32, #tpu.memory_space<vmem>>, vector<16x8x384xf32>,
    %c0_16 = arith.constant 0 : index
    %c0_17 = arith.constant 0 : index
    %21 = vector.load %arg6[%c0_16, %c0_17] : memref<128x384xbf16, #tpu.memory_space<vmem>>, vector<128x384xbf16>
    %c0_18 = arith.constant 0 : index
    %c0_19 = arith.constant 0 : index
    %22 = vector.load %arg8[%c0_18, %c0_19] : memref<1x128xf32, #tpu.memory_space<vmem>>, vector<1x128xf32>
    %23 = vector.shape_cast %22 : vector<1x128xf32> to vector<1x128xf32>
    %24 = vector.broadcast %23 : vector<1x128xf32> to vector<8x128xf32>
    %c0_20 = arith.constant 0 : index
    %c0_21 = arith.constant 0 : index
    %25 = vector.load %arg27[%c0_20, %c0_21] : memref<8x128xf32, #tpu.memory_space<vmem>>, vector<8x128xf32>
    %c0_i32_22 = arith.constant 0 : i32
    %26 = arith.index_cast %c0_i32_22 : i32 to index
    %c0_23 = arith.constant 0 : index
    %c0_24 = arith.constant 0 : index
    %27 = vector.load %arg24[%26, %c0_23, %c0_24] : memref<16x8x384xf32, #tpu.memory_space<vmem>>, vector<1x8x384xf32>
    %28 = vector.shape_cast %27 : vector<1x8x384xf32> to vector<8x384xf32>
    %29 = arith.truncf %25 : vector<8x128xf32> to vector<8x128xbf16>
    %cst_25 = arith.constant dense<0.000000e+00> : vector<8x384xf32>
    %30 = tpu.matmul %29, %21, %cst_25 {dimension_numbers = #tpu.dot_dimension_numbers<[1], [0], [0], [1], [0, 0, 1, 1], [], []>} : vector<8x128xbf16>, vector<128x384xbf16>, vector<8x384xf32> -> vector<8x384xf32>
    %31 = vector.extract_strided_slice %28 {offsets = [0, 0], sizes = [8, 128], strides = [1, 1]} : vector<8x384xf32> to vector<8x128xf32>
    %32 = vector.extract_strided_slice %30 {offsets = [0, 0], sizes = [8, 128], strides = [1, 1]} : vector<8x384xf32> to vector<8x128xf32>
    %33 = arith.addf %31, %32 : vector<8x128xf32>
    %34 = arith.negf %33 : vector<8x128xf32>
    %35 = math.exp %34 : vector<8x128xf32>
    %cst_26 = arith.constant 1.000000e+00 : f32
    %36 = vector.broadcast %cst_26 : f32 to vector<8x128xf32>
    %37 = arith.addf %36, %35 : vector<8x128xf32>
    %38 = arith.divf %36, %37 : vector<8x128xf32>
    %39 = vector.extract_strided_slice %28 {offsets = [0, 128], sizes = [8, 128], strides = [1, 1]} : vector<8x384xf32> to vector<8x128xf32>
    %40 = vector.extract_strided_slice %30 {offsets = [0, 128], sizes = [8, 128], strides = [1, 1]} : vector<8x384xf32> to vector<8x128xf32>
    %41 = arith.addf %39, %40 : vector<8x128xf32>
    %42 = arith.negf %41 : vector<8x128xf32>
    %43 = math.exp %42 : vector<8x128xf32>
    %cst_27 = arith.constant 1.000000e+00 : f32
    %44 = vector.broadcast %cst_27 : f32 to vector<8x128xf32>
    %45 = arith.addf %44, %43 : vector<8x128xf32>
    %46 = arith.divf %44, %45 : vector<8x128xf32>
    %47 = vector.extract_strided_slice %28 {offsets = [0, 256], sizes = [8, 128], strides = [1, 1]} : vector<8x384xf32> to vector<8x128xf32>
    %48 = vector.extract_strided_slice %30 {offsets = [0, 256], sizes = [8, 128], strides = [1, 1]} : vector<8x384xf32> to vector<8x128xf32>
    %49 = arith.addf %48, %24 : vector<8x128xf32>
    %50 = arith.mulf %38, %49 : vector<8x128xf32>
    %51 = arith.addf %47, %50 : vector<8x128xf32>
    %52 = math.tanh %51 : vector<8x128xf32>
    %cst_28 = arith.constant 1.000000e+00 : f32
    %53 = vector.broadcast %cst_28 : f32 to vector<8x128xf32>
    %54 = arith.subf %53, %46 : vector<8x128xf32>
    %55 = arith.mulf %54, %52 : vector<8x128xf32>
    %56 = arith.mulf %46, %25 : vector<8x128xf32>
    %57 = arith.addf %55, %56 : vector<8x128xf32>
    %58 = arith.truncf %57 : vector<8x128xf32> to vector<8x128xbf16>
    %59 = arith.index_cast %c0_i32_22 : i32 to index
    %c0_29 = arith.constant 0 : index
    %c0_30 = arith.constant 0 : index
    %60 = vector.load %arg25[%59, %c0_29, %c0_30] : memref<16x8x128xbf16, #tpu.memory_space<vmem>>, vector<1x8x128xbf16>
    %61 = vector.shape_cast %60 : vector<1x8x128xbf16> to vector<8x128xbf16>
    %62 = vector.shape_cast %58 : vector<8x128xbf16> to vector<1x8x128xbf16>
    tpu.vector_store %arg25[%59, %c0_29, %c0_30], %62 {strides = array<i32>} : memref<16x8x128xbf16, #tpu.memory_space<vmem>>, vector<1x8x128xbf16>,
    %c1_i32 = arith.constant 1 : i32
    %63 = arith.index_cast %c1_i32 : i32 to index
    %c0_31 = arith.constant 0 : index
    %c0_32 = arith.constant 0 : index
    %64 = vector.load %arg24[%63, %c0_31, %c0_32] : memref<16x8x384xf32, #tpu.memory_space<vmem>>, vector<1x8x384xf32>
    %65 = vector.shape_cast %64 : vector<1x8x384xf32> to vector<8x384xf32>
    %66 = arith.truncf %57 : vector<8x128xf32> to vector<8x128xbf16>
    %cst_33 = arith.constant dense<0.000000e+00> : vector<8x384xf32>
    %67 = tpu.matmul %66, %21, %cst_33 {dimension_numbers = #tpu.dot_dimension_numbers<[1], [0], [0], [1], [0, 0, 1, 1], [], []>} : vector<8x128xbf16>, vector<128x384xbf16>, vector<8x384xf32> -> vector<8x384xf32>
    %68 = vector.extract_strided_slice %65 {offsets = [0, 0], sizes = [8, 128], strides = [1, 1]} : vector<8x384xf32> to vector<8x128xf32>
    %69 = vector.extract_strided_slice %67 {offsets = [0, 0], sizes = [8, 128], strides = [1, 1]} : vector<8x384xf32> to vector<8x128xf32>
    %70 = arith.addf %68, %69 : vector<8x128xf32>
    %71 = arith.negf %70 : vector<8x128xf32>
    %72 = math.exp %71 : vector<8x128xf32>
    %cst_34 = arith.constant 1.000000e+00 : f32
    %73 = vector.broadcast %cst_34 : f32 to vector<8x128xf32>
    %74 = arith.addf %73, %72 : vector<8x128xf32>
    %75 = arith.divf %73, %74 : vector<8x128xf32>
    %76 = vector.extract_strided_slice %65 {offsets = [0, 128], sizes = [8, 128], strides = [1, 1]} : vector<8x384xf32> to vector<8x128xf32>
    %77 = vector.extract_strided_slice %67 {offsets = [0, 128], sizes = [8, 128], strides = [1, 1]} : vector<8x384xf32> to vector<8x128xf32>
    %78 = arith.addf %76, %77 : vector<8x128xf32>
    %79 = arith.negf %78 : vector<8x128xf32>
    %80 = math.exp %79 : vector<8x128xf32>
    %cst_35 = arith.constant 1.000000e+00 : f32
    %81 = vector.broadcast %cst_35 : f32 to vector<8x128xf32>
    %82 = arith.addf %81, %80 : vector<8x128xf32>
    %83 = arith.divf %81, %82 : vector<8x128xf32>
    %84 = vector.extract_strided_slice %65 {offsets = [0, 256], sizes = [8, 128], strides = [1, 1]} : vector<8x384xf32> to vector<8x128xf32>
    %85 = vector.extract_strided_slice %67 {offsets = [0, 256], sizes = [8, 128], strides = [1, 1]} : vector<8x384xf32> to vector<8x128xf32>
    %86 = arith.addf %85, %24 : vector<8x128xf32>
    %87 = arith.mulf %75, %86 : vector<8x128xf32>
    %88 = arith.addf %84, %87 : vector<8x128xf32>
    %89 = math.tanh %88 : vector<8x128xf32>
    %cst_36 = arith.constant 1.000000e+00 : f32
    %90 = vector.broadcast %cst_36 : f32 to vector<8x128xf32>
    %91 = arith.subf %90, %83 : vector<8x128xf32>
    %92 = arith.mulf %91, %89 : vector<8x128xf32>
    %93 = arith.mulf %83, %57 : vector<8x128xf32>
    %94 = arith.addf %92, %93 : vector<8x128xf32>
    %95 = arith.truncf %94 : vector<8x128xf32> to vector<8x128xbf16>
    %96 = arith.index_cast %c1_i32 : i32 to index
    %c0_37 = arith.constant 0 : index
    %c0_38 = arith.constant 0 : index
    %97 = vector.load %arg25[%96, %c0_37, %c0_38] : memref<16x8x128xbf16, #tpu.memory_space<vmem>>, vector<1x8x128xbf16>
    %98 = vector.shape_cast %97 : vector<1x8x128xbf16> to vector<8x128xbf16>
    %99 = vector.shape_cast %95 : vector<8x128xbf16> to vector<1x8x128xbf16>
    tpu.vector_store %arg25[%96, %c0_37, %c0_38], %99 {strides = array<i32>} : memref<16x8x128xbf16, #tpu.memory_space<vmem>>, vector<1x8x128xbf16>,
    %c2_i32 = arith.constant 2 : i32
    %100 = arith.index_cast %c2_i32 : i32 to index
    %c0_39 = arith.constant 0 : index
    %c0_40 = arith.constant 0 : index
    %101 = vector.load %arg24[%100, %c0_39, %c0_40] : memref<16x8x384xf32, #tpu.memory_space<vmem>>, vector<1x8x384xf32>
    %102 = vector.shape_cast %101 : vector<1x8x384xf32> to vector<8x384xf32>
    %103 = arith.truncf %94 : vector<8x128xf32> to vector<8x128xbf16>
    %cst_41 = arith.constant dense<0.000000e+00> : vector<8x384xf32>
    %104 = tpu.matmul %103, %21, %cst_41 {dimension_numbers = #tpu.dot_dimension_numbers<[1], [0], [0], [1], [0, 0, 1, 1], [], []>} : vector<8x128xbf16>, vector<128x384xbf16>, vector<8x384xf32> -> vector<8x384xf32>
    %105 = vector.extract_strided_slice %102 {offsets = [0, 0], sizes = [8, 128], strides = [1, 1]} : vector<8x384xf32> to vector<8x128xf32>
    %106 = vector.extract_strided_slice %104 {offsets = [0, 0], sizes = [8, 128], strides = [1, 1]} : vector<8x384xf32> to vector<8x128xf32>
    %107 = arith.addf %105, %106 : vector<8x128xf32>
    %108 = arith.negf %107 : vector<8x128xf32>
    %109 = math.exp %108 : vector<8x128xf32>
    %cst_42 = arith.constant 1.000000e+00 : f32
    %110 = vector.broadcast %cst_42 : f32 to vector<8x128xf32>
    %111 = arith.addf %110, %109 : vector<8x128xf32>
    %112 = arith.divf %110, %111 : vector<8x128xf32>
    %113 = vector.extract_strided_slice %102 {offsets = [0, 128], sizes = [8, 128], strides = [1, 1]} : vector<8x384xf32> to vector<8x128xf32>
    %114 = vector.extract_strided_slice %104 {offsets = [0, 128], sizes = [8, 128], strides = [1, 1]} : vector<8x384xf32> to vector<8x128xf32>
    %115 = arith.addf %113, %114 : vector<8x128xf32>
    %116 = arith.negf %115 : vector<8x128xf32>
    %117 = math.exp %116 : vector<8x128xf32>
    %cst_43 = arith.constant 1.000000e+00 : f32
    %118 = vector.broadcast %cst_43 : f32 to vector<8x128xf32>
    %119 = arith.addf %118, %117 : vector<8x128xf32>
    %120 = arith.divf %118, %119 : vector<8x128xf32>
    %121 = vector.extract_strided_slice %102 {offsets = [0, 256], sizes = [8, 128], strides = [1, 1]} : vector<8x384xf32> to vector<8x128xf32>
    %122 = vector.extract_strided_slice %104 {offsets = [0, 256], sizes = [8, 128], strides = [1, 1]} : vector<8x384xf32> to vector<8x128xf32>
    %123 = arith.addf %122, %24 : vector<8x128xf32>
    %124 = arith.mulf %112, %123 : vector<8x128xf32>
    %125 = arith.addf %121, %124 : vector<8x128xf32>
    %126 = math.tanh %125 : vector<8x128xf32>
    %cst_44 = arith.constant 1.000000e+00 : f32
    %127 = vector.broadcast %cst_44 : f32 to vector<8x128xf32>
    %128 = arith.subf %127, %120 : vector<8x128xf32>
    %129 = arith.mulf %128, %126 : vector<8x128xf32>
    %130 = arith.mulf %120, %94 : vector<8x128xf32>
    %131 = arith.addf %129, %130 : vector<8x128xf32>
    %132 = arith.truncf %131 : vector<8x128xf32> to vector<8x128xbf16>
    %133 = arith.index_cast %c2_i32 : i32 to index
    %c0_45 = arith.constant 0 : index
    %c0_46 = arith.constant 0 : index
    %134 = vector.load %arg25[%133, %c0_45, %c0_46] : memref<16x8x128xbf16, #tpu.memory_space<vmem>>, vector<1x8x128xbf16>
    %135 = vector.shape_cast %134 : vector<1x8x128xbf16> to vector<8x128xbf16>
    %136 = vector.shape_cast %132 : vector<8x128xbf16> to vector<1x8x128xbf16>
    tpu.vector_store %arg25[%133, %c0_45, %c0_46], %136 {strides = array<i32>} : memref<16x8x128xbf16, #tpu.memory_space<vmem>>, vector<1x8x128xbf16>,
    %c3_i32 = arith.constant 3 : i32
    %137 = arith.index_cast %c3_i32 : i32 to index
    %c0_47 = arith.constant 0 : index
    %c0_48 = arith.constant 0 : index
    %138 = vector.load %arg24[%137, %c0_47, %c0_48] : memref<16x8x384xf32, #tpu.memory_space<vmem>>, vector<1x8x384xf32>
    %139 = vector.shape_cast %138 : vector<1x8x384xf32> to vector<8x384xf32>
    %140 = arith.truncf %131 : vector<8x128xf32> to vector<8x128xbf16>
    %cst_49 = arith.constant dense<0.000000e+00> : vector<8x384xf32>
    %141 = tpu.matmul %140, %21, %cst_49 {dimension_numbers = #tpu.dot_dimension_numbers<[1], [0], [0], [1], [0, 0, 1, 1], [], []>} : vector<8x128xbf16>, vector<128x384xbf16>, vector<8x384xf32> -> vector<8x384xf32>
    %142 = vector.extract_strided_slice %139 {offsets = [0, 0], sizes = [8, 128], strides = [1, 1]} : vector<8x384xf32> to vector<8x128xf32>
    %143 = vector.extract_strided_slice %141 {offsets = [0, 0], sizes = [8, 128], strides = [1, 1]} : vector<8x384xf32> to vector<8x128xf32>
    %144 = arith.addf %142, %143 : vector<8x128xf32>
    %145 = arith.negf %144 : vector<8x128xf32>
    %146 = math.exp %145 : vector<8x128xf32>
    %cst_50 = arith.constant 1.000000e+00 : f32
    %147 = vector.broadcast %cst_50 : f32 to vector<8x128xf32>
    %148 = arith.addf %147, %146 : vector<8x128xf32>
    %149 = arith.divf %147, %148 : vector<8x128xf32>
    %150 = vector.extract_strided_slice %139 {offsets = [0, 128], sizes = [8, 128], strides = [1, 1]} : vector<8x384xf32> to vector<8x128xf32>
    %151 = vector.extract_strided_slice %141 {offsets = [0, 128], sizes = [8, 128], strides = [1, 1]} : vector<8x384xf32> to vector<8x128xf32>
    %152 = arith.addf %150, %151 : vector<8x128xf32>
    %153 = arith.negf %152 : vector<8x128xf32>
    %154 = math.exp %153 : vector<8x128xf32>
    %cst_51 = arith.constant 1.000000e+00 : f32
    %155 = vector.broadcast %cst_51 : f32 to vector<8x128xf32>
    %156 = arith.addf %155, %154 : vector<8x128xf32>
    %157 = arith.divf %155, %156 : vector<8x128xf32>
    %158 = vector.extract_strided_slice %139 {offsets = [0, 256], sizes = [8, 128], strides = [1, 1]} : vector<8x384xf32> to vector<8x128xf32>
    %159 = vector.extract_strided_slice %141 {offsets = [0, 256], sizes = [8, 128], strides = [1, 1]} : vector<8x384xf32> to vector<8x128xf32>
    %160 = arith.addf %159, %24 : vector<8x128xf32>
    %161 = arith.mulf %149, %160 : vector<8x128xf32>
    %162 = arith.addf %158, %161 : vector<8x128xf32>
    %163 = math.tanh %162 : vector<8x128xf32>
    %cst_52 = arith.constant 1.000000e+00 : f32
    %164 = vector.broadcast %cst_52 : f32 to vector<8x128xf32>
    %165 = arith.subf %164, %157 : vector<8x128xf32>
    %166 = arith.mulf %165, %163 : vector<8x128xf32>
    %167 = arith.mulf %157, %131 : vector<8x128xf32>
    %168 = arith.addf %166, %167 : vector<8x128xf32>
    %169 = arith.truncf %168 : vector<8x128xf32> to vector<8x128xbf16>
    %170 = arith.index_cast %c3_i32 : i32 to index
    %c0_53 = arith.constant 0 : index
    %c0_54 = arith.constant 0 : index
    %171 = vector.load %arg25[%170, %c0_53, %c0_54] : memref<16x8x128xbf16, #tpu.memory_space<vmem>>, vector<1x8x128xbf16>
    %172 = vector.shape_cast %171 : vector<1x8x128xbf16> to vector<8x128xbf16>
    %173 = vector.shape_cast %169 : vector<8x128xbf16> to vector<1x8x128xbf16>
    tpu.vector_store %arg25[%170, %c0_53, %c0_54], %173 {strides = array<i32>} : memref<16x8x128xbf16, #tpu.memory_space<vmem>>, vector<1x8x128xbf16>,
    %c4_i32 = arith.constant 4 : i32
    %174 = arith.index_cast %c4_i32 : i32 to index
    %c0_55 = arith.constant 0 : index
    %c0_56 = arith.constant 0 : index
    %175 = vector.load %arg24[%174, %c0_55, %c0_56] : memref<16x8x384xf32, #tpu.memory_space<vmem>>, vector<1x8x384xf32>
    %176 = vector.shape_cast %175 : vector<1x8x384xf32> to vector<8x384xf32>
    %177 = arith.truncf %168 : vector<8x128xf32> to vector<8x128xbf16>
    %cst_57 = arith.constant dense<0.000000e+00> : vector<8x384xf32>
    %178 = tpu.matmul %177, %21, %cst_57 {dimension_numbers = #tpu.dot_dimension_numbers<[1], [0], [0], [1], [0, 0, 1, 1], [], []>} : vector<8x128xbf16>, vector<128x384xbf16>, vector<8x384xf32> -> vector<8x384xf32>
    %179 = vector.extract_strided_slice %176 {offsets = [0, 0], sizes = [8, 128], strides = [1, 1]} : vector<8x384xf32> to vector<8x128xf32>
    %180 = vector.extract_strided_slice %178 {offsets = [0, 0], sizes = [8, 128], strides = [1, 1]} : vector<8x384xf32> to vector<8x128xf32>
    %181 = arith.addf %179, %180 : vector<8x128xf32>
    %182 = arith.negf %181 : vector<8x128xf32>
    %183 = math.exp %182 : vector<8x128xf32>
    %cst_58 = arith.constant 1.000000e+00 : f32
    %184 = vector.broadcast %cst_58 : f32 to vector<8x128xf32>
    %185 = arith.addf %184, %183 : vector<8x128xf32>
    %186 = arith.divf %184, %185 : vector<8x128xf32>
    %187 = vector.extract_strided_slice %176 {offsets = [0, 128], sizes = [8, 128], strides = [1, 1]} : vector<8x384xf32> to vector<8x128xf32>
    %188 = vector.extract_strided_slice %178 {offsets = [0, 128], sizes = [8, 128], strides = [1, 1]} : vector<8x384xf32> to vector<8x128xf32>
    %189 = arith.addf %187, %188 : vector<8x128xf32>
    %190 = arith.negf %189 : vector<8x128xf32>
    %191 = math.exp %190 : vector<8x128xf32>
    %cst_59 = arith.constant 1.000000e+00 : f32
    %192 = vector.broadcast %cst_59 : f32 to vector<8x128xf32>
    %193 = arith.addf %192, %191 : vector<8x128xf32>
    %194 = arith.divf %192, %193 : vector<8x128xf32>
    %195 = vector.extract_strided_slice %176 {offsets = [0, 256], sizes = [8, 128], strides = [1, 1]} : vector<8x384xf32> to vector<8x128xf32>
    %196 = vector.extract_strided_slice %178 {offsets = [0, 256], sizes = [8, 128], strides = [1, 1]} : vector<8x384xf32> to vector<8x128xf32>
    %197 = arith.addf %196, %24 : vector<8x128xf32>
    %198 = arith.mulf %186, %197 : vector<8x128xf32>
    %199 = arith.addf %195, %198 : vector<8x128xf32>
    %200 = math.tanh %199 : vector<8x128xf32>
    %cst_60 = arith.constant 1.000000e+00 : f32
    %201 = vector.broadcast %cst_60 : f32 to vector<8x128xf32>
    %202 = arith.subf %201, %194 : vector<8x128xf32>
    %203 = arith.mulf %202, %200 : vector<8x128xf32>
    %204 = arith.mulf %194, %168 : vector<8x128xf32>
    %205 = arith.addf %203, %204 : vector<8x128xf32>
    %206 = arith.truncf %205 : vector<8x128xf32> to vector<8x128xbf16>
    %207 = arith.index_cast %c4_i32 : i32 to index
    %c0_61 = arith.constant 0 : index
    %c0_62 = arith.constant 0 : index
    %208 = vector.load %arg25[%207, %c0_61, %c0_62] : memref<16x8x128xbf16, #tpu.memory_space<vmem>>, vector<1x8x128xbf16>
    %209 = vector.shape_cast %208 : vector<1x8x128xbf16> to vector<8x128xbf16>
    %210 = vector.shape_cast %206 : vector<8x128xbf16> to vector<1x8x128xbf16>
    tpu.vector_store %arg25[%207, %c0_61, %c0_62], %210 {strides = array<i32>} : memref<16x8x128xbf16, #tpu.memory_space<vmem>>, vector<1x8x128xbf16>,
    %c5_i32 = arith.constant 5 : i32
    %211 = arith.index_cast %c5_i32 : i32 to index
    %c0_63 = arith.constant 0 : index
    %c0_64 = arith.constant 0 : index
    %212 = vector.load %arg24[%211, %c0_63, %c0_64] : memref<16x8x384xf32, #tpu.memory_space<vmem>>, vector<1x8x384xf32>
    %213 = vector.shape_cast %212 : vector<1x8x384xf32> to vector<8x384xf32>
    %214 = arith.truncf %205 : vector<8x128xf32> to vector<8x128xbf16>
    %cst_65 = arith.constant dense<0.000000e+00> : vector<8x384xf32>
    %215 = tpu.matmul %214, %21, %cst_65 {dimension_numbers = #tpu.dot_dimension_numbers<[1], [0], [0], [1], [0, 0, 1, 1], [], []>} : vector<8x128xbf16>, vector<128x384xbf16>, vector<8x384xf32> -> vector<8x384xf32>
    %216 = vector.extract_strided_slice %213 {offsets = [0, 0], sizes = [8, 128], strides = [1, 1]} : vector<8x384xf32> to vector<8x128xf32>
    %217 = vector.extract_strided_slice %215 {offsets = [0, 0], sizes = [8, 128], strides = [1, 1]} : vector<8x384xf32> to vector<8x128xf32>
    %218 = arith.addf %216, %217 : vector<8x128xf32>
    %219 = arith.negf %218 : vector<8x128xf32>
    %220 = math.exp %219 : vector<8x128xf32>
    %cst_66 = arith.constant 1.000000e+00 : f32
    %221 = vector.broadcast %cst_66 : f32 to vector<8x128xf32>
    %222 = arith.addf %221, %220 : vector<8x128xf32>
    %223 = arith.divf %221, %222 : vector<8x128xf32>
    %224 = vector.extract_strided_slice %213 {offsets = [0, 128], sizes = [8, 128], strides = [1, 1]} : vector<8x384xf32> to vector<8x128xf32>
    %225 = vector.extract_strided_slice %215 {offsets = [0, 128], sizes = [8, 128], strides = [1, 1]} : vector<8x384xf32> to vector<8x128xf32>
    %226 = arith.addf %224, %225 : vector<8x128xf32>
    %227 = arith.negf %226 : vector<8x128xf32>
    %228 = math.exp %227 : vector<8x128xf32>
    %cst_67 = arith.constant 1.000000e+00 : f32
    %229 = vector.broadcast %cst_67 : f32 to vector<8x128xf32>
    %230 = arith.addf %229, %228 : vector<8x128xf32>
    %231 = arith.divf %229, %230 : vector<8x128xf32>
    %232 = vector.extract_strided_slice %213 {offsets = [0, 256], sizes = [8, 128], strides = [1, 1]} : vector<8x384xf32> to vector<8x128xf32>
    %233 = vector.extract_strided_slice %215 {offsets = [0, 256], sizes = [8, 128], strides = [1, 1]} : vector<8x384xf32> to vector<8x128xf32>
    %234 = arith.addf %233, %24 : vector<8x128xf32>
    %235 = arith.mulf %223, %234 : vector<8x128xf32>
    %236 = arith.addf %232, %235 : vector<8x128xf32>
    %237 = math.tanh %236 : vector<8x128xf32>
    %cst_68 = arith.constant 1.000000e+00 : f32
    %238 = vector.broadcast %cst_68 : f32 to vector<8x128xf32>
    %239 = arith.subf %238, %231 : vector<8x128xf32>
    %240 = arith.mulf %239, %237 : vector<8x128xf32>
    %241 = arith.mulf %231, %205 : vector<8x128xf32>
    %242 = arith.addf %240, %241 : vector<8x128xf32>
    %243 = arith.truncf %242 : vector<8x128xf32> to vector<8x128xbf16>
    %244 = arith.index_cast %c5_i32 : i32 to index
    %c0_69 = arith.constant 0 : index
    %c0_70 = arith.constant 0 : index
    %245 = vector.load %arg25[%244, %c0_69, %c0_70] : memref<16x8x128xbf16, #tpu.memory_space<vmem>>, vector<1x8x128xbf16>
    %246 = vector.shape_cast %245 : vector<1x8x128xbf16> to vector<8x128xbf16>
    %247 = vector.shape_cast %243 : vector<8x128xbf16> to vector<1x8x128xbf16>
    tpu.vector_store %arg25[%244, %c0_69, %c0_70], %247 {strides = array<i32>} : memref<16x8x128xbf16, #tpu.memory_space<vmem>>, vector<1x8x128xbf16>,
    %c6_i32 = arith.constant 6 : i32
    %248 = arith.index_cast %c6_i32 : i32 to index
    %c0_71 = arith.constant 0 : index
    %c0_72 = arith.constant 0 : index
    %249 = vector.load %arg24[%248, %c0_71, %c0_72] : memref<16x8x384xf32, #tpu.memory_space<vmem>>, vector<1x8x384xf32>
    %250 = vector.shape_cast %249 : vector<1x8x384xf32> to vector<8x384xf32>
    %251 = arith.truncf %242 : vector<8x128xf32> to vector<8x128xbf16>
    %cst_73 = arith.constant dense<0.000000e+00> : vector<8x384xf32>
    %252 = tpu.matmul %251, %21, %cst_73 {dimension_numbers = #tpu.dot_dimension_numbers<[1], [0], [0], [1], [0, 0, 1, 1], [], []>} : vector<8x128xbf16>, vector<128x384xbf16>, vector<8x384xf32> -> vector<8x384xf32>
    %253 = vector.extract_strided_slice %250 {offsets = [0, 0], sizes = [8, 128], strides = [1, 1]} : vector<8x384xf32> to vector<8x128xf32>
    %254 = vector.extract_strided_slice %252 {offsets = [0, 0], sizes = [8, 128], strides = [1, 1]} : vector<8x384xf32> to vector<8x128xf32>
    %255 = arith.addf %253, %254 : vector<8x128xf32>
    %256 = arith.negf %255 : vector<8x128xf32>
    %257 = math.exp %256 : vector<8x128xf32>
    %cst_74 = arith.constant 1.000000e+00 : f32
    %258 = vector.broadcast %cst_74 : f32 to vector<8x128xf32>
    %259 = arith.addf %258, %257 : vector<8x128xf32>
    %260 = arith.divf %258, %259 : vector<8x128xf32>
    %261 = vector.extract_strided_slice %250 {offsets = [0, 128], sizes = [8, 128], strides = [1, 1]} : vector<8x384xf32> to vector<8x128xf32>
    %262 = vector.extract_strided_slice %252 {offsets = [0, 128], sizes = [8, 128], strides = [1, 1]} : vector<8x384xf32> to vector<8x128xf32>
    %263 = arith.addf %261, %262 : vector<8x128xf32>
    %264 = arith.negf %263 : vector<8x128xf32>
    %265 = math.exp %264 : vector<8x128xf32>
    %cst_75 = arith.constant 1.000000e+00 : f32
    %266 = vector.broadcast %cst_75 : f32 to vector<8x128xf32>
    %267 = arith.addf %266, %265 : vector<8x128xf32>
    %268 = arith.divf %266, %267 : vector<8x128xf32>
    %269 = vector.extract_strided_slice %250 {offsets = [0, 256], sizes = [8, 128], strides = [1, 1]} : vector<8x384xf32> to vector<8x128xf32>
    %270 = vector.extract_strided_slice %252 {offsets = [0, 256], sizes = [8, 128], strides = [1, 1]} : vector<8x384xf32> to vector<8x128xf32>
    %271 = arith.addf %270, %24 : vector<8x128xf32>
    %272 = arith.mulf %260, %271 : vector<8x128xf32>
    %273 = arith.addf %269, %272 : vector<8x128xf32>
    %274 = math.tanh %273 : vector<8x128xf32>
    %cst_76 = arith.constant 1.000000e+00 : f32
    %275 = vector.broadcast %cst_76 : f32 to vector<8x128xf32>
    %276 = arith.subf %275, %268 : vector<8x128xf32>
    %277 = arith.mulf %276, %274 : vector<8x128xf32>
    %278 = arith.mulf %268, %242 : vector<8x128xf32>
    %279 = arith.addf %277, %278 : vector<8x128xf32>
    %280 = arith.truncf %279 : vector<8x128xf32> to vector<8x128xbf16>
    %281 = arith.index_cast %c6_i32 : i32 to index
    %c0_77 = arith.constant 0 : index
    %c0_78 = arith.constant 0 : index
    %282 = vector.load %arg25[%281, %c0_77, %c0_78] : memref<16x8x128xbf16, #tpu.memory_space<vmem>>, vector<1x8x128xbf16>
    %283 = vector.shape_cast %282 : vector<1x8x128xbf16> to vector<8x128xbf16>
    %284 = vector.shape_cast %280 : vector<8x128xbf16> to vector<1x8x128xbf16>
    tpu.vector_store %arg25[%281, %c0_77, %c0_78], %284 {strides = array<i32>} : memref<16x8x128xbf16, #tpu.memory_space<vmem>>, vector<1x8x128xbf16>,
    %c7_i32 = arith.constant 7 : i32
    %285 = arith.index_cast %c7_i32 : i32 to index
    %c0_79 = arith.constant 0 : index
    %c0_80 = arith.constant 0 : index
    %286 = vector.load %arg24[%285, %c0_79, %c0_80] : memref<16x8x384xf32, #tpu.memory_space<vmem>>, vector<1x8x384xf32>
    %287 = vector.shape_cast %286 : vector<1x8x384xf32> to vector<8x384xf32>
    %288 = arith.truncf %279 : vector<8x128xf32> to vector<8x128xbf16>
    %cst_81 = arith.constant dense<0.000000e+00> : vector<8x384xf32>
    %289 = tpu.matmul %288, %21, %cst_81 {dimension_numbers = #tpu.dot_dimension_numbers<[1], [0], [0], [1], [0, 0, 1, 1], [], []>} : vector<8x128xbf16>, vector<128x384xbf16>, vector<8x384xf32> -> vector<8x384xf32>
    %290 = vector.extract_strided_slice %287 {offsets = [0, 0], sizes = [8, 128], strides = [1, 1]} : vector<8x384xf32> to vector<8x128xf32>
    %291 = vector.extract_strided_slice %289 {offsets = [0, 0], sizes = [8, 128], strides = [1, 1]} : vector<8x384xf32> to vector<8x128xf32>
    %292 = arith.addf %290, %291 : vector<8x128xf32>
    %293 = arith.negf %292 : vector<8x128xf32>
    %294 = math.exp %293 : vector<8x128xf32>
    %cst_82 = arith.constant 1.000000e+00 : f32
    %295 = vector.broadcast %cst_82 : f32 to vector<8x128xf32>
    %296 = arith.addf %295, %294 : vector<8x128xf32>
    %297 = arith.divf %295, %296 : vector<8x128xf32>
    %298 = vector.extract_strided_slice %287 {offsets = [0, 128], sizes = [8, 128], strides = [1, 1]} : vector<8x384xf32> to vector<8x128xf32>
    %299 = vector.extract_strided_slice %289 {offsets = [0, 128], sizes = [8, 128], strides = [1, 1]} : vector<8x384xf32> to vector<8x128xf32>
    %300 = arith.addf %298, %299 : vector<8x128xf32>
    %301 = arith.negf %300 : vector<8x128xf32>
    %302 = math.exp %301 : vector<8x128xf32>
    %cst_83 = arith.constant 1.000000e+00 : f32
    %303 = vector.broadcast %cst_83 : f32 to vector<8x128xf32>
    %304 = arith.addf %303, %302 : vector<8x128xf32>
    %305 = arith.divf %303, %304 : vector<8x128xf32>
    %306 = vector.extract_strided_slice %287 {offsets = [0, 256], sizes = [8, 128], strides = [1, 1]} : vector<8x384xf32> to vector<8x128xf32>
    %307 = vector.extract_strided_slice %289 {offsets = [0, 256], sizes = [8, 128], strides = [1, 1]} : vector<8x384xf32> to vector<8x128xf32>
    %308 = arith.addf %307, %24 : vector<8x128xf32>
    %309 = arith.mulf %297, %308 : vector<8x128xf32>
    %310 = arith.addf %306, %309 : vector<8x128xf32>
    %311 = math.tanh %310 : vector<8x128xf32>
    %cst_84 = arith.constant 1.000000e+00 : f32
    %312 = vector.broadcast %cst_84 : f32 to vector<8x128xf32>
    %313 = arith.subf %312, %305 : vector<8x128xf32>
    %314 = arith.mulf %313, %311 : vector<8x128xf32>
    %315 = arith.mulf %305, %279 : vector<8x128xf32>
    %316 = arith.addf %314, %315 : vector<8x128xf32>
    %317 = arith.truncf %316 : vector<8x128xf32> to vector<8x128xbf16>
    %318 = arith.index_cast %c7_i32 : i32 to index
    %c0_85 = arith.constant 0 : index
    %c0_86 = arith.constant 0 : index
    %319 = vector.load %arg25[%318, %c0_85, %c0_86] : memref<16x8x128xbf16, #tpu.memory_space<vmem>>, vector<1x8x128xbf16>
    %320 = vector.shape_cast %319 : vector<1x8x128xbf16> to vector<8x128xbf16>
    %321 = vector.shape_cast %317 : vector<8x128xbf16> to vector<1x8x128xbf16>
    tpu.vector_store %arg25[%318, %c0_85, %c0_86], %321 {strides = array<i32>} : memref<16x8x128xbf16, #tpu.memory_space<vmem>>, vector<1x8x128xbf16>,
    %c8_i32 = arith.constant 8 : i32
    %322 = arith.index_cast %c8_i32 : i32 to index
    %c0_87 = arith.constant 0 : index
    %c0_88 = arith.constant 0 : index
    %323 = vector.load %arg24[%322, %c0_87, %c0_88] : memref<16x8x384xf32, #tpu.memory_space<vmem>>, vector<1x8x384xf32>
    %324 = vector.shape_cast %323 : vector<1x8x384xf32> to vector<8x384xf32>
    %325 = arith.truncf %316 : vector<8x128xf32> to vector<8x128xbf16>
    %cst_89 = arith.constant dense<0.000000e+00> : vector<8x384xf32>
    %326 = tpu.matmul %325, %21, %cst_89 {dimension_numbers = #tpu.dot_dimension_numbers<[1], [0], [0], [1], [0, 0, 1, 1], [], []>} : vector<8x128xbf16>, vector<128x384xbf16>, vector<8x384xf32> -> vector<8x384xf32>
    %327 = vector.extract_strided_slice %324 {offsets = [0, 0], sizes = [8, 128], strides = [1, 1]} : vector<8x384xf32> to vector<8x128xf32>
    %328 = vector.extract_strided_slice %326 {offsets = [0, 0], sizes = [8, 128], strides = [1, 1]} : vector<8x384xf32> to vector<8x128xf32>
    %329 = arith.addf %327, %328 : vector<8x128xf32>
    %330 = arith.negf %329 : vector<8x128xf32>
    %331 = math.exp %330 : vector<8x128xf32>
    %cst_90 = arith.constant 1.000000e+00 : f32
    %332 = vector.broadcast %cst_90 : f32 to vector<8x128xf32>
    %333 = arith.addf %332, %331 : vector<8x128xf32>
    %334 = arith.divf %332, %333 : vector<8x128xf32>
    %335 = vector.extract_strided_slice %324 {offsets = [0, 128], sizes = [8, 128], strides = [1, 1]} : vector<8x384xf32> to vector<8x128xf32>
    %336 = vector.extract_strided_slice %326 {offsets = [0, 128], sizes = [8, 128], strides = [1, 1]} : vector<8x384xf32> to vector<8x128xf32>
    %337 = arith.addf %335, %336 : vector<8x128xf32>
    %338 = arith.negf %337 : vector<8x128xf32>
    %339 = math.exp %338 : vector<8x128xf32>
    %cst_91 = arith.constant 1.000000e+00 : f32
    %340 = vector.broadcast %cst_91 : f32 to vector<8x128xf32>
    %341 = arith.addf %340, %339 : vector<8x128xf32>
    %342 = arith.divf %340, %341 : vector<8x128xf32>
    %343 = vector.extract_strided_slice %324 {offsets = [0, 256], sizes = [8, 128], strides = [1, 1]} : vector<8x384xf32> to vector<8x128xf32>
    %344 = vector.extract_strided_slice %326 {offsets = [0, 256], sizes = [8, 128], strides = [1, 1]} : vector<8x384xf32> to vector<8x128xf32>
    %345 = arith.addf %344, %24 : vector<8x128xf32>
    %346 = arith.mulf %334, %345 : vector<8x128xf32>
    %347 = arith.addf %343, %346 : vector<8x128xf32>
    %348 = math.tanh %347 : vector<8x128xf32>
    %cst_92 = arith.constant 1.000000e+00 : f32
    %349 = vector.broadcast %cst_92 : f32 to vector<8x128xf32>
    %350 = arith.subf %349, %342 : vector<8x128xf32>
    %351 = arith.mulf %350, %348 : vector<8x128xf32>
    %352 = arith.mulf %342, %316 : vector<8x128xf32>
    %353 = arith.addf %351, %352 : vector<8x128xf32>
    %354 = arith.truncf %353 : vector<8x128xf32> to vector<8x128xbf16>
    %355 = arith.index_cast %c8_i32 : i32 to index
    %c0_93 = arith.constant 0 : index
    %c0_94 = arith.constant 0 : index
    %356 = vector.load %arg25[%355, %c0_93, %c0_94] : memref<16x8x128xbf16, #tpu.memory_space<vmem>>, vector<1x8x128xbf16>
    %357 = vector.shape_cast %356 : vector<1x8x128xbf16> to vector<8x128xbf16>
    %358 = vector.shape_cast %354 : vector<8x128xbf16> to vector<1x8x128xbf16>
    tpu.vector_store %arg25[%355, %c0_93, %c0_94], %358 {strides = array<i32>} : memref<16x8x128xbf16, #tpu.memory_space<vmem>>, vector<1x8x128xbf16>,
    %c9_i32 = arith.constant 9 : i32
    %359 = arith.index_cast %c9_i32 : i32 to index
    %c0_95 = arith.constant 0 : index
    %c0_96 = arith.constant 0 : index
    %360 = vector.load %arg24[%359, %c0_95, %c0_96] : memref<16x8x384xf32, #tpu.memory_space<vmem>>, vector<1x8x384xf32>
    %361 = vector.shape_cast %360 : vector<1x8x384xf32> to vector<8x384xf32>
    %362 = arith.truncf %353 : vector<8x128xf32> to vector<8x128xbf16>
    %cst_97 = arith.constant dense<0.000000e+00> : vector<8x384xf32>
    %363 = tpu.matmul %362, %21, %cst_97 {dimension_numbers = #tpu.dot_dimension_numbers<[1], [0], [0], [1], [0, 0, 1, 1], [], []>} : vector<8x128xbf16>, vector<128x384xbf16>, vector<8x384xf32> -> vector<8x384xf32>
    %364 = vector.extract_strided_slice %361 {offsets = [0, 0], sizes = [8, 128], strides = [1, 1]} : vector<8x384xf32> to vector<8x128xf32>
    %365 = vector.extract_strided_slice %363 {offsets = [0, 0], sizes = [8, 128], strides = [1, 1]} : vector<8x384xf32> to vector<8x128xf32>
    %366 = arith.addf %364, %365 : vector<8x128xf32>
    %367 = arith.negf %366 : vector<8x128xf32>
    %368 = math.exp %367 : vector<8x128xf32>
    %cst_98 = arith.constant 1.000000e+00 : f32
    %369 = vector.broadcast %cst_98 : f32 to vector<8x128xf32>
    %370 = arith.addf %369, %368 : vector<8x128xf32>
    %371 = arith.divf %369, %370 : vector<8x128xf32>
    %372 = vector.extract_strided_slice %361 {offsets = [0, 128], sizes = [8, 128], strides = [1, 1]} : vector<8x384xf32> to vector<8x128xf32>
    %373 = vector.extract_strided_slice %363 {offsets = [0, 128], sizes = [8, 128], strides = [1, 1]} : vector<8x384xf32> to vector<8x128xf32>
    %374 = arith.addf %372, %373 : vector<8x128xf32>
    %375 = arith.negf %374 : vector<8x128xf32>
    %376 = math.exp %375 : vector<8x128xf32>
    %cst_99 = arith.constant 1.000000e+00 : f32
    %377 = vector.broadcast %cst_99 : f32 to vector<8x128xf32>
    %378 = arith.addf %377, %376 : vector<8x128xf32>
    %379 = arith.divf %377, %378 : vector<8x128xf32>
    %380 = vector.extract_strided_slice %361 {offsets = [0, 256], sizes = [8, 128], strides = [1, 1]} : vector<8x384xf32> to vector<8x128xf32>
    %381 = vector.extract_strided_slice %363 {offsets = [0, 256], sizes = [8, 128], strides = [1, 1]} : vector<8x384xf32> to vector<8x128xf32>
    %382 = arith.addf %381, %24 : vector<8x128xf32>
    %383 = arith.mulf %371, %382 : vector<8x128xf32>
    %384 = arith.addf %380, %383 : vector<8x128xf32>
    %385 = math.tanh %384 : vector<8x128xf32>
    %cst_100 = arith.constant 1.000000e+00 : f32
    %386 = vector.broadcast %cst_100 : f32 to vector<8x128xf32>
    %387 = arith.subf %386, %379 : vector<8x128xf32>
    %388 = arith.mulf %387, %385 : vector<8x128xf32>
    %389 = arith.mulf %379, %353 : vector<8x128xf32>
    %390 = arith.addf %388, %389 : vector<8x128xf32>
    %391 = arith.truncf %390 : vector<8x128xf32> to vector<8x128xbf16>
    %392 = arith.index_cast %c9_i32 : i32 to index
    %c0_101 = arith.constant 0 : index
    %c0_102 = arith.constant 0 : index
    %393 = vector.load %arg25[%392, %c0_101, %c0_102] : memref<16x8x128xbf16, #tpu.memory_space<vmem>>, vector<1x8x128xbf16>
    %394 = vector.shape_cast %393 : vector<1x8x128xbf16> to vector<8x128xbf16>
    %395 = vector.shape_cast %391 : vector<8x128xbf16> to vector<1x8x128xbf16>
    tpu.vector_store %arg25[%392, %c0_101, %c0_102], %395 {strides = array<i32>} : memref<16x8x128xbf16, #tpu.memory_space<vmem>>, vector<1x8x128xbf16>,
    %c10_i32 = arith.constant 10 : i32
    %396 = arith.index_cast %c10_i32 : i32 to index
    %c0_103 = arith.constant 0 : index
    %c0_104 = arith.constant 0 : index
    %397 = vector.load %arg24[%396, %c0_103, %c0_104] : memref<16x8x384xf32, #tpu.memory_space<vmem>>, vector<1x8x384xf32>
    %398 = vector.shape_cast %397 : vector<1x8x384xf32> to vector<8x384xf32>
    %399 = arith.truncf %390 : vector<8x128xf32> to vector<8x128xbf16>
    %cst_105 = arith.constant dense<0.000000e+00> : vector<8x384xf32>
    %400 = tpu.matmul %399, %21, %cst_105 {dimension_numbers = #tpu.dot_dimension_numbers<[1], [0], [0], [1], [0, 0, 1, 1], [], []>} : vector<8x128xbf16>, vector<128x384xbf16>, vector<8x384xf32> -> vector<8x384xf32>
    %401 = vector.extract_strided_slice %398 {offsets = [0, 0], sizes = [8, 128], strides = [1, 1]} : vector<8x384xf32> to vector<8x128xf32>
    %402 = vector.extract_strided_slice %400 {offsets = [0, 0], sizes = [8, 128], strides = [1, 1]} : vector<8x384xf32> to vector<8x128xf32>
    %403 = arith.addf %401, %402 : vector<8x128xf32>
    %404 = arith.negf %403 : vector<8x128xf32>
    %405 = math.exp %404 : vector<8x128xf32>
    %cst_106 = arith.constant 1.000000e+00 : f32
    %406 = vector.broadcast %cst_106 : f32 to vector<8x128xf32>
    %407 = arith.addf %406, %405 : vector<8x128xf32>
    %408 = arith.divf %406, %407 : vector<8x128xf32>
    %409 = vector.extract_strided_slice %398 {offsets = [0, 128], sizes = [8, 128], strides = [1, 1]} : vector<8x384xf32> to vector<8x128xf32>
    %410 = vector.extract_strided_slice %400 {offsets = [0, 128], sizes = [8, 128], strides = [1, 1]} : vector<8x384xf32> to vector<8x128xf32>
    %411 = arith.addf %409, %410 : vector<8x128xf32>
    %412 = arith.negf %411 : vector<8x128xf32>
    %413 = math.exp %412 : vector<8x128xf32>
    %cst_107 = arith.constant 1.000000e+00 : f32
    %414 = vector.broadcast %cst_107 : f32 to vector<8x128xf32>
    %415 = arith.addf %414, %413 : vector<8x128xf32>
    %416 = arith.divf %414, %415 : vector<8x128xf32>
    %417 = vector.extract_strided_slice %398 {offsets = [0, 256], sizes = [8, 128], strides = [1, 1]} : vector<8x384xf32> to vector<8x128xf32>
    %418 = vector.extract_strided_slice %400 {offsets = [0, 256], sizes = [8, 128], strides = [1, 1]} : vector<8x384xf32> to vector<8x128xf32>
    %419 = arith.addf %418, %24 : vector<8x128xf32>
    %420 = arith.mulf %408, %419 : vector<8x128xf32>
    %421 = arith.addf %417, %420 : vector<8x128xf32>
    %422 = math.tanh %421 : vector<8x128xf32>
    %cst_108 = arith.constant 1.000000e+00 : f32
    %423 = vector.broadcast %cst_108 : f32 to vector<8x128xf32>
    %424 = arith.subf %423, %416 : vector<8x128xf32>
    %425 = arith.mulf %424, %422 : vector<8x128xf32>
    %426 = arith.mulf %416, %390 : vector<8x128xf32>
    %427 = arith.addf %425, %426 : vector<8x128xf32>
    %428 = arith.truncf %427 : vector<8x128xf32> to vector<8x128xbf16>
    %429 = arith.index_cast %c10_i32 : i32 to index
    %c0_109 = arith.constant 0 : index
    %c0_110 = arith.constant 0 : index
    %430 = vector.load %arg25[%429, %c0_109, %c0_110] : memref<16x8x128xbf16, #tpu.memory_space<vmem>>, vector<1x8x128xbf16>
    %431 = vector.shape_cast %430 : vector<1x8x128xbf16> to vector<8x128xbf16>
    %432 = vector.shape_cast %428 : vector<8x128xbf16> to vector<1x8x128xbf16>
    tpu.vector_store %arg25[%429, %c0_109, %c0_110], %432 {strides = array<i32>} : memref<16x8x128xbf16, #tpu.memory_space<vmem>>, vector<1x8x128xbf16>,
    %c11_i32 = arith.constant 11 : i32
    %433 = arith.index_cast %c11_i32 : i32 to index
    %c0_111 = arith.constant 0 : index
    %c0_112 = arith.constant 0 : index
    %434 = vector.load %arg24[%433, %c0_111, %c0_112] : memref<16x8x384xf32, #tpu.memory_space<vmem>>, vector<1x8x384xf32>
    %435 = vector.shape_cast %434 : vector<1x8x384xf32> to vector<8x384xf32>
    %436 = arith.truncf %427 : vector<8x128xf32> to vector<8x128xbf16>
    %cst_113 = arith.constant dense<0.000000e+00> : vector<8x384xf32>
    %437 = tpu.matmul %436, %21, %cst_113 {dimension_numbers = #tpu.dot_dimension_numbers<[1], [0], [0], [1], [0, 0, 1, 1], [], []>} : vector<8x128xbf16>, vector<128x384xbf16>, vector<8x384xf32> -> vector<8x384xf32>
    %438 = vector.extract_strided_slice %435 {offsets = [0, 0], sizes = [8, 128], strides = [1, 1]} : vector<8x384xf32> to vector<8x128xf32>
    %439 = vector.extract_strided_slice %437 {offsets = [0, 0], sizes = [8, 128], strides = [1, 1]} : vector<8x384xf32> to vector<8x128xf32>
    %440 = arith.addf %438, %439 : vector<8x128xf32>
    %441 = arith.negf %440 : vector<8x128xf32>
    %442 = math.exp %441 : vector<8x128xf32>
    %cst_114 = arith.constant 1.000000e+00 : f32
    %443 = vector.broadcast %cst_114 : f32 to vector<8x128xf32>
    %444 = arith.addf %443, %442 : vector<8x128xf32>
    %445 = arith.divf %443, %444 : vector<8x128xf32>
    %446 = vector.extract_strided_slice %435 {offsets = [0, 128], sizes = [8, 128], strides = [1, 1]} : vector<8x384xf32> to vector<8x128xf32>
    %447 = vector.extract_strided_slice %437 {offsets = [0, 128], sizes = [8, 128], strides = [1, 1]} : vector<8x384xf32> to vector<8x128xf32>
    %448 = arith.addf %446, %447 : vector<8x128xf32>
    %449 = arith.negf %448 : vector<8x128xf32>
    %450 = math.exp %449 : vector<8x128xf32>
    %cst_115 = arith.constant 1.000000e+00 : f32
    %451 = vector.broadcast %cst_115 : f32 to vector<8x128xf32>
    %452 = arith.addf %451, %450 : vector<8x128xf32>
    %453 = arith.divf %451, %452 : vector<8x128xf32>
    %454 = vector.extract_strided_slice %435 {offsets = [0, 256], sizes = [8, 128], strides = [1, 1]} : vector<8x384xf32> to vector<8x128xf32>
    %455 = vector.extract_strided_slice %437 {offsets = [0, 256], sizes = [8, 128], strides = [1, 1]} : vector<8x384xf32> to vector<8x128xf32>
    %456 = arith.addf %455, %24 : vector<8x128xf32>
    %457 = arith.mulf %445, %456 : vector<8x128xf32>
    %458 = arith.addf %454, %457 : vector<8x128xf32>
    %459 = math.tanh %458 : vector<8x128xf32>
    %cst_116 = arith.constant 1.000000e+00 : f32
    %460 = vector.broadcast %cst_116 : f32 to vector<8x128xf32>
    %461 = arith.subf %460, %453 : vector<8x128xf32>
    %462 = arith.mulf %461, %459 : vector<8x128xf32>
    %463 = arith.mulf %453, %427 : vector<8x128xf32>
    %464 = arith.addf %462, %463 : vector<8x128xf32>
    %465 = arith.truncf %464 : vector<8x128xf32> to vector<8x128xbf16>
    %466 = arith.index_cast %c11_i32 : i32 to index
    %c0_117 = arith.constant 0 : index
    %c0_118 = arith.constant 0 : index
    %467 = vector.load %arg25[%466, %c0_117, %c0_118] : memref<16x8x128xbf16, #tpu.memory_space<vmem>>, vector<1x8x128xbf16>
    %468 = vector.shape_cast %467 : vector<1x8x128xbf16> to vector<8x128xbf16>
    %469 = vector.shape_cast %465 : vector<8x128xbf16> to vector<1x8x128xbf16>
    tpu.vector_store %arg25[%466, %c0_117, %c0_118], %469 {strides = array<i32>} : memref<16x8x128xbf16, #tpu.memory_space<vmem>>, vector<1x8x128xbf16>,
    %c12_i32 = arith.constant 12 : i32
    %470 = arith.index_cast %c12_i32 : i32 to index
    %c0_119 = arith.constant 0 : index
    %c0_120 = arith.constant 0 : index
    %471 = vector.load %arg24[%470, %c0_119, %c0_120] : memref<16x8x384xf32, #tpu.memory_space<vmem>>, vector<1x8x384xf32>
    %472 = vector.shape_cast %471 : vector<1x8x384xf32> to vector<8x384xf32>
    %473 = arith.truncf %464 : vector<8x128xf32> to vector<8x128xbf16>
    %cst_121 = arith.constant dense<0.000000e+00> : vector<8x384xf32>
    %474 = tpu.matmul %473, %21, %cst_121 {dimension_numbers = #tpu.dot_dimension_numbers<[1], [0], [0], [1], [0, 0, 1, 1], [], []>} : vector<8x128xbf16>, vector<128x384xbf16>, vector<8x384xf32> -> vector<8x384xf32>
    %475 = vector.extract_strided_slice %472 {offsets = [0, 0], sizes = [8, 128], strides = [1, 1]} : vector<8x384xf32> to vector<8x128xf32>
    %476 = vector.extract_strided_slice %474 {offsets = [0, 0], sizes = [8, 128], strides = [1, 1]} : vector<8x384xf32> to vector<8x128xf32>
    %477 = arith.addf %475, %476 : vector<8x128xf32>
    %478 = arith.negf %477 : vector<8x128xf32>
    %479 = math.exp %478 : vector<8x128xf32>
    %cst_122 = arith.constant 1.000000e+00 : f32
    %480 = vector.broadcast %cst_122 : f32 to vector<8x128xf32>
    %481 = arith.addf %480, %479 : vector<8x128xf32>
    %482 = arith.divf %480, %481 : vector<8x128xf32>
    %483 = vector.extract_strided_slice %472 {offsets = [0, 128], sizes = [8, 128], strides = [1, 1]} : vector<8x384xf32> to vector<8x128xf32>
    %484 = vector.extract_strided_slice %474 {offsets = [0, 128], sizes = [8, 128], strides = [1, 1]} : vector<8x384xf32> to vector<8x128xf32>
    %485 = arith.addf %483, %484 : vector<8x128xf32>
    %486 = arith.negf %485 : vector<8x128xf32>
    %487 = math.exp %486 : vector<8x128xf32>
    %cst_123 = arith.constant 1.000000e+00 : f32
    %488 = vector.broadcast %cst_123 : f32 to vector<8x128xf32>
    %489 = arith.addf %488, %487 : vector<8x128xf32>
    %490 = arith.divf %488, %489 : vector<8x128xf32>
    %491 = vector.extract_strided_slice %472 {offsets = [0, 256], sizes = [8, 128], strides = [1, 1]} : vector<8x384xf32> to vector<8x128xf32>
    %492 = vector.extract_strided_slice %474 {offsets = [0, 256], sizes = [8, 128], strides = [1, 1]} : vector<8x384xf32> to vector<8x128xf32>
    %493 = arith.addf %492, %24 : vector<8x128xf32>
    %494 = arith.mulf %482, %493 : vector<8x128xf32>
    %495 = arith.addf %491, %494 : vector<8x128xf32>
    %496 = math.tanh %495 : vector<8x128xf32>
    %cst_124 = arith.constant 1.000000e+00 : f32
    %497 = vector.broadcast %cst_124 : f32 to vector<8x128xf32>
    %498 = arith.subf %497, %490 : vector<8x128xf32>
    %499 = arith.mulf %498, %496 : vector<8x128xf32>
    %500 = arith.mulf %490, %464 : vector<8x128xf32>
    %501 = arith.addf %499, %500 : vector<8x128xf32>
    %502 = arith.truncf %501 : vector<8x128xf32> to vector<8x128xbf16>
    %503 = arith.index_cast %c12_i32 : i32 to index
    %c0_125 = arith.constant 0 : index
    %c0_126 = arith.constant 0 : index
    %504 = vector.load %arg25[%503, %c0_125, %c0_126] : memref<16x8x128xbf16, #tpu.memory_space<vmem>>, vector<1x8x128xbf16>
    %505 = vector.shape_cast %504 : vector<1x8x128xbf16> to vector<8x128xbf16>
    %506 = vector.shape_cast %502 : vector<8x128xbf16> to vector<1x8x128xbf16>
    tpu.vector_store %arg25[%503, %c0_125, %c0_126], %506 {strides = array<i32>} : memref<16x8x128xbf16, #tpu.memory_space<vmem>>, vector<1x8x128xbf16>,
    %c13_i32 = arith.constant 13 : i32
    %507 = arith.index_cast %c13_i32 : i32 to index
    %c0_127 = arith.constant 0 : index
    %c0_128 = arith.constant 0 : index
    %508 = vector.load %arg24[%507, %c0_127, %c0_128] : memref<16x8x384xf32, #tpu.memory_space<vmem>>, vector<1x8x384xf32>
    %509 = vector.shape_cast %508 : vector<1x8x384xf32> to vector<8x384xf32>
    %510 = arith.truncf %501 : vector<8x128xf32> to vector<8x128xbf16>
    %cst_129 = arith.constant dense<0.000000e+00> : vector<8x384xf32>
    %511 = tpu.matmul %510, %21, %cst_129 {dimension_numbers = #tpu.dot_dimension_numbers<[1], [0], [0], [1], [0, 0, 1, 1], [], []>} : vector<8x128xbf16>, vector<128x384xbf16>, vector<8x384xf32> -> vector<8x384xf32>
    %512 = vector.extract_strided_slice %509 {offsets = [0, 0], sizes = [8, 128], strides = [1, 1]} : vector<8x384xf32> to vector<8x128xf32>
    %513 = vector.extract_strided_slice %511 {offsets = [0, 0], sizes = [8, 128], strides = [1, 1]} : vector<8x384xf32> to vector<8x128xf32>
    %514 = arith.addf %512, %513 : vector<8x128xf32>
    %515 = arith.negf %514 : vector<8x128xf32>
    %516 = math.exp %515 : vector<8x128xf32>
    %cst_130 = arith.constant 1.000000e+00 : f32
    %517 = vector.broadcast %cst_130 : f32 to vector<8x128xf32>
    %518 = arith.addf %517, %516 : vector<8x128xf32>
    %519 = arith.divf %517, %518 : vector<8x128xf32>
    %520 = vector.extract_strided_slice %509 {offsets = [0, 128], sizes = [8, 128], strides = [1, 1]} : vector<8x384xf32> to vector<8x128xf32>
    %521 = vector.extract_strided_slice %511 {offsets = [0, 128], sizes = [8, 128], strides = [1, 1]} : vector<8x384xf32> to vector<8x128xf32>
    %522 = arith.addf %520, %521 : vector<8x128xf32>
    %523 = arith.negf %522 : vector<8x128xf32>
    %524 = math.exp %523 : vector<8x128xf32>
    %cst_131 = arith.constant 1.000000e+00 : f32
    %525 = vector.broadcast %cst_131 : f32 to vector<8x128xf32>
    %526 = arith.addf %525, %524 : vector<8x128xf32>
    %527 = arith.divf %525, %526 : vector<8x128xf32>
    %528 = vector.extract_strided_slice %509 {offsets = [0, 256], sizes = [8, 128], strides = [1, 1]} : vector<8x384xf32> to vector<8x128xf32>
    %529 = vector.extract_strided_slice %511 {offsets = [0, 256], sizes = [8, 128], strides = [1, 1]} : vector<8x384xf32> to vector<8x128xf32>
    %530 = arith.addf %529, %24 : vector<8x128xf32>
    %531 = arith.mulf %519, %530 : vector<8x128xf32>
    %532 = arith.addf %528, %531 : vector<8x128xf32>
    %533 = math.tanh %532 : vector<8x128xf32>
    %cst_132 = arith.constant 1.000000e+00 : f32
    %534 = vector.broadcast %cst_132 : f32 to vector<8x128xf32>
    %535 = arith.subf %534, %527 : vector<8x128xf32>
    %536 = arith.mulf %535, %533 : vector<8x128xf32>
    %537 = arith.mulf %527, %501 : vector<8x128xf32>
    %538 = arith.addf %536, %537 : vector<8x128xf32>
    %539 = arith.truncf %538 : vector<8x128xf32> to vector<8x128xbf16>
    %540 = arith.index_cast %c13_i32 : i32 to index
    %c0_133 = arith.constant 0 : index
    %c0_134 = arith.constant 0 : index
    %541 = vector.load %arg25[%540, %c0_133, %c0_134] : memref<16x8x128xbf16, #tpu.memory_space<vmem>>, vector<1x8x128xbf16>
    %542 = vector.shape_cast %541 : vector<1x8x128xbf16> to vector<8x128xbf16>
    %543 = vector.shape_cast %539 : vector<8x128xbf16> to vector<1x8x128xbf16>
    tpu.vector_store %arg25[%540, %c0_133, %c0_134], %543 {strides = array<i32>} : memref<16x8x128xbf16, #tpu.memory_space<vmem>>, vector<1x8x128xbf16>,
    %c14_i32 = arith.constant 14 : i32
    %544 = arith.index_cast %c14_i32 : i32 to index
    %c0_135 = arith.constant 0 : index
    %c0_136 = arith.constant 0 : index
    %545 = vector.load %arg24[%544, %c0_135, %c0_136] : memref<16x8x384xf32, #tpu.memory_space<vmem>>, vector<1x8x384xf32>
    %546 = vector.shape_cast %545 : vector<1x8x384xf32> to vector<8x384xf32>
    %547 = arith.truncf %538 : vector<8x128xf32> to vector<8x128xbf16>
    %cst_137 = arith.constant dense<0.000000e+00> : vector<8x384xf32>
    %548 = tpu.matmul %547, %21, %cst_137 {dimension_numbers = #tpu.dot_dimension_numbers<[1], [0], [0], [1], [0, 0, 1, 1], [], []>} : vector<8x128xbf16>, vector<128x384xbf16>, vector<8x384xf32> -> vector<8x384xf32>
    %549 = vector.extract_strided_slice %546 {offsets = [0, 0], sizes = [8, 128], strides = [1, 1]} : vector<8x384xf32> to vector<8x128xf32>
    %550 = vector.extract_strided_slice %548 {offsets = [0, 0], sizes = [8, 128], strides = [1, 1]} : vector<8x384xf32> to vector<8x128xf32>
    %551 = arith.addf %549, %550 : vector<8x128xf32>
    %552 = arith.negf %551 : vector<8x128xf32>
    %553 = math.exp %552 : vector<8x128xf32>
    %cst_138 = arith.constant 1.000000e+00 : f32
    %554 = vector.broadcast %cst_138 : f32 to vector<8x128xf32>
    %555 = arith.addf %554, %553 : vector<8x128xf32>
    %556 = arith.divf %554, %555 : vector<8x128xf32>
    %557 = vector.extract_strided_slice %546 {offsets = [0, 128], sizes = [8, 128], strides = [1, 1]} : vector<8x384xf32> to vector<8x128xf32>
    %558 = vector.extract_strided_slice %548 {offsets = [0, 128], sizes = [8, 128], strides = [1, 1]} : vector<8x384xf32> to vector<8x128xf32>
    %559 = arith.addf %557, %558 : vector<8x128xf32>
    %560 = arith.negf %559 : vector<8x128xf32>
    %561 = math.exp %560 : vector<8x128xf32>
    %cst_139 = arith.constant 1.000000e+00 : f32
    %562 = vector.broadcast %cst_139 : f32 to vector<8x128xf32>
    %563 = arith.addf %562, %561 : vector<8x128xf32>
    %564 = arith.divf %562, %563 : vector<8x128xf32>
    %565 = vector.extract_strided_slice %546 {offsets = [0, 256], sizes = [8, 128], strides = [1, 1]} : vector<8x384xf32> to vector<8x128xf32>
    %566 = vector.extract_strided_slice %548 {offsets = [0, 256], sizes = [8, 128], strides = [1, 1]} : vector<8x384xf32> to vector<8x128xf32>
    %567 = arith.addf %566, %24 : vector<8x128xf32>
    %568 = arith.mulf %556, %567 : vector<8x128xf32>
    %569 = arith.addf %565, %568 : vector<8x128xf32>
    %570 = math.tanh %569 : vector<8x128xf32>
    %cst_140 = arith.constant 1.000000e+00 : f32
    %571 = vector.broadcast %cst_140 : f32 to vector<8x128xf32>
    %572 = arith.subf %571, %564 : vector<8x128xf32>
    %573 = arith.mulf %572, %570 : vector<8x128xf32>
    %574 = arith.mulf %564, %538 : vector<8x128xf32>
    %575 = arith.addf %573, %574 : vector<8x128xf32>
    %576 = arith.truncf %575 : vector<8x128xf32> to vector<8x128xbf16>
    %577 = arith.index_cast %c14_i32 : i32 to index
    %c0_141 = arith.constant 0 : index
    %c0_142 = arith.constant 0 : index
    %578 = vector.load %arg25[%577, %c0_141, %c0_142] : memref<16x8x128xbf16, #tpu.memory_space<vmem>>, vector<1x8x128xbf16>
    %579 = vector.shape_cast %578 : vector<1x8x128xbf16> to vector<8x128xbf16>
    %580 = vector.shape_cast %576 : vector<8x128xbf16> to vector<1x8x128xbf16>
    tpu.vector_store %arg25[%577, %c0_141, %c0_142], %580 {strides = array<i32>} : memref<16x8x128xbf16, #tpu.memory_space<vmem>>, vector<1x8x128xbf16>,
    %c15_i32 = arith.constant 15 : i32
    %581 = arith.index_cast %c15_i32 : i32 to index
    %c0_143 = arith.constant 0 : index
    %c0_144 = arith.constant 0 : index
    %582 = vector.load %arg24[%581, %c0_143, %c0_144] : memref<16x8x384xf32, #tpu.memory_space<vmem>>, vector<1x8x384xf32>
    %583 = vector.shape_cast %582 : vector<1x8x384xf32> to vector<8x384xf32>
    %584 = arith.truncf %575 : vector<8x128xf32> to vector<8x128xbf16>
    %cst_145 = arith.constant dense<0.000000e+00> : vector<8x384xf32>
    %585 = tpu.matmul %584, %21, %cst_145 {dimension_numbers = #tpu.dot_dimension_numbers<[1], [0], [0], [1], [0, 0, 1, 1], [], []>} : vector<8x128xbf16>, vector<128x384xbf16>, vector<8x384xf32> -> vector<8x384xf32>
    %586 = vector.extract_strided_slice %583 {offsets = [0, 0], sizes = [8, 128], strides = [1, 1]} : vector<8x384xf32> to vector<8x128xf32>
    %587 = vector.extract_strided_slice %585 {offsets = [0, 0], sizes = [8, 128], strides = [1, 1]} : vector<8x384xf32> to vector<8x128xf32>
    %588 = arith.addf %586, %587 : vector<8x128xf32>
    %589 = arith.negf %588 : vector<8x128xf32>
    %590 = math.exp %589 : vector<8x128xf32>
    %cst_146 = arith.constant 1.000000e+00 : f32
    %591 = vector.broadcast %cst_146 : f32 to vector<8x128xf32>
    %592 = arith.addf %591, %590 : vector<8x128xf32>
    %593 = arith.divf %591, %592 : vector<8x128xf32>
    %594 = vector.extract_strided_slice %583 {offsets = [0, 128], sizes = [8, 128], strides = [1, 1]} : vector<8x384xf32> to vector<8x128xf32>
    %595 = vector.extract_strided_slice %585 {offsets = [0, 128], sizes = [8, 128], strides = [1, 1]} : vector<8x384xf32> to vector<8x128xf32>
    %596 = arith.addf %594, %595 : vector<8x128xf32>
    %597 = arith.negf %596 : vector<8x128xf32>
    %598 = math.exp %597 : vector<8x128xf32>
    %cst_147 = arith.constant 1.000000e+00 : f32
    %599 = vector.broadcast %cst_147 : f32 to vector<8x128xf32>
    %600 = arith.addf %599, %598 : vector<8x128xf32>
    %601 = arith.divf %599, %600 : vector<8x128xf32>
    %602 = vector.extract_strided_slice %583 {offsets = [0, 256], sizes = [8, 128], strides = [1, 1]} : vector<8x384xf32> to vector<8x128xf32>
    %603 = vector.extract_strided_slice %585 {offsets = [0, 256], sizes = [8, 128], strides = [1, 1]} : vector<8x384xf32> to vector<8x128xf32>
    %604 = arith.addf %603, %24 : vector<8x128xf32>
    %605 = arith.mulf %593, %604 : vector<8x128xf32>
    %606 = arith.addf %602, %605 : vector<8x128xf32>
    %607 = math.tanh %606 : vector<8x128xf32>
    %cst_148 = arith.constant 1.000000e+00 : f32
    %608 = vector.broadcast %cst_148 : f32 to vector<8x128xf32>
    %609 = arith.subf %608, %601 : vector<8x128xf32>
    %610 = arith.mulf %609, %607 : vector<8x128xf32>
    %611 = arith.mulf %601, %575 : vector<8x128xf32>
    %612 = arith.addf %610, %611 : vector<8x128xf32>
    %613 = arith.truncf %612 : vector<8x128xf32> to vector<8x128xbf16>
    %614 = arith.index_cast %c15_i32 : i32 to index
    %c0_149 = arith.constant 0 : index
    %c0_150 = arith.constant 0 : index
    %615 = vector.load %arg25[%614, %c0_149, %c0_150] : memref<16x8x128xbf16, #tpu.memory_space<vmem>>, vector<1x8x128xbf16>
    %616 = vector.shape_cast %615 : vector<1x8x128xbf16> to vector<8x128xbf16>
    %617 = vector.shape_cast %613 : vector<8x128xbf16> to vector<1x8x128xbf16>
    tpu.vector_store %arg25[%614, %c0_149, %c0_150], %617 {strides = array<i32>} : memref<16x8x128xbf16, #tpu.memory_space<vmem>>, vector<1x8x128xbf16>,
    %c16_i32 = arith.constant 16 : i32
    %c0_151 = arith.constant 0 : index
    %c0_152 = arith.constant 0 : index
    %618 = vector.load %arg27[%c0_151, %c0_152] : memref<8x128xf32, #tpu.memory_space<vmem>>, vector<8x128xf32>
    tpu.vector_store %arg27[%c0_151, %c0_152], %612 {strides = array<i32>} : memref<8x128xf32, #tpu.memory_space<vmem>>, vector<8x128xf32>,
    %c0_153 = arith.constant 0 : index
    %c0_154 = arith.constant 0 : index
    %c0_155 = arith.constant 0 : index
    %619 = vector.load %arg25[%c0_153, %c0_154, %c0_155] : memref<16x8x128xbf16, #tpu.memory_space<vmem>>, vector<16x8x128xbf16>
    %620 = vector.shape_cast %619 : vector<16x8x128xbf16> to vector<128x128xbf16>
    %c0_156 = arith.constant 0 : index
    %c0_157 = arith.constant 0 : index
    %621 = vector.load %arg13[%c0_156, %c0_157] : memref<128x128xbf16, #tpu.memory_space<vmem>>, vector<128x128xbf16>
    %cst_158 = arith.constant dense<0.000000e+00> : vector<128x128xf32>
    %622 = tpu.matmul %620, %621, %cst_158 {dimension_numbers = #tpu.dot_dimension_numbers<[1], [0], [0], [1], [0, 0, 1, 1], [], []>} : vector<128x128xbf16>, vector<128x128xbf16>, vector<128x128xf32> -> vector<128x128xf32>
    %c0_159 = arith.constant 0 : index
    %c0_160 = arith.constant 0 : index
    %623 = vector.load %arg14[%c0_159, %c0_160] : memref<1x128xf32, #tpu.memory_space<vmem>>, vector<1x128xf32>
    %624 = vector.broadcast %623 : vector<1x128xf32> to vector<128x128xf32>
    %625 = arith.addf %622, %624 : vector<128x128xf32>
    %626 = arith.truncf %625 : vector<128x128xf32> to vector<128x128xbf16>
    %c0_161 = arith.constant 0 : index
    %c0_162 = arith.constant 0 : index
    %627 = vector.load %arg15[%c0_161, %c0_162] : memref<128x128xbf16, #tpu.memory_space<vmem>>, vector<128x128xbf16>
    %cst_163 = arith.constant dense<0.000000e+00> : vector<128x128xf32>
    %628 = tpu.matmul %626, %627, %cst_163 {dimension_numbers = #tpu.dot_dimension_numbers<[1], [0], [0], [1], [0, 0, 1, 1], [], []>} : vector<128x128xbf16>, vector<128x128xbf16>, vector<128x128xf32> -> vector<128x128xf32>
    %c0_164 = arith.constant 0 : index
    %c0_165 = arith.constant 0 : index
    %629 = vector.load %arg16[%c0_164, %c0_165] : memref<1x128xf32, #tpu.memory_space<vmem>>, vector<1x128xf32>
    %630 = vector.broadcast %629 : vector<1x128xf32> to vector<128x128xf32>
    %631 = arith.addf %628, %630 : vector<128x128xf32>
    %632 = arith.negf %631 : vector<128x128xf32>
    %633 = math.exp %632 : vector<128x128xf32>
    %cst_166 = arith.constant 1.000000e+00 : f32
    %634 = vector.broadcast %cst_166 : f32 to vector<128x128xf32>
    %635 = arith.addf %634, %633 : vector<128x128xf32>
    %636 = arith.divf %634, %635 : vector<128x128xf32>
    %637 = vector.shape_cast %636 : vector<128x128xf32> to vector<16x8x128xf32>
    %c0_167 = arith.constant 0 : index
    %c0_168 = arith.constant 0 : index
    %c0_169 = arith.constant 0 : index
    %638 = vector.load %arg21[%c0_167, %c0_168, %c0_169] : memref<16x8x128xf32, #tpu.memory_space<vmem>>, vector<16x8x128xf32>
    tpu.vector_store %arg21[%c0_167, %c0_168, %c0_169], %637 {strides = array<i32>} : memref<16x8x128xf32, #tpu.memory_space<vmem>>, vector<16x8x128xf32>,
    %c0_170 = arith.constant 0 : index
    %c0_171 = arith.constant 0 : index
    %639 = vector.load %arg9[%c0_170, %c0_171] : memref<128x384xbf16, #tpu.memory_space<vmem>>, vector<128x384xbf16>
    %cst_172 = arith.constant dense<0.000000e+00> : vector<128x384xf32>
    %640 = tpu.matmul %620, %639, %cst_172 {dimension_numbers = #tpu.dot_dimension_numbers<[1], [0], [0], [1], [0, 0, 1, 1], [], []>} : vector<128x128xbf16>, vector<128x384xbf16>, vector<128x384xf32> -> vector<128x384xf32>
    %c0_173 = arith.constant 0 : index
    %c0_174 = arith.constant 0 : index
    %641 = vector.load %arg11[%c0_173, %c0_174] : memref<1x384xf32, #tpu.memory_space<vmem>>, vector<1x384xf32>
    %642 = vector.broadcast %641 : vector<1x384xf32> to vector<128x384xf32>
    %643 = arith.addf %640, %642 : vector<128x384xf32>
    %644 = vector.shape_cast %643 : vector<128x384xf32> to vector<16x8x384xf32>
    %c0_175 = arith.constant 0 : index
    %c0_176 = arith.constant 0 : index
    %c0_177 = arith.constant 0 : index
    %645 = vector.load %arg24[%c0_175, %c0_176, %c0_177] : memref<16x8x384xf32, #tpu.memory_space<vmem>>, vector<16x8x384xf32>
    tpu.vector_store %arg24[%c0_175, %c0_176, %c0_177], %644 {strides = array<i32>} : memref<16x8x384xf32, #tpu.memory_space<vmem>>, vector<16x8x384xf32>,
    %c0_178 = arith.constant 0 : index
    %c0_179 = arith.constant 0 : index
    %646 = vector.load %arg10[%c0_178, %c0_179] : memref<128x384xbf16, #tpu.memory_space<vmem>>, vector<128x384xbf16>
    %c0_180 = arith.constant 0 : index
    %c0_181 = arith.constant 0 : index
    %647 = vector.load %arg12[%c0_180, %c0_181] : memref<1x128xf32, #tpu.memory_space<vmem>>, vector<1x128xf32>
    %648 = vector.shape_cast %647 : vector<1x128xf32> to vector<1x128xf32>
    %649 = vector.broadcast %648 : vector<1x128xf32> to vector<8x128xf32>
    %c0_182 = arith.constant 0 : index
    %c0_183 = arith.constant 0 : index
    %650 = vector.load %arg28[%c0_182, %c0_183] : memref<8x128xf32, #tpu.memory_space<vmem>>, vector<8x128xf32>
    %c0_i32_184 = arith.constant 0 : i32
    %651 = arith.index_cast %c0_i32_184 : i32 to index
    %c0_185 = arith.constant 0 : index
    %c0_186 = arith.constant 0 : index
    %652 = vector.load %arg24[%651, %c0_185, %c0_186] : memref<16x8x384xf32, #tpu.memory_space<vmem>>, vector<1x8x384xf32>
    %653 = vector.shape_cast %652 : vector<1x8x384xf32> to vector<8x384xf32>
    %654 = arith.truncf %650 : vector<8x128xf32> to vector<8x128xbf16>
    %cst_187 = arith.constant dense<0.000000e+00> : vector<8x384xf32>
    %655 = tpu.matmul %654, %646, %cst_187 {dimension_numbers = #tpu.dot_dimension_numbers<[1], [0], [0], [1], [0, 0, 1, 1], [], []>} : vector<8x128xbf16>, vector<128x384xbf16>, vector<8x384xf32> -> vector<8x384xf32>
    %656 = vector.extract_strided_slice %653 {offsets = [0, 0], sizes = [8, 128], strides = [1, 1]} : vector<8x384xf32> to vector<8x128xf32>
    %657 = vector.extract_strided_slice %655 {offsets = [0, 0], sizes = [8, 128], strides = [1, 1]} : vector<8x384xf32> to vector<8x128xf32>
    %658 = arith.addf %656, %657 : vector<8x128xf32>
    %659 = arith.negf %658 : vector<8x128xf32>
    %660 = math.exp %659 : vector<8x128xf32>
    %cst_188 = arith.constant 1.000000e+00 : f32
    %661 = vector.broadcast %cst_188 : f32 to vector<8x128xf32>
    %662 = arith.addf %661, %660 : vector<8x128xf32>
    %663 = arith.divf %661, %662 : vector<8x128xf32>
    %664 = vector.extract_strided_slice %653 {offsets = [0, 128], sizes = [8, 128], strides = [1, 1]} : vector<8x384xf32> to vector<8x128xf32>
    %665 = vector.extract_strided_slice %655 {offsets = [0, 128], sizes = [8, 128], strides = [1, 1]} : vector<8x384xf32> to vector<8x128xf32>
    %666 = arith.addf %664, %665 : vector<8x128xf32>
    %667 = arith.negf %666 : vector<8x128xf32>
    %668 = math.exp %667 : vector<8x128xf32>
    %cst_189 = arith.constant 1.000000e+00 : f32
    %669 = vector.broadcast %cst_189 : f32 to vector<8x128xf32>
    %670 = arith.addf %669, %668 : vector<8x128xf32>
    %671 = arith.divf %669, %670 : vector<8x128xf32>
    %672 = vector.extract_strided_slice %653 {offsets = [0, 256], sizes = [8, 128], strides = [1, 1]} : vector<8x384xf32> to vector<8x128xf32>
    %673 = vector.extract_strided_slice %655 {offsets = [0, 256], sizes = [8, 128], strides = [1, 1]} : vector<8x384xf32> to vector<8x128xf32>
    %674 = arith.addf %673, %649 : vector<8x128xf32>
    %675 = arith.mulf %663, %674 : vector<8x128xf32>
    %676 = arith.addf %672, %675 : vector<8x128xf32>
    %677 = math.tanh %676 : vector<8x128xf32>
    %cst_190 = arith.constant 1.000000e+00 : f32
    %678 = vector.broadcast %cst_190 : f32 to vector<8x128xf32>
    %679 = arith.subf %678, %671 : vector<8x128xf32>
    %680 = arith.mulf %679, %677 : vector<8x128xf32>
    %681 = arith.mulf %671, %650 : vector<8x128xf32>
    %682 = arith.addf %680, %681 : vector<8x128xf32>
    %683 = arith.truncf %682 : vector<8x128xf32> to vector<8x128xbf16>
    %684 = arith.index_cast %c0_i32_184 : i32 to index
    %c0_191 = arith.constant 0 : index
    %c0_192 = arith.constant 0 : index
    %685 = vector.load %arg26[%684, %c0_191, %c0_192] : memref<16x8x128xbf16, #tpu.memory_space<vmem>>, vector<1x8x128xbf16>
    %686 = vector.shape_cast %685 : vector<1x8x128xbf16> to vector<8x128xbf16>
    %687 = vector.shape_cast %683 : vector<8x128xbf16> to vector<1x8x128xbf16>
    tpu.vector_store %arg26[%684, %c0_191, %c0_192], %687 {strides = array<i32>} : memref<16x8x128xbf16, #tpu.memory_space<vmem>>, vector<1x8x128xbf16>,
    %c1_i32_193 = arith.constant 1 : i32
    %688 = arith.index_cast %c1_i32_193 : i32 to index
    %c0_194 = arith.constant 0 : index
    %c0_195 = arith.constant 0 : index
    %689 = vector.load %arg24[%688, %c0_194, %c0_195] : memref<16x8x384xf32, #tpu.memory_space<vmem>>, vector<1x8x384xf32>
    %690 = vector.shape_cast %689 : vector<1x8x384xf32> to vector<8x384xf32>
    %691 = arith.truncf %682 : vector<8x128xf32> to vector<8x128xbf16>
    %cst_196 = arith.constant dense<0.000000e+00> : vector<8x384xf32>
    %692 = tpu.matmul %691, %646, %cst_196 {dimension_numbers = #tpu.dot_dimension_numbers<[1], [0], [0], [1], [0, 0, 1, 1], [], []>} : vector<8x128xbf16>, vector<128x384xbf16>, vector<8x384xf32> -> vector<8x384xf32>
    %693 = vector.extract_strided_slice %690 {offsets = [0, 0], sizes = [8, 128], strides = [1, 1]} : vector<8x384xf32> to vector<8x128xf32>
    %694 = vector.extract_strided_slice %692 {offsets = [0, 0], sizes = [8, 128], strides = [1, 1]} : vector<8x384xf32> to vector<8x128xf32>
    %695 = arith.addf %693, %694 : vector<8x128xf32>
    %696 = arith.negf %695 : vector<8x128xf32>
    %697 = math.exp %696 : vector<8x128xf32>
    %cst_197 = arith.constant 1.000000e+00 : f32
    %698 = vector.broadcast %cst_197 : f32 to vector<8x128xf32>
    %699 = arith.addf %698, %697 : vector<8x128xf32>
    %700 = arith.divf %698, %699 : vector<8x128xf32>
    %701 = vector.extract_strided_slice %690 {offsets = [0, 128], sizes = [8, 128], strides = [1, 1]} : vector<8x384xf32> to vector<8x128xf32>
    %702 = vector.extract_strided_slice %692 {offsets = [0, 128], sizes = [8, 128], strides = [1, 1]} : vector<8x384xf32> to vector<8x128xf32>
    %703 = arith.addf %701, %702 : vector<8x128xf32>
    %704 = arith.negf %703 : vector<8x128xf32>
    %705 = math.exp %704 : vector<8x128xf32>
    %cst_198 = arith.constant 1.000000e+00 : f32
    %706 = vector.broadcast %cst_198 : f32 to vector<8x128xf32>
    %707 = arith.addf %706, %705 : vector<8x128xf32>
    %708 = arith.divf %706, %707 : vector<8x128xf32>
    %709 = vector.extract_strided_slice %690 {offsets = [0, 256], sizes = [8, 128], strides = [1, 1]} : vector<8x384xf32> to vector<8x128xf32>
    %710 = vector.extract_strided_slice %692 {offsets = [0, 256], sizes = [8, 128], strides = [1, 1]} : vector<8x384xf32> to vector<8x128xf32>
    %711 = arith.addf %710, %649 : vector<8x128xf32>
    %712 = arith.mulf %700, %711 : vector<8x128xf32>
    %713 = arith.addf %709, %712 : vector<8x128xf32>
    %714 = math.tanh %713 : vector<8x128xf32>
    %cst_199 = arith.constant 1.000000e+00 : f32
    %715 = vector.broadcast %cst_199 : f32 to vector<8x128xf32>
    %716 = arith.subf %715, %708 : vector<8x128xf32>
    %717 = arith.mulf %716, %714 : vector<8x128xf32>
    %718 = arith.mulf %708, %682 : vector<8x128xf32>
    %719 = arith.addf %717, %718 : vector<8x128xf32>
    %720 = arith.truncf %719 : vector<8x128xf32> to vector<8x128xbf16>
    %721 = arith.index_cast %c1_i32_193 : i32 to index
    %c0_200 = arith.constant 0 : index
    %c0_201 = arith.constant 0 : index
    %722 = vector.load %arg26[%721, %c0_200, %c0_201] : memref<16x8x128xbf16, #tpu.memory_space<vmem>>, vector<1x8x128xbf16>
    %723 = vector.shape_cast %722 : vector<1x8x128xbf16> to vector<8x128xbf16>
    %724 = vector.shape_cast %720 : vector<8x128xbf16> to vector<1x8x128xbf16>
    tpu.vector_store %arg26[%721, %c0_200, %c0_201], %724 {strides = array<i32>} : memref<16x8x128xbf16, #tpu.memory_space<vmem>>, vector<1x8x128xbf16>,
    %c2_i32_202 = arith.constant 2 : i32
    %725 = arith.index_cast %c2_i32_202 : i32 to index
    %c0_203 = arith.constant 0 : index
    %c0_204 = arith.constant 0 : index
    %726 = vector.load %arg24[%725, %c0_203, %c0_204] : memref<16x8x384xf32, #tpu.memory_space<vmem>>, vector<1x8x384xf32>
    %727 = vector.shape_cast %726 : vector<1x8x384xf32> to vector<8x384xf32>
    %728 = arith.truncf %719 : vector<8x128xf32> to vector<8x128xbf16>
    %cst_205 = arith.constant dense<0.000000e+00> : vector<8x384xf32>
    %729 = tpu.matmul %728, %646, %cst_205 {dimension_numbers = #tpu.dot_dimension_numbers<[1], [0], [0], [1], [0, 0, 1, 1], [], []>} : vector<8x128xbf16>, vector<128x384xbf16>, vector<8x384xf32> -> vector<8x384xf32>
    %730 = vector.extract_strided_slice %727 {offsets = [0, 0], sizes = [8, 128], strides = [1, 1]} : vector<8x384xf32> to vector<8x128xf32>
    %731 = vector.extract_strided_slice %729 {offsets = [0, 0], sizes = [8, 128], strides = [1, 1]} : vector<8x384xf32> to vector<8x128xf32>
    %732 = arith.addf %730, %731 : vector<8x128xf32>
    %733 = arith.negf %732 : vector<8x128xf32>
    %734 = math.exp %733 : vector<8x128xf32>
    %cst_206 = arith.constant 1.000000e+00 : f32
    %735 = vector.broadcast %cst_206 : f32 to vector<8x128xf32>
    %736 = arith.addf %735, %734 : vector<8x128xf32>
    %737 = arith.divf %735, %736 : vector<8x128xf32>
    %738 = vector.extract_strided_slice %727 {offsets = [0, 128], sizes = [8, 128], strides = [1, 1]} : vector<8x384xf32> to vector<8x128xf32>
    %739 = vector.extract_strided_slice %729 {offsets = [0, 128], sizes = [8, 128], strides = [1, 1]} : vector<8x384xf32> to vector<8x128xf32>
    %740 = arith.addf %738, %739 : vector<8x128xf32>
    %741 = arith.negf %740 : vector<8x128xf32>
    %742 = math.exp %741 : vector<8x128xf32>
    %cst_207 = arith.constant 1.000000e+00 : f32
    %743 = vector.broadcast %cst_207 : f32 to vector<8x128xf32>
    %744 = arith.addf %743, %742 : vector<8x128xf32>
    %745 = arith.divf %743, %744 : vector<8x128xf32>
    %746 = vector.extract_strided_slice %727 {offsets = [0, 256], sizes = [8, 128], strides = [1, 1]} : vector<8x384xf32> to vector<8x128xf32>
    %747 = vector.extract_strided_slice %729 {offsets = [0, 256], sizes = [8, 128], strides = [1, 1]} : vector<8x384xf32> to vector<8x128xf32>
    %748 = arith.addf %747, %649 : vector<8x128xf32>
    %749 = arith.mulf %737, %748 : vector<8x128xf32>
    %750 = arith.addf %746, %749 : vector<8x128xf32>
    %751 = math.tanh %750 : vector<8x128xf32>
    %cst_208 = arith.constant 1.000000e+00 : f32
    %752 = vector.broadcast %cst_208 : f32 to vector<8x128xf32>
    %753 = arith.subf %752, %745 : vector<8x128xf32>
    %754 = arith.mulf %753, %751 : vector<8x128xf32>
    %755 = arith.mulf %745, %719 : vector<8x128xf32>
    %756 = arith.addf %754, %755 : vector<8x128xf32>
    %757 = arith.truncf %756 : vector<8x128xf32> to vector<8x128xbf16>
    %758 = arith.index_cast %c2_i32_202 : i32 to index
    %c0_209 = arith.constant 0 : index
    %c0_210 = arith.constant 0 : index
    %759 = vector.load %arg26[%758, %c0_209, %c0_210] : memref<16x8x128xbf16, #tpu.memory_space<vmem>>, vector<1x8x128xbf16>
    %760 = vector.shape_cast %759 : vector<1x8x128xbf16> to vector<8x128xbf16>
    %761 = vector.shape_cast %757 : vector<8x128xbf16> to vector<1x8x128xbf16>
    tpu.vector_store %arg26[%758, %c0_209, %c0_210], %761 {strides = array<i32>} : memref<16x8x128xbf16, #tpu.memory_space<vmem>>, vector<1x8x128xbf16>,
    %c3_i32_211 = arith.constant 3 : i32
    %762 = arith.index_cast %c3_i32_211 : i32 to index
    %c0_212 = arith.constant 0 : index
    %c0_213 = arith.constant 0 : index
    %763 = vector.load %arg24[%762, %c0_212, %c0_213] : memref<16x8x384xf32, #tpu.memory_space<vmem>>, vector<1x8x384xf32>
    %764 = vector.shape_cast %763 : vector<1x8x384xf32> to vector<8x384xf32>
    %765 = arith.truncf %756 : vector<8x128xf32> to vector<8x128xbf16>
    %cst_214 = arith.constant dense<0.000000e+00> : vector<8x384xf32>
    %766 = tpu.matmul %765, %646, %cst_214 {dimension_numbers = #tpu.dot_dimension_numbers<[1], [0], [0], [1], [0, 0, 1, 1], [], []>} : vector<8x128xbf16>, vector<128x384xbf16>, vector<8x384xf32> -> vector<8x384xf32>
    %767 = vector.extract_strided_slice %764 {offsets = [0, 0], sizes = [8, 128], strides = [1, 1]} : vector<8x384xf32> to vector<8x128xf32>
    %768 = vector.extract_strided_slice %766 {offsets = [0, 0], sizes = [8, 128], strides = [1, 1]} : vector<8x384xf32> to vector<8x128xf32>
    %769 = arith.addf %767, %768 : vector<8x128xf32>
    %770 = arith.negf %769 : vector<8x128xf32>
    %771 = math.exp %770 : vector<8x128xf32>
    %cst_215 = arith.constant 1.000000e+00 : f32
    %772 = vector.broadcast %cst_215 : f32 to vector<8x128xf32>
    %773 = arith.addf %772, %771 : vector<8x128xf32>
    %774 = arith.divf %772, %773 : vector<8x128xf32>
    %775 = vector.extract_strided_slice %764 {offsets = [0, 128], sizes = [8, 128], strides = [1, 1]} : vector<8x384xf32> to vector<8x128xf32>
    %776 = vector.extract_strided_slice %766 {offsets = [0, 128], sizes = [8, 128], strides = [1, 1]} : vector<8x384xf32> to vector<8x128xf32>
    %777 = arith.addf %775, %776 : vector<8x128xf32>
    %778 = arith.negf %777 : vector<8x128xf32>
    %779 = math.exp %778 : vector<8x128xf32>
    %cst_216 = arith.constant 1.000000e+00 : f32
    %780 = vector.broadcast %cst_216 : f32 to vector<8x128xf32>
    %781 = arith.addf %780, %779 : vector<8x128xf32>
    %782 = arith.divf %780, %781 : vector<8x128xf32>
    %783 = vector.extract_strided_slice %764 {offsets = [0, 256], sizes = [8, 128], strides = [1, 1]} : vector<8x384xf32> to vector<8x128xf32>
    %784 = vector.extract_strided_slice %766 {offsets = [0, 256], sizes = [8, 128], strides = [1, 1]} : vector<8x384xf32> to vector<8x128xf32>
    %785 = arith.addf %784, %649 : vector<8x128xf32>
    %786 = arith.mulf %774, %785 : vector<8x128xf32>
    %787 = arith.addf %783, %786 : vector<8x128xf32>
    %788 = math.tanh %787 : vector<8x128xf32>
    %cst_217 = arith.constant 1.000000e+00 : f32
    %789 = vector.broadcast %cst_217 : f32 to vector<8x128xf32>
    %790 = arith.subf %789, %782 : vector<8x128xf32>
    %791 = arith.mulf %790, %788 : vector<8x128xf32>
    %792 = arith.mulf %782, %756 : vector<8x128xf32>
    %793 = arith.addf %791, %792 : vector<8x128xf32>
    %794 = arith.truncf %793 : vector<8x128xf32> to vector<8x128xbf16>
    %795 = arith.index_cast %c3_i32_211 : i32 to index
    %c0_218 = arith.constant 0 : index
    %c0_219 = arith.constant 0 : index
    %796 = vector.load %arg26[%795, %c0_218, %c0_219] : memref<16x8x128xbf16, #tpu.memory_space<vmem>>, vector<1x8x128xbf16>
    %797 = vector.shape_cast %796 : vector<1x8x128xbf16> to vector<8x128xbf16>
    %798 = vector.shape_cast %794 : vector<8x128xbf16> to vector<1x8x128xbf16>
    tpu.vector_store %arg26[%795, %c0_218, %c0_219], %798 {strides = array<i32>} : memref<16x8x128xbf16, #tpu.memory_space<vmem>>, vector<1x8x128xbf16>,
    %c4_i32_220 = arith.constant 4 : i32
    %799 = arith.index_cast %c4_i32_220 : i32 to index
    %c0_221 = arith.constant 0 : index
    %c0_222 = arith.constant 0 : index
    %800 = vector.load %arg24[%799, %c0_221, %c0_222] : memref<16x8x384xf32, #tpu.memory_space<vmem>>, vector<1x8x384xf32>
    %801 = vector.shape_cast %800 : vector<1x8x384xf32> to vector<8x384xf32>
    %802 = arith.truncf %793 : vector<8x128xf32> to vector<8x128xbf16>
    %cst_223 = arith.constant dense<0.000000e+00> : vector<8x384xf32>
    %803 = tpu.matmul %802, %646, %cst_223 {dimension_numbers = #tpu.dot_dimension_numbers<[1], [0], [0], [1], [0, 0, 1, 1], [], []>} : vector<8x128xbf16>, vector<128x384xbf16>, vector<8x384xf32> -> vector<8x384xf32>
    %804 = vector.extract_strided_slice %801 {offsets = [0, 0], sizes = [8, 128], strides = [1, 1]} : vector<8x384xf32> to vector<8x128xf32>
    %805 = vector.extract_strided_slice %803 {offsets = [0, 0], sizes = [8, 128], strides = [1, 1]} : vector<8x384xf32> to vector<8x128xf32>
    %806 = arith.addf %804, %805 : vector<8x128xf32>
    %807 = arith.negf %806 : vector<8x128xf32>
    %808 = math.exp %807 : vector<8x128xf32>
    %cst_224 = arith.constant 1.000000e+00 : f32
    %809 = vector.broadcast %cst_224 : f32 to vector<8x128xf32>
    %810 = arith.addf %809, %808 : vector<8x128xf32>
    %811 = arith.divf %809, %810 : vector<8x128xf32>
    %812 = vector.extract_strided_slice %801 {offsets = [0, 128], sizes = [8, 128], strides = [1, 1]} : vector<8x384xf32> to vector<8x128xf32>
    %813 = vector.extract_strided_slice %803 {offsets = [0, 128], sizes = [8, 128], strides = [1, 1]} : vector<8x384xf32> to vector<8x128xf32>
    %814 = arith.addf %812, %813 : vector<8x128xf32>
    %815 = arith.negf %814 : vector<8x128xf32>
    %816 = math.exp %815 : vector<8x128xf32>
    %cst_225 = arith.constant 1.000000e+00 : f32
    %817 = vector.broadcast %cst_225 : f32 to vector<8x128xf32>
    %818 = arith.addf %817, %816 : vector<8x128xf32>
    %819 = arith.divf %817, %818 : vector<8x128xf32>
    %820 = vector.extract_strided_slice %801 {offsets = [0, 256], sizes = [8, 128], strides = [1, 1]} : vector<8x384xf32> to vector<8x128xf32>
    %821 = vector.extract_strided_slice %803 {offsets = [0, 256], sizes = [8, 128], strides = [1, 1]} : vector<8x384xf32> to vector<8x128xf32>
    %822 = arith.addf %821, %649 : vector<8x128xf32>
    %823 = arith.mulf %811, %822 : vector<8x128xf32>
    %824 = arith.addf %820, %823 : vector<8x128xf32>
    %825 = math.tanh %824 : vector<8x128xf32>
    %cst_226 = arith.constant 1.000000e+00 : f32
    %826 = vector.broadcast %cst_226 : f32 to vector<8x128xf32>
    %827 = arith.subf %826, %819 : vector<8x128xf32>
    %828 = arith.mulf %827, %825 : vector<8x128xf32>
    %829 = arith.mulf %819, %793 : vector<8x128xf32>
    %830 = arith.addf %828, %829 : vector<8x128xf32>
    %831 = arith.truncf %830 : vector<8x128xf32> to vector<8x128xbf16>
    %832 = arith.index_cast %c4_i32_220 : i32 to index
    %c0_227 = arith.constant 0 : index
    %c0_228 = arith.constant 0 : index
    %833 = vector.load %arg26[%832, %c0_227, %c0_228] : memref<16x8x128xbf16, #tpu.memory_space<vmem>>, vector<1x8x128xbf16>
    %834 = vector.shape_cast %833 : vector<1x8x128xbf16> to vector<8x128xbf16>
    %835 = vector.shape_cast %831 : vector<8x128xbf16> to vector<1x8x128xbf16>
    tpu.vector_store %arg26[%832, %c0_227, %c0_228], %835 {strides = array<i32>} : memref<16x8x128xbf16, #tpu.memory_space<vmem>>, vector<1x8x128xbf16>,
    %c5_i32_229 = arith.constant 5 : i32
    %836 = arith.index_cast %c5_i32_229 : i32 to index
    %c0_230 = arith.constant 0 : index
    %c0_231 = arith.constant 0 : index
    %837 = vector.load %arg24[%836, %c0_230, %c0_231] : memref<16x8x384xf32, #tpu.memory_space<vmem>>, vector<1x8x384xf32>
    %838 = vector.shape_cast %837 : vector<1x8x384xf32> to vector<8x384xf32>
    %839 = arith.truncf %830 : vector<8x128xf32> to vector<8x128xbf16>
    %cst_232 = arith.constant dense<0.000000e+00> : vector<8x384xf32>
    %840 = tpu.matmul %839, %646, %cst_232 {dimension_numbers = #tpu.dot_dimension_numbers<[1], [0], [0], [1], [0, 0, 1, 1], [], []>} : vector<8x128xbf16>, vector<128x384xbf16>, vector<8x384xf32> -> vector<8x384xf32>
    %841 = vector.extract_strided_slice %838 {offsets = [0, 0], sizes = [8, 128], strides = [1, 1]} : vector<8x384xf32> to vector<8x128xf32>
    %842 = vector.extract_strided_slice %840 {offsets = [0, 0], sizes = [8, 128], strides = [1, 1]} : vector<8x384xf32> to vector<8x128xf32>
    %843 = arith.addf %841, %842 : vector<8x128xf32>
    %844 = arith.negf %843 : vector<8x128xf32>
    %845 = math.exp %844 : vector<8x128xf32>
    %cst_233 = arith.constant 1.000000e+00 : f32
    %846 = vector.broadcast %cst_233 : f32 to vector<8x128xf32>
    %847 = arith.addf %846, %845 : vector<8x128xf32>
    %848 = arith.divf %846, %847 : vector<8x128xf32>
    %849 = vector.extract_strided_slice %838 {offsets = [0, 128], sizes = [8, 128], strides = [1, 1]} : vector<8x384xf32> to vector<8x128xf32>
    %850 = vector.extract_strided_slice %840 {offsets = [0, 128], sizes = [8, 128], strides = [1, 1]} : vector<8x384xf32> to vector<8x128xf32>
    %851 = arith.addf %849, %850 : vector<8x128xf32>
    %852 = arith.negf %851 : vector<8x128xf32>
    %853 = math.exp %852 : vector<8x128xf32>
    %cst_234 = arith.constant 1.000000e+00 : f32
    %854 = vector.broadcast %cst_234 : f32 to vector<8x128xf32>
    %855 = arith.addf %854, %853 : vector<8x128xf32>
    %856 = arith.divf %854, %855 : vector<8x128xf32>
    %857 = vector.extract_strided_slice %838 {offsets = [0, 256], sizes = [8, 128], strides = [1, 1]} : vector<8x384xf32> to vector<8x128xf32>
    %858 = vector.extract_strided_slice %840 {offsets = [0, 256], sizes = [8, 128], strides = [1, 1]} : vector<8x384xf32> to vector<8x128xf32>
    %859 = arith.addf %858, %649 : vector<8x128xf32>
    %860 = arith.mulf %848, %859 : vector<8x128xf32>
    %861 = arith.addf %857, %860 : vector<8x128xf32>
    %862 = math.tanh %861 : vector<8x128xf32>
    %cst_235 = arith.constant 1.000000e+00 : f32
    %863 = vector.broadcast %cst_235 : f32 to vector<8x128xf32>
    %864 = arith.subf %863, %856 : vector<8x128xf32>
    %865 = arith.mulf %864, %862 : vector<8x128xf32>
    %866 = arith.mulf %856, %830 : vector<8x128xf32>
    %867 = arith.addf %865, %866 : vector<8x128xf32>
    %868 = arith.truncf %867 : vector<8x128xf32> to vector<8x128xbf16>
    %869 = arith.index_cast %c5_i32_229 : i32 to index
    %c0_236 = arith.constant 0 : index
    %c0_237 = arith.constant 0 : index
    %870 = vector.load %arg26[%869, %c0_236, %c0_237] : memref<16x8x128xbf16, #tpu.memory_space<vmem>>, vector<1x8x128xbf16>
    %871 = vector.shape_cast %870 : vector<1x8x128xbf16> to vector<8x128xbf16>
    %872 = vector.shape_cast %868 : vector<8x128xbf16> to vector<1x8x128xbf16>
    tpu.vector_store %arg26[%869, %c0_236, %c0_237], %872 {strides = array<i32>} : memref<16x8x128xbf16, #tpu.memory_space<vmem>>, vector<1x8x128xbf16>,
    %c6_i32_238 = arith.constant 6 : i32
    %873 = arith.index_cast %c6_i32_238 : i32 to index
    %c0_239 = arith.constant 0 : index
    %c0_240 = arith.constant 0 : index
    %874 = vector.load %arg24[%873, %c0_239, %c0_240] : memref<16x8x384xf32, #tpu.memory_space<vmem>>, vector<1x8x384xf32>
    %875 = vector.shape_cast %874 : vector<1x8x384xf32> to vector<8x384xf32>
    %876 = arith.truncf %867 : vector<8x128xf32> to vector<8x128xbf16>
    %cst_241 = arith.constant dense<0.000000e+00> : vector<8x384xf32>
    %877 = tpu.matmul %876, %646, %cst_241 {dimension_numbers = #tpu.dot_dimension_numbers<[1], [0], [0], [1], [0, 0, 1, 1], [], []>} : vector<8x128xbf16>, vector<128x384xbf16>, vector<8x384xf32> -> vector<8x384xf32>
    %878 = vector.extract_strided_slice %875 {offsets = [0, 0], sizes = [8, 128], strides = [1, 1]} : vector<8x384xf32> to vector<8x128xf32>
    %879 = vector.extract_strided_slice %877 {offsets = [0, 0], sizes = [8, 128], strides = [1, 1]} : vector<8x384xf32> to vector<8x128xf32>
    %880 = arith.addf %878, %879 : vector<8x128xf32>
    %881 = arith.negf %880 : vector<8x128xf32>
    %882 = math.exp %881 : vector<8x128xf32>
    %cst_242 = arith.constant 1.000000e+00 : f32
    %883 = vector.broadcast %cst_242 : f32 to vector<8x128xf32>
    %884 = arith.addf %883, %882 : vector<8x128xf32>
    %885 = arith.divf %883, %884 : vector<8x128xf32>
    %886 = vector.extract_strided_slice %875 {offsets = [0, 128], sizes = [8, 128], strides = [1, 1]} : vector<8x384xf32> to vector<8x128xf32>
    %887 = vector.extract_strided_slice %877 {offsets = [0, 128], sizes = [8, 128], strides = [1, 1]} : vector<8x384xf32> to vector<8x128xf32>
    %888 = arith.addf %886, %887 : vector<8x128xf32>
    %889 = arith.negf %888 : vector<8x128xf32>
    %890 = math.exp %889 : vector<8x128xf32>
    %cst_243 = arith.constant 1.000000e+00 : f32
    %891 = vector.broadcast %cst_243 : f32 to vector<8x128xf32>
    %892 = arith.addf %891, %890 : vector<8x128xf32>
    %893 = arith.divf %891, %892 : vector<8x128xf32>
    %894 = vector.extract_strided_slice %875 {offsets = [0, 256], sizes = [8, 128], strides = [1, 1]} : vector<8x384xf32> to vector<8x128xf32>
    %895 = vector.extract_strided_slice %877 {offsets = [0, 256], sizes = [8, 128], strides = [1, 1]} : vector<8x384xf32> to vector<8x128xf32>
    %896 = arith.addf %895, %649 : vector<8x128xf32>
    %897 = arith.mulf %885, %896 : vector<8x128xf32>
    %898 = arith.addf %894, %897 : vector<8x128xf32>
    %899 = math.tanh %898 : vector<8x128xf32>
    %cst_244 = arith.constant 1.000000e+00 : f32
    %900 = vector.broadcast %cst_244 : f32 to vector<8x128xf32>
    %901 = arith.subf %900, %893 : vector<8x128xf32>
    %902 = arith.mulf %901, %899 : vector<8x128xf32>
    %903 = arith.mulf %893, %867 : vector<8x128xf32>
    %904 = arith.addf %902, %903 : vector<8x128xf32>
    %905 = arith.truncf %904 : vector<8x128xf32> to vector<8x128xbf16>
    %906 = arith.index_cast %c6_i32_238 : i32 to index
    %c0_245 = arith.constant 0 : index
    %c0_246 = arith.constant 0 : index
    %907 = vector.load %arg26[%906, %c0_245, %c0_246] : memref<16x8x128xbf16, #tpu.memory_space<vmem>>, vector<1x8x128xbf16>
    %908 = vector.shape_cast %907 : vector<1x8x128xbf16> to vector<8x128xbf16>
    %909 = vector.shape_cast %905 : vector<8x128xbf16> to vector<1x8x128xbf16>
    tpu.vector_store %arg26[%906, %c0_245, %c0_246], %909 {strides = array<i32>} : memref<16x8x128xbf16, #tpu.memory_space<vmem>>, vector<1x8x128xbf16>,
    %c7_i32_247 = arith.constant 7 : i32
    %910 = arith.index_cast %c7_i32_247 : i32 to index
    %c0_248 = arith.constant 0 : index
    %c0_249 = arith.constant 0 : index
    %911 = vector.load %arg24[%910, %c0_248, %c0_249] : memref<16x8x384xf32, #tpu.memory_space<vmem>>, vector<1x8x384xf32>
    %912 = vector.shape_cast %911 : vector<1x8x384xf32> to vector<8x384xf32>
    %913 = arith.truncf %904 : vector<8x128xf32> to vector<8x128xbf16>
    %cst_250 = arith.constant dense<0.000000e+00> : vector<8x384xf32>
    %914 = tpu.matmul %913, %646, %cst_250 {dimension_numbers = #tpu.dot_dimension_numbers<[1], [0], [0], [1], [0, 0, 1, 1], [], []>} : vector<8x128xbf16>, vector<128x384xbf16>, vector<8x384xf32> -> vector<8x384xf32>
    %915 = vector.extract_strided_slice %912 {offsets = [0, 0], sizes = [8, 128], strides = [1, 1]} : vector<8x384xf32> to vector<8x128xf32>
    %916 = vector.extract_strided_slice %914 {offsets = [0, 0], sizes = [8, 128], strides = [1, 1]} : vector<8x384xf32> to vector<8x128xf32>
    %917 = arith.addf %915, %916 : vector<8x128xf32>
    %918 = arith.negf %917 : vector<8x128xf32>
    %919 = math.exp %918 : vector<8x128xf32>
    %cst_251 = arith.constant 1.000000e+00 : f32
    %920 = vector.broadcast %cst_251 : f32 to vector<8x128xf32>
    %921 = arith.addf %920, %919 : vector<8x128xf32>
    %922 = arith.divf %920, %921 : vector<8x128xf32>
    %923 = vector.extract_strided_slice %912 {offsets = [0, 128], sizes = [8, 128], strides = [1, 1]} : vector<8x384xf32> to vector<8x128xf32>
    %924 = vector.extract_strided_slice %914 {offsets = [0, 128], sizes = [8, 128], strides = [1, 1]} : vector<8x384xf32> to vector<8x128xf32>
    %925 = arith.addf %923, %924 : vector<8x128xf32>
    %926 = arith.negf %925 : vector<8x128xf32>
    %927 = math.exp %926 : vector<8x128xf32>
    %cst_252 = arith.constant 1.000000e+00 : f32
    %928 = vector.broadcast %cst_252 : f32 to vector<8x128xf32>
    %929 = arith.addf %928, %927 : vector<8x128xf32>
    %930 = arith.divf %928, %929 : vector<8x128xf32>
    %931 = vector.extract_strided_slice %912 {offsets = [0, 256], sizes = [8, 128], strides = [1, 1]} : vector<8x384xf32> to vector<8x128xf32>
    %932 = vector.extract_strided_slice %914 {offsets = [0, 256], sizes = [8, 128], strides = [1, 1]} : vector<8x384xf32> to vector<8x128xf32>
    %933 = arith.addf %932, %649 : vector<8x128xf32>
    %934 = arith.mulf %922, %933 : vector<8x128xf32>
    %935 = arith.addf %931, %934 : vector<8x128xf32>
    %936 = math.tanh %935 : vector<8x128xf32>
    %cst_253 = arith.constant 1.000000e+00 : f32
    %937 = vector.broadcast %cst_253 : f32 to vector<8x128xf32>
    %938 = arith.subf %937, %930 : vector<8x128xf32>
    %939 = arith.mulf %938, %936 : vector<8x128xf32>
    %940 = arith.mulf %930, %904 : vector<8x128xf32>
    %941 = arith.addf %939, %940 : vector<8x128xf32>
    %942 = arith.truncf %941 : vector<8x128xf32> to vector<8x128xbf16>
    %943 = arith.index_cast %c7_i32_247 : i32 to index
    %c0_254 = arith.constant 0 : index
    %c0_255 = arith.constant 0 : index
    %944 = vector.load %arg26[%943, %c0_254, %c0_255] : memref<16x8x128xbf16, #tpu.memory_space<vmem>>, vector<1x8x128xbf16>
    %945 = vector.shape_cast %944 : vector<1x8x128xbf16> to vector<8x128xbf16>
    %946 = vector.shape_cast %942 : vector<8x128xbf16> to vector<1x8x128xbf16>
    tpu.vector_store %arg26[%943, %c0_254, %c0_255], %946 {strides = array<i32>} : memref<16x8x128xbf16, #tpu.memory_space<vmem>>, vector<1x8x128xbf16>,
    %c8_i32_256 = arith.constant 8 : i32
    %947 = arith.index_cast %c8_i32_256 : i32 to index
    %c0_257 = arith.constant 0 : index
    %c0_258 = arith.constant 0 : index
    %948 = vector.load %arg24[%947, %c0_257, %c0_258] : memref<16x8x384xf32, #tpu.memory_space<vmem>>, vector<1x8x384xf32>
    %949 = vector.shape_cast %948 : vector<1x8x384xf32> to vector<8x384xf32>
    %950 = arith.truncf %941 : vector<8x128xf32> to vector<8x128xbf16>
    %cst_259 = arith.constant dense<0.000000e+00> : vector<8x384xf32>
    %951 = tpu.matmul %950, %646, %cst_259 {dimension_numbers = #tpu.dot_dimension_numbers<[1], [0], [0], [1], [0, 0, 1, 1], [], []>} : vector<8x128xbf16>, vector<128x384xbf16>, vector<8x384xf32> -> vector<8x384xf32>
    %952 = vector.extract_strided_slice %949 {offsets = [0, 0], sizes = [8, 128], strides = [1, 1]} : vector<8x384xf32> to vector<8x128xf32>
    %953 = vector.extract_strided_slice %951 {offsets = [0, 0], sizes = [8, 128], strides = [1, 1]} : vector<8x384xf32> to vector<8x128xf32>
    %954 = arith.addf %952, %953 : vector<8x128xf32>
    %955 = arith.negf %954 : vector<8x128xf32>
    %956 = math.exp %955 : vector<8x128xf32>
    %cst_260 = arith.constant 1.000000e+00 : f32
    %957 = vector.broadcast %cst_260 : f32 to vector<8x128xf32>
    %958 = arith.addf %957, %956 : vector<8x128xf32>
    %959 = arith.divf %957, %958 : vector<8x128xf32>
    %960 = vector.extract_strided_slice %949 {offsets = [0, 128], sizes = [8, 128], strides = [1, 1]} : vector<8x384xf32> to vector<8x128xf32>
    %961 = vector.extract_strided_slice %951 {offsets = [0, 128], sizes = [8, 128], strides = [1, 1]} : vector<8x384xf32> to vector<8x128xf32>
    %962 = arith.addf %960, %961 : vector<8x128xf32>
    %963 = arith.negf %962 : vector<8x128xf32>
    %964 = math.exp %963 : vector<8x128xf32>
    %cst_261 = arith.constant 1.000000e+00 : f32
    %965 = vector.broadcast %cst_261 : f32 to vector<8x128xf32>
    %966 = arith.addf %965, %964 : vector<8x128xf32>
    %967 = arith.divf %965, %966 : vector<8x128xf32>
    %968 = vector.extract_strided_slice %949 {offsets = [0, 256], sizes = [8, 128], strides = [1, 1]} : vector<8x384xf32> to vector<8x128xf32>
    %969 = vector.extract_strided_slice %951 {offsets = [0, 256], sizes = [8, 128], strides = [1, 1]} : vector<8x384xf32> to vector<8x128xf32>
    %970 = arith.addf %969, %649 : vector<8x128xf32>
    %971 = arith.mulf %959, %970 : vector<8x128xf32>
    %972 = arith.addf %968, %971 : vector<8x128xf32>
    %973 = math.tanh %972 : vector<8x128xf32>
    %cst_262 = arith.constant 1.000000e+00 : f32
    %974 = vector.broadcast %cst_262 : f32 to vector<8x128xf32>
    %975 = arith.subf %974, %967 : vector<8x128xf32>
    %976 = arith.mulf %975, %973 : vector<8x128xf32>
    %977 = arith.mulf %967, %941 : vector<8x128xf32>
    %978 = arith.addf %976, %977 : vector<8x128xf32>
    %979 = arith.truncf %978 : vector<8x128xf32> to vector<8x128xbf16>
    %980 = arith.index_cast %c8_i32_256 : i32 to index
    %c0_263 = arith.constant 0 : index
    %c0_264 = arith.constant 0 : index
    %981 = vector.load %arg26[%980, %c0_263, %c0_264] : memref<16x8x128xbf16, #tpu.memory_space<vmem>>, vector<1x8x128xbf16>
    %982 = vector.shape_cast %981 : vector<1x8x128xbf16> to vector<8x128xbf16>
    %983 = vector.shape_cast %979 : vector<8x128xbf16> to vector<1x8x128xbf16>
    tpu.vector_store %arg26[%980, %c0_263, %c0_264], %983 {strides = array<i32>} : memref<16x8x128xbf16, #tpu.memory_space<vmem>>, vector<1x8x128xbf16>,
    %c9_i32_265 = arith.constant 9 : i32
    %984 = arith.index_cast %c9_i32_265 : i32 to index
    %c0_266 = arith.constant 0 : index
    %c0_267 = arith.constant 0 : index
    %985 = vector.load %arg24[%984, %c0_266, %c0_267] : memref<16x8x384xf32, #tpu.memory_space<vmem>>, vector<1x8x384xf32>
    %986 = vector.shape_cast %985 : vector<1x8x384xf32> to vector<8x384xf32>
    %987 = arith.truncf %978 : vector<8x128xf32> to vector<8x128xbf16>
    %cst_268 = arith.constant dense<0.000000e+00> : vector<8x384xf32>
    %988 = tpu.matmul %987, %646, %cst_268 {dimension_numbers = #tpu.dot_dimension_numbers<[1], [0], [0], [1], [0, 0, 1, 1], [], []>} : vector<8x128xbf16>, vector<128x384xbf16>, vector<8x384xf32> -> vector<8x384xf32>
    %989 = vector.extract_strided_slice %986 {offsets = [0, 0], sizes = [8, 128], strides = [1, 1]} : vector<8x384xf32> to vector<8x128xf32>
    %990 = vector.extract_strided_slice %988 {offsets = [0, 0], sizes = [8, 128], strides = [1, 1]} : vector<8x384xf32> to vector<8x128xf32>
    %991 = arith.addf %989, %990 : vector<8x128xf32>
    %992 = arith.negf %991 : vector<8x128xf32>
    %993 = math.exp %992 : vector<8x128xf32>
    %cst_269 = arith.constant 1.000000e+00 : f32
    %994 = vector.broadcast %cst_269 : f32 to vector<8x128xf32>
    %995 = arith.addf %994, %993 : vector<8x128xf32>
    %996 = arith.divf %994, %995 : vector<8x128xf32>
    %997 = vector.extract_strided_slice %986 {offsets = [0, 128], sizes = [8, 128], strides = [1, 1]} : vector<8x384xf32> to vector<8x128xf32>
    %998 = vector.extract_strided_slice %988 {offsets = [0, 128], sizes = [8, 128], strides = [1, 1]} : vector<8x384xf32> to vector<8x128xf32>
    %999 = arith.addf %997, %998 : vector<8x128xf32>
    %1000 = arith.negf %999 : vector<8x128xf32>
    %1001 = math.exp %1000 : vector<8x128xf32>
    %cst_270 = arith.constant 1.000000e+00 : f32
    %1002 = vector.broadcast %cst_270 : f32 to vector<8x128xf32>
    %1003 = arith.addf %1002, %1001 : vector<8x128xf32>
    %1004 = arith.divf %1002, %1003 : vector<8x128xf32>
    %1005 = vector.extract_strided_slice %986 {offsets = [0, 256], sizes = [8, 128], strides = [1, 1]} : vector<8x384xf32> to vector<8x128xf32>
    %1006 = vector.extract_strided_slice %988 {offsets = [0, 256], sizes = [8, 128], strides = [1, 1]} : vector<8x384xf32> to vector<8x128xf32>
    %1007 = arith.addf %1006, %649 : vector<8x128xf32>
    %1008 = arith.mulf %996, %1007 : vector<8x128xf32>
    %1009 = arith.addf %1005, %1008 : vector<8x128xf32>
    %1010 = math.tanh %1009 : vector<8x128xf32>
    %cst_271 = arith.constant 1.000000e+00 : f32
    %1011 = vector.broadcast %cst_271 : f32 to vector<8x128xf32>
    %1012 = arith.subf %1011, %1004 : vector<8x128xf32>
    %1013 = arith.mulf %1012, %1010 : vector<8x128xf32>
    %1014 = arith.mulf %1004, %978 : vector<8x128xf32>
    %1015 = arith.addf %1013, %1014 : vector<8x128xf32>
    %1016 = arith.truncf %1015 : vector<8x128xf32> to vector<8x128xbf16>
    %1017 = arith.index_cast %c9_i32_265 : i32 to index
    %c0_272 = arith.constant 0 : index
    %c0_273 = arith.constant 0 : index
    %1018 = vector.load %arg26[%1017, %c0_272, %c0_273] : memref<16x8x128xbf16, #tpu.memory_space<vmem>>, vector<1x8x128xbf16>
    %1019 = vector.shape_cast %1018 : vector<1x8x128xbf16> to vector<8x128xbf16>
    %1020 = vector.shape_cast %1016 : vector<8x128xbf16> to vector<1x8x128xbf16>
    tpu.vector_store %arg26[%1017, %c0_272, %c0_273], %1020 {strides = array<i32>} : memref<16x8x128xbf16, #tpu.memory_space<vmem>>, vector<1x8x128xbf16>,
    %c10_i32_274 = arith.constant 10 : i32
    %1021 = arith.index_cast %c10_i32_274 : i32 to index
    %c0_275 = arith.constant 0 : index
    %c0_276 = arith.constant 0 : index
    %1022 = vector.load %arg24[%1021, %c0_275, %c0_276] : memref<16x8x384xf32, #tpu.memory_space<vmem>>, vector<1x8x384xf32>
    %1023 = vector.shape_cast %1022 : vector<1x8x384xf32> to vector<8x384xf32>
    %1024 = arith.truncf %1015 : vector<8x128xf32> to vector<8x128xbf16>
    %cst_277 = arith.constant dense<0.000000e+00> : vector<8x384xf32>
    %1025 = tpu.matmul %1024, %646, %cst_277 {dimension_numbers = #tpu.dot_dimension_numbers<[1], [0], [0], [1], [0, 0, 1, 1], [], []>} : vector<8x128xbf16>, vector<128x384xbf16>, vector<8x384xf32> -> vector<8x384xf32>
    %1026 = vector.extract_strided_slice %1023 {offsets = [0, 0], sizes = [8, 128], strides = [1, 1]} : vector<8x384xf32> to vector<8x128xf32>
    %1027 = vector.extract_strided_slice %1025 {offsets = [0, 0], sizes = [8, 128], strides = [1, 1]} : vector<8x384xf32> to vector<8x128xf32>
    %1028 = arith.addf %1026, %1027 : vector<8x128xf32>
    %1029 = arith.negf %1028 : vector<8x128xf32>
    %1030 = math.exp %1029 : vector<8x128xf32>
    %cst_278 = arith.constant 1.000000e+00 : f32
    %1031 = vector.broadcast %cst_278 : f32 to vector<8x128xf32>
    %1032 = arith.addf %1031, %1030 : vector<8x128xf32>
    %1033 = arith.divf %1031, %1032 : vector<8x128xf32>
    %1034 = vector.extract_strided_slice %1023 {offsets = [0, 128], sizes = [8, 128], strides = [1, 1]} : vector<8x384xf32> to vector<8x128xf32>
    %1035 = vector.extract_strided_slice %1025 {offsets = [0, 128], sizes = [8, 128], strides = [1, 1]} : vector<8x384xf32> to vector<8x128xf32>
    %1036 = arith.addf %1034, %1035 : vector<8x128xf32>
    %1037 = arith.negf %1036 : vector<8x128xf32>
    %1038 = math.exp %1037 : vector<8x128xf32>
    %cst_279 = arith.constant 1.000000e+00 : f32
    %1039 = vector.broadcast %cst_279 : f32 to vector<8x128xf32>
    %1040 = arith.addf %1039, %1038 : vector<8x128xf32>
    %1041 = arith.divf %1039, %1040 : vector<8x128xf32>
    %1042 = vector.extract_strided_slice %1023 {offsets = [0, 256], sizes = [8, 128], strides = [1, 1]} : vector<8x384xf32> to vector<8x128xf32>
    %1043 = vector.extract_strided_slice %1025 {offsets = [0, 256], sizes = [8, 128], strides = [1, 1]} : vector<8x384xf32> to vector<8x128xf32>
    %1044 = arith.addf %1043, %649 : vector<8x128xf32>
    %1045 = arith.mulf %1033, %1044 : vector<8x128xf32>
    %1046 = arith.addf %1042, %1045 : vector<8x128xf32>
    %1047 = math.tanh %1046 : vector<8x128xf32>
    %cst_280 = arith.constant 1.000000e+00 : f32
    %1048 = vector.broadcast %cst_280 : f32 to vector<8x128xf32>
    %1049 = arith.subf %1048, %1041 : vector<8x128xf32>
    %1050 = arith.mulf %1049, %1047 : vector<8x128xf32>
    %1051 = arith.mulf %1041, %1015 : vector<8x128xf32>
    %1052 = arith.addf %1050, %1051 : vector<8x128xf32>
    %1053 = arith.truncf %1052 : vector<8x128xf32> to vector<8x128xbf16>
    %1054 = arith.index_cast %c10_i32_274 : i32 to index
    %c0_281 = arith.constant 0 : index
    %c0_282 = arith.constant 0 : index
    %1055 = vector.load %arg26[%1054, %c0_281, %c0_282] : memref<16x8x128xbf16, #tpu.memory_space<vmem>>, vector<1x8x128xbf16>
    %1056 = vector.shape_cast %1055 : vector<1x8x128xbf16> to vector<8x128xbf16>
    %1057 = vector.shape_cast %1053 : vector<8x128xbf16> to vector<1x8x128xbf16>
    tpu.vector_store %arg26[%1054, %c0_281, %c0_282], %1057 {strides = array<i32>} : memref<16x8x128xbf16, #tpu.memory_space<vmem>>, vector<1x8x128xbf16>,
    %c11_i32_283 = arith.constant 11 : i32
    %1058 = arith.index_cast %c11_i32_283 : i32 to index
    %c0_284 = arith.constant 0 : index
    %c0_285 = arith.constant 0 : index
    %1059 = vector.load %arg24[%1058, %c0_284, %c0_285] : memref<16x8x384xf32, #tpu.memory_space<vmem>>, vector<1x8x384xf32>
    %1060 = vector.shape_cast %1059 : vector<1x8x384xf32> to vector<8x384xf32>
    %1061 = arith.truncf %1052 : vector<8x128xf32> to vector<8x128xbf16>
    %cst_286 = arith.constant dense<0.000000e+00> : vector<8x384xf32>
    %1062 = tpu.matmul %1061, %646, %cst_286 {dimension_numbers = #tpu.dot_dimension_numbers<[1], [0], [0], [1], [0, 0, 1, 1], [], []>} : vector<8x128xbf16>, vector<128x384xbf16>, vector<8x384xf32> -> vector<8x384xf32>
    %1063 = vector.extract_strided_slice %1060 {offsets = [0, 0], sizes = [8, 128], strides = [1, 1]} : vector<8x384xf32> to vector<8x128xf32>
    %1064 = vector.extract_strided_slice %1062 {offsets = [0, 0], sizes = [8, 128], strides = [1, 1]} : vector<8x384xf32> to vector<8x128xf32>
    %1065 = arith.addf %1063, %1064 : vector<8x128xf32>
    %1066 = arith.negf %1065 : vector<8x128xf32>
    %1067 = math.exp %1066 : vector<8x128xf32>
    %cst_287 = arith.constant 1.000000e+00 : f32
    %1068 = vector.broadcast %cst_287 : f32 to vector<8x128xf32>
    %1069 = arith.addf %1068, %1067 : vector<8x128xf32>
    %1070 = arith.divf %1068, %1069 : vector<8x128xf32>
    %1071 = vector.extract_strided_slice %1060 {offsets = [0, 128], sizes = [8, 128], strides = [1, 1]} : vector<8x384xf32> to vector<8x128xf32>
    %1072 = vector.extract_strided_slice %1062 {offsets = [0, 128], sizes = [8, 128], strides = [1, 1]} : vector<8x384xf32> to vector<8x128xf32>
    %1073 = arith.addf %1071, %1072 : vector<8x128xf32>
    %1074 = arith.negf %1073 : vector<8x128xf32>
    %1075 = math.exp %1074 : vector<8x128xf32>
    %cst_288 = arith.constant 1.000000e+00 : f32
    %1076 = vector.broadcast %cst_288 : f32 to vector<8x128xf32>
    %1077 = arith.addf %1076, %1075 : vector<8x128xf32>
    %1078 = arith.divf %1076, %1077 : vector<8x128xf32>
    %1079 = vector.extract_strided_slice %1060 {offsets = [0, 256], sizes = [8, 128], strides = [1, 1]} : vector<8x384xf32> to vector<8x128xf32>
    %1080 = vector.extract_strided_slice %1062 {offsets = [0, 256], sizes = [8, 128], strides = [1, 1]} : vector<8x384xf32> to vector<8x128xf32>
    %1081 = arith.addf %1080, %649 : vector<8x128xf32>
    %1082 = arith.mulf %1070, %1081 : vector<8x128xf32>
    %1083 = arith.addf %1079, %1082 : vector<8x128xf32>
    %1084 = math.tanh %1083 : vector<8x128xf32>
    %cst_289 = arith.constant 1.000000e+00 : f32
    %1085 = vector.broadcast %cst_289 : f32 to vector<8x128xf32>
    %1086 = arith.subf %1085, %1078 : vector<8x128xf32>
    %1087 = arith.mulf %1086, %1084 : vector<8x128xf32>
    %1088 = arith.mulf %1078, %1052 : vector<8x128xf32>
    %1089 = arith.addf %1087, %1088 : vector<8x128xf32>
    %1090 = arith.truncf %1089 : vector<8x128xf32> to vector<8x128xbf16>
    %1091 = arith.index_cast %c11_i32_283 : i32 to index
    %c0_290 = arith.constant 0 : index
    %c0_291 = arith.constant 0 : index
    %1092 = vector.load %arg26[%1091, %c0_290, %c0_291] : memref<16x8x128xbf16, #tpu.memory_space<vmem>>, vector<1x8x128xbf16>
    %1093 = vector.shape_cast %1092 : vector<1x8x128xbf16> to vector<8x128xbf16>
    %1094 = vector.shape_cast %1090 : vector<8x128xbf16> to vector<1x8x128xbf16>
    tpu.vector_store %arg26[%1091, %c0_290, %c0_291], %1094 {strides = array<i32>} : memref<16x8x128xbf16, #tpu.memory_space<vmem>>, vector<1x8x128xbf16>,
    %c12_i32_292 = arith.constant 12 : i32
    %1095 = arith.index_cast %c12_i32_292 : i32 to index
    %c0_293 = arith.constant 0 : index
    %c0_294 = arith.constant 0 : index
    %1096 = vector.load %arg24[%1095, %c0_293, %c0_294] : memref<16x8x384xf32, #tpu.memory_space<vmem>>, vector<1x8x384xf32>
    %1097 = vector.shape_cast %1096 : vector<1x8x384xf32> to vector<8x384xf32>
    %1098 = arith.truncf %1089 : vector<8x128xf32> to vector<8x128xbf16>
    %cst_295 = arith.constant dense<0.000000e+00> : vector<8x384xf32>
    %1099 = tpu.matmul %1098, %646, %cst_295 {dimension_numbers = #tpu.dot_dimension_numbers<[1], [0], [0], [1], [0, 0, 1, 1], [], []>} : vector<8x128xbf16>, vector<128x384xbf16>, vector<8x384xf32> -> vector<8x384xf32>
    %1100 = vector.extract_strided_slice %1097 {offsets = [0, 0], sizes = [8, 128], strides = [1, 1]} : vector<8x384xf32> to vector<8x128xf32>
    %1101 = vector.extract_strided_slice %1099 {offsets = [0, 0], sizes = [8, 128], strides = [1, 1]} : vector<8x384xf32> to vector<8x128xf32>
    %1102 = arith.addf %1100, %1101 : vector<8x128xf32>
    %1103 = arith.negf %1102 : vector<8x128xf32>
    %1104 = math.exp %1103 : vector<8x128xf32>
    %cst_296 = arith.constant 1.000000e+00 : f32
    %1105 = vector.broadcast %cst_296 : f32 to vector<8x128xf32>
    %1106 = arith.addf %1105, %1104 : vector<8x128xf32>
    %1107 = arith.divf %1105, %1106 : vector<8x128xf32>
    %1108 = vector.extract_strided_slice %1097 {offsets = [0, 128], sizes = [8, 128], strides = [1, 1]} : vector<8x384xf32> to vector<8x128xf32>
    %1109 = vector.extract_strided_slice %1099 {offsets = [0, 128], sizes = [8, 128], strides = [1, 1]} : vector<8x384xf32> to vector<8x128xf32>
    %1110 = arith.addf %1108, %1109 : vector<8x128xf32>
    %1111 = arith.negf %1110 : vector<8x128xf32>
    %1112 = math.exp %1111 : vector<8x128xf32>
    %cst_297 = arith.constant 1.000000e+00 : f32
    %1113 = vector.broadcast %cst_297 : f32 to vector<8x128xf32>
    %1114 = arith.addf %1113, %1112 : vector<8x128xf32>
    %1115 = arith.divf %1113, %1114 : vector<8x128xf32>
    %1116 = vector.extract_strided_slice %1097 {offsets = [0, 256], sizes = [8, 128], strides = [1, 1]} : vector<8x384xf32> to vector<8x128xf32>
    %1117 = vector.extract_strided_slice %1099 {offsets = [0, 256], sizes = [8, 128], strides = [1, 1]} : vector<8x384xf32> to vector<8x128xf32>
    %1118 = arith.addf %1117, %649 : vector<8x128xf32>
    %1119 = arith.mulf %1107, %1118 : vector<8x128xf32>
    %1120 = arith.addf %1116, %1119 : vector<8x128xf32>
    %1121 = math.tanh %1120 : vector<8x128xf32>
    %cst_298 = arith.constant 1.000000e+00 : f32
    %1122 = vector.broadcast %cst_298 : f32 to vector<8x128xf32>
    %1123 = arith.subf %1122, %1115 : vector<8x128xf32>
    %1124 = arith.mulf %1123, %1121 : vector<8x128xf32>
    %1125 = arith.mulf %1115, %1089 : vector<8x128xf32>
    %1126 = arith.addf %1124, %1125 : vector<8x128xf32>
    %1127 = arith.truncf %1126 : vector<8x128xf32> to vector<8x128xbf16>
    %1128 = arith.index_cast %c12_i32_292 : i32 to index
    %c0_299 = arith.constant 0 : index
    %c0_300 = arith.constant 0 : index
    %1129 = vector.load %arg26[%1128, %c0_299, %c0_300] : memref<16x8x128xbf16, #tpu.memory_space<vmem>>, vector<1x8x128xbf16>
    %1130 = vector.shape_cast %1129 : vector<1x8x128xbf16> to vector<8x128xbf16>
    %1131 = vector.shape_cast %1127 : vector<8x128xbf16> to vector<1x8x128xbf16>
    tpu.vector_store %arg26[%1128, %c0_299, %c0_300], %1131 {strides = array<i32>} : memref<16x8x128xbf16, #tpu.memory_space<vmem>>, vector<1x8x128xbf16>,
    %c13_i32_301 = arith.constant 13 : i32
    %1132 = arith.index_cast %c13_i32_301 : i32 to index
    %c0_302 = arith.constant 0 : index
    %c0_303 = arith.constant 0 : index
    %1133 = vector.load %arg24[%1132, %c0_302, %c0_303] : memref<16x8x384xf32, #tpu.memory_space<vmem>>, vector<1x8x384xf32>
    %1134 = vector.shape_cast %1133 : vector<1x8x384xf32> to vector<8x384xf32>
    %1135 = arith.truncf %1126 : vector<8x128xf32> to vector<8x128xbf16>
    %cst_304 = arith.constant dense<0.000000e+00> : vector<8x384xf32>
    %1136 = tpu.matmul %1135, %646, %cst_304 {dimension_numbers = #tpu.dot_dimension_numbers<[1], [0], [0], [1], [0, 0, 1, 1], [], []>} : vector<8x128xbf16>, vector<128x384xbf16>, vector<8x384xf32> -> vector<8x384xf32>
    %1137 = vector.extract_strided_slice %1134 {offsets = [0, 0], sizes = [8, 128], strides = [1, 1]} : vector<8x384xf32> to vector<8x128xf32>
    %1138 = vector.extract_strided_slice %1136 {offsets = [0, 0], sizes = [8, 128], strides = [1, 1]} : vector<8x384xf32> to vector<8x128xf32>
    %1139 = arith.addf %1137, %1138 : vector<8x128xf32>
    %1140 = arith.negf %1139 : vector<8x128xf32>
    %1141 = math.exp %1140 : vector<8x128xf32>
    %cst_305 = arith.constant 1.000000e+00 : f32
    %1142 = vector.broadcast %cst_305 : f32 to vector<8x128xf32>
    %1143 = arith.addf %1142, %1141 : vector<8x128xf32>
    %1144 = arith.divf %1142, %1143 : vector<8x128xf32>
    %1145 = vector.extract_strided_slice %1134 {offsets = [0, 128], sizes = [8, 128], strides = [1, 1]} : vector<8x384xf32> to vector<8x128xf32>
    %1146 = vector.extract_strided_slice %1136 {offsets = [0, 128], sizes = [8, 128], strides = [1, 1]} : vector<8x384xf32> to vector<8x128xf32>
    %1147 = arith.addf %1145, %1146 : vector<8x128xf32>
    %1148 = arith.negf %1147 : vector<8x128xf32>
    %1149 = math.exp %1148 : vector<8x128xf32>
    %cst_306 = arith.constant 1.000000e+00 : f32
    %1150 = vector.broadcast %cst_306 : f32 to vector<8x128xf32>
    %1151 = arith.addf %1150, %1149 : vector<8x128xf32>
    %1152 = arith.divf %1150, %1151 : vector<8x128xf32>
    %1153 = vector.extract_strided_slice %1134 {offsets = [0, 256], sizes = [8, 128], strides = [1, 1]} : vector<8x384xf32> to vector<8x128xf32>
    %1154 = vector.extract_strided_slice %1136 {offsets = [0, 256], sizes = [8, 128], strides = [1, 1]} : vector<8x384xf32> to vector<8x128xf32>
    %1155 = arith.addf %1154, %649 : vector<8x128xf32>
    %1156 = arith.mulf %1144, %1155 : vector<8x128xf32>
    %1157 = arith.addf %1153, %1156 : vector<8x128xf32>
    %1158 = math.tanh %1157 : vector<8x128xf32>
    %cst_307 = arith.constant 1.000000e+00 : f32
    %1159 = vector.broadcast %cst_307 : f32 to vector<8x128xf32>
    %1160 = arith.subf %1159, %1152 : vector<8x128xf32>
    %1161 = arith.mulf %1160, %1158 : vector<8x128xf32>
    %1162 = arith.mulf %1152, %1126 : vector<8x128xf32>
    %1163 = arith.addf %1161, %1162 : vector<8x128xf32>
    %1164 = arith.truncf %1163 : vector<8x128xf32> to vector<8x128xbf16>
    %1165 = arith.index_cast %c13_i32_301 : i32 to index
    %c0_308 = arith.constant 0 : index
    %c0_309 = arith.constant 0 : index
    %1166 = vector.load %arg26[%1165, %c0_308, %c0_309] : memref<16x8x128xbf16, #tpu.memory_space<vmem>>, vector<1x8x128xbf16>
    %1167 = vector.shape_cast %1166 : vector<1x8x128xbf16> to vector<8x128xbf16>
    %1168 = vector.shape_cast %1164 : vector<8x128xbf16> to vector<1x8x128xbf16>
    tpu.vector_store %arg26[%1165, %c0_308, %c0_309], %1168 {strides = array<i32>} : memref<16x8x128xbf16, #tpu.memory_space<vmem>>, vector<1x8x128xbf16>,
    %c14_i32_310 = arith.constant 14 : i32
    %1169 = arith.index_cast %c14_i32_310 : i32 to index
    %c0_311 = arith.constant 0 : index
    %c0_312 = arith.constant 0 : index
    %1170 = vector.load %arg24[%1169, %c0_311, %c0_312] : memref<16x8x384xf32, #tpu.memory_space<vmem>>, vector<1x8x384xf32>
    %1171 = vector.shape_cast %1170 : vector<1x8x384xf32> to vector<8x384xf32>
    %1172 = arith.truncf %1163 : vector<8x128xf32> to vector<8x128xbf16>
    %cst_313 = arith.constant dense<0.000000e+00> : vector<8x384xf32>
    %1173 = tpu.matmul %1172, %646, %cst_313 {dimension_numbers = #tpu.dot_dimension_numbers<[1], [0], [0], [1], [0, 0, 1, 1], [], []>} : vector<8x128xbf16>, vector<128x384xbf16>, vector<8x384xf32> -> vector<8x384xf32>
    %1174 = vector.extract_strided_slice %1171 {offsets = [0, 0], sizes = [8, 128], strides = [1, 1]} : vector<8x384xf32> to vector<8x128xf32>
    %1175 = vector.extract_strided_slice %1173 {offsets = [0, 0], sizes = [8, 128], strides = [1, 1]} : vector<8x384xf32> to vector<8x128xf32>
    %1176 = arith.addf %1174, %1175 : vector<8x128xf32>
    %1177 = arith.negf %1176 : vector<8x128xf32>
    %1178 = math.exp %1177 : vector<8x128xf32>
    %cst_314 = arith.constant 1.000000e+00 : f32
    %1179 = vector.broadcast %cst_314 : f32 to vector<8x128xf32>
    %1180 = arith.addf %1179, %1178 : vector<8x128xf32>
    %1181 = arith.divf %1179, %1180 : vector<8x128xf32>
    %1182 = vector.extract_strided_slice %1171 {offsets = [0, 128], sizes = [8, 128], strides = [1, 1]} : vector<8x384xf32> to vector<8x128xf32>
    %1183 = vector.extract_strided_slice %1173 {offsets = [0, 128], sizes = [8, 128], strides = [1, 1]} : vector<8x384xf32> to vector<8x128xf32>
    %1184 = arith.addf %1182, %1183 : vector<8x128xf32>
    %1185 = arith.negf %1184 : vector<8x128xf32>
    %1186 = math.exp %1185 : vector<8x128xf32>
    %cst_315 = arith.constant 1.000000e+00 : f32
    %1187 = vector.broadcast %cst_315 : f32 to vector<8x128xf32>
    %1188 = arith.addf %1187, %1186 : vector<8x128xf32>
    %1189 = arith.divf %1187, %1188 : vector<8x128xf32>
    %1190 = vector.extract_strided_slice %1171 {offsets = [0, 256], sizes = [8, 128], strides = [1, 1]} : vector<8x384xf32> to vector<8x128xf32>
    %1191 = vector.extract_strided_slice %1173 {offsets = [0, 256], sizes = [8, 128], strides = [1, 1]} : vector<8x384xf32> to vector<8x128xf32>
    %1192 = arith.addf %1191, %649 : vector<8x128xf32>
    %1193 = arith.mulf %1181, %1192 : vector<8x128xf32>
    %1194 = arith.addf %1190, %1193 : vector<8x128xf32>
    %1195 = math.tanh %1194 : vector<8x128xf32>
    %cst_316 = arith.constant 1.000000e+00 : f32
    %1196 = vector.broadcast %cst_316 : f32 to vector<8x128xf32>
    %1197 = arith.subf %1196, %1189 : vector<8x128xf32>
    %1198 = arith.mulf %1197, %1195 : vector<8x128xf32>
    %1199 = arith.mulf %1189, %1163 : vector<8x128xf32>
    %1200 = arith.addf %1198, %1199 : vector<8x128xf32>
    %1201 = arith.truncf %1200 : vector<8x128xf32> to vector<8x128xbf16>
    %1202 = arith.index_cast %c14_i32_310 : i32 to index
    %c0_317 = arith.constant 0 : index
    %c0_318 = arith.constant 0 : index
    %1203 = vector.load %arg26[%1202, %c0_317, %c0_318] : memref<16x8x128xbf16, #tpu.memory_space<vmem>>, vector<1x8x128xbf16>
    %1204 = vector.shape_cast %1203 : vector<1x8x128xbf16> to vector<8x128xbf16>
    %1205 = vector.shape_cast %1201 : vector<8x128xbf16> to vector<1x8x128xbf16>
    tpu.vector_store %arg26[%1202, %c0_317, %c0_318], %1205 {strides = array<i32>} : memref<16x8x128xbf16, #tpu.memory_space<vmem>>, vector<1x8x128xbf16>,
    %c15_i32_319 = arith.constant 15 : i32
    %1206 = arith.index_cast %c15_i32_319 : i32 to index
    %c0_320 = arith.constant 0 : index
    %c0_321 = arith.constant 0 : index
    %1207 = vector.load %arg24[%1206, %c0_320, %c0_321] : memref<16x8x384xf32, #tpu.memory_space<vmem>>, vector<1x8x384xf32>
    %1208 = vector.shape_cast %1207 : vector<1x8x384xf32> to vector<8x384xf32>
    %1209 = arith.truncf %1200 : vector<8x128xf32> to vector<8x128xbf16>
    %cst_322 = arith.constant dense<0.000000e+00> : vector<8x384xf32>
    %1210 = tpu.matmul %1209, %646, %cst_322 {dimension_numbers = #tpu.dot_dimension_numbers<[1], [0], [0], [1], [0, 0, 1, 1], [], []>} : vector<8x128xbf16>, vector<128x384xbf16>, vector<8x384xf32> -> vector<8x384xf32>
    %1211 = vector.extract_strided_slice %1208 {offsets = [0, 0], sizes = [8, 128], strides = [1, 1]} : vector<8x384xf32> to vector<8x128xf32>
    %1212 = vector.extract_strided_slice %1210 {offsets = [0, 0], sizes = [8, 128], strides = [1, 1]} : vector<8x384xf32> to vector<8x128xf32>
    %1213 = arith.addf %1211, %1212 : vector<8x128xf32>
    %1214 = arith.negf %1213 : vector<8x128xf32>
    %1215 = math.exp %1214 : vector<8x128xf32>
    %cst_323 = arith.constant 1.000000e+00 : f32
    %1216 = vector.broadcast %cst_323 : f32 to vector<8x128xf32>
    %1217 = arith.addf %1216, %1215 : vector<8x128xf32>
    %1218 = arith.divf %1216, %1217 : vector<8x128xf32>
    %1219 = vector.extract_strided_slice %1208 {offsets = [0, 128], sizes = [8, 128], strides = [1, 1]} : vector<8x384xf32> to vector<8x128xf32>
    %1220 = vector.extract_strided_slice %1210 {offsets = [0, 128], sizes = [8, 128], strides = [1, 1]} : vector<8x384xf32> to vector<8x128xf32>
    %1221 = arith.addf %1219, %1220 : vector<8x128xf32>
    %1222 = arith.negf %1221 : vector<8x128xf32>
    %1223 = math.exp %1222 : vector<8x128xf32>
    %cst_324 = arith.constant 1.000000e+00 : f32
    %1224 = vector.broadcast %cst_324 : f32 to vector<8x128xf32>
    %1225 = arith.addf %1224, %1223 : vector<8x128xf32>
    %1226 = arith.divf %1224, %1225 : vector<8x128xf32>
    %1227 = vector.extract_strided_slice %1208 {offsets = [0, 256], sizes = [8, 128], strides = [1, 1]} : vector<8x384xf32> to vector<8x128xf32>
    %1228 = vector.extract_strided_slice %1210 {offsets = [0, 256], sizes = [8, 128], strides = [1, 1]} : vector<8x384xf32> to vector<8x128xf32>
    %1229 = arith.addf %1228, %649 : vector<8x128xf32>
    %1230 = arith.mulf %1218, %1229 : vector<8x128xf32>
    %1231 = arith.addf %1227, %1230 : vector<8x128xf32>
    %1232 = math.tanh %1231 : vector<8x128xf32>
    %cst_325 = arith.constant 1.000000e+00 : f32
    %1233 = vector.broadcast %cst_325 : f32 to vector<8x128xf32>
    %1234 = arith.subf %1233, %1226 : vector<8x128xf32>
    %1235 = arith.mulf %1234, %1232 : vector<8x128xf32>
    %1236 = arith.mulf %1226, %1200 : vector<8x128xf32>
    %1237 = arith.addf %1235, %1236 : vector<8x128xf32>
    %1238 = arith.truncf %1237 : vector<8x128xf32> to vector<8x128xbf16>
    %1239 = arith.index_cast %c15_i32_319 : i32 to index
    %c0_326 = arith.constant 0 : index
    %c0_327 = arith.constant 0 : index
    %1240 = vector.load %arg26[%1239, %c0_326, %c0_327] : memref<16x8x128xbf16, #tpu.memory_space<vmem>>, vector<1x8x128xbf16>
    %1241 = vector.shape_cast %1240 : vector<1x8x128xbf16> to vector<8x128xbf16>
    %1242 = vector.shape_cast %1238 : vector<8x128xbf16> to vector<1x8x128xbf16>
    tpu.vector_store %arg26[%1239, %c0_326, %c0_327], %1242 {strides = array<i32>} : memref<16x8x128xbf16, #tpu.memory_space<vmem>>, vector<1x8x128xbf16>,
    %c16_i32_328 = arith.constant 16 : i32
    %c0_329 = arith.constant 0 : index
    %c0_330 = arith.constant 0 : index
    %1243 = vector.load %arg28[%c0_329, %c0_330] : memref<8x128xf32, #tpu.memory_space<vmem>>, vector<8x128xf32>
    tpu.vector_store %arg28[%c0_329, %c0_330], %1237 {strides = array<i32>} : memref<8x128xf32, #tpu.memory_space<vmem>>, vector<8x128xf32>,
    %c0_331 = arith.constant 0 : index
    %c0_332 = arith.constant 0 : index
    %c0_333 = arith.constant 0 : index
    %1244 = vector.load %arg26[%c0_331, %c0_332, %c0_333] : memref<16x8x128xbf16, #tpu.memory_space<vmem>>, vector<16x8x128xbf16>
    %1245 = vector.shape_cast %1244 : vector<16x8x128xbf16> to vector<128x128xbf16>
    %c0_334 = arith.constant 0 : index
    %c0_335 = arith.constant 0 : index
    %1246 = vector.load %arg13[%c0_334, %c0_335] : memref<128x128xbf16, #tpu.memory_space<vmem>>, vector<128x128xbf16>
    %cst_336 = arith.constant dense<0.000000e+00> : vector<128x128xf32>
    %1247 = tpu.matmul %1245, %1246, %cst_336 {dimension_numbers = #tpu.dot_dimension_numbers<[1], [0], [0], [1], [0, 0, 1, 1], [], []>} : vector<128x128xbf16>, vector<128x128xbf16>, vector<128x128xf32> -> vector<128x128xf32>
    %c0_337 = arith.constant 0 : index
    %c0_338 = arith.constant 0 : index
    %1248 = vector.load %arg14[%c0_337, %c0_338] : memref<1x128xf32, #tpu.memory_space<vmem>>, vector<1x128xf32>
    %1249 = vector.broadcast %1248 : vector<1x128xf32> to vector<128x128xf32>
    %1250 = arith.addf %1247, %1249 : vector<128x128xf32>
    %1251 = arith.truncf %1250 : vector<128x128xf32> to vector<128x128xbf16>
    %c0_339 = arith.constant 0 : index
    %c0_340 = arith.constant 0 : index
    %1252 = vector.load %arg17[%c0_339, %c0_340] : memref<128x128xbf16, #tpu.memory_space<vmem>>, vector<128x128xbf16>
    %cst_341 = arith.constant dense<0.000000e+00> : vector<128x128xf32>
    %1253 = tpu.matmul %1251, %1252, %cst_341 {dimension_numbers = #tpu.dot_dimension_numbers<[1], [0], [0], [1], [0, 0, 1, 1], [], []>} : vector<128x128xbf16>, vector<128x128xbf16>, vector<128x128xf32> -> vector<128x128xf32>
    %c0_342 = arith.constant 0 : index
    %c0_343 = arith.constant 0 : index
    %1254 = vector.load %arg18[%c0_342, %c0_343] : memref<1x128xf32, #tpu.memory_space<vmem>>, vector<1x128xf32>
    %1255 = vector.broadcast %1254 : vector<1x128xf32> to vector<128x128xf32>
    %1256 = arith.addf %1253, %1255 : vector<128x128xf32>
    %1257 = arith.negf %1256 : vector<128x128xf32>
    %1258 = math.exp %1257 : vector<128x128xf32>
    %cst_344 = arith.constant 1.000000e+00 : f32
    %1259 = vector.broadcast %cst_344 : f32 to vector<128x128xf32>
    %1260 = arith.addf %1259, %1258 : vector<128x128xf32>
    %1261 = arith.divf %1259, %1260 : vector<128x128xf32>
    %1262 = vector.shape_cast %1261 : vector<128x128xf32> to vector<16x8x128xf32>
    %c0_345 = arith.constant 0 : index
    %c0_346 = arith.constant 0 : index
    %c0_347 = arith.constant 0 : index
    %1263 = vector.load %arg22[%c0_345, %c0_346, %c0_347] : memref<16x8x128xf32, #tpu.memory_space<vmem>>, vector<16x8x128xf32>
    tpu.vector_store %arg22[%c0_345, %c0_346, %c0_347], %1262 {strides = array<i32>} : memref<16x8x128xf32, #tpu.memory_space<vmem>>, vector<16x8x128xf32>,
    %cst_348 = arith.constant 0.000000e+00 : f32
    %1264 = vector.broadcast %cst_348 : f32 to vector<128x128xf32>
    %1265 = arith.maximumf %1250, %1264 : vector<128x128xf32>
    %1266 = arith.truncf %1265 : vector<128x128xf32> to vector<128x128xbf16>
    %c0_349 = arith.constant 0 : index
    %c0_350 = arith.constant 0 : index
    %1267 = vector.load %arg19[%c0_349, %c0_350] : memref<128x128xbf16, #tpu.memory_space<vmem>>, vector<128x128xbf16>
    %cst_351 = arith.constant dense<0.000000e+00> : vector<128x128xf32>
    %1268 = tpu.matmul %1266, %1267, %cst_351 {dimension_numbers = #tpu.dot_dimension_numbers<[1], [0], [0], [1], [0, 0, 1, 1], [], []>} : vector<128x128xbf16>, vector<128x128xbf16>, vector<128x128xf32> -> vector<128x128xf32>
    %c0_352 = arith.constant 0 : index
    %c0_353 = arith.constant 0 : index
    %1269 = vector.load %arg20[%c0_352, %c0_353] : memref<1x128xf32, #tpu.memory_space<vmem>>, vector<1x128xf32>
    %1270 = vector.broadcast %1269 : vector<1x128xf32> to vector<128x128xf32>
    %1271 = arith.addf %1268, %1270 : vector<128x128xf32>
    %1272 = arith.negf %1271 : vector<128x128xf32>
    %1273 = math.exp %1272 : vector<128x128xf32>
    %cst_354 = arith.constant 1.000000e+00 : f32
    %1274 = vector.broadcast %cst_354 : f32 to vector<128x128xf32>
    %1275 = arith.addf %1274, %1273 : vector<128x128xf32>
    %1276 = arith.divf %1274, %1275 : vector<128x128xf32>
    %1277 = vector.shape_cast %1276 : vector<128x128xf32> to vector<16x8x128xf32>
    %c0_355 = arith.constant 0 : index
    %c0_356 = arith.constant 0 : index
    %c0_357 = arith.constant 0 : index
    %1278 = vector.load %arg23[%c0_355, %c0_356, %c0_357] : memref<16x8x128xf32, #tpu.memory_space<vmem>>, vector<16x8x128xf32>
    tpu.vector_store %arg23[%c0_355, %c0_356, %c0_357], %1277 {strides = array<i32>} : memref<16x8x128xf32, #tpu.memory_space<vmem>>, vector<16x8x128xf32>,
    return
  }
  func.func @transform_0(%arg0: i32, %arg1: i32) -> (i32, i32, i32) {
    %c0_i32 = arith.constant 0 : i32
    %c0_i32_0 = arith.constant 0 : i32
    return %arg1, %arg0, %c0_i32 : i32, i32, i32
  }
  func.func @transform_1(%arg0: i32, %arg1: i32) -> (i32, i32) {
    %c0_i32 = arith.constant 0 : i32
    %c0_i32_0 = arith.constant 0 : i32
    %c0_i32_1 = arith.constant 0 : i32
    return %c0_i32, %c0_i32_0 : i32, i32
  }
  func.func @transform_2(%arg0: i32, %arg1: i32) -> (i32, i32) {
    %c0_i32 = arith.constant 0 : i32
    %c0_i32_0 = arith.constant 0 : i32
    %c0_i32_1 = arith.constant 0 : i32
    return %c0_i32, %c0_i32_0 : i32, i32
  }
  func.func @transform_3(%arg0: i32, %arg1: i32) -> (i32, i32) {
    %c0_i32 = arith.constant 0 : i32
    %c0_i32_0 = arith.constant 0 : i32
    %c0_i32_1 = arith.constant 0 : i32
    return %c0_i32, %c0_i32_0 : i32, i32
  }
  func.func @transform_4(%arg0: i32, %arg1: i32) -> (i32, i32) {
    %c0_i32 = arith.constant 0 : i32
    %c0_i32_0 = arith.constant 0 : i32
    %c0_i32_1 = arith.constant 0 : i32
    return %c0_i32, %c0_i32_0 : i32, i32
  }
  func.func @transform_5(%arg0: i32, %arg1: i32) -> (i32, i32) {
    %c0_i32 = arith.constant 0 : i32
    %c0_i32_0 = arith.constant 0 : i32
    %c0_i32_1 = arith.constant 0 : i32
    return %c0_i32, %c0_i32_0 : i32, i32
  }
  func.func @transform_6(%arg0: i32, %arg1: i32) -> (i32, i32) {
    %c0_i32 = arith.constant 0 : i32
    %c0_i32_0 = arith.constant 0 : i32
    %c0_i32_1 = arith.constant 0 : i32
    return %c0_i32, %c0_i32_0 : i32, i32
  }
  func.func @transform_7(%arg0: i32, %arg1: i32) -> (i32, i32) {
    %c0_i32 = arith.constant 0 : i32
    %c0_i32_0 = arith.constant 0 : i32
    %c0_i32_1 = arith.constant 0 : i32
    return %c0_i32, %c0_i32_0 : i32, i32
  }
  func.func @transform_8(%arg0: i32, %arg1: i32) -> (i32, i32) {
    %c0_i32 = arith.constant 0 : i32
    %c0_i32_0 = arith.constant 0 : i32
    %c0_i32_1 = arith.constant 0 : i32
    return %c0_i32, %c0_i32_0 : i32, i32
  }
  func.func @transform_9(%arg0: i32, %arg1: i32) -> (i32, i32) {
    %c0_i32 = arith.constant 0 : i32
    %c0_i32_0 = arith.constant 0 : i32
    %c0_i32_1 = arith.constant 0 : i32
    return %c0_i32, %c0_i32_0 : i32, i32
  }
  func.func @transform_10(%arg0: i32, %arg1: i32) -> (i32, i32) {
    %c0_i32 = arith.constant 0 : i32
    %c0_i32_0 = arith.constant 0 : i32
    %c0_i32_1 = arith.constant 0 : i32
    return %c0_i32, %c0_i32_0 : i32, i32
  }
  func.func @transform_11(%arg0: i32, %arg1: i32) -> (i32, i32) {
    %c0_i32 = arith.constant 0 : i32
    %c0_i32_0 = arith.constant 0 : i32
    %c0_i32_1 = arith.constant 0 : i32
    return %c0_i32, %c0_i32_0 : i32, i32
  }
  func.func @transform_12(%arg0: i32, %arg1: i32) -> (i32, i32) {
    %c0_i32 = arith.constant 0 : i32
    %c0_i32_0 = arith.constant 0 : i32
    %c0_i32_1 = arith.constant 0 : i32
    return %c0_i32, %c0_i32_0 : i32, i32
  }
  func.func @transform_13(%arg0: i32, %arg1: i32) -> (i32, i32) {
    %c0_i32 = arith.constant 0 : i32
    %c0_i32_0 = arith.constant 0 : i32
    %c0_i32_1 = arith.constant 0 : i32
    return %c0_i32, %c0_i32_0 : i32, i32
  }
  func.func @transform_14(%arg0: i32, %arg1: i32) -> (i32, i32) {
    %c0_i32 = arith.constant 0 : i32
    %c0_i32_0 = arith.constant 0 : i32
    %c0_i32_1 = arith.constant 0 : i32
    return %c0_i32, %c0_i32_0 : i32, i32
  }
  func.func @transform_15(%arg0: i32, %arg1: i32) -> (i32, i32) {
    %c0_i32 = arith.constant 0 : i32
    %c0_i32_0 = arith.constant 0 : i32
    %c0_i32_1 = arith.constant 0 : i32
    return %c0_i32, %c0_i32_0 : i32, i32
  }
  func.func @transform_16(%arg0: i32, %arg1: i32) -> (i32, i32) {
    %c0_i32 = arith.constant 0 : i32
    %c0_i32_0 = arith.constant 0 : i32
    %c0_i32_1 = arith.constant 0 : i32
    return %c0_i32, %c0_i32_0 : i32, i32
  }
  func.func @transform_17(%arg0: i32, %arg1: i32) -> (i32, i32) {
    %c0_i32 = arith.constant 0 : i32
    %c0_i32_0 = arith.constant 0 : i32
    %c0_i32_1 = arith.constant 0 : i32
    return %c0_i32, %c0_i32_0 : i32, i32
  }
  func.func @transform_18(%arg0: i32, %arg1: i32) -> (i32, i32) {
    %c0_i32 = arith.constant 0 : i32
    %c0_i32_0 = arith.constant 0 : i32
    %c0_i32_1 = arith.constant 0 : i32
    return %c0_i32, %c0_i32_0 : i32, i32
  }
  func.func @transform_19(%arg0: i32, %arg1: i32) -> (i32, i32, i32) {
    %c0_i32 = arith.constant 0 : i32
    %c0_i32_0 = arith.constant 0 : i32
    return %arg1, %arg0, %c0_i32 : i32, i32, i32
  }
  func.func @transform_20(%arg0: i32, %arg1: i32) -> (i32, i32, i32) {
    %c0_i32 = arith.constant 0 : i32
    %c0_i32_0 = arith.constant 0 : i32
    return %arg1, %arg0, %c0_i32 : i32, i32, i32
  }
  func.func @transform_21(%arg0: i32, %arg1: i32) -> (i32, i32, i32) {
    %c0_i32 = arith.constant 0 : i32
    %c0_i32_0 = arith.constant 0 : i32
    return %arg1, %arg0, %c0_i32 : i32, i32, i32
  }
}

</mosaic_0001>

<bundles_post_ra>
// kernel: tpu_custom_call.1
= control target key start
LH: loop header
LB: loop body
LE: loop exit
PB: predicated region body
PF: predicated region fallthrough
CT: control target
= control target key end

     0   :  { %s12122_s0 = inlined_call_operand.hbm [shape: f32[16,8,128], index: 0, kind: input, shape index: {}]   ;;  %s12123_s1 = inlined_call_operand.hbm [shape: bf16[128,128], index: 1, kind: input, shape index: {}]   ;;  %s12124_s2 = inlined_call_operand.hbm [shape: f32[1,128], index: 2, kind: input, shape index: {}]   ;;  %s12125_s3 = inlined_call_operand.hbm [shape: bf16[128,384], index: 3, kind: input, shape index: {}]   ;;  %s12126_s4 = inlined_call_operand.hbm [shape: bf16[128,384], index: 4, kind: input, shape index: {}]   ;;  %s12127_s5 = inlined_call_operand.hbm [shape: f32[1,384], index: 5, kind: input, shape index: {}]   ;;  %s12128_s6 = inlined_call_operand.hbm [shape: f32[1,128], index: 6, kind: input, shape index: {}]   ;;  %s12129_s7 = inlined_call_operand.hbm [shape: bf16[128,384], index: 7, kind: input, shape index: {}]   ;;  %s12130_s8 = inlined_call_operand.hbm [shape: bf16[128,384], index: 8, kind: input, shape index: {}]   ;;  %s12131_s9 = inlined_call_operand.hbm [shape: f32[1,384], index: 9, kind: input, shape index: {}]   ;;  %s12132_s10 = inlined_call_operand.hbm [shape: f32[1,128], index: 10, kind: input, shape index: {}]   ;;  %s12133_s11 = inlined_call_operand.hbm [shape: bf16[128,128], index: 11, kind: input, shape index: {}]   ;;  %s12134_s12 = inlined_call_operand.hbm [shape: f32[1,128], index: 12, kind: input, shape index: {}]   ;;  %s12135_s13 = inlined_call_operand.hbm [shape: bf16[128,128], index: 13, kind: input, shape index: {}]   ;;  %s12136_s14 = inlined_call_operand.hbm [shape: f32[1,128], index: 14, kind: input, shape index: {}]   ;;  %s12137_s15 = inlined_call_operand.hbm [shape: bf16[128,128], index: 15, kind: input, shape index: {}]   ;;  %s12138_s16 = inlined_call_operand.hbm [shape: f32[1,128], index: 16, kind: input, shape index: {}]   ;;  %s12139_s17 = inlined_call_operand.vmem [shape: bf16[128,128], index: 17, kind: input, shape index: {}]   ;;  %s12140_s18 = inlined_call_operand.vmem [shape: f32[1,128], index: 18, kind: input, shape index: {}]   ;;  %s12141_s19 = inlined_call_operand.hbm [shape: f32[16,8,128], index: 19, kind: output, shape index: {0}]   ;;  %s12142_s20 = inlined_call_operand.hbm [shape: f32[16,8,128], index: 20, kind: output, shape index: {1}]   ;;  %s12143_s21 = inlined_call_operand.hbm [shape: f32[16,8,128], index: 21, kind: output, shape index: {2}]  }
   0x1   :  { %12168 = sst [smem:[#allocation77_spill]] %s12122_s0 }
   0x2   :  { %12169 = sst [smem:[#allocation78_spill]] %s12123_s1 }
   0x3   :  { %12170 = sst [smem:[#allocation79_spill]] %s12124_s2 }
   0x4   :  { %12171 = sst [smem:[#allocation80_spill]] %s12125_s3 }
   0x5   :  { %12172 = sst [smem:[#allocation81_spill]] %s12126_s4 }
   0x6   :  { %12173 = sst [smem:[#allocation82_spill]] %s12127_s5 }
   0x7   :  { %12174 = sst [smem:[#allocation83_spill]] %s12141_s19 }
   0x8   :  { %12175 = sst [smem:[#allocation84_spill]] %s12142_s20 }
   0x9   :  { %12176 = sst [smem:[#allocation85_spill]] %s12143_s21 }
   0xa   :  { %27 = vsyncpa [#allocation8], 0 }
   0xb   :  { %28 = vsyncpa [#allocation11], 0 }
   0xc   :  { %29 = vsyncpa [#allocation14], 0 }
   0xd   :  { %30 = vsyncpa [#allocation17], 0 }
   0xe   :  { %31 = vsyncpa [#allocation20], 0 }
   0xf   :  { %32 = vsyncpa [#allocation23], 0 }
  0x10   :  { %33 = vsyncpa [#allocation26], 0 }
  0x11   :  { %34 = vsyncpa [#allocation29], 0 }
  0x12   :  { %35 = vsyncpa [#allocation32], 0 }
  0x13   :  { %36 = vsyncpa [#allocation9], 0 }
  0x14   :  { %37 = vsyncpa [#allocation36], 0  ;;  %s9503_s2 = smov [#allocation10]   ;;  %s12177_s3 = sld [smem:[#allocation78_spill]] }
  0x15   :  { %s55_s25 = sshll.u32 %s9503_s2, 4  ;;  %s56_s25 = int_to_ptr.vmem [resolvable:$true] %s55_s25 }
  0x1a   :  { %s9041_s28 = scalar_lea.hbm %s12177_s3, 1024 }
  0x1b   :  { %p9042_p0 = scmp.ne.s32.totalorder %s12177_s3, %s9041_s28  ;;  %p9045_p1 = scmp.lt.u32.totalorder %s9041_s28, %s12177_s3 }
  0x1d   :  { %p9047_p2 = pnand %p9045_p1, %p9042_p0 }
  0x1f   :  { %9050 = shalt.err (!%p9047_p2)
}
  0x20   :  { %s9051_s5 = scalar_lea.vmem %s56_s25, 1024  ;;  %p9056_p4 = scmp.lt.s32.totalorder %s56_s25, %s56_s25 }
  0x21   :  { %p9052_p3 = scmp.ne.s32.totalorder %s56_s25, %s9051_s5  ;;  %p9057_p5 = scmp.lt.s32.totalorder %s9051_s5, %s9051_s5 }
  0x23   :  { %p9058_p6 = por %p9057_p5, %p9056_p4 }
  0x25   :  { %p9059_p7 = pnand %p9058_p6, %p9052_p3 }
  0x27   :  { %9062 = shalt.err (!%p9059_p7)
}
  0x28   :  { %s12152_s22 = smov 64   ;;  %s12154_s23 = smov 4  }
  0x29   :  { %61 = dma.hbm_to_vmem [thread:$0]  %s12177_s3, 1024, %s56_s25, [#allocation11], %s12152_s22, %s12152_s22, %s12154_s23  }
  0x2a   :  { %s9506_s2 = smov [#allocation13]   ;;  %s12178_s29 = sld [smem:[#allocation80_spill]] }
  0x2b   :  { %s77_s26 = sshll.u32 %s9506_s2, 4  ;;  %s78_s26 = int_to_ptr.vmem [resolvable:$true] %s77_s26 }
  0x30   :  { %s9063_s0 = scalar_lea.hbm %s12178_s29, 3072 }
  0x31   :  { %p9064_p8 = scmp.ne.s32.totalorder %s12178_s29, %s9063_s0  ;;  %p9067_p9 = scmp.lt.u32.totalorder %s9063_s0, %s12178_s29 }
  0x33   :  { %p9069_p10 = pnand %p9067_p9, %p9064_p8 }
  0x35   :  { %9072 = shalt.err (!%p9069_p10)
}
  0x36   :  { %s9073_s20 = scalar_lea.vmem %s78_s26, 3072  ;;  %p9078_p12 = scmp.lt.s32.totalorder %s78_s26, %s78_s26 }
  0x37   :  { %p9074_p11 = scmp.ne.s32.totalorder %s78_s26, %s9073_s20  ;;  %p9079_p13 = scmp.lt.s32.totalorder %s9073_s20, %s9073_s20 }
  0x39   :  { %p9080_p0 = por %p9079_p13, %p9078_p12 }
  0x3b   :  { %p9081_p1 = pnand %p9080_p0, %p9074_p11 }
  0x3d   :  { %9084 = shalt.err (!%p9081_p1)
}
  0x3e   :  { %s9507_s25 = smov 192   ;;  %s9508_s3 = smov 12  }
  0x3f   :  { %83 = dma.hbm_to_vmem [thread:$0]  %s12178_s29, 3072, %s78_s26, [#allocation14], %s9507_s25, %s9507_s25, %s9508_s3  }
  0x40   :  { %s9509_s21 = smov [#allocation16]   ;;  %s9510_s27 = smov [#allocation19]  }
  0x41   :  { %s102_s2 = sshll.u32 %s9509_s21, 4  ;;  %s121_s28 = sshll.u32 %s9510_s27, 4  ;;  %s103_s2 = int_to_ptr.vmem [resolvable:$true] %s102_s2  ;;  %s9673_s28 = int_to_ptr.vmem [resolvable:$true] %s121_s28 }
  0x42   :  { %s12179_s4 = sld [smem:[#allocation82_spill]] }
  0x48   :  { %s9085_s30 = scalar_lea.hbm %s12179_s4, 48 }
  0x49   :  { %p9086_p2 = scmp.ne.s32.totalorder %s12179_s4, %s9085_s30  ;;  %p9089_p3 = scmp.lt.u32.totalorder %s9085_s30, %s12179_s4 }
  0x4b   :  { %p9091_p4 = pnand %p9089_p3, %p9086_p2 }
  0x4d   :  { %9094 = shalt.err (!%p9091_p4)
}
  0x4e   :  { %s9095_s26 = scalar_lea.vmem %s103_s2, 48  ;;  %s9099_s29 = scalar_lea.vmem %s103_s2, 64 }
  0x4f   :  { %p9096_p5 = scmp.ne.s32.totalorder %s103_s2, %s9095_s26  ;;  %p9100_p6 = scmp.lt.s32.totalorder %s103_s2, %s103_s2 }
  0x50   :  { %p9101_p7 = scmp.lt.s32.totalorder %s9099_s29, %s9095_s26 }
  0x52   :  { %p9102_p8 = por %p9101_p7, %p9100_p6 }
  0x54   :  { %p9103_p9 = pnand %p9102_p8, %p9096_p5 }
  0x56   :  { %9106 = shalt.err (!%p9103_p9)
}
  0x57   :  { %105 = dma.hbm_to_vmem [thread:$0]  %s12179_s4, 48, %s103_s2, [#allocation17]  }
  0x58   :  { %s9107_s27 = scalar_lea.hbm %s12129_s7, 3072 }
  0x59   :  { %p9108_p10 = scmp.ne.s32.totalorder %s12129_s7, %s9107_s27  ;;  %p9111_p11 = scmp.lt.u32.totalorder %s9107_s27, %s12129_s7 }
  0x5b   :  { %p9113_p12 = pnand %p9111_p11, %p9108_p10 }
  0x5d   :  { %9116 = shalt.err (!%p9113_p12)
}
  0x5e   :  { %s9117_s30 = scalar_lea.vmem %s9673_s28, 3072  ;;  %p9122_p0 = scmp.lt.s32.totalorder %s9673_s28, %s9673_s28 }
  0x5f   :  { %p9118_p13 = scmp.ne.s32.totalorder %s9673_s28, %s9117_s30  ;;  %p9123_p1 = scmp.lt.s32.totalorder %s9117_s30, %s9117_s30 }
  0x61   :  { %p9124_p2 = por %p9123_p1, %p9122_p0 }
  0x63   :  { %p9125_p3 = pnand %p9124_p2, %p9118_p13 }
  0x65   :  { %9128 = shalt.err (!%p9125_p3)
}
  0x66   :  { %127 = dma.hbm_to_vmem [thread:$0]  %s12129_s7, 3072, %s9673_s28, [#allocation20], %s9507_s25, %s9507_s25, %s9508_s3  }
  0x67   :  { %s9511_s5 = smov [#allocation22]   ;;  %s9512_s29 = smov [#allocation25]  }
  0x68   :  { %s146_s26 = sshll.u32 %s9511_s5, 4  ;;  %s165_s1 = sshll.u32 %s9512_s29, 4  ;;  %s147_s26 = int_to_ptr.vmem [resolvable:$true] %s146_s26  ;;  %s9707_s1 = int_to_ptr.vmem [resolvable:$true] %s165_s1 }
  0x69   :  { %s9129_s21 = scalar_lea.hbm %s12131_s9, 48 }
  0x6a   :  { %p9130_p4 = scmp.ne.s32.totalorder %s12131_s9, %s9129_s21  ;;  %p9133_p5 = scmp.lt.u32.totalorder %s9129_s21, %s12131_s9 }
  0x6c   :  { %p9135_p6 = pnand %p9133_p5, %p9130_p4 }
  0x6e   :  { %9138 = shalt.err (!%p9135_p6)
}
  0x6f   :  { %s9139_s7 = scalar_lea.vmem %s147_s26, 48  ;;  %s9143_s28 = scalar_lea.vmem %s147_s26, 64 }
  0x70   :  { %p9140_p7 = scmp.ne.s32.totalorder %s147_s26, %s9139_s7  ;;  %p9144_p8 = scmp.lt.s32.totalorder %s147_s26, %s147_s26 }
  0x71   :  { %p9145_p9 = scmp.lt.s32.totalorder %s9143_s28, %s9139_s7 }
  0x73   :  { %p9146_p10 = por %p9145_p9, %p9144_p8 }
  0x75   :  { %p9147_p11 = pnand %p9146_p10, %p9140_p7 }
  0x77   :  { %9150 = shalt.err (!%p9147_p11)
}
  0x78   :  { %149 = dma.hbm_to_vmem [thread:$0]  %s12131_s9, 48, %s147_s26, [#allocation23]  }
  0x79   :  { %s9151_s5 = scalar_lea.hbm %s12133_s11, 1024 }
  0x7a   :  { %p9152_p12 = scmp.ne.s32.totalorder %s12133_s11, %s9151_s5  ;;  %p9155_p13 = scmp.lt.u32.totalorder %s9151_s5, %s12133_s11 }
  0x7c   :  { %p9157_p0 = pnand %p9155_p13, %p9152_p12 }
  0x7e   :  { %9160 = shalt.err (!%p9157_p0)
}
  0x7f   :  { %s9161_s27 = scalar_lea.vmem %s9707_s1, 1024  ;;  %p9166_p2 = scmp.lt.s32.totalorder %s9707_s1, %s9707_s1 }
  0x80   :  { %p9162_p1 = scmp.ne.s32.totalorder %s9707_s1, %s9161_s27  ;;  %p9167_p3 = scmp.lt.s32.totalorder %s9161_s27, %s9161_s27 }
  0x82   :  { %p9168_p4 = por %p9167_p3, %p9166_p2 }
  0x84   :  { %p9169_p5 = pnand %p9168_p4, %p9162_p1 }
  0x86   :  { %9172 = shalt.err (!%p9169_p5)
}
  0x87   :  { %s12180_s9 = smov 4   ;;  %s12181_s26 = smov 64  }
  0x88   :  { %171 = dma.hbm_to_vmem [thread:$0]  %s12133_s11, 1024, %s9707_s1, [#allocation26], %s12181_s26, %s12181_s26, %s12180_s9  }
  0x89   :  { %s9513_s20 = smov [#allocation28]   ;;  %s9514_s28 = smov [#allocation31]  }
  0x8a   :  { %s187_s7 = sshll.u32 %s9513_s20, 4  ;;  %s209_s0 = sshll.u32 %s9514_s28, 4  ;;  %s188_s7 = int_to_ptr.vmem [resolvable:$true] %s187_s7  ;;  %s9741_s0 = int_to_ptr.vmem [resolvable:$true] %s209_s0 }
  0x8b   :  { %s9173_s4 = scalar_lea.hbm %s12135_s13, 1024 }
  0x8c   :  { %p9174_p6 = scmp.ne.s32.totalorder %s12135_s13, %s9173_s4  ;;  %p9177_p7 = scmp.lt.u32.totalorder %s9173_s4, %s12135_s13 }
  0x8e   :  { %p9179_p8 = pnand %p9177_p7, %p9174_p6 }
  0x90   :  { %9182 = shalt.err (!%p9179_p8)
}
  0x91   :  { %s9183_s11 = scalar_lea.vmem %s188_s7, 1024  ;;  %p9188_p10 = scmp.lt.s32.totalorder %s188_s7, %s188_s7 }
  0x92   :  { %p9184_p9 = scmp.ne.s32.totalorder %s188_s7, %s9183_s11  ;;  %p9189_p11 = scmp.lt.s32.totalorder %s9183_s11, %s9183_s11 }
  0x94   :  { %p9190_p12 = por %p9189_p11, %p9188_p10 }
  0x96   :  { %p9191_p13 = pnand %p9190_p12, %p9184_p9 }
  0x98   :  { %9194 = shalt.err (!%p9191_p13)
}
  0x99   :  { %193 = dma.hbm_to_vmem [thread:$0]  %s12135_s13, 1024, %s188_s7, [#allocation29], %s12181_s26, %s12181_s26, %s12180_s9  }
  0x9a   :  { %s9195_s23 = scalar_lea.hbm %s12137_s15, 1024 }
  0x9b   :  { %p9196_p0 = scmp.ne.s32.totalorder %s12137_s15, %s9195_s23  ;;  %p9199_p1 = scmp.lt.u32.totalorder %s9195_s23, %s12137_s15 }
  0x9d   :  { %p9201_p2 = pnand %p9199_p1, %p9196_p0 }
  0x9f   :  { %9204 = shalt.err (!%p9201_p2)
}
  0xa0   :  { %s9205_s4 = scalar_lea.vmem %s9741_s0, 1024  ;;  %p9210_p4 = scmp.lt.s32.totalorder %s9741_s0, %s9741_s0 }
  0xa1   :  { %p9206_p3 = scmp.ne.s32.totalorder %s9741_s0, %s9205_s4  ;;  %p9211_p5 = scmp.lt.s32.totalorder %s9205_s4, %s9205_s4 }
  0xa3   :  { %p9212_p6 = por %p9211_p5, %p9210_p4 }
  0xa5   :  { %p9213_p7 = pnand %p9212_p6, %p9206_p3 }
  0xa7   :  { %9216 = shalt.err (!%p9213_p7)
}
  0xa8   :  { %215 = dma.hbm_to_vmem [thread:$0]  %s12137_s15, 1024, %s9741_s0, [#allocation32], %s12181_s26, %s12181_s26, %s12180_s9  }
  0xa9   :  { %s9515_s5 = smov [#allocation7]   ;;  %s12182_s11 = sld [smem:[#allocation77_spill]] }
  0xaa   :  { %s43_s29 = sshll.u32 %s9515_s5, 4  ;;  %s44_s29 = int_to_ptr.vmem [resolvable:$true] %s43_s29 }
  0xaf   :  { %s9217_s1 = scalar_lea.hbm %s12182_s11, 2048 }
  0xb0   :  { %p9218_p8 = scmp.ne.s32.totalorder %s12182_s11, %s9217_s1  ;;  %p9221_p9 = scmp.lt.u32.totalorder %s9217_s1, %s12182_s11 }
  0xb2   :  { %p9223_p10 = pnand %p9221_p9, %p9218_p8 }
  0xb4   :  { %9226 = shalt.err (!%p9223_p10)
}
  0xb5   :  { %s9227_s20 = scalar_lea.vmem %s44_s29, 2048  ;;  %p9232_p12 = scmp.lt.s32.totalorder %s44_s29, %s44_s29 }
  0xb6   :  { %p9228_p11 = scmp.ne.s32.totalorder %s44_s29, %s9227_s20  ;;  %p9233_p13 = scmp.lt.s32.totalorder %s9227_s20, %s9227_s20 }
  0xb8   :  { %p9234_p0 = por %p9233_p13, %p9232_p12 }
  0xba   :  { %p9235_p1 = pnand %p9234_p0, %p9228_p11 }
  0xbc   :  { %9238 = shalt.err (!%p9235_p1)
}
  0xbd   :  { %s9516_s15 = smov 128   ;;  %s9517_s9 = smov 8  }
  0xbe   :  { %49 = dma.hbm_to_vmem [thread:$0]  %s12182_s11, 2048, %s44_s29, [#allocation8], %s9516_s15, %s9516_s15, %s9517_s9  }
  0xbf   :  { %s9518_s28 = smov [#allocation12]   ;;  %s9519_s2 = smov [#allocation15]  }
  0xc0   :  { %s68_s30 = sshll.u32 %s9518_s28, 4  ;;  %s89_s4 = sshll.u32 %s9519_s2, 4  ;;  %s69_s30 = int_to_ptr.vmem [resolvable:$true] %s68_s30  ;;  %s90_s4 = int_to_ptr.vmem [resolvable:$true] %s89_s4 }
  0xc1   :  { %s12183_s5 = sld [smem:[#allocation79_spill]] }
  0xc7   :  { %s9239_s24 = scalar_lea.hbm %s12183_s5, 16 }
  0xc8   :  { %p9240_p2 = scmp.ne.s32.totalorder %s12183_s5, %s9239_s24  ;;  %p9243_p3 = scmp.lt.u32.totalorder %s9239_s24, %s12183_s5 }
  0xca   :  { %p9245_p4 = pnand %p9243_p3, %p9240_p2 }
  0xcc   :  { %9248 = shalt.err (!%p9245_p4)
}
  0xcd   :  { %s9249_s29 = scalar_lea.vmem %s69_s30, 16  ;;  %s9253_s11 = scalar_lea.vmem %s69_s30, 32 }
  0xce   :  { %p9250_p5 = scmp.ne.s32.totalorder %s69_s30, %s9249_s29  ;;  %p9254_p6 = scmp.lt.s32.totalorder %s69_s30, %s69_s30 }
  0xcf   :  { %p9255_p7 = scmp.lt.s32.totalorder %s9253_s11, %s9249_s29 }
  0xd1   :  { %p9256_p8 = por %p9255_p7, %p9254_p6 }
  0xd3   :  { %p9257_p9 = pnand %p9256_p8, %p9250_p5 }
  0xd5   :  { %9260 = shalt.err (!%p9257_p9)
}
  0xd6   :  { %71 = dma.hbm_to_vmem [thread:$0]  %s12183_s5, 16, %s69_s30, [#allocation11]  }
  0xd7   :  { %s12184_s0 = sld [smem:[#allocation81_spill]] }
  0xdd   :  { %s9261_s28 = scalar_lea.hbm %s12184_s0, 3072 }
  0xde   :  { %p9262_p10 = scmp.ne.s32.totalorder %s12184_s0, %s9261_s28  ;;  %p9265_p11 = scmp.lt.u32.totalorder %s9261_s28, %s12184_s0 }
  0xe0   :  { %p9267_p12 = pnand %p9265_p11, %p9262_p10 }
  0xe2   :  { %9270 = shalt.err (!%p9267_p12)
}
  0xe3   :  { %s9271_s22 = scalar_lea.vmem %s90_s4, 3072  ;;  %p9276_p0 = scmp.lt.s32.totalorder %s90_s4, %s90_s4 }
  0xe4   :  { %p9272_p13 = scmp.ne.s32.totalorder %s90_s4, %s9271_s22  ;;  %p9277_p1 = scmp.lt.s32.totalorder %s9271_s22, %s9271_s22 }
  0xe6   :  { %p9278_p2 = por %p9277_p1, %p9276_p0 }
  0xe8   :  { %p9279_p3 = pnand %p9278_p2, %p9272_p13 }
  0xea   :  { %9282 = shalt.err (!%p9279_p3)
}
  0xeb   :  { %95 = dma.hbm_to_vmem [thread:$0]  %s12184_s0, 3072, %s90_s4, [#allocation14], %s9507_s25, %s9507_s25, %s9508_s3  }
  0xec   :  { %s9520_s1 = smov [#allocation18]   ;;  %s9521_s27 = smov [#allocation21]  }
  0xed   :  { %s112_s21 = sshll.u32 %s9520_s1, 4  ;;  %s133_s29 = sshll.u32 %s9521_s27, 4  ;;  %s113_s21 = int_to_ptr.vmem [resolvable:$true] %s112_s21  ;;  %s134_s29 = int_to_ptr.vmem [resolvable:$true] %s133_s29 }
  0xee   :  { %s9283_s23 = scalar_lea.hbm %s12128_s6, 16 }
  0xef   :  { %p9284_p4 = scmp.ne.s32.totalorder %s12128_s6, %s9283_s23  ;;  %p9287_p5 = scmp.lt.u32.totalorder %s9283_s23, %s12128_s6 }
  0xf1   :  { %p9289_p6 = pnand %p9287_p5, %p9284_p4 }
  0xf3   :  { %9292 = shalt.err (!%p9289_p6)
}
  0xf4   :  { %s9293_s4 = scalar_lea.vmem %s113_s21, 16  ;;  %s9297_s0 = scalar_lea.vmem %s113_s21, 32 }
  0xf5   :  { %p9294_p7 = scmp.ne.s32.totalorder %s113_s21, %s9293_s4  ;;  %p9298_p8 = scmp.lt.s32.totalorder %s113_s21, %s113_s21 }
  0xf6   :  { %p9299_p9 = scmp.lt.s32.totalorder %s9297_s0, %s9293_s4 }
  0xf8   :  { %p9300_p10 = por %p9299_p9, %p9298_p8 }
  0xfa   :  { %p9301_p11 = pnand %p9300_p10, %p9294_p7 }
  0xfc   :  { %9304 = shalt.err (!%p9301_p11)
}
  0xfd   :  { %115 = dma.hbm_to_vmem [thread:$0]  %s12128_s6, 16, %s113_s21, [#allocation17]  }
  0xfe   :  { %s9305_s30 = scalar_lea.hbm %s12130_s8, 3072 }
  0xff   :  { %p9306_p12 = scmp.ne.s32.totalorder %s12130_s8, %s9305_s30  ;;  %p9309_p13 = scmp.lt.u32.totalorder %s9305_s30, %s12130_s8 }
 0x101   :  { %p9311_p0 = pnand %p9309_p13, %p9306_p12 }
 0x103   :  { %9314 = shalt.err (!%p9311_p0)
}
 0x104   :  { %s9315_s19 = scalar_lea.vmem %s134_s29, 3072  ;;  %p9320_p2 = scmp.lt.s32.totalorder %s134_s29, %s134_s29 }
 0x105   :  { %p9316_p1 = scmp.ne.s32.totalorder %s134_s29, %s9315_s19  ;;  %p9321_p3 = scmp.lt.s32.totalorder %s9315_s19, %s9315_s19 }
 0x107   :  { %p9322_p4 = por %p9321_p3, %p9320_p2 }
 0x109   :  { %p9323_p5 = pnand %p9322_p4, %p9316_p1 }
 0x10b   :  { %9326 = shalt.err (!%p9323_p5)
}
 0x10c   :  { %139 = dma.hbm_to_vmem [thread:$0]  %s12130_s8, 3072, %s134_s29, [#allocation20], %s9507_s25, %s9507_s25, %s9508_s3  }
 0x10d   :  { %s9522_s23 = smov [#allocation24]   ;;  %s9523_s26 = smov [#allocation27]  }
 0x10e   :  { %s156_s20 = sshll.u32 %s9522_s23, 4  ;;  %s178_s28 = sshll.u32 %s9523_s26, 4  ;;  %s157_s20 = int_to_ptr.vmem [resolvable:$true] %s156_s20  ;;  %s179_s28 = int_to_ptr.vmem [resolvable:$true] %s178_s28 }
 0x10f   :  { %s9327_s0 = scalar_lea.hbm %s12132_s10, 16 }
 0x110   :  { %p9328_p6 = scmp.ne.s32.totalorder %s12132_s10, %s9327_s0  ;;  %p9331_p7 = scmp.lt.u32.totalorder %s9327_s0, %s12132_s10 }
 0x112   :  { %p9333_p8 = pnand %p9331_p7, %p9328_p6 }
 0x114   :  { %9336 = shalt.err (!%p9333_p8)
}
 0x115   :  { %s9337_s8 = scalar_lea.vmem %s157_s20, 16  ;;  %s9341_s25 = scalar_lea.vmem %s157_s20, 32 }
 0x116   :  { %p9338_p9 = scmp.ne.s32.totalorder %s157_s20, %s9337_s8  ;;  %p9342_p10 = scmp.lt.s32.totalorder %s157_s20, %s157_s20 }
 0x117   :  { %p9343_p11 = scmp.lt.s32.totalorder %s9341_s25, %s9337_s8 }
 0x119   :  { %p9344_p12 = por %p9343_p11, %p9342_p10 }
 0x11b   :  { %p9345_p13 = pnand %p9344_p12, %p9338_p9 }
 0x11d   :  { %9348 = shalt.err (!%p9345_p13)
}
 0x11e   :  { %159 = dma.hbm_to_vmem [thread:$0]  %s12132_s10, 16, %s157_s20, [#allocation23]  }
 0x11f   :  { %s9349_s1 = scalar_lea.hbm %s12134_s12, 16 }
 0x120   :  { %p9350_p0 = scmp.ne.s32.totalorder %s12134_s12, %s9349_s1  ;;  %p9353_p1 = scmp.lt.u32.totalorder %s9349_s1, %s12134_s12 }
 0x122   :  { %p9355_p2 = pnand %p9353_p1, %p9350_p0 }
 0x124   :  { %9358 = shalt.err (!%p9355_p2)
}
 0x125   :  { %s9359_s21 = scalar_lea.vmem %s179_s28, 16  ;;  %s9363_s23 = scalar_lea.vmem %s179_s28, 32 }
 0x126   :  { %p9360_p3 = scmp.ne.s32.totalorder %s179_s28, %s9359_s21  ;;  %p9364_p4 = scmp.lt.s32.totalorder %s179_s28, %s179_s28 }
 0x127   :  { %p9365_p5 = scmp.lt.s32.totalorder %s9363_s23, %s9359_s21 }
 0x129   :  { %p9366_p6 = por %p9365_p5, %p9364_p4 }
 0x12b   :  { %p9367_p7 = pnand %p9366_p6, %p9360_p3 }
 0x12d   :  { %9370 = shalt.err (!%p9367_p7)
}
 0x12e   :  { %181 = dma.hbm_to_vmem [thread:$0]  %s12134_s12, 16, %s179_s28, [#allocation26]  }
 0x12f   :  { %s9524_s26 = smov [#allocation30]   ;;  %s9525_s4 = smov [#allocation33]  }
 0x130   :  { %s200_s2 = sshll.u32 %s9524_s26, 4  ;;  %s222_s0 = sshll.u32 %s9525_s4, 4  ;;  %s201_s2 = int_to_ptr.vmem [resolvable:$true] %s200_s2  ;;  %s223_s0 = int_to_ptr.vmem [resolvable:$true] %s222_s0 }
 0x131   :  { %s9371_s24 = scalar_lea.hbm %s12136_s14, 16 }
 0x132   :  { %p9372_p8 = scmp.ne.s32.totalorder %s12136_s14, %s9371_s24  ;;  %p9375_p9 = scmp.lt.u32.totalorder %s9371_s24, %s12136_s14 }
 0x134   :  { %p9377_p10 = pnand %p9375_p9, %p9372_p8 }
 0x136   :  { %9380 = shalt.err (!%p9377_p10)
}
 0x137   :  { %s9381_s12 = scalar_lea.vmem %s201_s2, 16  ;;  %s9385_s28 = scalar_lea.vmem %s201_s2, 32 }
 0x138   :  { %p9382_p11 = scmp.ne.s32.totalorder %s201_s2, %s9381_s12  ;;  %p9386_p12 = scmp.lt.s32.totalorder %s201_s2, %s201_s2 }
 0x139   :  { %p9387_p13 = scmp.lt.s32.totalorder %s9385_s28, %s9381_s12 }
 0x13b   :  { %p9388_p0 = por %p9387_p13, %p9386_p12 }
 0x13d   :  { %p9389_p1 = pnand %p9388_p0, %p9382_p11 }
 0x13f   :  { %9392 = shalt.err (!%p9389_p1)
}
 0x140   :  { %203 = dma.hbm_to_vmem [thread:$0]  %s12136_s14, 16, %s201_s2, [#allocation29]  }
 0x141   :  { %s9393_s27 = scalar_lea.hbm %s12138_s16, 16 }
 0x142   :  { %p9394_p2 = scmp.ne.s32.totalorder %s12138_s16, %s9393_s27  ;;  %p9397_p3 = scmp.lt.u32.totalorder %s9393_s27, %s12138_s16 }
 0x144   :  { %p9399_p4 = pnand %p9397_p3, %p9394_p2 }
 0x146   :  { %9402 = shalt.err (!%p9399_p4)
}
 0x147   :  { %s9403_s23 = scalar_lea.vmem %s223_s0, 16  ;;  %s9407_s10 = scalar_lea.vmem %s223_s0, 32 }
 0x148   :  { %p9404_p5 = scmp.ne.s32.totalorder %s223_s0, %s9403_s23  ;;  %p9408_p6 = scmp.lt.s32.totalorder %s223_s0, %s223_s0 }
 0x149   :  { %p9409_p7 = scmp.lt.s32.totalorder %s9407_s10, %s9403_s23 }
 0x14b   :  { %p9410_p8 = por %p9409_p7, %p9408_p6 }
 0x14d   :  { %p9411_p9 = pnand %p9410_p8, %p9404_p5 }
 0x14f   :  { %9414 = shalt.err (!%p9411_p9)
}
 0x150   :  { %225 = dma.hbm_to_vmem [thread:$0]  %s12138_s16, 16, %s223_s0, [#allocation32]  }
 0x151   :  { %9481 = dma.done.wait [#allocation8], 2048  }
 0x152   :  { %9482 = vsyncadd [#allocation8], 4294965248 }
 0x153   :  { %9483 = dma.done.wait [#allocation11], 1040  }
 0x154   :  { %9484 = vsyncadd [#allocation11], 4294966256 }
 0x155   :  { %9485 = dma.done.wait [#allocation14], 6144  }
 0x156   :  { %9486 = vsyncadd [#allocation14], 4294961152 }
 0x157   :  { %9487 = dma.done.wait [#allocation17], 64  }
 0x158   :  { %9488 = vsyncadd [#allocation17], 4294967232 }
 0x159   :  { %9489 = dma.done.wait [#allocation20], 6144  }
 0x15a   :  { %9490 = vsyncadd [#allocation20], 4294961152 }
 0x15b   :  { %9491 = dma.done.wait [#allocation23], 64  }
 0x15c   :  { %9492 = vsyncadd [#allocation23], 4294967232 }
 0x15d   :  { %9493 = dma.done.wait [#allocation26], 1040  }
 0x15e   :  { %9494 = vsyncadd [#allocation26], 4294966256 }
 0x15f   :  { %9495 = dma.done.wait [#allocation29], 1040  }
 0x160   :  { %9496 = vsyncadd [#allocation29], 4294966256 }
 0x161   :  { %9497 = dma.done.wait [#allocation32], 1040  }
 0x162   :  { %9498 = vsyncadd [#allocation32], 4294966256  ;;  %v8237_v0 = vld [vmem:[#allocation10] sm:$0xff]   ;;  %v8238_v1 = vld [vmem:[#allocation10 + $0x8] sm:$0xff]   ;;  %v12162_v56 = vmov 0   ;;  %v12164_v58 = vmov 0.0  }
 0x163   :  { %7311 = vmatprep.subr.bf16.mxu0 %v8237_v0  ;;  %v8239_v2 = vld [vmem:[#allocation10 + $0x10] sm:$0xff]   ;;  %v8240_v3 = vld [vmem:[#allocation10 + $0x18] sm:$0xff]   ;;  %v288_v4 = vld [vmem:[#allocation7] sm:$0xff]  ;;  %713 = vmatprep.mubr.bf16.mxu1 %v12162_v56  ;;  %vm9529_vm0 = vmmov 0  }
 0x164   :  { %7312 = vmatpush3.bf16.msra.mxu0 %v8237_v0  ;;  %v289_v5 = vld [vmem:[#allocation7 + $0x8] sm:$0xff]  ;;  %v8241_v7 = vld [vmem:[#allocation10 + $0x20] sm:$0xff]   ;;  %v8243_v14 = vld [vmem:[#allocation10 + $0x30] sm:$0xff]  }
 0x165   :  { %7313 = vmatprep.subr.bf16.mxu0 %v8238_v1  ;;  %v304_v6 = vpack.c.bf16 %v289_v5, %v288_v4  ;;  %v8245_v8 = vld [vmem:[#allocation13 + $0x4] ss:$12 sps:$4 sm:$0xff]   ;;  %v8247_v9 = vld [vmem:[#allocation13] ss:$12 sps:$4 sm:$0xff]   ;;  %v8249_v11 = vld [vmem:[#allocation13 + $0x1c] ss:$12 sps:$4 sm:$0xff]  }
 0x166   :  { %v8242_v10 = vld [vmem:[#allocation10 + $0x28] sm:$0xff]   ;;  %681 = vmatprep.subr.bf16.mxu1 %v8245_v8  ;;  %v8253_v13 = vld [vmem:[#allocation13 + $0x34] ss:$12 sps:$4 sm:$0xff]   ;;  %v8255_v15 = vld [vmem:[#allocation13 + $0x30] ss:$12 sps:$4 sm:$0xff]  }
 0x167   :  { %7327 = vmatprep.mubr.bf16.mxu0 %v304_v6  ;;  %682 = vmatpush1.bf16.msra.mxu1 %v8247_v9  ;;  %v8251_v12 = vld [vmem:[#allocation13 + $0x18] ss:$12 sps:$4 sm:$0xff]   ;;  %v290_v18 = vld [vmem:[#allocation7 + $0x10] sm:$0xff]  ;;  %v8265_v26 = vld [vmem:[#allocation13 + $0x7c] ss:$12 sps:$4 sm:$0xff]  }
 0x168   :  { %7314 = vmatpush3.bf16.msra.mxu0 %v8238_v1  ;;  %683 = vmatprep.subr.bf16.mxu1 %v8249_v11  ;;  %v8257_v16 = vld [vmem:[#allocation13 + $0x4c] ss:$12 sps:$4 sm:$0xff]   ;;  %v8259_v20 = vld [vmem:[#allocation13 + $0x48] ss:$12 sps:$4 sm:$0xff]   ;;  %v292_v21 = vld [vmem:[#allocation7 + $0x20] sm:$0xff] }
 0x169   :  { %7315 = vmatprep.subr.bf16.mxu0 %v8239_v2  ;;  %v8244_v17 = vld [vmem:[#allocation10 + $0x38] sm:$0xff]   ;;  %v293_v22 = vld [vmem:[#allocation7 + $0x28] sm:$0xff]  ;;  %v294_v31 = vld [vmem:[#allocation7 + $0x30] sm:$0xff] }
 0x16a   :  { %v291_v19 = vld [vmem:[#allocation7 + $0x18] sm:$0xff]  ;;  %v8261_v24 = vld [vmem:[#allocation13 + $0x64] ss:$12 sps:$4 sm:$0xff]   ;;  %v8263_v25 = vld [vmem:[#allocation13 + $0x60] ss:$12 sps:$4 sm:$0xff]   ;;  %v306_v29 = vpack.c.bf16 %v293_v22, %v292_v21 }
 0x16b   :  { %684 = vmatpush1.bf16.msra.mxu1 %v8251_v12  ;;  %v8248_v23 = vld [vmem:[#allocation13 + $0x8] ss:$12 sps:$4 sm:$0xff]   ;;  %v305_v27 = vpack.c.bf16 %v291_v19, %v290_v18  ;;  %v8252_v28 = vld [vmem:[#allocation13 + $0x20] ss:$12 sps:$4 sm:$0xff]   ;;  %v8267_v30 = vld [vmem:[#allocation13 + $0x78] ss:$12 sps:$4 sm:$0xff]  }
 0x16c   :  { %7316 = vmatpush3.bf16.msra.mxu0 %v8239_v2  ;;  %685 = vmatprep.subr.bf16.mxu1 %v8253_v13  ;;  %v295_v32 = vld [vmem:[#allocation7 + $0x38] sm:$0xff]  ;;  %v296_v33 = vld [vmem:[#allocation7 + $0x40] sm:$0xff]  ;;  %v297_v34 = vld [vmem:[#allocation7 + $0x48] sm:$0xff] }
 0x16d   :  { %7317 = vmatprep.subr.bf16.mxu0 %v8240_v3  ;;  %v8256_v35 = vld [vmem:[#allocation13 + $0x38] ss:$12 sps:$4 sm:$0xff]   ;;  %v307_v36 = vpack.c.bf16 %v295_v32, %v294_v31  ;;  %v8260_v37 = vld [vmem:[#allocation13 + $0x50] ss:$12 sps:$4 sm:$0xff]   ;;  %v308_v38 = vpack.c.bf16 %v297_v34, %v296_v33  ;;  %v8264_v43 = vld [vmem:[#allocation13 + $0x68] ss:$12 sps:$4 sm:$0xff]  }
 0x16e   :  { %v298_v39 = vld [vmem:[#allocation7 + $0x50] sm:$0xff]  ;;  %v299_v40 = vld [vmem:[#allocation7 + $0x58] sm:$0xff]  ;;  %v300_v41 = vld [vmem:[#allocation7 + $0x60] sm:$0xff] }
 0x16f   :  { %686 = vmatpush1.bf16.msra.mxu1 %v8255_v15  ;;  %v301_v42 = vld [vmem:[#allocation7 + $0x68] sm:$0xff]  ;;  %v309_v44 = vpack.c.bf16 %v299_v40, %v298_v39  ;;  %v302_v47 = vld [vmem:[#allocation7 + $0x70] sm:$0xff]  ;;  %v303_v48 = vld [vmem:[#allocation7 + $0x78] sm:$0xff] }
 0x170   :  { %7318 = vmatpush3.bf16.msra.mxu0 %v8240_v3  ;;  %687 = vmatprep.subr.bf16.mxu1 %v8257_v16  ;;  %v8268_v45 = vld [vmem:[#allocation13 + $0x80] ss:$12 sps:$4 sm:$0xff]   ;;  %v310_v46 = vpack.c.bf16 %v301_v42, %v300_v41  ;;  %v311_v49 = vpack.c.bf16 %v303_v48, %v302_v47  ;;  %v8271_v51 = vld [vmem:[#allocation13 + $0x90] ss:$12 sps:$4 sm:$0xff]   ;;  %v8272_v52 = vld [vmem:[#allocation13 + $0x98] ss:$12 sps:$4 sm:$0xff]  }
 0x171   :  { %7319 = vmatprep.subr.bf16.mxu0 %v8241_v7  ;;  %v8269_v50 = vld [vmem:[#allocation13 + $0x94] ss:$12 sps:$4 sm:$0xff]   ;;  %v8273_v53 = vld [vmem:[#allocation13 + $0xac] ss:$12 sps:$4 sm:$0xff]   ;;  %v8276_v55 = vld [vmem:[#allocation13 + $0xb0] ss:$12 sps:$4 sm:$0xff]  }
 0x172   :  { %v8275_v54 = vld [vmem:[#allocation13 + $0xa8] ss:$12 sps:$4 sm:$0xff]   ;;  %v9896_v57 = vld [vmem:[#allocation15 + $0x4] ss:$12 sps:$4 sm:$0xff]   ;;  %v9900_v59 = vld [vmem:[#allocation12] ss:$0 sm:$0xff] }
 0x173   :  { %688 = vmatpush1.bf16.msra.mxu1 %v8259_v20  ;;  %v9906_v9 = vld [vmem:[#allocation15 + $0x8] ss:$12 sps:$4 sm:$0xff]   ;;  %v9908_v12 = vld [vmem:[#allocation15] ss:$12 sps:$4 sm:$0xff]   ;;  %v9931_v31 = vld [vmem:[#allocation15 + $0x30] ss:$12 sps:$4 sm:$0xff]  }
 0x174   :  { %7320 = vmatpush3.bf16.msra.mxu0 %v8241_v7  ;;  %689 = vmatprep.subr.bf16.mxu1 %v8261_v24  ;;  %v9911_v15 = vld [vmem:[#allocation15 + $0x1c] ss:$12 sps:$4 sm:$0xff]   ;;  %v9916_v21 = vld [vmem:[#allocation15 + $0x20] ss:$12 sps:$4 sm:$0xff]   ;;  %v9920_v24 = vld [vmem:[#allocation15 + $0x18] ss:$12 sps:$4 sm:$0xff]  }
 0x175   :  { %7321 = vmatprep.subr.bf16.mxu0 %v8242_v10  ;;  %v9934_v32 = vld [vmem:[#allocation15 + $0x38] ss:$12 sps:$4 sm:$0xff]  }
 0x177   :  { %690 = vmatpush1.bf16.msra.mxu1 %v8263_v25 }
 0x178   :  { %7322 = vmatpush3.bf16.msra.mxu0 %v8242_v10  ;;  %691 = vmatprep.subr.bf16.mxu1 %v8265_v26  ;;  %v9925_v26 = vld [vmem:[#allocation15 + $0x34] ss:$12 sps:$4 sm:$0xff]  }
 0x179   :  { %7323 = vmatprep.subr.bf16.mxu0 %v8243_v14 }
 0x17b   :  { %692 = vmatpush1.bf16.msra.mxu1 %v8267_v30 }
 0x17c   :  { %7324 = vmatpush3.bf16.msra.mxu0 %v8243_v14  ;;  %693 = vmatprep.subr.bf16.mxu1 %v8269_v50 }
 0x17d   :  { %7325 = vmatprep.subr.bf16.mxu0 %v8244_v17 }
 0x17f   :  { %694 = vmatpush1.bf16.msra.mxu1 %v8271_v51  ;;  %v9958_v51 = vld [vmem:[#allocation15 + $0x60] ss:$12 sps:$4 sm:$0xff]  }
 0x180   :  { %7326 = vmatpush3.bf16.msra.mxu0 %v8244_v17  ;;  %695 = vmatprep.subr.bf16.mxu1 %v8273_v53 }
 0x181   :  { %7343 = vmatprep.subr.bf16.mxu0 %v8248_v23 }
 0x183   :  { %7328 = vmatmul.mubr.bf16.vlgmr.msra.gmra.mrb[0].mxu0 %v305_v27  ;;  %696 = vmatpush1.bf16.msra.mxu1 %v8275_v54 }
 0x184   :  { %7331 = vmatprep.mubr.bf16.mxu0 %v306_v29  ;;  %7344 = vmatpush3.bf16.msra.mxu0 %v8248_v23 }
 0x185   :  { %7345 = vmatprep.subr.bf16.mxu0 %v8252_v28  ;;  %7375 = vmatprep.subr.bf16.mxu1 %v12164_v58 }
 0x188   :  { %7346 = vmatpush3.bf16.msra.mxu0 %v8252_v28 }
 0x189   :  { %7347 = vmatprep.subr.bf16.mxu0 %v8256_v35 }
 0x18b   :  { %7332 = vmatmul.mubr.bf16.gmra.mrb[4].mxu0 %v307_v36 }
 0x18c   :  { %7335 = vmatprep.mubr.bf16.mxu0 %v308_v38  ;;  %7348 = vmatpush3.bf16.msra.mxu0 %v8256_v35  ;;  %v9938_v35 = vld [vmem:[#allocation15 + $0x4c] ss:$12 sps:$4 sm:$0xff]  }
 0x18d   :  { %7349 = vmatprep.subr.bf16.mxu0 %v8260_v37 }
 0x190   :  { %7350 = vmatpush3.bf16.msra.mxu0 %v8260_v37 }
 0x191   :  { %7351 = vmatprep.subr.bf16.mxu0 %v8264_v43 }
 0x193   :  { %7336 = vmatmul.mubr.bf16.gmra.mrb[8].mxu0 %v309_v44  ;;  %v9949_v44 = vld [vmem:[#allocation15 + $0x50] ss:$12 sps:$4 sm:$0xff]  }
 0x194   :  { %7339 = vmatprep.mubr.bf16.mxu0 %v310_v46  ;;  %7352 = vmatpush3.bf16.msra.mxu0 %v8264_v43  ;;  %v9946_v43 = vld [vmem:[#allocation15 + $0x48] ss:$12 sps:$4 sm:$0xff]   ;;  %v9952_v46 = vld [vmem:[#allocation15 + $0x64] ss:$12 sps:$4 sm:$0xff]  }
 0x195   :  { %7353 = vmatprep.subr.bf16.mxu0 %v8268_v45 }
 0x198   :  { %7354 = vmatpush3.bf16.msra.mxu0 %v8268_v45 }
 0x199   :  { %7355 = vmatprep.subr.bf16.mxu0 %v8272_v52 }
 0x19b   :  { %7340 = vmatmul.mubr.bf16.gmra.mrb[12].mxu0 %v311_v49 }
 0x19c   :  { %7356 = vmatpush3.bf16.msra.mxu0 %v8272_v52  ;;  %v9961_v52 = vld [vmem:[#allocation15 + $0x68] ss:$12 sps:$4 sm:$0xff]  }
 0x19d   :  { %7357 = vmatprep.subr.bf16.mxu0 %v8276_v55 }
 0x1a0   :  { %7358 = vmatpush3.bf16.msra.mxu0 %v8276_v55  ;;  %v9965_v55 = vld [vmem:[#allocation15 + $0x7c] ss:$12 sps:$4 sm:$0xff]  }
 0x1a1   :  { %1111 = vmatprep.subr.bf16.mxu0 %v9896_v57 }
 0x256   :  { %v7329_v60 = vpop.f32.mrb[0].mxu0 }
 0x257   :  { %v426_v61 = vadd.f32 %v7329_v60, %v9900_v59  ;;  %v417_v62 = vpop.f32.mrb[1].mxu0 }
 0x258   :  { %v418_v63 = vadd.f32 %v9900_v59, %v417_v62  ;;  %v7330_v0 = vpop.f32.mrb[2].mxu0 }
 0x259   :  { %v429_v1 = vadd.f32 %v7330_v0, %v9900_v59  ;;  %v420_v2 = vpop.f32.mrb[3].mxu0  ;;  %v482_v4 = vmax.f32 %v426_v61, 0.0 }
 0x25a   :  { %v421_v3 = vadd.f32 %v9900_v59, %v420_v2  ;;  %v480_v6 = vmax.f32 %v418_v63, 0.0 }
 0x25b   :  { %v483_v5 = vmax.f32 %v429_v1, 0.0 }
 0x25c   :  { %v481_v7 = vmax.f32 %v421_v3, 0.0  ;;  %v9974_v3 = vld [vmem:[#allocation15 + $0x78] ss:$12 sps:$4 sm:$0xff]  }
 0x25d   :  { %v497_v8 = vpack.c.bf16 %v483_v5, %v482_v4  ;;  %v9977_v4 = vld [vmem:[#allocation15 + $0x80] ss:$12 sps:$4 sm:$0xff]  }
 0x25e   :  { %v496_v10 = vpack.c.bf16 %v481_v7, %v480_v6  ;;  %v7333_v11 = vpop.f32.mrb[4].mxu0  ;;  %v9980_v6 = vld [vmem:[#allocation15 + $0x94] ss:$12 sps:$4 sm:$0xff]  }
 0x25f   :  { %v442_v13 = vadd.f32 %v7333_v11, %v9900_v59  ;;  %v433_v14 = vpop.f32.mrb[5].mxu0  ;;  %v9988_v11 = vld [vmem:[#allocation15 + $0xac] ss:$12 sps:$4 sm:$0xff]  }
 0x260   :  { %v434_v16 = vadd.f32 %v9900_v59, %v433_v14  ;;  %v7334_v17 = vpop.f32.mrb[6].mxu0  ;;  %714 = vmatmul.mubr.bf16.vlgmr.msra.gmra.mrb[0].mxu1 %v496_v10  ;;  %7359 = vmatprep.mubr.bf16.mxu0 %v496_v10  ;;  %v9996_v14 = vld [vmem:[#allocation15 + $0xa8] ss:$12 sps:$4 sm:$0xff]  }
 0x261   :  { %v486_v18 = vmax.f32 %v442_v13, 0.0  ;;  %v445_v19 = vadd.f32 %v7334_v17, %v9900_v59  ;;  %7376 = vmatpush3.bf16.msra.mxu1 %v9906_v9  ;;  %v436_v20 = vpop.f32.mrb[7].mxu0  ;;  %7360 = vmatmul.mubr.bf16.vlgmr.msra.gmra.mrb[16].mxu0 %v497_v8  ;;  %v9991_v13 = vld [vmem:[#allocation15 + $0x98] ss:$12 sps:$4 sm:$0xff]   ;;  %v12160_v17 = vmov 0.0|0.0  }
 0x262   :  { %v484_v22 = vmax.f32 %v434_v16, 0.0  ;;  %v437_v23 = vadd.f32 %v9900_v59, %v436_v20  ;;  %1112 = vmatpush1.bf16.msra.mxu0 %v9908_v12  ;;  %723 = vmatprep.mubr.bf16.mxu1 %v12162_v56  ;;  %v10001_v16 = vld [vmem:[#allocation15 + $0xb0] ss:$12 sps:$4 sm:$0xff]  }
 0x263   :  { %v487_v25 = vmax.f32 %v445_v19, 0.0  ;;  %1113 = vmatprep.subr.bf16.mxu0 %v9911_v15  ;;  %7377 = vmatprep.subr.bf16.mxu1 %v12164_v58 }
 0x264   :  { %v485_v27 = vmax.f32 %v437_v23, 0.0 }
 0x265   :  { %v9927_v28 = vpack.c.bf16 %v487_v25, %v486_v18  ;;  %7378 = vmatpush3.bf16.msra.mxu1 %v9916_v21  ;;  %v538_v18 = vlaneseq }
 0x266   :  { %v498_v29 = vpack.c.bf16 %v485_v27, %v484_v22  ;;  %v7337_v30 = vpop.f32.mrb[8].mxu0  ;;  %1114 = vmatpush1.bf16.msra.mxu0 %v9920_v24  ;;  %7379 = vmatprep.subr.bf16.mxu1 %v12164_v58  ;;  %v536_v22 = vld [vmem:[#allocation16] sm:$0x7] }
 0x267   :  { %v458_v33 = vadd.f32 %v7337_v30, %v9900_v59  ;;  %v449_v34 = vpop.f32.mrb[9].mxu0  ;;  %1115 = vmatprep.subr.bf16.mxu0 %v9925_v26  ;;  %v10051_v19 = vshrl.u32 %v538_v18, 7 }
 0x268   :  { %v450_v36 = vadd.f32 %v9900_v59, %v449_v34  ;;  %v7338_v37 = vpop.f32.mrb[10].mxu0  ;;  %724 = vmatmul.mubr.bf16.gmra.mrb[4].mxu1 %v497_v8  ;;  %7363 = vmatprep.mubr.bf16.mxu0 %v498_v29 }
 0x269   :  { %v490_v38 = vmax.f32 %v458_v33, 0.0  ;;  %v461_v39 = vadd.f32 %v7338_v37, %v9900_v59  ;;  %v452_v40 = vpop.f32.mrb[11].mxu0  ;;  %7364 = vmatmul.mubr.bf16.gmra.mrb[20].mxu0 %v9927_v28  ;;  %733 = vmatprep.mubr.bf16.mxu1 %v12162_v56  ;;  %12185 = vst [vmem:[#allocation49_spill] sm:$0xff] %v10051_v19  ;;  %v12157_v20 = vsub.s32 2, %v10051_v19  ;;  %v12159_v23 = vsub.s32 0, %v10051_v19 }
 0x26a   :  { %v488_v41 = vmax.f32 %v450_v36, 0.0  ;;  %v453_v42 = vadd.f32 %v9900_v59, %v452_v40  ;;  %1116 = vmatpush1.bf16.msra.mxu0 %v9931_v31  ;;  %7380 = vmatpush3.bf16.msra.mxu1 %v9934_v32  ;;  %v12158_v25 = vsub.s32 1, %v10051_v19 }
 0x26b   :  { %v491_v45 = vmax.f32 %v461_v39, 0.0  ;;  %1117 = vmatprep.subr.bf16.mxu0 %v9938_v35  ;;  %7381 = vmatprep.subr.bf16.mxu1 %v12164_v58  ;;  %v10058_v27 = vrot.slane %v536_v22, %v12157_v20 }
 0x26c   :  { %v489_v47 = vmax.f32 %v453_v42, 0.0  ;;  %v10070_v34 = vrot.slane %v536_v22, %v12158_v25 }
 0x26d   :  { %v9955_v48 = vpack.c.bf16 %v491_v45, %v490_v38 }
 0x26e   :  { %v500_v49 = vpack.c.bf16 %v489_v47, %v488_v41  ;;  %v7341_v50 = vpop.f32.mrb[12].mxu0  ;;  %1118 = vmatpush1.bf16.msra.mxu0 %v9946_v43  ;;  %7382 = vmatpush3.bf16.msra.mxu1 %v9949_v44 }
 0x26f   :  { %v474_v53 = vadd.f32 %v7341_v50, %v9900_v59  ;;  %v465_v54 = vpop.f32.mrb[13].mxu0  ;;  %1119 = vmatprep.subr.bf16.mxu0 %v9952_v46  ;;  %7383 = vmatprep.subr.bf16.mxu1 %v12164_v58 }
 0x270   :  { %v466_v60 = vadd.f32 %v9900_v59, %v465_v54  ;;  %v7342_v61 = vpop.f32.mrb[14].mxu0  ;;  %734 = vmatmul.mubr.bf16.gmra.mrb[8].mxu1 %v498_v29  ;;  %7367 = vmatprep.mubr.bf16.mxu0 %v500_v49  ;;  %v10064_v29 = vrot.slane %v536_v22, %v12159_v23 }
 0x271   :  { %v494_v62 = vmax.f32 %v474_v53, 0.0  ;;  %v477_v63 = vadd.f32 %v7342_v61, %v9900_v59  ;;  %v468_v0 = vpop.f32.mrb[15].mxu0  ;;  %7368 = vmatmul.mubr.bf16.gmra.mrb[24].mxu0 %v9955_v48  ;;  %743 = vmatprep.mubr.bf16.mxu1 %v12162_v56 }
 0x272   :  { %v492_v1 = vmax.f32 %v466_v60, 0.0  ;;  %v469_v2 = vadd.f32 %v9900_v59, %v468_v0  ;;  %1120 = vmatpush1.bf16.msra.mxu0 %v9958_v51  ;;  %7384 = vmatpush3.bf16.msra.mxu1 %v9961_v52  ;;  %v9984_v59 = vld [vmem:[#allocation15 + $0x90] ss:$12 sps:$4 sm:$0xff]  }
 0x273   :  { %v495_v5 = vmax.f32 %v477_v63, 0.0  ;;  %1121 = vmatprep.subr.bf16.mxu0 %v9965_v55  ;;  %7385 = vmatprep.subr.bf16.mxu1 %v12164_v58 }
 0x274   :  { %v493_v7 = vmax.f32 %v469_v2, 0.0 }
 0x275   :  { %v503_v8 = vpack.c.bf16 %v495_v5, %v494_v62 }
 0x276   :  { %v502_v10 = vpack.c.bf16 %v493_v7, %v492_v1  ;;  %1122 = vmatpush1.bf16.msra.mxu0 %v9974_v3  ;;  %7386 = vmatpush3.bf16.msra.mxu1 %v9977_v4 }
 0x277   :  { %1123 = vmatprep.subr.bf16.mxu0 %v9980_v6  ;;  %7387 = vmatprep.subr.bf16.mxu1 %v12164_v58 }
 0x278   :  { %744 = vmatmul.mubr.bf16.gmra.mrb[12].mxu1 %v9927_v28  ;;  %7371 = vmatprep.mubr.bf16.mxu0 %v502_v10 }
 0x279   :  { %7372 = vmatmul.mubr.bf16.gmra.mrb[28].mxu0 %v503_v8  ;;  %753 = vmatprep.mubr.bf16.mxu1 %v12162_v56 }
 0x27a   :  { %1124 = vmatpush1.bf16.msra.mxu0 %v9984_v59  ;;  %1143 = vmatprep.mubr.bf16.mxu0 %v12162_v56 }
 0x27b   :  { %1125 = vmatprep.subr.bf16.mxu0 %v9988_v11  ;;  %7388 = vmatpush3.bf16.msra.mxu1 %v9991_v13 }
 0x27c   :  { %7389 = vmatprep.subr.bf16.mxu1 %v12164_v58 }
 0x27e   :  { %1126 = vmatpush1.bf16.msra.mxu0 %v9996_v14 }
 0x27f   :  { %7390 = vmatpush3.bf16.msra.mxu1 %v10001_v16  ;;  %1220 = vmatprep.subr.bf16.mxu0 %v9896_v57 }
 0x280   :  { %754 = vmatmul.mubr.bf16.gmra.mrb[16].mxu1 %v500_v49  ;;  %7395 = vmatprep.subr.bf16.mxu1 %v12164_v58 }
 0x281   :  { %1144 = vmatmul.mubr.bf16.vlgmr.msra.gmra.mrb[32].mxu0 %v12160_v17  ;;  %763 = vmatprep.mubr.bf16.mxu1 %v12162_v56 }
 0x282   :  { %1221 = vmatpush1.bf16.msra.mxu0 %v9908_v12  ;;  %1252 = vmatprep.mubr.bf16.mxu0 %v12162_v56 }
 0x283   :  { %1222 = vmatprep.subr.bf16.mxu0 %v9911_v15 }
 0x286   :  { %1223 = vmatpush1.bf16.msra.mxu0 %v9920_v24 }
 0x287   :  { %1224 = vmatprep.subr.bf16.mxu0 %v9925_v26 }
 0x288   :  { %764 = vmatmul.mubr.bf16.gmra.mrb[20].mxu1 %v9955_v48 }
 0x289   :  { %773 = vmatprep.mubr.bf16.mxu1 %v12162_v56 }
 0x28a   :  { %1225 = vmatpush1.bf16.msra.mxu0 %v9931_v31 }
 0x28b   :  { %1226 = vmatprep.subr.bf16.mxu0 %v9938_v35 }
 0x28e   :  { %1227 = vmatpush1.bf16.msra.mxu0 %v9946_v43 }
 0x28f   :  { %1228 = vmatprep.subr.bf16.mxu0 %v9952_v46 }
 0x290   :  { %774 = vmatmul.mubr.bf16.gmra.mrb[24].mxu1 %v502_v10 }
 0x291   :  { %783 = vmatprep.mubr.bf16.mxu1 %v12162_v56 }
 0x292   :  { %1229 = vmatpush1.bf16.msra.mxu0 %v9958_v51 }
 0x293   :  { %1230 = vmatprep.subr.bf16.mxu0 %v9965_v55 }
 0x296   :  { %1231 = vmatpush1.bf16.msra.mxu0 %v9974_v3 }
 0x297   :  { %1232 = vmatprep.subr.bf16.mxu0 %v9980_v6 }
 0x298   :  { %784 = vmatmul.mubr.bf16.gmra.mrb[28].mxu1 %v503_v8 }
 0x299   :  { %7391 = vmatprep.mubr.msk.bf16.mxu1 %vm9529_vm0, %v12164_v58 }
 0x29a   :  { %1233 = vmatpush1.bf16.msra.mxu0 %v9984_v59 }
 0x29b   :  { %1234 = vmatprep.subr.bf16.mxu0 %v9988_v11 }
 0x29e   :  { %1235 = vmatpush1.bf16.msra.mxu0 %v9996_v14 }
 0x29f   :  { %1330 = vmatprep.subr.bf16.mxu0 %v9896_v57 }
 0x2a0   :  { %7392 = vmatmul.mubr.bf16.vlgmr.msra.gmra.mrb[32].mxu1 %v12160_v17 }
 0x2a1   :  { %7396 = vmatpush3.bf16.msra.mxu1 %v9906_v9  ;;  %7411 = vmatprep.mubr.msk.bf16.mxu1 %vm9529_vm0, %v12164_v58 }
 0x2a2   :  { %7397 = vmatprep.subr.bf16.mxu1 %v12164_v58 }
 0x2a5   :  { %7398 = vmatpush3.bf16.msra.mxu1 %v9916_v21 }
 0x2a6   :  { %7399 = vmatprep.subr.bf16.mxu1 %v12164_v58 }
 0x2a9   :  { %7400 = vmatpush3.bf16.msra.mxu1 %v9934_v32 }
 0x2aa   :  { %7401 = vmatprep.subr.bf16.mxu1 %v12164_v58 }
 0x2ad   :  { %7402 = vmatpush3.bf16.msra.mxu1 %v9949_v44 }
 0x2ae   :  { %7403 = vmatprep.subr.bf16.mxu1 %v12164_v58 }
 0x2b1   :  { %7404 = vmatpush3.bf16.msra.mxu1 %v9961_v52 }
 0x2b2   :  { %7405 = vmatprep.subr.bf16.mxu1 %v12164_v58 }
 0x2b5   :  { %7406 = vmatpush3.bf16.msra.mxu1 %v9977_v4 }
 0x2b6   :  { %7407 = vmatprep.subr.bf16.mxu1 %v12164_v58 }
 0x2b9   :  { %7408 = vmatpush3.bf16.msra.mxu1 %v9991_v13 }
 0x2ba   :  { %7409 = vmatprep.subr.bf16.mxu1 %v12164_v58 }
 0x2bd   :  { %7410 = vmatpush3.bf16.msra.mxu1 %v10001_v16 }
 0x2be   :  { %7415 = vmatprep.subr.bf16.mxu1 %v12164_v58 }
 0x333   :  { %v10060_v28 = vpop.f32.mrb[0].mxu1 }
 0x334   :  { %v10066_v30 = vpop.f32.mrb[1].mxu1  ;;  %v7361_v33 = vpop.f32.mrb[16].mxu0 }
 0x335   :  { %v10073_v36 = vadd.f32 %v7361_v33, %v10058_v27  ;;  %v719_v37 = vpop.f32.mrb[2].mxu1  ;;  %v10075_v38 = vpop.f32.mrb[17].mxu0 }
 0x336   :  { %v10078_v39 = vadd.f32 %v719_v37, %v10064_v29  ;;  %v721_v40 = vpop.f32.mrb[3].mxu1  ;;  %v7362_v41 = vpop.f32.mrb[18].mxu0 }
 0x337   :  { %v10081_v42 = vadd.f32 %v721_v40, %v10070_v34  ;;  %v10084_v45 = vadd.f32 %v7362_v41, %v10058_v27  ;;  %v831_v47 = vpop.f32.mrb[19].mxu0 }
 0x338   :  { %v10087_v48 = vadd.f32 %v831_v47, %v10058_v27 }
 0x33b   :  { %v725_v49 = vpop.f32.mrb[4].mxu1 }
 0x33c   :  { %v10090_v50 = vadd.f32 %v725_v49, %v10064_v29  ;;  %v727_v53 = vpop.f32.mrb[5].mxu1  ;;  %v7365_v54 = vpop.f32.mrb[20].mxu0 }
 0x33d   :  { %v10093_v60 = vadd.f32 %v727_v53, %v10070_v34  ;;  %v10096_v61 = vadd.f32 %v7365_v54, %v10058_v27  ;;  %v729_v62 = vpop.f32.mrb[6].mxu1  ;;  %v844_v63 = vpop.f32.mrb[21].mxu0 }
 0x33e   :  { %v10099_v0 = vadd.f32 %v729_v62, %v10064_v29  ;;  %v10102_v1 = vadd.f32 %v844_v63, %v10058_v27  ;;  %v731_v2 = vpop.f32.mrb[7].mxu1  ;;  %v7366_v5 = vpop.f32.mrb[22].mxu0 }
 0x33f   :  { %v10105_v7 = vadd.f32 %v731_v2, %v10070_v34  ;;  %v10108_v8 = vadd.f32 %v7366_v5, %v10058_v27  ;;  %v847_v10 = vpop.f32.mrb[23].mxu0 }
 0x340   :  { %v10111_v18 = vadd.f32 %v847_v10, %v10058_v27 }
 0x341   :  { %12186 = vst [vmem:[#allocation50_spill] sm:$0xff] %v10108_v8 }
 0x343   :  { %v735_v22 = vpop.f32.mrb[8].mxu1 }
 0x344   :  { %v10114_v33 = vadd.f32 %v735_v22, %v10064_v29  ;;  %v737_v37 = vpop.f32.mrb[9].mxu1  ;;  %v7369_v40 = vpop.f32.mrb[24].mxu0 }
 0x345   :  { %v10117_v41 = vadd.f32 %v737_v37, %v10070_v34  ;;  %v10120_v47 = vadd.f32 %v7369_v40, %v10058_v27  ;;  %v739_v49 = vpop.f32.mrb[10].mxu1  ;;  %v860_v53 = vpop.f32.mrb[25].mxu0 }
 0x346   :  { %v10123_v54 = vadd.f32 %v739_v49, %v10064_v29  ;;  %v10126_v62 = vadd.f32 %v860_v53, %v10058_v27  ;;  %v741_v63 = vpop.f32.mrb[11].mxu1  ;;  %v7370_v2 = vpop.f32.mrb[26].mxu0 }
 0x347   :  { %12187 = vst [vmem:[#allocation51_spill] sm:$0xff] %v10120_v47  ;;  %v10129_v5 = vadd.f32 %v741_v63, %v10070_v34  ;;  %v10132_v10 = vadd.f32 %v7370_v2, %v10058_v27  ;;  %v863_v22 = vpop.f32.mrb[27].mxu0 }
 0x348   :  { %12188 = vst [vmem:[#allocation52_spill] sm:$0xff] %v10126_v62  ;;  %v10135_v37 = vadd.f32 %v863_v22, %v10058_v27 }
 0x349   :  { %12189 = vst [vmem:[#allocation53_spill] sm:$0xff] %v10132_v10 }
 0x34a   :  { %12190 = vst [vmem:[#allocation54_spill] sm:$0xff] %v10135_v37 }
 0x34b   :  { %v745_v40 = vpop.f32.mrb[12].mxu1 }
 0x34c   :  { %v10138_v20 = vadd.f32 %v745_v40, %v10064_v29  ;;  %v747_v49 = vpop.f32.mrb[13].mxu1  ;;  %v7373_v25 = vpop.f32.mrb[28].mxu0 }
 0x34d   :  { %v10141_v53 = vadd.f32 %v747_v49, %v10070_v34  ;;  %v10144_v23 = vadd.f32 %v7373_v25, %v10058_v27  ;;  %v749_v63 = vpop.f32.mrb[14].mxu1  ;;  %v876_v17 = vpop.f32.mrb[29].mxu0 }
 0x34e   :  { %v10147_v2 = vadd.f32 %v749_v63, %v10064_v29  ;;  %v10150_v22 = vadd.f32 %v876_v17, %v10058_v27  ;;  %v751_v56 = vpop.f32.mrb[15].mxu1  ;;  %v7374_v58 = vpop.f32.mrb[30].mxu0  ;;  %v718_v17 = vadd.f32 %v10066_v30, %v10070_v34 }
 0x34f   :  { %12191 = vst [vmem:[#allocation55_spill] sm:$0xff] %v10144_v23  ;;  %v10153_v40 = vadd.f32 %v751_v56, %v10070_v34  ;;  %v10156_v19 = vadd.f32 %v7374_v58, %v10058_v27  ;;  %v879_v49 = vpop.f32.mrb[31].mxu0  ;;  %v716_v23 = vadd.f32 %v10060_v28, %v10064_v29 }
 0x350   :  { %12192 = vst [vmem:[#allocation56_spill] sm:$0xff] %v10150_v22  ;;  %v10159_v25 = vadd.f32 %v879_v49, %v10058_v27 }
 0x351   :  { %12193 = vst [vmem:[#allocation57_spill] sm:$0xff] %v10153_v40  ;;  %12194 = vst [vmem:[#allocation58_spill] sm:$0xff] %v10156_v19 }
 0x352   :  { %12195 = vst [vmem:[#allocation59_spill] sm:$0xff] %v10159_v25 }
 0x353   :  { %v755_v63 = vpop.f32.mrb[16].mxu1 }
 0x354   :  { %v10166_v22 = vadd.f32 %v755_v63, %v10064_v29  ;;  %v757_v10 = vpop.f32.mrb[17].mxu1  ;;  %v1145_v56 = vpop.f32.mrb[32].mxu0 }
 0x355   :  { %v10169_v47 = vadd.f32 %v757_v10, %v10070_v34  ;;  %v1192_v58 = vadd.f32 %v1145_v56, %v716_v23  ;;  %v759_v19 = vpop.f32.mrb[18].mxu1  ;;  %v1147_v37 = vpop.f32.mrb[33].mxu0 }
 0x356   :  { %12196 = vst [vmem:[#allocation60_spill] sm:$0xff] %v10166_v22  ;;  %v10172_v49 = vadd.f32 %v759_v19, %v10064_v29  ;;  %v1199_v25 = vadd.f32 %v1147_v37, %v718_v17  ;;  %v761_v28 = vpop.f32.mrb[19].mxu1  ;;  %v1149_v62 = vpop.f32.mrb[34].mxu0 }
 0x357   :  { %12197 = vst [vmem:[#allocation61_spill] sm:$0xff] %v10169_v47  ;;  %v6673_v8 = vmul.f32 -1.442695, %v1192_v58  ;;  %v10175_v30 = vadd.f32 %v761_v28, %v10070_v34  ;;  %v1150_v63 = vpop.f32.mrb[35].mxu0 }
 0x358   :  { %12198 = vst [vmem:[#allocation62_spill] sm:$0xff] %v10172_v49  ;;  %v6674_v17 = vmul.f32 -1.442695, %v1199_v25 }
 0x359   :  { %12199 = vst [vmem:[#allocation63_spill] sm:$0xff] %v10175_v30  ;;  %8429 = vpow2.f32 %v6673_v8 }
 0x35a   :  { %8431 = vpow2.f32 %v6674_v17 }
 0x35b   :  { %v765_v22 = vpop.f32.mrb[20].mxu1 }
 0x35c   :  { %v10178_v40 = vadd.f32 %v765_v22, %v10064_v29  ;;  %v767_v10 = vpop.f32.mrb[21].mxu1 }
 0x35d   :  { %v10181_v23 = vadd.f32 %v767_v10, %v10070_v34  ;;  %v769_v56 = vpop.f32.mrb[22].mxu1 }
 0x35e   :  { %12200 = vst [vmem:[#allocation64_spill] sm:$0xff] %v10178_v40  ;;  %v10184_v19 = vadd.f32 %v769_v56, %v10064_v29  ;;  %v771_v37 = vpop.f32.mrb[23].mxu1 }
 0x35f   :  { %12201 = vst [vmem:[#allocation65_spill] sm:$0xff] %v10181_v23  ;;  %v10187_v62 = vadd.f32 %v771_v37, %v10070_v34 }
 0x360   :  { %12202 = vst [vmem:[#allocation66_spill] sm:$0xff] %v10184_v19 }
 0x361   :  { %12203 = vst [vmem:[#allocation67_spill] sm:$0xff] %v10187_v62 }
 0x363   :  { %v775_v58 = vpop.f32.mrb[24].mxu1  ;;  %v8430_v28 = vpop.eup %8429 }
 0x364   :  { %v10190_v8 = vadd.f32 %v775_v58, %v10064_v29  ;;  %v777_v22 = vpop.f32.mrb[25].mxu1  ;;  %v1196_v19 = vadd.f32 1.0, %v8430_v28 }
 0x365   :  { %v10193_v63 = vadd.f32 %v777_v22, %v10070_v34  ;;  %v779_v10 = vpop.f32.mrb[26].mxu1 }
 0x366   :  { %12204 = vst [vmem:[#allocation68_spill] sm:$0xff] %v10190_v8  ;;  %v10196_v23 = vadd.f32 %v779_v10, %v10064_v29  ;;  %v781_v56 = vpop.f32.mrb[27].mxu1  ;;  %8433 = vrcp.f32 %v1196_v19 }
 0x367   :  { %12205 = vst [vmem:[#allocation69_spill] sm:$0xff] %v10193_v63  ;;  %v10199_v37 = vadd.f32 %v781_v56, %v10070_v34  ;;  %v10213_v56 = vld [vmem:[#allocation18] ss:$0 sm:$0xff] }
 0x368   :  { %12206 = vst [vmem:[#allocation70_spill] sm:$0xff] %v10196_v23  ;;  %v8432_v23 = vpop.eup %8431 }
 0x369   :  { %12207 = vst [vmem:[#allocation71_spill] sm:$0xff] %v10199_v37  ;;  %v1203_v19 = vadd.f32 1.0, %v8432_v23 }
 0x36b   :  { %v785_v25 = vpop.f32.mrb[28].mxu1  ;;  %8435 = vrcp.f32 %v1203_v19 }
 0x36c   :  { %v10202_v62 = vadd.f32 %v785_v25, %v10064_v29  ;;  %v787_v58 = vpop.f32.mrb[29].mxu1 }
 0x36d   :  { %v10205_v17 = vadd.f32 %v787_v58, %v10070_v34  ;;  %v789_v22 = vpop.f32.mrb[30].mxu1  ;;  %v829_v58 = vadd.f32 %v10075_v38, %v10058_v27  ;;  %v12212_v27 = vmov 0.0   ;;  %v12213_v38 = vmov 0  }
 0x36e   :  { %12208 = vst [vmem:[#allocation72_spill] sm:$0xff] %v10202_v62  ;;  %v10208_v63 = vadd.f32 %v789_v22, %v10064_v29  ;;  %v791_v10 = vpop.f32.mrb[31].mxu1 }
 0x36f   :  { %12209 = vst [vmem:[#allocation73_spill] sm:$0xff] %v10205_v17  ;;  %v10211_v28 = vadd.f32 %v791_v10, %v10070_v34 }
 0x370   :  { %12210 = vst [vmem:[#allocation74_spill] sm:$0xff] %v10208_v63  ;;  %v8434_v8 = vpop.eup %8433 }
 0x371   :  { %12211 = vst [vmem:[#allocation75_spill] sm:$0xff] %v10211_v28 }
 0x373   :  { %v1186_v37 = vpop.f32.mrb[32].mxu1 }
 0x374   :  { %v1206_v25 = vadd.f32 %v10213_v56, %v1186_v37  ;;  %v7393_v62 = vpop.f32.mrb[33].mxu1 }
 0x375   :  { %v1189_v40 = vpop.f32.mrb[34].mxu1  ;;  %v8436_v17 = vpop.eup %8435 }
 0x376   :  { %v1207_v29 = vmul.f32 %v8434_v8, %v1206_v25  ;;  %v7394_v22 = vpop.f32.mrb[35].mxu1  ;;  %v1210_v34 = vsub.f32 1.0, %v8436_v17  ;;  %v1212_v30 = vmul.f32 0.0, %v8436_v17 }
 0x378   :  { %v1208_v63 = vadd.f32 %v1207_v29, %v829_v58 }
 0x37a   :  { %8437 = vtanh.f32 %v1208_v63 }
 0x384   :  { %v8438_v10 = vpop.eup %8437 }
 0x385   :  { %v1211_v28 = vmul.f32 %v8438_v10, %v1210_v34 }
 0x387   :  { %v10218_v23 = vadd.f32 %v1212_v30, %v1211_v28 }
 0x389   :  { %v1214_v62 = vpack.c.bf16 %v10218_v23, %v10218_v23 }
 0x38b   :  { %1215 = vst [vmem:[#allocation3] sm:$0xf] %v1214_v62  ;;  %1253 = vmatmul.mubr.bf16.vlgmr.msra.gmra.mrb[36].mxu0 %v1214_v62  ;;  %7412 = vmatmul.mubr.bf16.vlgmr.msra.gmra.mrb[36].mxu1 %v1214_v62 }
 0x38c   :  { %1331 = vmatpush1.bf16.msra.mxu0 %v9908_v12  ;;  %7416 = vmatpush3.bf16.msra.mxu1 %v9906_v9 }
 0x38d   :  { %1332 = vmatprep.subr.bf16.mxu0 %v9911_v15  ;;  %7417 = vmatprep.subr.bf16.mxu1 %v12212_v27 }
 0x38e   :  { %1362 = vmatprep.mubr.bf16.mxu0 %v12213_v38  ;;  %7431 = vmatprep.mubr.msk.bf16.mxu1 %vm9529_vm0, %v12212_v27 }
 0x390   :  { %1333 = vmatpush1.bf16.msra.mxu0 %v9920_v24  ;;  %7418 = vmatpush3.bf16.msra.mxu1 %v9916_v21 }
 0x391   :  { %1334 = vmatprep.subr.bf16.mxu0 %v9925_v26  ;;  %7419 = vmatprep.subr.bf16.mxu1 %v12212_v27 }
 0x394   :  { %1335 = vmatpush1.bf16.msra.mxu0 %v9931_v31  ;;  %7420 = vmatpush3.bf16.msra.mxu1 %v9934_v32 }
 0x395   :  { %1336 = vmatprep.subr.bf16.mxu0 %v9938_v35  ;;  %7421 = vmatprep.subr.bf16.mxu1 %v12212_v27 }
 0x398   :  { %1337 = vmatpush1.bf16.msra.mxu0 %v9946_v43  ;;  %7422 = vmatpush3.bf16.msra.mxu1 %v9949_v44 }
 0x399   :  { %1338 = vmatprep.subr.bf16.mxu0 %v9952_v46  ;;  %7423 = vmatprep.subr.bf16.mxu1 %v12212_v27 }
 0x39c   :  { %1339 = vmatpush1.bf16.msra.mxu0 %v9958_v51  ;;  %7424 = vmatpush3.bf16.msra.mxu1 %v9961_v52 }
 0x39d   :  { %1340 = vmatprep.subr.bf16.mxu0 %v9965_v55  ;;  %7425 = vmatprep.subr.bf16.mxu1 %v12212_v27 }
 0x3a0   :  { %1341 = vmatpush1.bf16.msra.mxu0 %v9974_v3  ;;  %7426 = vmatpush3.bf16.msra.mxu1 %v9977_v4 }
 0x3a1   :  { %1342 = vmatprep.subr.bf16.mxu0 %v9980_v6  ;;  %7427 = vmatprep.subr.bf16.mxu1 %v12212_v27 }
 0x3a4   :  { %1343 = vmatpush1.bf16.msra.mxu0 %v9984_v59  ;;  %7428 = vmatpush3.bf16.msra.mxu1 %v9991_v13 }
 0x3a5   :  { %1344 = vmatprep.subr.bf16.mxu0 %v9988_v11  ;;  %7429 = vmatprep.subr.bf16.mxu1 %v12212_v27 }
 0x3a8   :  { %1345 = vmatpush1.bf16.msra.mxu0 %v9996_v14  ;;  %7430 = vmatpush3.bf16.msra.mxu1 %v10001_v16 }
 0x3a9   :  { %1440 = vmatprep.subr.bf16.mxu0 %v9896_v57  ;;  %7435 = vmatprep.subr.bf16.mxu1 %v12212_v27 }
 0x45e   :  { %v1254_v40 = vpop.f32.mrb[36].mxu0  ;;  %v1295_v30 = vpop.f32.mrb[36].mxu1 }
 0x45f   :  { %v1301_v8 = vadd.f32 %v1254_v40, %v10078_v39  ;;  %v1256_v63 = vpop.f32.mrb[37].mxu0  ;;  %v7413_v37 = vpop.f32.mrb[37].mxu1  ;;  %v1315_v47 = vadd.f32 %v10213_v56, %v1295_v30 }
 0x460   :  { %v1308_v17 = vadd.f32 %v1256_v63, %v10081_v42  ;;  %v1258_v28 = vpop.f32.mrb[38].mxu0  ;;  %v1298_v19 = vpop.f32.mrb[38].mxu1 }
 0x461   :  { %v6675_v25 = vmul.f32 -1.442695, %v1301_v8  ;;  %v1259_v58 = vpop.f32.mrb[39].mxu0  ;;  %v7414_v29 = vpop.f32.mrb[39].mxu1 }
 0x462   :  { %v6676_v22 = vmul.f32 -1.442695, %v1308_v17 }
 0x463   :  { %8439 = vpow2.f32 %v6675_v25 }
 0x464   :  { %8441 = vpow2.f32 %v6676_v22 }
 0x46d   :  { %v8440_v34 = vpop.eup %8439 }
 0x46e   :  { %v1305_v10 = vadd.f32 1.0, %v8440_v34  ;;  %v8442_v62 = vpop.eup %8441 }
 0x46f   :  { %v1312_v49 = vadd.f32 1.0, %v8442_v62 }
 0x470   :  { %8443 = vrcp.f32 %v1305_v10 }
 0x471   :  { %8445 = vrcp.f32 %v1312_v49 }
 0x47a   :  { %v8444_v39 = vpop.eup %8443 }
 0x47b   :  { %v1316_v40 = vmul.f32 %v8444_v39, %v1315_v47  ;;  %v8446_v63 = vpop.eup %8445 }
 0x47c   :  { %v1319_v8 = vsub.f32 1.0, %v8446_v63  ;;  %v1321_v17 = vmul.f32 %v8446_v63, %v10218_v23 }
 0x47d   :  { %v1317_v42 = vadd.f32 %v1316_v40, %v10087_v48 }
 0x47f   :  { %8447 = vtanh.f32 %v1317_v42 }
 0x489   :  { %v8448_v37 = vpop.eup %8447 }
 0x48a   :  { %v1320_v28 = vmul.f32 %v8448_v37, %v1319_v8 }
 0x48c   :  { %v10262_v19 = vadd.f32 %v1321_v17, %v1320_v28 }
 0x48e   :  { %v1323_v25 = vpack.c.bf16 %v10262_v19, %v10262_v19 }
 0x490   :  { %1325 = vst [vmem:[#allocation3 + $0x4] sm:$0xf] %v1323_v25  ;;  %1363 = vmatmul.mubr.bf16.vlgmr.msra.gmra.mrb[40].mxu0 %v1323_v25  ;;  %7432 = vmatmul.mubr.bf16.vlgmr.msra.gmra.mrb[40].mxu1 %v1323_v25 }
 0x491   :  { %1441 = vmatpush1.bf16.msra.mxu0 %v9908_v12  ;;  %7436 = vmatpush3.bf16.msra.mxu1 %v9906_v9 }
 0x492   :  { %1442 = vmatprep.subr.bf16.mxu0 %v9911_v15  ;;  %7437 = vmatprep.subr.bf16.mxu1 %v12212_v27 }
 0x493   :  { %1472 = vmatprep.mubr.bf16.mxu0 %v12213_v38  ;;  %7451 = vmatprep.mubr.msk.bf16.mxu1 %vm9529_vm0, %v12212_v27 }
 0x495   :  { %1443 = vmatpush1.bf16.msra.mxu0 %v9920_v24  ;;  %7438 = vmatpush3.bf16.msra.mxu1 %v9916_v21 }
 0x496   :  { %1444 = vmatprep.subr.bf16.mxu0 %v9925_v26  ;;  %7439 = vmatprep.subr.bf16.mxu1 %v12212_v27 }
 0x499   :  { %1445 = vmatpush1.bf16.msra.mxu0 %v9931_v31  ;;  %7440 = vmatpush3.bf16.msra.mxu1 %v9934_v32 }
 0x49a   :  { %1446 = vmatprep.subr.bf16.mxu0 %v9938_v35  ;;  %7441 = vmatprep.subr.bf16.mxu1 %v12212_v27 }
 0x49d   :  { %1447 = vmatpush1.bf16.msra.mxu0 %v9946_v43  ;;  %7442 = vmatpush3.bf16.msra.mxu1 %v9949_v44 }
 0x49e   :  { %1448 = vmatprep.subr.bf16.mxu0 %v9952_v46  ;;  %7443 = vmatprep.subr.bf16.mxu1 %v12212_v27 }
 0x4a1   :  { %1449 = vmatpush1.bf16.msra.mxu0 %v9958_v51  ;;  %7444 = vmatpush3.bf16.msra.mxu1 %v9961_v52 }
 0x4a2   :  { %1450 = vmatprep.subr.bf16.mxu0 %v9965_v55  ;;  %7445 = vmatprep.subr.bf16.mxu1 %v12212_v27 }
 0x4a5   :  { %1451 = vmatpush1.bf16.msra.mxu0 %v9974_v3  ;;  %7446 = vmatpush3.bf16.msra.mxu1 %v9977_v4 }
 0x4a6   :  { %1452 = vmatprep.subr.bf16.mxu0 %v9980_v6  ;;  %7447 = vmatprep.subr.bf16.mxu1 %v12212_v27 }
 0x4a9   :  { %1453 = vmatpush1.bf16.msra.mxu0 %v9984_v59  ;;  %7448 = vmatpush3.bf16.msra.mxu1 %v9991_v13 }
 0x4aa   :  { %1454 = vmatprep.subr.bf16.mxu0 %v9988_v11  ;;  %7449 = vmatprep.subr.bf16.mxu1 %v12212_v27 }
 0x4ad   :  { %1455 = vmatpush1.bf16.msra.mxu0 %v9996_v14  ;;  %7450 = vmatpush3.bf16.msra.mxu1 %v10001_v16 }
 0x4ae   :  { %1550 = vmatprep.subr.bf16.mxu0 %v9896_v57  ;;  %7455 = vmatprep.subr.bf16.mxu1 %v12212_v27 }
 0x563   :  { %v1364_v48 = vpop.f32.mrb[40].mxu0  ;;  %v1405_v47 = vpop.f32.mrb[40].mxu1 }
 0x564   :  { %v1411_v49 = vadd.f32 %v1364_v48, %v10090_v50  ;;  %v1366_v23 = vpop.f32.mrb[41].mxu0  ;;  %v7433_v30 = vpop.f32.mrb[41].mxu1  ;;  %v1425_v37 = vadd.f32 %v10213_v56, %v1405_v47 }
 0x565   :  { %v1418_v58 = vadd.f32 %v1366_v23, %v10093_v60  ;;  %v1368_v29 = vpop.f32.mrb[42].mxu0  ;;  %v1408_v22 = vpop.f32.mrb[42].mxu1 }
 0x566   :  { %v6677_v34 = vmul.f32 -1.442695, %v1411_v49  ;;  %v1369_v10 = vpop.f32.mrb[43].mxu0  ;;  %v7434_v62 = vpop.f32.mrb[43].mxu1 }
 0x567   :  { %v6678_v39 = vmul.f32 -1.442695, %v1418_v58 }
 0x568   :  { %8449 = vpow2.f32 %v6677_v34 }
 0x569   :  { %8451 = vpow2.f32 %v6678_v39 }
 0x572   :  { %v8450_v40 = vpop.eup %8449 }
 0x573   :  { %v1415_v42 = vadd.f32 1.0, %v8450_v40  ;;  %v8452_v63 = vpop.eup %8451 }
 0x574   :  { %v1422_v8 = vadd.f32 1.0, %v8452_v63 }
 0x575   :  { %8453 = vrcp.f32 %v1415_v42 }
 0x576   :  { %8455 = vrcp.f32 %v1422_v8 }
 0x57f   :  { %v8454_v50 = vpop.eup %8453 }
 0x580   :  { %v1426_v28 = vmul.f32 %v8454_v50, %v1425_v37  ;;  %v8456_v17 = vpop.eup %8455 }
 0x581   :  { %v1429_v25 = vsub.f32 1.0, %v8456_v17  ;;  %v1431_v23 = vmul.f32 %v8456_v17, %v10262_v19 }
 0x582   :  { %v1427_v60 = vadd.f32 %v1426_v28, %v10073_v36 }
 0x584   :  { %8457 = vtanh.f32 %v1427_v60 }
 0x58e   :  { %v8458_v48 = vpop.eup %8457 }
 0x58f   :  { %v1430_v49 = vmul.f32 %v8458_v48, %v1429_v25 }
 0x591   :  { %v10306_v30 = vadd.f32 %v1431_v23, %v1430_v49 }
 0x593   :  { %v1433_v58 = vpack.c.bf16 %v10306_v30, %v10306_v30 }
 0x595   :  { %1435 = vst [vmem:[#allocation3 + $0x8] sm:$0xf] %v1433_v58  ;;  %1473 = vmatmul.mubr.bf16.vlgmr.msra.gmra.mrb[44].mxu0 %v1433_v58  ;;  %7452 = vmatmul.mubr.bf16.vlgmr.msra.gmra.mrb[44].mxu1 %v1433_v58 }
 0x596   :  { %1551 = vmatpush1.bf16.msra.mxu0 %v9908_v12  ;;  %7456 = vmatpush3.bf16.msra.mxu1 %v9906_v9 }
 0x597   :  { %1552 = vmatprep.subr.bf16.mxu0 %v9911_v15  ;;  %7457 = vmatprep.subr.bf16.mxu1 %v12212_v27 }
 0x598   :  { %1582 = vmatprep.mubr.bf16.mxu0 %v12213_v38  ;;  %7471 = vmatprep.mubr.msk.bf16.mxu1 %vm9529_vm0, %v12212_v27 }
 0x59a   :  { %1553 = vmatpush1.bf16.msra.mxu0 %v9920_v24  ;;  %7458 = vmatpush3.bf16.msra.mxu1 %v9916_v21 }
 0x59b   :  { %1554 = vmatprep.subr.bf16.mxu0 %v9925_v26  ;;  %7459 = vmatprep.subr.bf16.mxu1 %v12212_v27 }
 0x59e   :  { %1555 = vmatpush1.bf16.msra.mxu0 %v9931_v31  ;;  %7460 = vmatpush3.bf16.msra.mxu1 %v9934_v32 }
 0x59f   :  { %1556 = vmatprep.subr.bf16.mxu0 %v9938_v35  ;;  %7461 = vmatprep.subr.bf16.mxu1 %v12212_v27 }
 0x5a2   :  { %1557 = vmatpush1.bf16.msra.mxu0 %v9946_v43  ;;  %7462 = vmatpush3.bf16.msra.mxu1 %v9949_v44 }
 0x5a3   :  { %1558 = vmatprep.subr.bf16.mxu0 %v9952_v46  ;;  %7463 = vmatprep.subr.bf16.mxu1 %v12212_v27 }
 0x5a6   :  { %1559 = vmatpush1.bf16.msra.mxu0 %v9958_v51  ;;  %7464 = vmatpush3.bf16.msra.mxu1 %v9961_v52 }
 0x5a7   :  { %1560 = vmatprep.subr.bf16.mxu0 %v9965_v55  ;;  %7465 = vmatprep.subr.bf16.mxu1 %v12212_v27 }
 0x5aa   :  { %1561 = vmatpush1.bf16.msra.mxu0 %v9974_v3  ;;  %7466 = vmatpush3.bf16.msra.mxu1 %v9977_v4 }
 0x5ab   :  { %1562 = vmatprep.subr.bf16.mxu0 %v9980_v6  ;;  %7467 = vmatprep.subr.bf16.mxu1 %v12212_v27 }
 0x5ae   :  { %1563 = vmatpush1.bf16.msra.mxu0 %v9984_v59  ;;  %7468 = vmatpush3.bf16.msra.mxu1 %v9991_v13 }
 0x5af   :  { %1564 = vmatprep.subr.bf16.mxu0 %v9988_v11  ;;  %7469 = vmatprep.subr.bf16.mxu1 %v12212_v27 }
 0x5b2   :  { %1565 = vmatpush1.bf16.msra.mxu0 %v9996_v14  ;;  %7470 = vmatpush3.bf16.msra.mxu1 %v10001_v16 }
 0x5b3   :  { %1660 = vmatprep.subr.bf16.mxu0 %v9896_v57  ;;  %7475 = vmatprep.subr.bf16.mxu1 %v12212_v27 }
 0x668   :  { %v1474_v9 = vpop.f32.mrb[44].mxu0  ;;  %v1515_v36 = vpop.f32.mrb[44].mxu1 }
 0x669   :  { %v1521_v19 = vadd.f32 %v1474_v9, %v10099_v0  ;;  %v1476_v47 = vpop.f32.mrb[45].mxu0  ;;  %v7453_v29 = vpop.f32.mrb[45].mxu1  ;;  %v1535_v50 = vadd.f32 %v10213_v56, %v1515_v36  ;;  %v10355_v9 = vld [vmem:[#allocation15 + $0x8] ss:$12 sps:$4 sm:$0xff]  }
 0x66a   :  { %v1528_v22 = vadd.f32 %v1476_v47, %v10105_v7  ;;  %v1478_v34 = vpop.f32.mrb[46].mxu0  ;;  %v1518_v10 = vpop.f32.mrb[46].mxu1 }
 0x66b   :  { %v6679_v62 = vmul.f32 -1.442695, %v1521_v19  ;;  %v1479_v39 = vpop.f32.mrb[47].mxu0  ;;  %v7454_v40 = vpop.f32.mrb[47].mxu1  ;;  %v10402_v34 = vld [vmem:[#allocation15] ss:$12 sps:$4 sm:$0xff]  }
 0x66c   :  { %v6680_v42 = vmul.f32 -1.442695, %v1528_v22  ;;  %v10413_v10 = vld [vmem:[#allocation15 + $0x18] ss:$12 sps:$4 sm:$0xff]   ;;  %v10419_v39 = vld [vmem:[#allocation15 + $0x34] ss:$12 sps:$4 sm:$0xff]  }
 0x66d   :  { %8459 = vpow2.f32 %v6679_v62  ;;  %v10416_v62 = vld [vmem:[#allocation15 + $0x20] ss:$12 sps:$4 sm:$0xff]   ;;  %v10423_v40 = vld [vmem:[#allocation15 + $0x30] ss:$12 sps:$4 sm:$0xff]  }
 0x66e   :  { %8461 = vpow2.f32 %v6680_v42  ;;  %v10426_v42 = vld [vmem:[#allocation15 + $0x38] ss:$12 sps:$4 sm:$0xff]  }
 0x677   :  { %v8460_v63 = vpop.eup %8459 }
 0x678   :  { %v1525_v57 = vadd.f32 1.0, %v8460_v63  ;;  %v8462_v8 = vpop.eup %8461  ;;  %v10429_v63 = vld [vmem:[#allocation15 + $0x4c] ss:$12 sps:$4 sm:$0xff]  }
 0x679   :  { %v1532_v37 = vadd.f32 1.0, %v8462_v8  ;;  %v10436_v8 = vld [vmem:[#allocation15 + $0x50] ss:$12 sps:$4 sm:$0xff]  }
 0x67a   :  { %8463 = vrcp.f32 %v1525_v57  ;;  %v10433_v57 = vld [vmem:[#allocation15 + $0x48] ss:$12 sps:$4 sm:$0xff]  }
 0x67b   :  { %8465 = vrcp.f32 %v1532_v37  ;;  %v10439_v37 = vld [vmem:[#allocation15 + $0x64] ss:$12 sps:$4 sm:$0xff]  }
 0x684   :  { %v8464_v0 = vpop.eup %8463 }
 0x685   :  { %v1536_v28 = vmul.f32 %v8464_v0, %v1535_v50  ;;  %v8466_v60 = vpop.eup %8465  ;;  %v10443_v50 = vld [vmem:[#allocation15 + $0x60] ss:$12 sps:$4 sm:$0xff]   ;;  %v10446_v0 = vld [vmem:[#allocation15 + $0x68] ss:$12 sps:$4 sm:$0xff]  }
 0x686   :  { %v1539_v17 = vsub.f32 1.0, %v8466_v60  ;;  %v1541_v49 = vmul.f32 %v8466_v60, %v10306_v30  ;;  %v10456_v60 = vld [vmem:[#allocation15 + $0x80] ss:$12 sps:$4 sm:$0xff]  }
 0x687   :  { %v1537_v7 = vadd.f32 %v1536_v28, %v10084_v45  ;;  %v10449_v28 = vld [vmem:[#allocation15 + $0x7c] ss:$12 sps:$4 sm:$0xff]  }
 0x689   :  { %8467 = vtanh.f32 %v1537_v7  ;;  %v10453_v7 = vld [vmem:[#allocation15 + $0x78] ss:$12 sps:$4 sm:$0xff]  }
 0x693   :  { %v8468_v25 = vpop.eup %8467 }
 0x694   :  { %v1540_v48 = vmul.f32 %v8468_v25, %v1539_v17  ;;  %v10459_v17 = vld [vmem:[#allocation15 + $0x94] ss:$12 sps:$4 sm:$0xff]   ;;  %v10463_v25 = vld [vmem:[#allocation15 + $0x90] ss:$12 sps:$4 sm:$0xff]  }
 0x696   :  { %v10350_v23 = vadd.f32 %v1541_v49, %v1540_v48  ;;  %v10467_v48 = vld [vmem:[#allocation15 + $0xac] ss:$12 sps:$4 sm:$0xff]  }
 0x698   :  { %v1543_v58 = vpack.c.bf16 %v10350_v23, %v10350_v23 }
 0x69a   :  { %1545 = vst [vmem:[#allocation3 + $0xc] sm:$0xf] %v1543_v58  ;;  %1583 = vmatmul.mubr.bf16.vlgmr.msra.gmra.mrb[48].mxu0 %v1543_v58  ;;  %7472 = vmatmul.mubr.bf16.vlgmr.msra.gmra.mrb[48].mxu1 %v1543_v58 }
 0x69b   :  { %1661 = vmatpush1.bf16.msra.mxu0 %v9908_v12  ;;  %7476 = vmatpush3.bf16.msra.mxu1 %v10355_v9  ;;  %v10389_v12 = vld [vmem:[#allocation15 + $0x4] ss:$12 sps:$4 sm:$0xff]  }
 0x69c   :  { %1662 = vmatprep.subr.bf16.mxu0 %v9911_v15  ;;  %7477 = vmatprep.subr.bf16.mxu1 %v12212_v27 }
 0x69d   :  { %1692 = vmatprep.mubr.bf16.mxu0 %v12213_v38  ;;  %7491 = vmatprep.mubr.msk.bf16.mxu1 %vm9529_vm0, %v12212_v27 }
 0x69f   :  { %1663 = vmatpush1.bf16.msra.mxu0 %v9920_v24  ;;  %7478 = vmatpush3.bf16.msra.mxu1 %v9916_v21 }
 0x6a0   :  { %1664 = vmatprep.subr.bf16.mxu0 %v9925_v26  ;;  %7479 = vmatprep.subr.bf16.mxu1 %v12212_v27 }
 0x6a3   :  { %1665 = vmatpush1.bf16.msra.mxu0 %v9931_v31  ;;  %7480 = vmatpush3.bf16.msra.mxu1 %v9934_v32 }
 0x6a4   :  { %1666 = vmatprep.subr.bf16.mxu0 %v9938_v35  ;;  %7481 = vmatprep.subr.bf16.mxu1 %v12212_v27 }
 0x6a7   :  { %1667 = vmatpush1.bf16.msra.mxu0 %v9946_v43  ;;  %7482 = vmatpush3.bf16.msra.mxu1 %v9949_v44 }
 0x6a8   :  { %1668 = vmatprep.subr.bf16.mxu0 %v9952_v46  ;;  %7483 = vmatprep.subr.bf16.mxu1 %v12212_v27 }
 0x6ab   :  { %1669 = vmatpush1.bf16.msra.mxu0 %v9958_v51  ;;  %7484 = vmatpush3.bf16.msra.mxu1 %v9961_v52 }
 0x6ac   :  { %1670 = vmatprep.subr.bf16.mxu0 %v9965_v55  ;;  %7485 = vmatprep.subr.bf16.mxu1 %v12212_v27 }
 0x6af   :  { %1671 = vmatpush1.bf16.msra.mxu0 %v9974_v3  ;;  %7486 = vmatpush3.bf16.msra.mxu1 %v9977_v4 }
 0x6b0   :  { %1672 = vmatprep.subr.bf16.mxu0 %v9980_v6  ;;  %7487 = vmatprep.subr.bf16.mxu1 %v12212_v27 }
 0x6b3   :  { %1673 = vmatpush1.bf16.msra.mxu0 %v9984_v59  ;;  %7488 = vmatpush3.bf16.msra.mxu1 %v9991_v13 }
 0x6b4   :  { %1674 = vmatprep.subr.bf16.mxu0 %v9988_v11  ;;  %7489 = vmatprep.subr.bf16.mxu1 %v12212_v27 }
 0x6b7   :  { %1675 = vmatpush1.bf16.msra.mxu0 %v9996_v14  ;;  %7490 = vmatpush3.bf16.msra.mxu1 %v10001_v16 }
 0x6b8   :  { %1770 = vmatprep.subr.bf16.mxu0 %v10389_v12  ;;  %7495 = vmatprep.subr.bf16.mxu1 %v12212_v27 }
 0x76d   :  { %v1584_v15 = vpop.f32.mrb[48].mxu0  ;;  %v1625_v21 = vpop.f32.mrb[48].mxu1 }
 0x76e   :  { %v1631_v24 = vadd.f32 %v1584_v15, %v10114_v33  ;;  %v1586_v26 = vpop.f32.mrb[49].mxu0  ;;  %v7473_v31 = vpop.f32.mrb[49].mxu1  ;;  %v1645_v59 = vadd.f32 %v10213_v56, %v1625_v21 }
 0x76f   :  { %v1638_v32 = vadd.f32 %v1586_v26, %v10117_v41  ;;  %v1588_v35 = vpop.f32.mrb[50].mxu0  ;;  %v1628_v43 = vpop.f32.mrb[50].mxu1 }
 0x770   :  { %v6681_v44 = vmul.f32 -1.442695, %v1631_v24  ;;  %v1589_v46 = vpop.f32.mrb[51].mxu0  ;;  %v7474_v51 = vpop.f32.mrb[51].mxu1 }
 0x771   :  { %v6682_v52 = vmul.f32 -1.442695, %v1638_v32 }
 0x772   :  { %8469 = vpow2.f32 %v6681_v44 }
 0x773   :  { %8471 = vpow2.f32 %v6682_v52 }
 0x77c   :  { %v8470_v55 = vpop.eup %8469 }
 0x77d   :  { %v1635_v3 = vadd.f32 1.0, %v8470_v55  ;;  %v8472_v4 = vpop.eup %8471 }
 0x77e   :  { %v1642_v6 = vadd.f32 1.0, %v8472_v4 }
 0x77f   :  { %8473 = vrcp.f32 %v1635_v3 }
 0x780   :  { %8475 = vrcp.f32 %v1642_v6 }
 0x789   :  { %v8474_v11 = vpop.eup %8473 }
 0x78a   :  { %v1646_v45 = vmul.f32 %v8474_v11, %v1645_v59  ;;  %v8476_v41 = vpop.eup %8475 }
 0x78b   :  { %v1649_v30 = vsub.f32 1.0, %v8476_v41  ;;  %v1651_v47 = vmul.f32 %v8476_v41, %v10350_v23  ;;  %v10520_v41 = vld [vmem:[#allocation15 + $0xb0] ss:$12 sps:$4 sm:$0xff]  }
 0x78c   :  { %v1647_v33 = vadd.f32 %v1646_v45, %v10102_v1  ;;  %v10406_v1 = vld [vmem:[#allocation15 + $0x1c] ss:$12 sps:$4 sm:$0xff]  }
 0x78e   :  { %8477 = vtanh.f32 %v1647_v33  ;;  %v10517_v33 = vld [vmem:[#allocation15 + $0xa8] ss:$12 sps:$4 sm:$0xff]  }
 0x798   :  { %v8478_v36 = vpop.eup %8477 }
 0x799   :  { %v1650_v19 = vmul.f32 %v8478_v36, %v1649_v30 }
 0x79b   :  { %v10398_v29 = vadd.f32 %v1651_v47, %v1650_v19 }
 0x79d   :  { %v1653_v22 = vpack.c.bf16 %v10398_v29, %v10398_v29 }
 0x79f   :  { %1655 = vst [vmem:[#allocation3 + $0x10] sm:$0xf] %v1653_v22  ;;  %1693 = vmatmul.mubr.bf16.vlgmr.msra.gmra.mrb[52].mxu0 %v1653_v22  ;;  %7492 = vmatmul.mubr.bf16.vlgmr.msra.gmra.mrb[52].mxu1 %v1653_v22 }
 0x7a0   :  { %1771 = vmatpush1.bf16.msra.mxu0 %v10402_v34  ;;  %7496 = vmatpush3.bf16.msra.mxu1 %v10355_v9 }
 0x7a1   :  { %1772 = vmatprep.subr.bf16.mxu0 %v10406_v1  ;;  %7497 = vmatprep.subr.bf16.mxu1 %v12212_v27 }
 0x7a2   :  { %1802 = vmatprep.mubr.bf16.mxu0 %v12213_v38  ;;  %7511 = vmatprep.mubr.msk.bf16.mxu1 %vm9529_vm0, %v12212_v27 }
 0x7a4   :  { %1773 = vmatpush1.bf16.msra.mxu0 %v10413_v10  ;;  %7498 = vmatpush3.bf16.msra.mxu1 %v10416_v62 }
 0x7a5   :  { %1774 = vmatprep.subr.bf16.mxu0 %v10419_v39  ;;  %7499 = vmatprep.subr.bf16.mxu1 %v12212_v27 }
 0x7a8   :  { %1775 = vmatpush1.bf16.msra.mxu0 %v10423_v40  ;;  %7500 = vmatpush3.bf16.msra.mxu1 %v10426_v42 }
 0x7a9   :  { %1776 = vmatprep.subr.bf16.mxu0 %v10429_v63  ;;  %7501 = vmatprep.subr.bf16.mxu1 %v12212_v27 }
 0x7ac   :  { %1777 = vmatpush1.bf16.msra.mxu0 %v10433_v57  ;;  %7502 = vmatpush3.bf16.msra.mxu1 %v10436_v8 }
 0x7ad   :  { %1778 = vmatprep.subr.bf16.mxu0 %v10439_v37  ;;  %7503 = vmatprep.subr.bf16.mxu1 %v12212_v27 }
 0x7b0   :  { %1779 = vmatpush1.bf16.msra.mxu0 %v10443_v50  ;;  %7504 = vmatpush3.bf16.msra.mxu1 %v10446_v0 }
 0x7b1   :  { %1780 = vmatprep.subr.bf16.mxu0 %v10449_v28  ;;  %7505 = vmatprep.subr.bf16.mxu1 %v12212_v27 }
 0x7b4   :  { %1781 = vmatpush1.bf16.msra.mxu0 %v10453_v7  ;;  %7506 = vmatpush3.bf16.msra.mxu1 %v10456_v60 }
 0x7b5   :  { %1782 = vmatprep.subr.bf16.mxu0 %v10459_v17  ;;  %7507 = vmatprep.subr.bf16.mxu1 %v12212_v27 }
 0x7b8   :  { %1783 = vmatpush1.bf16.msra.mxu0 %v10463_v25  ;;  %7508 = vmatpush3.bf16.msra.mxu1 %v9991_v13 }
 0x7b9   :  { %1784 = vmatprep.subr.bf16.mxu0 %v10467_v48  ;;  %7509 = vmatprep.subr.bf16.mxu1 %v12212_v27 }
 0x7bc   :  { %1785 = vmatpush1.bf16.msra.mxu0 %v9996_v14  ;;  %7510 = vmatpush3.bf16.msra.mxu1 %v10001_v16 }
 0x7bd   :  { %1880 = vmatprep.subr.bf16.mxu0 %v10389_v12  ;;  %7515 = vmatprep.subr.bf16.mxu1 %v12212_v27 }
 0x872   :  { %v1694_v49 = vpop.f32.mrb[52].mxu0  ;;  %v1735_v23 = vpop.f32.mrb[52].mxu1 }
 0x873   :  { %v1741_v58 = vadd.f32 %v1694_v49, %v10123_v54  ;;  %v1696_v15 = vpop.f32.mrb[53].mxu0  ;;  %v7493_v13 = vpop.f32.mrb[53].mxu1  ;;  %v1755_v51 = vadd.f32 %v10213_v56, %v1735_v23 }
 0x874   :  { %v1748_v21 = vadd.f32 %v1696_v15, %v10129_v5  ;;  %v1698_v24 = vpop.f32.mrb[54].mxu0  ;;  %v1738_v26 = vpop.f32.mrb[54].mxu1 }
 0x875   :  { %v6683_v31 = vmul.f32 -1.442695, %v1741_v58  ;;  %v1699_v32 = vpop.f32.mrb[55].mxu0  ;;  %v7494_v35 = vpop.f32.mrb[55].mxu1 }
 0x876   :  { %v6684_v14 = vmul.f32 -1.442695, %v1748_v21 }
 0x877   :  { %8479 = vpow2.f32 %v6683_v31 }
 0x878   :  { %8481 = vpow2.f32 %v6684_v14 }
 0x881   :  { %v8480_v16 = vpop.eup %8479 }
 0x882   :  { %v1745_v43 = vadd.f32 1.0, %v8480_v16  ;;  %v8482_v44 = vpop.eup %8481 }
 0x883   :  { %v1752_v46 = vadd.f32 1.0, %v8482_v44 }
 0x884   :  { %8483 = vrcp.f32 %v1745_v43 }
 0x885   :  { %8485 = vrcp.f32 %v1752_v46 }
 0x88e   :  { %v8484_v54 = vpop.eup %8483 }
 0x88f   :  { %v1756_v52 = vmul.f32 %v8484_v54, %v1755_v51  ;;  %v8486_v55 = vpop.eup %8485 }
 0x890   :  { %v1759_v3 = vsub.f32 1.0, %v8486_v55  ;;  %v1761_v59 = vmul.f32 %v8486_v55, %v10398_v29 }
 0x891   :  { %v1757_v5 = vadd.f32 %v1756_v52, %v10111_v18  ;;  %v10512_v18 = vld [vmem:[#allocation15 + $0x98] ss:$12 sps:$4 sm:$0xff]  }
 0x893   :  { %8487 = vtanh.f32 %v1757_v5 }
 0x89d   :  { %v8488_v4 = vpop.eup %8487 }
 0x89e   :  { %v1760_v6 = vmul.f32 %v8488_v4, %v1759_v3 }
 0x8a0   :  { %v10480_v11 = vadd.f32 %v1761_v59, %v1760_v6  ;;  %v12214_v6 = vld [vmem:[#allocation57_spill] sm:$0xff] }
 0x8a2   :  { %v1763_v45 = vpack.c.bf16 %v10480_v11, %v10480_v11 }
 0x8a4   :  { %1765 = vst [vmem:[#allocation3 + $0x14] sm:$0xf] %v1763_v45  ;;  %1803 = vmatmul.mubr.bf16.vlgmr.msra.gmra.mrb[56].mxu0 %v1763_v45  ;;  %7512 = vmatmul.mubr.bf16.vlgmr.msra.gmra.mrb[56].mxu1 %v1763_v45 }
 0x8a5   :  { %1881 = vmatpush1.bf16.msra.mxu0 %v10402_v34  ;;  %7516 = vmatpush3.bf16.msra.mxu1 %v10355_v9 }
 0x8a6   :  { %1882 = vmatprep.subr.bf16.mxu0 %v10406_v1  ;;  %7517 = vmatprep.subr.bf16.mxu1 %v12212_v27 }
 0x8a7   :  { %1912 = vmatprep.mubr.bf16.mxu0 %v12213_v38  ;;  %7531 = vmatprep.mubr.msk.bf16.mxu1 %vm9529_vm0, %v12212_v27 }
 0x8a9   :  { %1883 = vmatpush1.bf16.msra.mxu0 %v10413_v10  ;;  %7518 = vmatpush3.bf16.msra.mxu1 %v10416_v62 }
 0x8aa   :  { %1884 = vmatprep.subr.bf16.mxu0 %v10419_v39  ;;  %7519 = vmatprep.subr.bf16.mxu1 %v12212_v27 }
 0x8ad   :  { %1885 = vmatpush1.bf16.msra.mxu0 %v10423_v40  ;;  %7520 = vmatpush3.bf16.msra.mxu1 %v10426_v42 }
 0x8ae   :  { %1886 = vmatprep.subr.bf16.mxu0 %v10429_v63  ;;  %7521 = vmatprep.subr.bf16.mxu1 %v12212_v27 }
 0x8b1   :  { %1887 = vmatpush1.bf16.msra.mxu0 %v10433_v57  ;;  %7522 = vmatpush3.bf16.msra.mxu1 %v10436_v8 }
 0x8b2   :  { %1888 = vmatprep.subr.bf16.mxu0 %v10439_v37  ;;  %7523 = vmatprep.subr.bf16.mxu1 %v12212_v27 }
 0x8b5   :  { %1889 = vmatpush1.bf16.msra.mxu0 %v10443_v50  ;;  %7524 = vmatpush3.bf16.msra.mxu1 %v10446_v0 }
 0x8b6   :  { %1890 = vmatprep.subr.bf16.mxu0 %v10449_v28  ;;  %7525 = vmatprep.subr.bf16.mxu1 %v12212_v27 }
 0x8b9   :  { %1891 = vmatpush1.bf16.msra.mxu0 %v10453_v7  ;;  %7526 = vmatpush3.bf16.msra.mxu1 %v10456_v60 }
 0x8ba   :  { %1892 = vmatprep.subr.bf16.mxu0 %v10459_v17  ;;  %7527 = vmatprep.subr.bf16.mxu1 %v12212_v27 }
 0x8bd   :  { %1893 = vmatpush1.bf16.msra.mxu0 %v10463_v25  ;;  %7528 = vmatpush3.bf16.msra.mxu1 %v10512_v18 }
 0x8be   :  { %1894 = vmatprep.subr.bf16.mxu0 %v10467_v48  ;;  %7529 = vmatprep.subr.bf16.mxu1 %v12212_v27 }
 0x8c1   :  { %1895 = vmatpush1.bf16.msra.mxu0 %v10517_v33  ;;  %7530 = vmatpush3.bf16.msra.mxu1 %v10520_v41 }
 0x8c2   :  { %1990 = vmatprep.subr.bf16.mxu0 %v10389_v12  ;;  %7535 = vmatprep.subr.bf16.mxu1 %v12212_v27 }
 0x977   :  { %v1804_v30 = vpop.f32.mrb[56].mxu0  ;;  %v1845_v36 = vpop.f32.mrb[56].mxu1 }
 0x978   :  { %v1851_v19 = vadd.f32 %v1804_v30, %v10138_v20  ;;  %v1806_v47 = vpop.f32.mrb[57].mxu0  ;;  %v7513_v29 = vpop.f32.mrb[57].mxu1  ;;  %v1865_v35 = vadd.f32 %v10213_v56, %v1845_v36 }
 0x979   :  { %v1858_v22 = vadd.f32 %v1806_v47, %v10141_v53  ;;  %v1808_v49 = vpop.f32.mrb[58].mxu0  ;;  %v1848_v23 = vpop.f32.mrb[58].mxu1 }
 0x97a   :  { %v6685_v58 = vmul.f32 -1.442695, %v1851_v19  ;;  %v1809_v15 = vpop.f32.mrb[59].mxu0  ;;  %v7514_v13 = vpop.f32.mrb[59].mxu1 }
 0x97b   :  { %v6686_v21 = vmul.f32 -1.442695, %v1858_v22  ;;  %v12215_v13 = vld [vmem:[#allocation50_spill] sm:$0xff] }
 0x97c   :  { %8489 = vpow2.f32 %v6685_v58 }
 0x97d   :  { %8491 = vpow2.f32 %v6686_v21 }
 0x986   :  { %v8490_v24 = vpop.eup %8489 }
 0x987   :  { %v1855_v26 = vadd.f32 1.0, %v8490_v24  ;;  %v8492_v31 = vpop.eup %8491 }
 0x988   :  { %v1862_v32 = vadd.f32 1.0, %v8492_v31 }
 0x989   :  { %8493 = vrcp.f32 %v1855_v26 }
 0x98a   :  { %8495 = vrcp.f32 %v1862_v32 }
 0x993   :  { %v8494_v20 = vpop.eup %8493 }
 0x994   :  { %v1866_v14 = vmul.f32 %v8494_v20, %v1865_v35  ;;  %v8496_v16 = vpop.eup %8495 }
 0x995   :  { %v1869_v43 = vsub.f32 1.0, %v8496_v16  ;;  %v1871_v51 = vmul.f32 %v8496_v16, %v10480_v11  ;;  %v12216_v16 = vld [vmem:[#allocation60_spill] sm:$0xff] }
 0x996   :  { %v1867_v53 = vadd.f32 %v1866_v14, %v10096_v61 }
 0x998   :  { %8497 = vtanh.f32 %v1867_v53 }
 0x9a2   :  { %v8498_v44 = vpop.eup %8497 }
 0x9a3   :  { %v1870_v46 = vmul.f32 %v8498_v44, %v1869_v43 }
 0x9a5   :  { %v10530_v54 = vadd.f32 %v1871_v51, %v1870_v46  ;;  %v12217_v51 = vld [vmem:[#allocation61_spill] sm:$0xff] }
 0x9a7   :  { %v1873_v52 = vpack.c.bf16 %v10530_v54, %v10530_v54 }
 0x9a9   :  { %1875 = vst [vmem:[#allocation3 + $0x18] sm:$0xf] %v1873_v52  ;;  %1913 = vmatmul.mubr.bf16.vlgmr.msra.gmra.mrb[60].mxu0 %v1873_v52  ;;  %7532 = vmatmul.mubr.bf16.vlgmr.msra.gmra.mrb[60].mxu1 %v1873_v52 }
 0x9aa   :  { %1991 = vmatpush1.bf16.msra.mxu0 %v10402_v34  ;;  %7536 = vmatpush3.bf16.msra.mxu1 %v10355_v9 }
 0x9ab   :  { %1992 = vmatprep.subr.bf16.mxu0 %v10406_v1  ;;  %7537 = vmatprep.subr.bf16.mxu1 %v12212_v27 }
 0x9ac   :  { %2022 = vmatprep.mubr.bf16.mxu0 %v12213_v38  ;;  %7551 = vmatprep.mubr.msk.bf16.mxu1 %vm9529_vm0, %v12212_v27 }
 0x9ae   :  { %1993 = vmatpush1.bf16.msra.mxu0 %v10413_v10  ;;  %7538 = vmatpush3.bf16.msra.mxu1 %v10416_v62 }
 0x9af   :  { %1994 = vmatprep.subr.bf16.mxu0 %v10419_v39  ;;  %7539 = vmatprep.subr.bf16.mxu1 %v12212_v27 }
 0x9b2   :  { %1995 = vmatpush1.bf16.msra.mxu0 %v10423_v40  ;;  %7540 = vmatpush3.bf16.msra.mxu1 %v10426_v42 }
 0x9b3   :  { %1996 = vmatprep.subr.bf16.mxu0 %v10429_v63  ;;  %7541 = vmatprep.subr.bf16.mxu1 %v12212_v27 }
 0x9b6   :  { %1997 = vmatpush1.bf16.msra.mxu0 %v10433_v57  ;;  %7542 = vmatpush3.bf16.msra.mxu1 %v10436_v8 }
 0x9b7   :  { %1998 = vmatprep.subr.bf16.mxu0 %v10439_v37  ;;  %7543 = vmatprep.subr.bf16.mxu1 %v12212_v27 }
 0x9ba   :  { %1999 = vmatpush1.bf16.msra.mxu0 %v10443_v50  ;;  %7544 = vmatpush3.bf16.msra.mxu1 %v10446_v0 }
 0x9bb   :  { %2000 = vmatprep.subr.bf16.mxu0 %v10449_v28  ;;  %7545 = vmatprep.subr.bf16.mxu1 %v12212_v27 }
 0x9be   :  { %2001 = vmatpush1.bf16.msra.mxu0 %v10453_v7  ;;  %7546 = vmatpush3.bf16.msra.mxu1 %v10456_v60 }
 0x9bf   :  { %2002 = vmatprep.subr.bf16.mxu0 %v10459_v17  ;;  %7547 = vmatprep.subr.bf16.mxu1 %v12212_v27 }
 0x9c2   :  { %2003 = vmatpush1.bf16.msra.mxu0 %v10463_v25  ;;  %7548 = vmatpush3.bf16.msra.mxu1 %v10512_v18 }
 0x9c3   :  { %2004 = vmatprep.subr.bf16.mxu0 %v10467_v48  ;;  %7549 = vmatprep.subr.bf16.mxu1 %v12212_v27 }
 0x9c6   :  { %2005 = vmatpush1.bf16.msra.mxu0 %v10517_v33  ;;  %7550 = vmatpush3.bf16.msra.mxu1 %v10520_v41 }
 0x9c7   :  { %2100 = vmatprep.subr.bf16.mxu0 %v10389_v12  ;;  %7555 = vmatprep.subr.bf16.mxu1 %v12212_v27 }
 0xa7c   :  { %v1914_v61 = vpop.f32.mrb[60].mxu0  ;;  %v1955_v5 = vpop.f32.mrb[60].mxu1 }
 0xa7d   :  { %v1961_v55 = vadd.f32 %v1914_v61, %v10147_v2  ;;  %v1916_v3 = vpop.f32.mrb[61].mxu0  ;;  %v7533_v4 = vpop.f32.mrb[61].mxu1  ;;  %v1975_v58 = vadd.f32 %v10213_v56, %v1955_v5 }
 0xa7e   :  { %v1968_v59 = vadd.f32 %v1916_v3, %v12214_v6  ;;  %v1918_v11 = vpop.f32.mrb[62].mxu0  ;;  %v1958_v45 = vpop.f32.mrb[62].mxu1 }
 0xa7f   :  { %v6687_v30 = vmul.f32 -1.442695, %v1961_v55  ;;  %v1919_v36 = vpop.f32.mrb[63].mxu0  ;;  %v7534_v19 = vpop.f32.mrb[63].mxu1 }
 0xa80   :  { %v6688_v47 = vmul.f32 -1.442695, %v1968_v59 }
 0xa81   :  { %8499 = vpow2.f32 %v6687_v30  ;;  %v10615_v30 = vld [vmem:[#allocation18] ss:$0 sm:$0xff] }
 0xa82   :  { %8501 = vpow2.f32 %v6688_v47 }
 0xa8b   :  { %v8500_v29 = vpop.eup %8499 }
 0xa8c   :  { %v1965_v22 = vadd.f32 1.0, %v8500_v29  ;;  %v8502_v49 = vpop.eup %8501  ;;  %v12218_v29 = vld [vmem:[#allocation52_spill] sm:$0xff] }
 0xa8d   :  { %v1972_v23 = vadd.f32 1.0, %v8502_v49 }
 0xa8e   :  { %8503 = vrcp.f32 %v1965_v22 }
 0xa8f   :  { %8505 = vrcp.f32 %v1972_v23 }
 0xa98   :  { %v8504_v2 = vpop.eup %8503 }
 0xa99   :  { %v1976_v15 = vmul.f32 %v8504_v2, %v1975_v58  ;;  %v8506_v24 = vpop.eup %8505 }
 0xa9a   :  { %v1979_v26 = vsub.f32 1.0, %v8506_v24  ;;  %v1981_v35 = vmul.f32 %v8506_v24, %v10530_v54 }
 0xa9b   :  { %v1977_v21 = vadd.f32 %v1976_v15, %v12215_v13 }
 0xa9d   :  { %8507 = vtanh.f32 %v1977_v21 }
 0xaa7   :  { %v8508_v31 = vpop.eup %8507 }
 0xaa8   :  { %v1980_v32 = vmul.f32 %v8508_v31, %v1979_v26  ;;  %v12219_v31 = vld [vmem:[#allocation62_spill] sm:$0xff] }
 0xaaa   :  { %v10574_v20 = vadd.f32 %v1981_v35, %v1980_v32 }
 0xaac   :  { %v1983_v14 = vpack.c.bf16 %v10574_v20, %v10574_v20 }
 0xaae   :  { %1985 = vst [vmem:[#allocation3 + $0x1c] sm:$0xf] %v1983_v14  ;;  %2023 = vmatmul.mubr.bf16.vlgmr.msra.gmra.mrb[64].mxu0 %v1983_v14  ;;  %7552 = vmatmul.mubr.bf16.vlgmr.msra.gmra.mrb[64].mxu1 %v1983_v14  ;;  %v12220_v14 = vld [vmem:[#allocation63_spill] sm:$0xff] }
 0xaaf   :  { %2101 = vmatpush1.bf16.msra.mxu0 %v10402_v34  ;;  %7556 = vmatpush3.bf16.msra.mxu1 %v10355_v9 }
 0xab0   :  { %2102 = vmatprep.subr.bf16.mxu0 %v10406_v1  ;;  %7557 = vmatprep.subr.bf16.mxu1 %v12212_v27 }
 0xab1   :  { %2132 = vmatprep.mubr.bf16.mxu0 %v12213_v38  ;;  %7571 = vmatprep.mubr.msk.bf16.mxu1 %vm9529_vm0, %v12212_v27 }
 0xab3   :  { %2103 = vmatpush1.bf16.msra.mxu0 %v10413_v10  ;;  %7558 = vmatpush3.bf16.msra.mxu1 %v10416_v62 }
 0xab4   :  { %2104 = vmatprep.subr.bf16.mxu0 %v10419_v39  ;;  %7559 = vmatprep.subr.bf16.mxu1 %v12212_v27 }
 0xab7   :  { %2105 = vmatpush1.bf16.msra.mxu0 %v10423_v40  ;;  %7560 = vmatpush3.bf16.msra.mxu1 %v10426_v42 }
 0xab8   :  { %2106 = vmatprep.subr.bf16.mxu0 %v10429_v63  ;;  %7561 = vmatprep.subr.bf16.mxu1 %v12212_v27 }
 0xabb   :  { %2107 = vmatpush1.bf16.msra.mxu0 %v10433_v57  ;;  %7562 = vmatpush3.bf16.msra.mxu1 %v10436_v8 }
 0xabc   :  { %2108 = vmatprep.subr.bf16.mxu0 %v10439_v37  ;;  %7563 = vmatprep.subr.bf16.mxu1 %v12212_v27 }
 0xabf   :  { %2109 = vmatpush1.bf16.msra.mxu0 %v10443_v50  ;;  %7564 = vmatpush3.bf16.msra.mxu1 %v10446_v0 }
 0xac0   :  { %2110 = vmatprep.subr.bf16.mxu0 %v10449_v28  ;;  %7565 = vmatprep.subr.bf16.mxu1 %v12212_v27 }
 0xac3   :  { %2111 = vmatpush1.bf16.msra.mxu0 %v10453_v7  ;;  %7566 = vmatpush3.bf16.msra.mxu1 %v10456_v60 }
 0xac4   :  { %2112 = vmatprep.subr.bf16.mxu0 %v10459_v17  ;;  %7567 = vmatprep.subr.bf16.mxu1 %v12212_v27 }
 0xac7   :  { %2113 = vmatpush1.bf16.msra.mxu0 %v10463_v25  ;;  %7568 = vmatpush3.bf16.msra.mxu1 %v10512_v18 }
 0xac8   :  { %2114 = vmatprep.subr.bf16.mxu0 %v10467_v48  ;;  %7569 = vmatprep.subr.bf16.mxu1 %v12212_v27 }
 0xacb   :  { %2115 = vmatpush1.bf16.msra.mxu0 %v10517_v33  ;;  %7570 = vmatpush3.bf16.msra.mxu1 %v10520_v41 }
 0xacc   :  { %2210 = vmatprep.subr.bf16.mxu0 %v10389_v12  ;;  %7575 = vmatprep.subr.bf16.mxu1 %v12212_v27 }
 0xb81   :  { %v2024_v56 = vpop.f32.mrb[64].mxu0  ;;  %v2065_v53 = vpop.f32.mrb[64].mxu1 }
 0xb82   :  { %v2071_v43 = vadd.f32 %v2024_v56, %v12216_v16  ;;  %v2026_v44 = vpop.f32.mrb[65].mxu0  ;;  %v7553_v46 = vpop.f32.mrb[65].mxu1  ;;  %v2085_v36 = vadd.f32 %v10615_v30, %v2065_v53 }
 0xb83   :  { %v2078_v54 = vadd.f32 %v2026_v44, %v12217_v51  ;;  %v2028_v52 = vpop.f32.mrb[66].mxu0  ;;  %v2068_v61 = vpop.f32.mrb[66].mxu1 }
 0xb84   :  { %v6689_v5 = vmul.f32 -1.442695, %v2071_v43  ;;  %v2029_v55 = vpop.f32.mrb[67].mxu0  ;;  %v7554_v3 = vpop.f32.mrb[67].mxu1 }
 0xb85   :  { %v6690_v4 = vmul.f32 -1.442695, %v2078_v54 }
 0xb86   :  { %8509 = vpow2.f32 %v6689_v5 }
 0xb87   :  { %8511 = vpow2.f32 %v6690_v4 }
 0xb90   :  { %v8510_v6 = vpop.eup %8509 }
 0xb91   :  { %v2075_v59 = vadd.f32 1.0, %v8510_v6  ;;  %v8512_v11 = vpop.eup %8511  ;;  %v12221_v6 = vld [vmem:[#allocation54_spill] sm:$0xff] }
 0xb92   :  { %v2082_v45 = vadd.f32 1.0, %v8512_v11 }
 0xb93   :  { %8513 = vrcp.f32 %v2075_v59 }
 0xb94   :  { %8515 = vrcp.f32 %v2082_v45 }
 0xb9d   :  { %v8514_v19 = vpop.eup %8513 }
 0xb9e   :  { %v2086_v47 = vmul.f32 %v8514_v19, %v2085_v36  ;;  %v8516_v49 = vpop.eup %8515 }
 0xb9f   :  { %v2089_v23 = vsub.f32 1.0, %v8516_v49  ;;  %v2091_v15 = vmul.f32 %v8516_v49, %v10574_v20 }
 0xba0   :  { %v2087_v22 = vadd.f32 %v2086_v47, %v12218_v29 }
 0xba2   :  { %8517 = vtanh.f32 %v2087_v22 }
 0xbac   :  { %v8518_v58 = vpop.eup %8517 }
 0xbad   :  { %v2090_v2 = vmul.f32 %v8518_v58, %v2089_v23  ;;  %v12222_v58 = vld [vmem:[#allocation64_spill] sm:$0xff] }
 0xbaf   :  { %v10620_v13 = vadd.f32 %v2091_v15, %v2090_v2 }
 0xbb1   :  { %v2093_v21 = vpack.c.bf16 %v10620_v13, %v10620_v13 }
 0xbb3   :  { %2095 = vst [vmem:[#allocation3 + $0x20] sm:$0xf] %v2093_v21  ;;  %2133 = vmatmul.mubr.bf16.vlgmr.msra.gmra.mrb[68].mxu0 %v2093_v21  ;;  %7572 = vmatmul.mubr.bf16.vlgmr.msra.gmra.mrb[68].mxu1 %v2093_v21  ;;  %v12223_v21 = vld [vmem:[#allocation65_spill] sm:$0xff] }
 0xbb4   :  { %2211 = vmatpush1.bf16.msra.mxu0 %v10402_v34  ;;  %7576 = vmatpush3.bf16.msra.mxu1 %v10355_v9 }
 0xbb5   :  { %2212 = vmatprep.subr.bf16.mxu0 %v10406_v1  ;;  %7577 = vmatprep.subr.bf16.mxu1 %v12212_v27 }
 0xbb6   :  { %2242 = vmatprep.mubr.bf16.mxu0 %v12213_v38  ;;  %7591 = vmatprep.mubr.msk.bf16.mxu1 %vm9529_vm0, %v12212_v27 }
 0xbb8   :  { %2213 = vmatpush1.bf16.msra.mxu0 %v10413_v10  ;;  %7578 = vmatpush3.bf16.msra.mxu1 %v10416_v62 }
 0xbb9   :  { %2214 = vmatprep.subr.bf16.mxu0 %v10419_v39  ;;  %7579 = vmatprep.subr.bf16.mxu1 %v12212_v27 }
 0xbbc   :  { %2215 = vmatpush1.bf16.msra.mxu0 %v10423_v40  ;;  %7580 = vmatpush3.bf16.msra.mxu1 %v10426_v42 }
 0xbbd   :  { %2216 = vmatprep.subr.bf16.mxu0 %v10429_v63  ;;  %7581 = vmatprep.subr.bf16.mxu1 %v12212_v27 }
 0xbc0   :  { %2217 = vmatpush1.bf16.msra.mxu0 %v10433_v57  ;;  %7582 = vmatpush3.bf16.msra.mxu1 %v10436_v8 }
 0xbc1   :  { %2218 = vmatprep.subr.bf16.mxu0 %v10439_v37  ;;  %7583 = vmatprep.subr.bf16.mxu1 %v12212_v27 }
 0xbc4   :  { %2219 = vmatpush1.bf16.msra.mxu0 %v10443_v50  ;;  %7584 = vmatpush3.bf16.msra.mxu1 %v10446_v0 }
 0xbc5   :  { %2220 = vmatprep.subr.bf16.mxu0 %v10449_v28  ;;  %7585 = vmatprep.subr.bf16.mxu1 %v12212_v27 }
 0xbc8   :  { %2221 = vmatpush1.bf16.msra.mxu0 %v10453_v7  ;;  %7586 = vmatpush3.bf16.msra.mxu1 %v10456_v60 }
 0xbc9   :  { %2222 = vmatprep.subr.bf16.mxu0 %v10459_v17  ;;  %7587 = vmatprep.subr.bf16.mxu1 %v12212_v27 }
 0xbcc   :  { %2223 = vmatpush1.bf16.msra.mxu0 %v10463_v25  ;;  %7588 = vmatpush3.bf16.msra.mxu1 %v10512_v18 }
 0xbcd   :  { %2224 = vmatprep.subr.bf16.mxu0 %v10467_v48  ;;  %7589 = vmatprep.subr.bf16.mxu1 %v12212_v27 }
 0xbd0   :  { %2225 = vmatpush1.bf16.msra.mxu0 %v10517_v33  ;;  %7590 = vmatpush3.bf16.msra.mxu1 %v10520_v41 }
 0xbd1   :  { %2320 = vmatprep.subr.bf16.mxu0 %v10389_v12  ;;  %7595 = vmatprep.subr.bf16.mxu1 %v12212_v27 }
 0xc86   :  { %v2134_v24 = vpop.f32.mrb[68].mxu0  ;;  %v2175_v26 = vpop.f32.mrb[68].mxu1 }
 0xc87   :  { %v2181_v32 = vadd.f32 %v2134_v24, %v12219_v31  ;;  %v2136_v35 = vpop.f32.mrb[69].mxu0  ;;  %v7573_v20 = vpop.f32.mrb[69].mxu1  ;;  %v2195_v55 = vadd.f32 %v10615_v30, %v2175_v26 }
 0xc88   :  { %v2188_v56 = vadd.f32 %v2136_v35, %v12220_v14  ;;  %v2138_v53 = vpop.f32.mrb[70].mxu0  ;;  %v2178_v16 = vpop.f32.mrb[70].mxu1 }
 0xc89   :  { %v6691_v43 = vmul.f32 -1.442695, %v2181_v32  ;;  %v2139_v44 = vpop.f32.mrb[71].mxu0  ;;  %v7574_v46 = vpop.f32.mrb[71].mxu1 }
 0xc8a   :  { %v6692_v51 = vmul.f32 -1.442695, %v2188_v56 }
 0xc8b   :  { %8519 = vpow2.f32 %v6691_v43 }
 0xc8c   :  { %8521 = vpow2.f32 %v6692_v51 }
 0xc95   :  { %v8520_v54 = vpop.eup %8519 }
 0xc96   :  { %v2185_v52 = vadd.f32 1.0, %v8520_v54  ;;  %v8522_v61 = vpop.eup %8521  ;;  %v12224_v54 = vld [vmem:[#allocation51_spill] sm:$0xff] }
 0xc97   :  { %v2192_v5 = vadd.f32 1.0, %v8522_v61 }
 0xc98   :  { %8523 = vrcp.f32 %v2185_v52 }
 0xc99   :  { %8525 = vrcp.f32 %v2192_v5 }
 0xca2   :  { %v8524_v3 = vpop.eup %8523 }
 0xca3   :  { %v2196_v4 = vmul.f32 %v8524_v3, %v2195_v55  ;;  %v8526_v11 = vpop.eup %8525 }
 0xca4   :  { %v2199_v45 = vsub.f32 1.0, %v8526_v11  ;;  %v2201_v47 = vmul.f32 %v8526_v11, %v10620_v13 }
 0xca5   :  { %v2197_v59 = vadd.f32 %v2196_v4, %v12221_v6 }
 0xca7   :  { %8527 = vtanh.f32 %v2197_v59 }
 0xcb1   :  { %v8528_v36 = vpop.eup %8527 }
 0xcb2   :  { %v2200_v19 = vmul.f32 %v8528_v36, %v2199_v45  ;;  %v12225_v45 = vld [vmem:[#allocation66_spill] sm:$0xff] }
 0xcb4   :  { %v10664_v29 = vadd.f32 %v2201_v47, %v2200_v19 }
 0xcb6   :  { %v2203_v22 = vpack.c.bf16 %v10664_v29, %v10664_v29 }
 0xcb8   :  { %2205 = vst [vmem:[#allocation3 + $0x24] sm:$0xf] %v2203_v22  ;;  %2243 = vmatmul.mubr.bf16.vlgmr.msra.gmra.mrb[72].mxu0 %v2203_v22  ;;  %7592 = vmatmul.mubr.bf16.vlgmr.msra.gmra.mrb[72].mxu1 %v2203_v22 }
 0xcb9   :  { %2321 = vmatpush1.bf16.msra.mxu0 %v10402_v34  ;;  %7596 = vmatpush3.bf16.msra.mxu1 %v10355_v9 }
 0xcba   :  { %2322 = vmatprep.subr.bf16.mxu0 %v10406_v1  ;;  %7597 = vmatprep.subr.bf16.mxu1 %v12212_v27 }
 0xcbb   :  { %2352 = vmatprep.mubr.bf16.mxu0 %v12213_v38  ;;  %7611 = vmatprep.mubr.msk.bf16.mxu1 %vm9529_vm0, %v12212_v27 }
 0xcbd   :  { %2323 = vmatpush1.bf16.msra.mxu0 %v10413_v10  ;;  %7598 = vmatpush3.bf16.msra.mxu1 %v10416_v62 }
 0xcbe   :  { %2324 = vmatprep.subr.bf16.mxu0 %v10419_v39  ;;  %7599 = vmatprep.subr.bf16.mxu1 %v12212_v27 }
 0xcc1   :  { %2325 = vmatpush1.bf16.msra.mxu0 %v10423_v40  ;;  %7600 = vmatpush3.bf16.msra.mxu1 %v10426_v42 }
 0xcc2   :  { %2326 = vmatprep.subr.bf16.mxu0 %v10429_v63  ;;  %7601 = vmatprep.subr.bf16.mxu1 %v12212_v27 }
 0xcc5   :  { %2327 = vmatpush1.bf16.msra.mxu0 %v10433_v57  ;;  %7602 = vmatpush3.bf16.msra.mxu1 %v10436_v8 }
 0xcc6   :  { %2328 = vmatprep.subr.bf16.mxu0 %v10439_v37  ;;  %7603 = vmatprep.subr.bf16.mxu1 %v12212_v27 }
 0xcc9   :  { %2329 = vmatpush1.bf16.msra.mxu0 %v10443_v50  ;;  %7604 = vmatpush3.bf16.msra.mxu1 %v10446_v0 }
 0xcca   :  { %2330 = vmatprep.subr.bf16.mxu0 %v10449_v28  ;;  %7605 = vmatprep.subr.bf16.mxu1 %v12212_v27 }
 0xccd   :  { %2331 = vmatpush1.bf16.msra.mxu0 %v10453_v7  ;;  %7606 = vmatpush3.bf16.msra.mxu1 %v10456_v60 }
 0xcce   :  { %2332 = vmatprep.subr.bf16.mxu0 %v10459_v17  ;;  %7607 = vmatprep.subr.bf16.mxu1 %v12212_v27 }
 0xcd1   :  { %2333 = vmatpush1.bf16.msra.mxu0 %v10463_v25  ;;  %7608 = vmatpush3.bf16.msra.mxu1 %v10512_v18 }
 0xcd2   :  { %2334 = vmatprep.subr.bf16.mxu0 %v10467_v48  ;;  %7609 = vmatprep.subr.bf16.mxu1 %v12212_v27 }
 0xcd5   :  { %2335 = vmatpush1.bf16.msra.mxu0 %v10517_v33  ;;  %7610 = vmatpush3.bf16.msra.mxu1 %v10520_v41 }
 0xcd6   :  { %2430 = vmatprep.subr.bf16.mxu0 %v10389_v12  ;;  %7615 = vmatprep.subr.bf16.mxu1 %v12212_v27 }
 0xd8b   :  { %v2244_v49 = vpop.f32.mrb[72].mxu0  ;;  %v2285_v23 = vpop.f32.mrb[72].mxu1 }
 0xd8c   :  { %v2291_v2 = vadd.f32 %v2244_v49, %v12222_v58  ;;  %v2246_v15 = vpop.f32.mrb[73].mxu0  ;;  %v7593_v13 = vpop.f32.mrb[73].mxu1  ;;  %v2305_v44 = vadd.f32 %v10615_v30, %v2285_v23 }
 0xd8d   :  { %v2298_v24 = vadd.f32 %v2246_v15, %v12223_v21  ;;  %v2248_v26 = vpop.f32.mrb[74].mxu0  ;;  %v2288_v31 = vpop.f32.mrb[74].mxu1 }
 0xd8e   :  { %v6693_v32 = vmul.f32 -1.442695, %v2291_v2  ;;  %v2249_v35 = vpop.f32.mrb[75].mxu0  ;;  %v7594_v20 = vpop.f32.mrb[75].mxu1 }
 0xd8f   :  { %v6694_v14 = vmul.f32 -1.442695, %v2298_v24  ;;  %v12227_v20 = vld [vmem:[#allocation53_spill] sm:$0xff] }
 0xd90   :  { %8529 = vpow2.f32 %v6693_v32 }
 0xd91   :  { %8531 = vpow2.f32 %v6694_v14 }
 0xd9a   :  { %v8530_v56 = vpop.eup %8529 }
 0xd9b   :  { %v2295_v53 = vadd.f32 1.0, %v8530_v56  ;;  %v8532_v16 = vpop.eup %8531 }
 0xd9c   :  { %v2302_v43 = vadd.f32 1.0, %v8532_v16 }
 0xd9d   :  { %8533 = vrcp.f32 %v2295_v53 }
 0xd9e   :  { %8535 = vrcp.f32 %v2302_v43 }
 0xda7   :  { %v8534_v46 = vpop.eup %8533 }
 0xda8   :  { %v2306_v51 = vmul.f32 %v8534_v46, %v2305_v44  ;;  %v8536_v61 = vpop.eup %8535 }
 0xda9   :  { %v2309_v5 = vsub.f32 1.0, %v8536_v61  ;;  %v2311_v4 = vmul.f32 %v8536_v61, %v10664_v29  ;;  %v12226_v29 = vld [vmem:[#allocation67_spill] sm:$0xff] }
 0xdaa   :  { %v2307_v52 = vadd.f32 %v2306_v51, %v12224_v54  ;;  %v10757_v54 = vld [vmem:[#allocation15 + $0x8] ss:$12 sps:$4 sm:$0xff]  }
 0xdac   :  { %8537 = vtanh.f32 %v2307_v52 }
 0xdb6   :  { %v8538_v55 = vpop.eup %8537 }
 0xdb7   :  { %v2310_v3 = vmul.f32 %v8538_v55, %v2309_v5  ;;  %v12230_v55 = vld [vmem:[#allocation56_spill] sm:$0xff] }
 0xdb9   :  { %v10708_v6 = vadd.f32 %v2311_v4, %v2310_v3 }
 0xdbb   :  { %v2313_v59 = vpack.c.bf16 %v10708_v6, %v10708_v6 }
 0xdbd   :  { %2315 = vst [vmem:[#allocation3 + $0x28] sm:$0xf] %v2313_v59  ;;  %2353 = vmatmul.mubr.bf16.vlgmr.msra.gmra.mrb[76].mxu0 %v2313_v59  ;;  %7612 = vmatmul.mubr.bf16.vlgmr.msra.gmra.mrb[76].mxu1 %v2313_v59 }
 0xdbe   :  { %2431 = vmatpush1.bf16.msra.mxu0 %v10402_v34  ;;  %7616 = vmatpush3.bf16.msra.mxu1 %v10355_v9 }
 0xdbf   :  { %2432 = vmatprep.subr.bf16.mxu0 %v10406_v1  ;;  %7617 = vmatprep.subr.bf16.mxu1 %v12212_v27 }
 0xdc0   :  { %2462 = vmatprep.mubr.bf16.mxu0 %v12213_v38  ;;  %7631 = vmatprep.mubr.msk.bf16.mxu1 %vm9529_vm0, %v12212_v27 }
 0xdc2   :  { %2433 = vmatpush1.bf16.msra.mxu0 %v10413_v10  ;;  %7618 = vmatpush3.bf16.msra.mxu1 %v10416_v62 }
 0xdc3   :  { %2434 = vmatprep.subr.bf16.mxu0 %v10419_v39  ;;  %7619 = vmatprep.subr.bf16.mxu1 %v12212_v27 }
 0xdc6   :  { %2435 = vmatpush1.bf16.msra.mxu0 %v10423_v40  ;;  %7620 = vmatpush3.bf16.msra.mxu1 %v10426_v42 }
 0xdc7   :  { %2436 = vmatprep.subr.bf16.mxu0 %v10429_v63  ;;  %7621 = vmatprep.subr.bf16.mxu1 %v12212_v27 }
 0xdca   :  { %2437 = vmatpush1.bf16.msra.mxu0 %v10433_v57  ;;  %7622 = vmatpush3.bf16.msra.mxu1 %v10436_v8 }
 0xdcb   :  { %2438 = vmatprep.subr.bf16.mxu0 %v10439_v37  ;;  %7623 = vmatprep.subr.bf16.mxu1 %v12212_v27 }
 0xdce   :  { %2439 = vmatpush1.bf16.msra.mxu0 %v10443_v50  ;;  %7624 = vmatpush3.bf16.msra.mxu1 %v10446_v0 }
 0xdcf   :  { %2440 = vmatprep.subr.bf16.mxu0 %v10449_v28  ;;  %7625 = vmatprep.subr.bf16.mxu1 %v12212_v27 }
 0xdd2   :  { %2441 = vmatpush1.bf16.msra.mxu0 %v10453_v7  ;;  %7626 = vmatpush3.bf16.msra.mxu1 %v10456_v60 }
 0xdd3   :  { %2442 = vmatprep.subr.bf16.mxu0 %v10459_v17  ;;  %7627 = vmatprep.subr.bf16.mxu1 %v12212_v27 }
 0xdd6   :  { %2443 = vmatpush1.bf16.msra.mxu0 %v10463_v25  ;;  %7628 = vmatpush3.bf16.msra.mxu1 %v10512_v18 }
 0xdd7   :  { %2444 = vmatprep.subr.bf16.mxu0 %v10467_v48  ;;  %7629 = vmatprep.subr.bf16.mxu1 %v12212_v27 }
 0xdda   :  { %2445 = vmatpush1.bf16.msra.mxu0 %v10517_v33  ;;  %7630 = vmatpush3.bf16.msra.mxu1 %v10520_v41 }
 0xddb   :  { %2540 = vmatprep.subr.bf16.mxu0 %v10389_v12  ;;  %7635 = vmatprep.subr.bf16.mxu1 %v12212_v27 }
 0xe90   :  { %v2354_v9 = vpop.f32.mrb[76].mxu0  ;;  %v2395_v11 = vpop.f32.mrb[76].mxu1 }
 0xe91   :  { %v2401_v36 = vadd.f32 %v2354_v9, %v12225_v45  ;;  %v2356_v19 = vpop.f32.mrb[77].mxu0  ;;  %v7613_v47 = vpop.f32.mrb[77].mxu1  ;;  %v2415_v31 = vadd.f32 %v10615_v30, %v2395_v11 }
 0xe92   :  { %v2408_v22 = vadd.f32 %v2356_v19, %v12226_v29  ;;  %v2358_v49 = vpop.f32.mrb[78].mxu0  ;;  %v2398_v23 = vpop.f32.mrb[78].mxu1  ;;  %v10804_v19 = vld [vmem:[#allocation15] ss:$12 sps:$4 sm:$0xff]   ;;  %v10808_v47 = vld [vmem:[#allocation15 + $0x1c] ss:$12 sps:$4 sm:$0xff]  }
 0xe93   :  { %v6695_v58 = vmul.f32 -1.442695, %v2401_v36  ;;  %v2359_v2 = vpop.f32.mrb[79].mxu0  ;;  %v7614_v15 = vpop.f32.mrb[79].mxu1  ;;  %v10815_v29 = vld [vmem:[#allocation15 + $0x18] ss:$12 sps:$4 sm:$0xff]  }
 0xe94   :  { %v6696_v13 = vmul.f32 -1.442695, %v2408_v22  ;;  %v10818_v22 = vld [vmem:[#allocation15 + $0x20] ss:$12 sps:$4 sm:$0xff]   ;;  %v10825_v23 = vld [vmem:[#allocation15 + $0x30] ss:$12 sps:$4 sm:$0xff]  }
 0xe95   :  { %8539 = vpow2.f32 %v6695_v58  ;;  %v10821_v49 = vld [vmem:[#allocation15 + $0x34] ss:$12 sps:$4 sm:$0xff]   ;;  %v10828_v58 = vld [vmem:[#allocation15 + $0x38] ss:$12 sps:$4 sm:$0xff]  }
 0xe96   :  { %8541 = vpow2.f32 %v6696_v13  ;;  %v10831_v2 = vld [vmem:[#allocation15 + $0x4c] ss:$12 sps:$4 sm:$0xff]   ;;  %v10835_v15 = vld [vmem:[#allocation15 + $0x48] ss:$12 sps:$4 sm:$0xff]   ;;  %v10838_v13 = vld [vmem:[#allocation15 + $0x50] ss:$12 sps:$4 sm:$0xff]  }
 0xe9f   :  { %v8540_v21 = vpop.eup %8539 }
 0xea0   :  { %v2405_v12 = vadd.f32 1.0, %v8540_v21  ;;  %v8542_v24 = vpop.eup %8541  ;;  %v10841_v21 = vld [vmem:[#allocation15 + $0x64] ss:$12 sps:$4 sm:$0xff]  }
 0xea1   :  { %v2412_v26 = vadd.f32 1.0, %v8542_v24  ;;  %v10848_v24 = vld [vmem:[#allocation15 + $0x68] ss:$12 sps:$4 sm:$0xff]  }
 0xea2   :  { %8543 = vrcp.f32 %v2405_v12  ;;  %v10845_v12 = vld [vmem:[#allocation15 + $0x60] ss:$12 sps:$4 sm:$0xff]  }
 0xea3   :  { %8545 = vrcp.f32 %v2412_v26  ;;  %v10851_v26 = vld [vmem:[#allocation15 + $0x7c] ss:$12 sps:$4 sm:$0xff]  }
 0xeac   :  { %v8544_v32 = vpop.eup %8543 }
 0xead   :  { %v2416_v35 = vmul.f32 %v8544_v32, %v2415_v31  ;;  %v8546_v56 = vpop.eup %8545  ;;  %v10855_v31 = vld [vmem:[#allocation15 + $0x78] ss:$12 sps:$4 sm:$0xff]   ;;  %v10858_v32 = vld [vmem:[#allocation15 + $0x80] ss:$12 sps:$4 sm:$0xff]  }
 0xeae   :  { %v2419_v53 = vsub.f32 1.0, %v8546_v56  ;;  %v2421_v44 = vmul.f32 %v8546_v56, %v10708_v6 }
 0xeaf   :  { %v2417_v14 = vadd.f32 %v2416_v35, %v12227_v20  ;;  %v10861_v35 = vld [vmem:[#allocation15 + $0x94] ss:$12 sps:$4 sm:$0xff]   ;;  %v10865_v20 = vld [vmem:[#allocation15 + $0x90] ss:$12 sps:$4 sm:$0xff]  }
 0xeb1   :  { %8547 = vtanh.f32 %v2417_v14  ;;  %v10869_v14 = vld [vmem:[#allocation15 + $0xac] ss:$12 sps:$4 sm:$0xff]  }
 0xebb   :  { %v8548_v16 = vpop.eup %8547 }
 0xebc   :  { %v2420_v43 = vmul.f32 %v8548_v16, %v2419_v53  ;;  %v12231_v16 = vld [vmem:[#allocation70_spill] sm:$0xff] }
 0xebe   :  { %v10752_v46 = vadd.f32 %v2421_v44, %v2420_v43 }
 0xec0   :  { %v2423_v51 = vpack.c.bf16 %v10752_v46, %v10752_v46 }
 0xec2   :  { %2425 = vst [vmem:[#allocation3 + $0x2c] sm:$0xf] %v2423_v51  ;;  %2463 = vmatmul.mubr.bf16.vlgmr.msra.gmra.mrb[80].mxu0 %v2423_v51  ;;  %7632 = vmatmul.mubr.bf16.vlgmr.msra.gmra.mrb[80].mxu1 %v2423_v51 }
 0xec3   :  { %2541 = vmatpush1.bf16.msra.mxu0 %v10402_v34  ;;  %7636 = vmatpush3.bf16.msra.mxu1 %v10757_v54  ;;  %v10791_v34 = vld [vmem:[#allocation15 + $0x4] ss:$12 sps:$4 sm:$0xff]  }
 0xec4   :  { %2542 = vmatprep.subr.bf16.mxu0 %v10406_v1  ;;  %7637 = vmatprep.subr.bf16.mxu1 %v12212_v27 }
 0xec5   :  { %2572 = vmatprep.mubr.bf16.mxu0 %v12213_v38  ;;  %7651 = vmatprep.mubr.msk.bf16.mxu1 %vm9529_vm0, %v12212_v27 }
 0xec7   :  { %2543 = vmatpush1.bf16.msra.mxu0 %v10413_v10  ;;  %7638 = vmatpush3.bf16.msra.mxu1 %v10416_v62  ;;  %v12228_v62 = vld [vmem:[#allocation68_spill] sm:$0xff] }
 0xec8   :  { %2544 = vmatprep.subr.bf16.mxu0 %v10419_v39  ;;  %7639 = vmatprep.subr.bf16.mxu1 %v12212_v27 }
 0xecb   :  { %2545 = vmatpush1.bf16.msra.mxu0 %v10423_v40  ;;  %7640 = vmatpush3.bf16.msra.mxu1 %v10426_v42 }
 0xecc   :  { %2546 = vmatprep.subr.bf16.mxu0 %v10429_v63  ;;  %7641 = vmatprep.subr.bf16.mxu1 %v12212_v27  ;;  %v12229_v63 = vld [vmem:[#allocation69_spill] sm:$0xff] }
 0xecf   :  { %2547 = vmatpush1.bf16.msra.mxu0 %v10433_v57  ;;  %7642 = vmatpush3.bf16.msra.mxu1 %v10436_v8 }
 0xed0   :  { %2548 = vmatprep.subr.bf16.mxu0 %v10439_v37  ;;  %7643 = vmatprep.subr.bf16.mxu1 %v12212_v27 }
 0xed3   :  { %2549 = vmatpush1.bf16.msra.mxu0 %v10443_v50  ;;  %7644 = vmatpush3.bf16.msra.mxu1 %v10446_v0 }
 0xed4   :  { %2550 = vmatprep.subr.bf16.mxu0 %v10449_v28  ;;  %7645 = vmatprep.subr.bf16.mxu1 %v12212_v27 }
 0xed7   :  { %2551 = vmatpush1.bf16.msra.mxu0 %v10453_v7  ;;  %7646 = vmatpush3.bf16.msra.mxu1 %v10456_v60 }
 0xed8   :  { %2552 = vmatprep.subr.bf16.mxu0 %v10459_v17  ;;  %7647 = vmatprep.subr.bf16.mxu1 %v12212_v27 }
 0xedb   :  { %2553 = vmatpush1.bf16.msra.mxu0 %v10463_v25  ;;  %7648 = vmatpush3.bf16.msra.mxu1 %v10512_v18 }
 0xedc   :  { %2554 = vmatprep.subr.bf16.mxu0 %v10467_v48  ;;  %7649 = vmatprep.subr.bf16.mxu1 %v12212_v27 }
 0xedf   :  { %2555 = vmatpush1.bf16.msra.mxu0 %v10517_v33  ;;  %7650 = vmatpush3.bf16.msra.mxu1 %v10520_v41 }
 0xee0   :  { %2650 = vmatprep.subr.bf16.mxu0 %v10791_v34  ;;  %7655 = vmatprep.subr.bf16.mxu1 %v12212_v27 }
 0xf95   :  { %v2464_v1 = vpop.f32.mrb[80].mxu0  ;;  %v2505_v10 = vpop.f32.mrb[80].mxu1 }
 0xf96   :  { %v2511_v39 = vadd.f32 %v2464_v1, %v12228_v62  ;;  %v2466_v40 = vpop.f32.mrb[81].mxu0  ;;  %v7633_v42 = vpop.f32.mrb[81].mxu1  ;;  %v2525_v52 = vadd.f32 %v10615_v30, %v2505_v10 }
 0xf97   :  { %v2518_v57 = vadd.f32 %v2466_v40, %v12229_v63  ;;  %v2468_v8 = vpop.f32.mrb[82].mxu0  ;;  %v2508_v37 = vpop.f32.mrb[82].mxu1 }
 0xf98   :  { %v6697_v50 = vmul.f32 -1.442695, %v2511_v39  ;;  %v2469_v0 = vpop.f32.mrb[83].mxu0  ;;  %v7634_v28 = vpop.f32.mrb[83].mxu1 }
 0xf99   :  { %v6698_v7 = vmul.f32 -1.442695, %v2518_v57 }
 0xf9a   :  { %8549 = vpow2.f32 %v6697_v50  ;;  %v12233_v50 = vld [vmem:[#allocation59_spill] sm:$0xff] }
 0xf9b   :  { %8551 = vpow2.f32 %v6698_v7 }
 0xfa4   :  { %v8550_v60 = vpop.eup %8549 }
 0xfa5   :  { %v2515_v17 = vadd.f32 1.0, %v8550_v60  ;;  %v8552_v25 = vpop.eup %8551 }
 0xfa6   :  { %v2522_v48 = vadd.f32 1.0, %v8552_v25 }
 0xfa7   :  { %8553 = vrcp.f32 %v2515_v17 }
 0xfa8   :  { %8555 = vrcp.f32 %v2522_v48 }
 0xfb1   :  { %v8554_v61 = vpop.eup %8553 }
 0xfb2   :  { %v2526_v5 = vmul.f32 %v8554_v61, %v2525_v52  ;;  %v8556_v4 = vpop.eup %8555  ;;  %v8988_v61 = vld [vmem:[#allocation15 + $0xa8] ss:$12 sps:$4 sm:$0xff]  }
 0xfb3   :  { %v2529_v6 = vsub.f32 1.0, %v8556_v4  ;;  %v2531_v11 = vmul.f32 %v8556_v4, %v10752_v46  ;;  %v12232_v46 = vld [vmem:[#allocation71_spill] sm:$0xff] }
 0xfb4   :  { %v2527_v3 = vadd.f32 %v2526_v5, %v12230_v55  ;;  %v8989_v5 = vld [vmem:[#allocation15 + $0xb0] ss:$12 sps:$4 sm:$0xff]  }
 0xfb5   :  { %v8309_v55 = vld [vmem:[#allocation25] sm:$0xff]  }
 0xfb6   :  { %8557 = vtanh.f32 %v2527_v3 }
 0xfc0   :  { %v8558_v59 = vpop.eup %8557 }
 0xfc1   :  { %v2530_v9 = vmul.f32 %v8558_v59, %v2529_v6  ;;  %v12234_v6 = vld [vmem:[#allocation72_spill] sm:$0xff] }
 0xfc3   :  { %v10800_v45 = vadd.f32 %v2531_v11, %v2530_v9 }
 0xfc5   :  { %v2533_v36 = vpack.c.bf16 %v10800_v45, %v10800_v45 }
 0xfc7   :  { %2535 = vst [vmem:[#allocation3 + $0x30] sm:$0xf] %v2533_v36  ;;  %2573 = vmatmul.mubr.bf16.vlgmr.msra.gmra.mrb[84].mxu0 %v2533_v36  ;;  %7652 = vmatmul.mubr.bf16.vlgmr.msra.gmra.mrb[84].mxu1 %v2533_v36 }
 0xfc8   :  { %2651 = vmatpush1.bf16.msra.mxu0 %v10804_v19  ;;  %7656 = vmatpush3.bf16.msra.mxu1 %v10757_v54 }
 0xfc9   :  { %2652 = vmatprep.subr.bf16.mxu0 %v10808_v47  ;;  %7657 = vmatprep.subr.bf16.mxu1 %v12212_v27 }
 0xfca   :  { %2682 = vmatprep.mubr.bf16.mxu0 %v12213_v38  ;;  %7671 = vmatprep.mubr.msk.bf16.mxu1 %vm9529_vm0, %v12212_v27 }
 0xfcc   :  { %2653 = vmatpush1.bf16.msra.mxu0 %v10815_v29  ;;  %7658 = vmatpush3.bf16.msra.mxu1 %v10818_v22 }
 0xfcd   :  { %2654 = vmatprep.subr.bf16.mxu0 %v10821_v49  ;;  %7659 = vmatprep.subr.bf16.mxu1 %v12212_v27 }
 0xfd0   :  { %2655 = vmatpush1.bf16.msra.mxu0 %v10825_v23  ;;  %7660 = vmatpush3.bf16.msra.mxu1 %v10828_v58 }
 0xfd1   :  { %2656 = vmatprep.subr.bf16.mxu0 %v10831_v2  ;;  %7661 = vmatprep.subr.bf16.mxu1 %v12212_v27 }
 0xfd4   :  { %2657 = vmatpush1.bf16.msra.mxu0 %v10835_v15  ;;  %7662 = vmatpush3.bf16.msra.mxu1 %v10838_v13 }
 0xfd5   :  { %2658 = vmatprep.subr.bf16.mxu0 %v10841_v21  ;;  %7663 = vmatprep.subr.bf16.mxu1 %v12212_v27 }
 0xfd8   :  { %2659 = vmatpush1.bf16.msra.mxu0 %v10845_v12  ;;  %7664 = vmatpush3.bf16.msra.mxu1 %v10848_v24 }
 0xfd9   :  { %2660 = vmatprep.subr.bf16.mxu0 %v10851_v26  ;;  %7665 = vmatprep.subr.bf16.mxu1 %v12212_v27 }
 0xfdc   :  { %2661 = vmatpush1.bf16.msra.mxu0 %v10855_v31  ;;  %7666 = vmatpush3.bf16.msra.mxu1 %v10858_v32 }
 0xfdd   :  { %2662 = vmatprep.subr.bf16.mxu0 %v10861_v35  ;;  %7667 = vmatprep.subr.bf16.mxu1 %v12212_v27 }
 0xfe0   :  { %2663 = vmatpush1.bf16.msra.mxu0 %v10865_v20  ;;  %7668 = vmatpush3.bf16.msra.mxu1 %v10512_v18 }
 0xfe1   :  { %2664 = vmatprep.subr.bf16.mxu0 %v10869_v14  ;;  %7669 = vmatprep.subr.bf16.mxu1 %v12212_v27 }
 0xfe4   :  { %2665 = vmatpush1.bf16.msra.mxu0 %v10517_v33  ;;  %7670 = vmatpush3.bf16.msra.mxu1 %v10520_v41 }
 0xfe5   :  { %2760 = vmatprep.subr.bf16.mxu0 %v10791_v34  ;;  %7675 = vmatprep.subr.bf16.mxu1 %v12212_v27 }
0x109a   :  { %v2574_v56 = vpop.f32.mrb[84].mxu0  ;;  %v2615_v53 = vpop.f32.mrb[84].mxu1 }
0x109b   :  { %v2621_v43 = vadd.f32 %v2574_v56, %v12231_v16  ;;  %v2576_v44 = vpop.f32.mrb[85].mxu0  ;;  %v7653_v18 = vpop.f32.mrb[85].mxu1  ;;  %v2635_v57 = vadd.f32 %v10615_v30, %v2615_v53 }
0x109c   :  { %v2628_v51 = vadd.f32 %v2576_v44, %v12232_v46  ;;  %v2578_v1 = vpop.f32.mrb[86].mxu0  ;;  %v2618_v10 = vpop.f32.mrb[86].mxu1  ;;  %v10925_v44 = vld [vmem:[#allocation3] sm:$0xff]   ;;  %v8314_v46 = vld [vmem:[#allocation25 + $0x20] sm:$0xff]  }
0x109d   :  { %v6699_v62 = vmul.f32 -1.442695, %v2621_v43  ;;  %v2579_v39 = vpop.f32.mrb[87].mxu0  ;;  %v7654_v40 = vpop.f32.mrb[87].mxu1  ;;  %v8311_v43 = vld [vmem:[#allocation25 + $0x8] sm:$0xff]   ;;  %v8313_v18 = vld [vmem:[#allocation25 + $0x18] sm:$0xff]  }
0x109e   :  { %v6700_v33 = vmul.f32 -1.442695, %v2628_v51  ;;  %v8315_v51 = vld [vmem:[#allocation25 + $0x28] sm:$0xff]   ;;  %v8316_v1 = vld [vmem:[#allocation25 + $0x30] sm:$0xff]   ;;  %v8317_v10 = vld [vmem:[#allocation25 + $0x38] sm:$0xff]  }
0x109f   :  { %8559 = vpow2.f32 %v6699_v62  ;;  %v10928_v62 = vld [vmem:[#allocation3 + $0x8] sm:$0xff]   ;;  %v10930_v39 = vld [vmem:[#allocation3 + $0x10] sm:$0xff]   ;;  %v10934_v40 = vld [vmem:[#allocation3 + $0x18] sm:$0xff]  }
0x10a0   :  { %8561 = vpow2.f32 %v6700_v33  ;;  %v10936_v33 = vld [vmem:[#allocation3 + $0x20] sm:$0xff]  }
0x10a9   :  { %v8560_v41 = vpop.eup %8559 }
0x10aa   :  { %v2625_v34 = vadd.f32 1.0, %v8560_v41  ;;  %v8562_v42 = vpop.eup %8561  ;;  %v10940_v41 = vld [vmem:[#allocation3 + $0x28] sm:$0xff]  }
0x10ab   :  { %v2632_v63 = vadd.f32 1.0, %v8562_v42  ;;  %v8324_v42 = vld [vmem:[#allocation28] sm:$0xff]  }
0x10ac   :  { %8563 = vrcp.f32 %v2625_v34 }
0x10ad   :  { %8565 = vrcp.f32 %v2632_v63  ;;  %v8325_v63 = vld [vmem:[#allocation28 + $0x8] sm:$0xff]  }
0x10b6   :  { %v8564_v8 = vpop.eup %8563 }
0x10b7   :  { %v2636_v37 = vmul.f32 %v8564_v8, %v2635_v57  ;;  %v8566_v28 = vpop.eup %8565  ;;  %v8326_v57 = vld [vmem:[#allocation28 + $0x10] sm:$0xff]   ;;  %v8327_v8 = vld [vmem:[#allocation28 + $0x18] sm:$0xff]  }
0x10b8   :  { %v2639_v7 = vsub.f32 1.0, %v8566_v28  ;;  %v2641_v25 = vmul.f32 %v8566_v28, %v10800_v45  ;;  %v12235_v45 = vld [vmem:[#allocation73_spill] sm:$0xff] }
0x10b9   :  { %v2637_v0 = vadd.f32 %v2636_v37, %v12233_v50  ;;  %v8328_v37 = vld [vmem:[#allocation28 + $0x20] sm:$0xff]   ;;  %v8329_v50 = vld [vmem:[#allocation28 + $0x28] sm:$0xff]  }
0x10ba   :  { %v8334_v28 = vld [vmem:[#allocation19 + $0x4] ss:$12 sps:$4 sm:$0xff]  }
0x10bb   :  { %8567 = vtanh.f32 %v2637_v0  ;;  %v8330_v0 = vld [vmem:[#allocation28 + $0x30] sm:$0xff]  }
0x10c5   :  { %v8568_v60 = vpop.eup %8567 }
0x10c6   :  { %v2640_v17 = vmul.f32 %v8568_v60, %v2639_v7  ;;  %v8331_v7 = vld [vmem:[#allocation28 + $0x38] sm:$0xff]  }
0x10c7   :  { %v8332_v60 = vld [vmem:[#allocation19] ss:$12 sps:$4 sm:$0xff]  }
0x10c8   :  { %v10882_v48 = vadd.f32 %v2641_v25, %v2640_v17  ;;  %v8337_v17 = vld [vmem:[#allocation19 + $0x1c] ss:$12 sps:$4 sm:$0xff]   ;;  %v8335_v25 = vld [vmem:[#allocation19 + $0x18] ss:$12 sps:$4 sm:$0xff]  }
0x10ca   :  { %v2643_v52 = vpack.c.bf16 %v10882_v48, %v10882_v48 }
0x10cc   :  { %2645 = vst [vmem:[#allocation3 + $0x34] sm:$0xf] %v2643_v52  ;;  %2683 = vmatmul.mubr.bf16.vlgmr.msra.gmra.mrb[88].mxu0 %v2643_v52  ;;  %7672 = vmatmul.mubr.bf16.vlgmr.msra.gmra.mrb[88].mxu1 %v2643_v52  ;;  %v8338_v52 = vld [vmem:[#allocation19 + $0x30] ss:$12 sps:$4 sm:$0xff]  }
0x10cd   :  { %2761 = vmatpush1.bf16.msra.mxu0 %v10804_v19  ;;  %7676 = vmatpush3.bf16.msra.mxu1 %v10757_v54  ;;  %v8987_v54 = vld [vmem:[#allocation15 + $0x98] ss:$12 sps:$4 sm:$0xff]  }
0x10ce   :  { %2762 = vmatprep.subr.bf16.mxu0 %v10808_v47  ;;  %7677 = vmatprep.subr.bf16.mxu1 %v12212_v27 }
0x10cf   :  { %2792 = vmatprep.mubr.bf16.mxu0 %v12213_v38  ;;  %7691 = vmatprep.mubr.msk.bf16.mxu1 %vm9529_vm0, %v12212_v27 }
0x10d1   :  { %2763 = vmatpush1.bf16.msra.mxu0 %v10815_v29  ;;  %7678 = vmatpush3.bf16.msra.mxu1 %v10818_v22 }
0x10d2   :  { %2764 = vmatprep.subr.bf16.mxu0 %v10821_v49  ;;  %7679 = vmatprep.subr.bf16.mxu1 %v12212_v27 }
0x10d3   :  { %v10942_v34 = vld [vmem:[#allocation3 + $0x30] sm:$0xff]  }
0x10d5   :  { %2765 = vmatpush1.bf16.msra.mxu0 %v10825_v23  ;;  %7680 = vmatpush3.bf16.msra.mxu1 %v10828_v58 }
0x10d6   :  { %2766 = vmatprep.subr.bf16.mxu0 %v10831_v2  ;;  %7681 = vmatprep.subr.bf16.mxu1 %v12212_v27 }
0x10d9   :  { %2767 = vmatpush1.bf16.msra.mxu0 %v10835_v15  ;;  %7682 = vmatpush3.bf16.msra.mxu1 %v10838_v13 }
0x10da   :  { %2768 = vmatprep.subr.bf16.mxu0 %v10841_v21  ;;  %7683 = vmatprep.subr.bf16.mxu1 %v12212_v27 }
0x10dd   :  { %2769 = vmatpush1.bf16.msra.mxu0 %v10845_v12  ;;  %7684 = vmatpush3.bf16.msra.mxu1 %v10848_v24 }
0x10de   :  { %2770 = vmatprep.subr.bf16.mxu0 %v10851_v26  ;;  %7685 = vmatprep.subr.bf16.mxu1 %v12212_v27  ;;  %v12236_v26 = vld [vmem:[#allocation55_spill] sm:$0xff] }
0x10e1   :  { %2771 = vmatpush1.bf16.msra.mxu0 %v10855_v31  ;;  %7686 = vmatpush3.bf16.msra.mxu1 %v10858_v32 }
0x10e2   :  { %2772 = vmatprep.subr.bf16.mxu0 %v10861_v35  ;;  %7687 = vmatprep.subr.bf16.mxu1 %v12212_v27 }
0x10e5   :  { %2773 = vmatpush1.bf16.msra.mxu0 %v10865_v20  ;;  %7688 = vmatpush3.bf16.msra.mxu1 %v8987_v54  ;;  %v8343_v54 = vld [vmem:[#allocation19 + $0x4c] ss:$12 sps:$4 sm:$0xff]  }
0x10e6   :  { %2774 = vmatprep.subr.bf16.mxu0 %v10869_v14  ;;  %7689 = vmatprep.subr.bf16.mxu1 %v12212_v27 }
0x10e9   :  { %2775 = vmatpush1.bf16.msra.mxu0 %v8988_v61  ;;  %7690 = vmatpush3.bf16.msra.mxu1 %v8989_v5  ;;  %v8341_v61 = vld [vmem:[#allocation19 + $0x48] ss:$12 sps:$4 sm:$0xff]   ;;  %v8346_v5 = vld [vmem:[#allocation19 + $0x64] ss:$12 sps:$4 sm:$0xff]  }
0x10ea   :  { %7695 = vmatprep.subr.bf16.mxu0 %v8309_v55  ;;  %7727 = vmatprep.subr.bf16.mxu1 %v8324_v42 }
0x119f   :  { %v2684_v3 = vpop.f32.mrb[88].mxu0  ;;  %v2725_v4 = vpop.f32.mrb[88].mxu1 }
0x11a0   :  { %v2731_v59 = vadd.f32 %v2684_v3, %v12234_v6  ;;  %v2686_v9 = vpop.f32.mrb[89].mxu0  ;;  %v7673_v11 = vpop.f32.mrb[89].mxu1  ;;  %v2745_v21 = vadd.f32 %v10615_v30, %v2725_v4  ;;  %v8312_v30 = vld [vmem:[#allocation25 + $0x10] sm:$0xff]  }
0x11a1   :  { %v2738_v36 = vadd.f32 %v2686_v9, %v12235_v45  ;;  %v2688_v19 = vpop.f32.mrb[90].mxu0  ;;  %v2728_v47 = vpop.f32.mrb[90].mxu1  ;;  %v8349_v3 = vld [vmem:[#allocation19 + $0x7c] ss:$12 sps:$4 sm:$0xff]   ;;  %v8347_v4 = vld [vmem:[#allocation19 + $0x78] ss:$12 sps:$4 sm:$0xff]  }
0x11a2   :  { %v6701_v29 = vmul.f32 -1.442695, %v2731_v59  ;;  %v2689_v22 = vpop.f32.mrb[91].mxu0  ;;  %v7674_v49 = vpop.f32.mrb[91].mxu1  ;;  %v8353_v6 = vld [vmem:[#allocation19 + $0x94] ss:$12 sps:$4 sm:$0xff]  }
0x11a3   :  { %v6702_v23 = vmul.f32 -1.442695, %v2738_v36  ;;  %v8351_v59 = vld [vmem:[#allocation19 + $0x90] ss:$12 sps:$4 sm:$0xff]   ;;  %v8356_v9 = vld [vmem:[#allocation19 + $0xac] ss:$12 sps:$4 sm:$0xff]  }
0x11a4   :  { %8569 = vpow2.f32 %v6701_v29  ;;  %v8354_v11 = vld [vmem:[#allocation19 + $0xa8] ss:$12 sps:$4 sm:$0xff]   ;;  %v12238_v49 = vld [vmem:[#allocation75_spill] sm:$0xff] }
0x11a5   :  { %8571 = vpow2.f32 %v6702_v23  ;;  %v12237_v19 = vld [vmem:[#allocation74_spill] sm:$0xff] }
0x11ae   :  { %v8570_v58 = vpop.eup %8569 }
0x11af   :  { %v2735_v2 = vadd.f32 1.0, %v8570_v58  ;;  %v8572_v15 = vpop.eup %8571 }
0x11b0   :  { %v2742_v13 = vadd.f32 1.0, %v8572_v15 }
0x11b1   :  { %8573 = vrcp.f32 %v2735_v2 }
0x11b2   :  { %8575 = vrcp.f32 %v2742_v13 }
0x11bb   :  { %v8574_v12 = vpop.eup %8573 }
0x11bc   :  { %v2746_v24 = vmul.f32 %v8574_v12, %v2745_v21  ;;  %v8576_v32 = vpop.eup %8575 }
0x11bd   :  { %v2749_v35 = vsub.f32 1.0, %v8576_v32  ;;  %v2751_v56 = vmul.f32 %v8576_v32, %v10882_v48  ;;  %v8340_v48 = vld [vmem:[#allocation19 + $0x34] ss:$12 sps:$4 sm:$0xff]  }
0x11be   :  { %v2747_v31 = vadd.f32 %v2746_v24, %v12236_v26 }
0x11c0   :  { %8577 = vtanh.f32 %v2747_v31 }
0x11ca   :  { %v8578_v20 = vpop.eup %8577 }
0x11cb   :  { %v2750_v14 = vmul.f32 %v8578_v20, %v2749_v35  ;;  %v8990_v35 = vld [vmem:[#allocation18] ss:$0 sm:$0xff] }
0x11cd   :  { %v10921_v53 = vadd.f32 %v2751_v56, %v2750_v14 }
0x11cf   :  { %v2753_v16 = vpack.c.bf16 %v10921_v53, %v10921_v53 }
0x11d1   :  { %2755 = vst [vmem:[#allocation3 + $0x38] sm:$0xf] %v2753_v16  ;;  %2793 = vmatmul.mubr.bf16.vlgmr.msra.gmra.mrb[92].mxu0 %v2753_v16  ;;  %7692 = vmatmul.mubr.bf16.vlgmr.msra.gmra.mrb[92].mxu1 %v2753_v16  ;;  %v12239_v16 = vld [vmem:[#allocation58_spill] sm:$0xff] }
0x11d2   :  { %7696 = vmatpush3.bf16.msra.mxu0 %v8309_v55  ;;  %7711 = vmatprep.mubr.bf16.mxu0 %v10925_v44  ;;  %v8344_v55 = vld [vmem:[#allocation19 + $0x60] ss:$12 sps:$4 sm:$0xff]  }
0x11d3   :  { %7697 = vmatprep.subr.bf16.mxu0 %v8311_v43  ;;  %7728 = vmatpush3.bf16.msra.mxu1 %v8324_v42 }
0x11d4   :  { %7729 = vmatprep.subr.bf16.mxu1 %v8325_v63 }
0x11d6   :  { %7698 = vmatpush3.bf16.msra.mxu0 %v8311_v43 }
0x11d7   :  { %7699 = vmatprep.subr.bf16.mxu0 %v8312_v30  ;;  %7730 = vmatpush3.bf16.msra.mxu1 %v8325_v63 }
0x11d8   :  { %7731 = vmatprep.subr.bf16.mxu1 %v8326_v57 }
0x11da   :  { %7700 = vmatpush3.bf16.msra.mxu0 %v8312_v30 }
0x11db   :  { %7701 = vmatprep.subr.bf16.mxu0 %v8313_v18  ;;  %7732 = vmatpush3.bf16.msra.mxu1 %v8326_v57 }
0x11dc   :  { %7733 = vmatprep.subr.bf16.mxu1 %v8327_v8 }
0x11de   :  { %7702 = vmatpush3.bf16.msra.mxu0 %v8313_v18  ;;  %v10950_v18 = vld [vmem:[#allocation27] ss:$0 sm:$0xff] }
0x11df   :  { %7703 = vmatprep.subr.bf16.mxu0 %v8314_v46  ;;  %7734 = vmatpush3.bf16.msra.mxu1 %v8327_v8 }
0x11e0   :  { %7735 = vmatprep.subr.bf16.mxu1 %v8328_v37 }
0x11e2   :  { %7704 = vmatpush3.bf16.msra.mxu0 %v8314_v46 }
0x11e3   :  { %7705 = vmatprep.subr.bf16.mxu0 %v8315_v51  ;;  %7736 = vmatpush3.bf16.msra.mxu1 %v8328_v37 }
0x11e4   :  { %7737 = vmatprep.subr.bf16.mxu1 %v8329_v50 }
0x11e6   :  { %7706 = vmatpush3.bf16.msra.mxu0 %v8315_v51 }
0x11e7   :  { %7707 = vmatprep.subr.bf16.mxu0 %v8316_v1  ;;  %7738 = vmatpush3.bf16.msra.mxu1 %v8329_v50 }
0x11e8   :  { %7739 = vmatprep.subr.bf16.mxu1 %v8330_v0 }
0x11ea   :  { %7708 = vmatpush3.bf16.msra.mxu0 %v8316_v1 }
0x11eb   :  { %7709 = vmatprep.subr.bf16.mxu0 %v8317_v10  ;;  %7740 = vmatpush3.bf16.msra.mxu1 %v8330_v0 }
0x11ec   :  { %7741 = vmatprep.subr.bf16.mxu1 %v8331_v7 }
0x11ee   :  { %7710 = vmatpush3.bf16.msra.mxu0 %v8317_v10 }
0x11ef   :  { %3564 = vmatprep.subr.bf16.mxu0 %v8334_v28  ;;  %7742 = vmatpush3.bf16.msra.mxu1 %v8331_v7 }
0x11f1   :  { %7712 = vmatmul.mubr.bf16.vlgmr.msra.gmra.mrb[96].mxu0 %v10928_v62 }
0x11f2   :  { %7715 = vmatprep.mubr.bf16.mxu0 %v10930_v39  ;;  %3565 = vmatpush1.bf16.msra.mxu0 %v8332_v60 }
0x11f3   :  { %3566 = vmatprep.subr.bf16.mxu0 %v8337_v17 }
0x11f6   :  { %3567 = vmatpush1.bf16.msra.mxu0 %v8335_v25 }
0x11f7   :  { %3568 = vmatprep.subr.bf16.mxu0 %v8340_v48 }
0x11f9   :  { %7716 = vmatmul.mubr.bf16.gmra.mrb[100].mxu0 %v10934_v40 }
0x11fa   :  { %7719 = vmatprep.mubr.bf16.mxu0 %v10936_v33  ;;  %3569 = vmatpush1.bf16.msra.mxu0 %v8338_v52 }
0x11fb   :  { %3570 = vmatprep.subr.bf16.mxu0 %v8343_v54 }
0x11fe   :  { %3571 = vmatpush1.bf16.msra.mxu0 %v8341_v61 }
0x11ff   :  { %3572 = vmatprep.subr.bf16.mxu0 %v8346_v5 }
0x1201   :  { %7720 = vmatmul.mubr.bf16.gmra.mrb[104].mxu0 %v10940_v41 }
0x1202   :  { %7723 = vmatprep.mubr.bf16.mxu0 %v10942_v34  ;;  %3573 = vmatpush1.bf16.msra.mxu0 %v8344_v55 }
0x1203   :  { %3574 = vmatprep.subr.bf16.mxu0 %v8349_v3 }
0x1206   :  { %3575 = vmatpush1.bf16.msra.mxu0 %v8347_v4 }
0x1207   :  { %3576 = vmatprep.subr.bf16.mxu0 %v8353_v6 }
0x120a   :  { %3577 = vmatpush1.bf16.msra.mxu0 %v8351_v59 }
0x120b   :  { %3578 = vmatprep.subr.bf16.mxu0 %v8356_v9 }
0x120e   :  { %3579 = vmatpush1.bf16.msra.mxu0 %v8354_v11 }
0x120f   :  { %7791 = vmatprep.subr.bf16.mxu0 %v12212_v27 }
0x12a4   :  { %v2794_v45 = vpop.f32.mrb[92].mxu0  ;;  %v2835_v36 = vpop.f32.mrb[92].mxu1 }
0x12a5   :  { %v2841_v47 = vadd.f32 %v2794_v45, %v12237_v19  ;;  %v2796_v29 = vpop.f32.mrb[93].mxu0  ;;  %v7693_v22 = vpop.f32.mrb[93].mxu1  ;;  %v2855_v20 = vadd.f32 %v8990_v35, %v2835_v36  ;;  %v10992_v35 = vld [vmem:[#allocation21 + $0x20] ss:$12 sps:$4 sm:$0xff]  }
0x12a6   :  { %v2848_v23 = vadd.f32 %v2796_v29, %v12238_v49  ;;  %v2798_v58 = vpop.f32.mrb[94].mxu0  ;;  %v2838_v2 = vpop.f32.mrb[94].mxu1 }
0x12a7   :  { %v6703_v15 = vmul.f32 -1.442695, %v2841_v47  ;;  %v2799_v13 = vpop.f32.mrb[95].mxu0  ;;  %v7694_v21 = vpop.f32.mrb[95].mxu1  ;;  %v8357_v58 = vld [vmem:[#allocation19 + $0x8] ss:$12 sps:$4 sm:$0xff]  }
0x12a8   :  { %v6704_v12 = vmul.f32 -1.442695, %v2848_v23  ;;  %7759 = vmatprep.subr.bf16.mxu1 %v8357_v58  ;;  %v8358_v2 = vld [vmem:[#allocation19 + $0x20] ss:$12 sps:$4 sm:$0xff]   ;;  %v8360_v13 = vld [vmem:[#allocation19 + $0x50] ss:$12 sps:$4 sm:$0xff]  }
0x12a9   :  { %8579 = vpow2.f32 %v6703_v15  ;;  %v8359_v15 = vld [vmem:[#allocation19 + $0x38] ss:$12 sps:$4 sm:$0xff]   ;;  %v8361_v21 = vld [vmem:[#allocation19 + $0x68] ss:$12 sps:$4 sm:$0xff]  }
0x12aa   :  { %8581 = vpow2.f32 %v6704_v12  ;;  %v8362_v12 = vld [vmem:[#allocation19 + $0x80] ss:$12 sps:$4 sm:$0xff]  }
0x12b3   :  { %v8580_v24 = vpop.eup %8579 }
0x12b4   :  { %v2845_v26 = vadd.f32 1.0, %v8580_v24  ;;  %v8582_v31 = vpop.eup %8581  ;;  %v8363_v24 = vld [vmem:[#allocation19 + $0x98] ss:$12 sps:$4 sm:$0xff]  }
0x12b5   :  { %v2852_v32 = vadd.f32 1.0, %v8582_v31  ;;  %v10986_v31 = vld [vmem:[#allocation21 + $0x4] ss:$12 sps:$4 sm:$0xff]  }
0x12b6   :  { %8583 = vrcp.f32 %v2845_v26  ;;  %v8365_v26 = vld [vmem:[#allocation19 + $0xb0] ss:$12 sps:$4 sm:$0xff]  }
0x12b7   :  { %8585 = vrcp.f32 %v2852_v32  ;;  %v10989_v32 = vld [vmem:[#allocation21 + $0x8] ss:$12 sps:$4 sm:$0xff]  }
0x12c0   :  { %v8584_v14 = vpop.eup %8583 }
0x12c1   :  { %v2856_v56 = vmul.f32 %v8584_v14, %v2855_v20  ;;  %v8586_v50 = vpop.eup %8585  ;;  %v10996_v20 = vld [vmem:[#allocation21 + $0x38] ss:$12 sps:$4 sm:$0xff]   ;;  %v11000_v14 = vld [vmem:[#allocation21 + $0x50] ss:$12 sps:$4 sm:$0xff]  }
0x12c2   :  { %v2859_v7 = vsub.f32 1.0, %v8586_v50  ;;  %v2861_v61 = vmul.f32 %v8586_v50, %v10921_v53 }
0x12c3   :  { %v2857_v43 = vadd.f32 %v2856_v56, %v12239_v16  ;;  %v11004_v56 = vld [vmem:[#allocation21 + $0x68] ss:$12 sps:$4 sm:$0xff]   ;;  %v11009_v16 = vld [vmem:[#allocation21 + $0x80] ss:$12 sps:$4 sm:$0xff]  }
0x12c4   :  { %v7713_v30 = vpop.f32.mrb[96].mxu0 }
0x12c5   :  { %8587 = vtanh.f32 %v2857_v43  ;;  %v3036_v46 = vpop.f32.mrb[97].mxu0  ;;  %v3045_v1 = vadd.f32 %v7713_v30, %v10950_v18  ;;  %v11013_v43 = vld [vmem:[#allocation21 + $0x98] ss:$12 sps:$4 sm:$0xff]   ;;  %v11017_v30 = vld [vmem:[#allocation21 + $0xb0] ss:$12 sps:$4 sm:$0xff]  }
0x12c6   :  { %v7714_v51 = vpop.f32.mrb[98].mxu0  ;;  %v3037_v63 = vadd.f32 %v10950_v18, %v3036_v46  ;;  %v12240_v46 = vmov 0.0|0.0  }
0x12c7   :  { %v3048_v10 = vadd.f32 %v7714_v51, %v10950_v18  ;;  %v3039_v42 = vpop.f32.mrb[99].mxu0  ;;  %v11040_v51 = vld [vmem:[#allocation30] ss:$0 sm:$0xff] }
0x12c8   :  { %v3040_v57 = vadd.f32 %v10950_v18, %v3039_v42 }
0x12c9   :  { %v3100_v8 = vpack.c.bf16 %v3048_v10, %v3045_v1 }
0x12ca   :  { %v3099_v37 = vpack.c.bf16 %v3040_v57, %v3037_v63 }
0x12cc   :  { %v7717_v0 = vpop.f32.mrb[100].mxu0  ;;  %7743 = vmatprep.mubr.bf16.mxu1 %v3099_v37 }
0x12cd   :  { %v3052_v28 = vpop.f32.mrb[101].mxu0  ;;  %7744 = vmatmul.mubr.bf16.vlgmr.msra.gmra.mrb[96].mxu1 %v3100_v8  ;;  %v3061_v25 = vadd.f32 %v7717_v0, %v10950_v18 }
0x12ce   :  { %v7718_v60 = vpop.f32.mrb[102].mxu0  ;;  %v3053_v5 = vadd.f32 %v10950_v18, %v3052_v28  ;;  %7760 = vmatpush3.bf16.msra.mxu1 %v8357_v58 }
0x12cf   :  { %v8588_v17 = vpop.eup %8587  ;;  %v3064_v48 = vadd.f32 %v7718_v60, %v10950_v18  ;;  %v3055_v52 = vpop.f32.mrb[103].mxu0  ;;  %7761 = vmatprep.subr.bf16.mxu1 %v8358_v2 }
0x12d0   :  { %v2860_v54 = vmul.f32 %v8588_v17, %v2859_v7  ;;  %v3056_v55 = vadd.f32 %v10950_v18, %v3055_v52 }
0x12d1   :  { %v3102_v3 = vpack.c.bf16 %v3064_v48, %v3061_v25 }
0x12d2   :  { %v2862_v4 = vadd.f32 %v2861_v61, %v2860_v54  ;;  %v3101_v6 = vpack.c.bf16 %v3056_v55, %v3053_v5  ;;  %7762 = vmatpush3.bf16.msra.mxu1 %v8358_v2 }
0x12d3   :  { %7763 = vmatprep.subr.bf16.mxu1 %v8359_v15 }
0x12d4   :  { %v2863_v59 = vpack.c.bf16 %v2862_v4, %v2862_v4  ;;  %v7721_v9 = vpop.f32.mrb[104].mxu0  ;;  %7747 = vmatprep.mubr.bf16.mxu1 %v3101_v6 }
0x12d5   :  { %v3068_v11 = vpop.f32.mrb[105].mxu0  ;;  %7748 = vmatmul.mubr.bf16.gmra.mrb[100].mxu1 %v3102_v3  ;;  %v3077_v36 = vadd.f32 %v7721_v9, %v10950_v18 }
0x12d6   :  { %2865 = vst [vmem:[#allocation3 + $0x3c] sm:$0xf] %v2863_v59  ;;  %v7722_v45 = vpop.f32.mrb[106].mxu0  ;;  %v3069_v53 = vadd.f32 %v10950_v18, %v3068_v11  ;;  %7764 = vmatpush3.bf16.msra.mxu1 %v8359_v15 }
0x12d7   :  { %v3080_v19 = vadd.f32 %v7722_v45, %v10950_v18  ;;  %v3071_v47 = vpop.f32.mrb[107].mxu0  ;;  %7765 = vmatprep.subr.bf16.mxu1 %v8360_v13 }
0x12d8   :  { %v3072_v29 = vadd.f32 %v10950_v18, %v3071_v47 }
0x12d9   :  { %v3104_v22 = vpack.c.bf16 %v3080_v19, %v3077_v36 }
0x12da   :  { %v3103_v49 = vpack.c.bf16 %v3072_v29, %v3069_v53  ;;  %7766 = vmatpush3.bf16.msra.mxu1 %v8360_v13 }
0x12db   :  { %7767 = vmatprep.subr.bf16.mxu1 %v8361_v21 }
0x12dc   :  { %7751 = vmatprep.mubr.bf16.mxu1 %v3103_v49 }
0x12dd   :  { %7752 = vmatmul.mubr.bf16.gmra.mrb[104].mxu1 %v3104_v22  ;;  %v10965_v23 = vld [vmem:[#allocation3 + $0x38] sm:$0xff]  }
0x12de   :  { %7724 = vmatmul.mubr.bf16.gmra.mrb[108].mxu0 %v10965_v23  ;;  %7768 = vmatpush3.bf16.msra.mxu1 %v8361_v21 }
0x12df   :  { %3596 = vmatprep.mubr.bf16.mxu0 %v12213_v38  ;;  %7769 = vmatprep.subr.bf16.mxu1 %v8362_v12 }
0x12e2   :  { %7770 = vmatpush3.bf16.msra.mxu1 %v8362_v12 }
0x12e3   :  { %7771 = vmatprep.subr.bf16.mxu1 %v8363_v24 }
0x12e6   :  { %3597 = vmatmul.mubr.bf16.vlgmr.msra.gmra.mrb[112].mxu0 %v10925_v44  ;;  %7772 = vmatpush3.bf16.msra.mxu1 %v8363_v24 }
0x12e7   :  { %3606 = vmatprep.mubr.bf16.mxu0 %v12213_v38  ;;  %7773 = vmatprep.subr.bf16.mxu1 %v8365_v26 }
0x12e8   :  { %7792 = vmatpush3.bf16.msra.mxu0 %v10989_v32 }
0x12e9   :  { %7793 = vmatprep.subr.bf16.mxu0 %v12212_v27 }
0x12ea   :  { %7774 = vmatpush3.bf16.msra.mxu1 %v8365_v26 }
0x12eb   :  { %3994 = vmatprep.subr.bf16.mxu1 %v10986_v31 }
0x12ec   :  { %7794 = vmatpush3.bf16.msra.mxu0 %v10992_v35 }
0x12ed   :  { %7795 = vmatprep.subr.bf16.mxu0 %v12212_v27 }
0x12ee   :  { %3607 = vmatmul.mubr.bf16.gmra.mrb[116].mxu0 %v10928_v62 }
0x12ef   :  { %3616 = vmatprep.mubr.bf16.mxu0 %v12213_v38 }
0x12f0   :  { %7796 = vmatpush3.bf16.msra.mxu0 %v10996_v20 }
0x12f1   :  { %7797 = vmatprep.subr.bf16.mxu0 %v12212_v27 }
0x12f4   :  { %7798 = vmatpush3.bf16.msra.mxu0 %v11000_v14 }
0x12f5   :  { %7799 = vmatprep.subr.bf16.mxu0 %v12212_v27 }
0x12f6   :  { %3617 = vmatmul.mubr.bf16.gmra.mrb[120].mxu0 %v10930_v39 }
0x12f7   :  { %3626 = vmatprep.mubr.bf16.mxu0 %v12213_v38 }
0x12f8   :  { %7800 = vmatpush3.bf16.msra.mxu0 %v11004_v56 }
0x12f9   :  { %7801 = vmatprep.subr.bf16.mxu0 %v12212_v27 }
0x12fc   :  { %7802 = vmatpush3.bf16.msra.mxu0 %v11009_v16 }
0x12fd   :  { %7803 = vmatprep.subr.bf16.mxu0 %v12212_v27 }
0x12fe   :  { %3627 = vmatmul.mubr.bf16.gmra.mrb[124].mxu0 %v10934_v40 }
0x12ff   :  { %3636 = vmatprep.mubr.bf16.mxu0 %v12213_v38 }
0x1300   :  { %7804 = vmatpush3.bf16.msra.mxu0 %v11013_v43 }
0x1301   :  { %7805 = vmatprep.subr.bf16.mxu0 %v12212_v27 }
0x1304   :  { %7806 = vmatpush3.bf16.msra.mxu0 %v11017_v30 }
0x1305   :  { %7811 = vmatprep.subr.bf16.mxu0 %v12212_v27 }
0x1306   :  { %3637 = vmatmul.mubr.bf16.gmra.mrb[128].mxu0 %v10936_v33 }
0x1307   :  { %3646 = vmatprep.mubr.bf16.mxu0 %v12213_v38 }
0x130e   :  { %3647 = vmatmul.mubr.bf16.gmra.mrb[132].mxu0 %v10940_v41 }
0x130f   :  { %3656 = vmatprep.mubr.bf16.mxu0 %v12213_v38 }
0x1316   :  { %3657 = vmatmul.mubr.bf16.gmra.mrb[136].mxu0 %v10942_v34 }
0x1317   :  { %3666 = vmatprep.mubr.bf16.mxu0 %v12213_v38 }
0x131e   :  { %3667 = vmatmul.mubr.bf16.gmra.mrb[140].mxu0 %v10965_v23 }
0x131f   :  { %7807 = vmatprep.mubr.msk.bf16.mxu0 %vm9529_vm0, %v12212_v27 }
0x1326   :  { %7808 = vmatmul.mubr.bf16.vlgmr.msra.gmra.mrb[144].mxu0 %v12240_v46 }
0x1327   :  { %7812 = vmatpush3.bf16.msra.mxu0 %v10989_v32  ;;  %7827 = vmatprep.mubr.msk.bf16.mxu0 %vm9529_vm0, %v12212_v27 }
0x1328   :  { %7813 = vmatprep.subr.bf16.mxu0 %v12212_v27 }
0x132b   :  { %7814 = vmatpush3.bf16.msra.mxu0 %v10992_v35 }
0x132c   :  { %7815 = vmatprep.subr.bf16.mxu0 %v12212_v27 }
0x132f   :  { %7816 = vmatpush3.bf16.msra.mxu0 %v10996_v20 }
0x1330   :  { %7817 = vmatprep.subr.bf16.mxu0 %v12212_v27 }
0x1333   :  { %7818 = vmatpush3.bf16.msra.mxu0 %v11000_v14 }
0x1334   :  { %7819 = vmatprep.subr.bf16.mxu0 %v12212_v27 }
0x1337   :  { %7820 = vmatpush3.bf16.msra.mxu0 %v11004_v56 }
0x1338   :  { %7821 = vmatprep.subr.bf16.mxu0 %v12212_v27 }
0x133b   :  { %7822 = vmatpush3.bf16.msra.mxu0 %v11009_v16 }
0x133c   :  { %7823 = vmatprep.subr.bf16.mxu0 %v12212_v27 }
0x133f   :  { %7824 = vmatpush3.bf16.msra.mxu0 %v11013_v43 }
0x1340   :  { %7825 = vmatprep.subr.bf16.mxu0 %v12212_v27 }
0x1343   :  { %7826 = vmatpush3.bf16.msra.mxu0 %v11017_v30 }
0x1344   :  { %7831 = vmatprep.subr.bf16.mxu0 %v12212_v27 }
0x13a0   :  { %v7745_v1 = vpop.f32.mrb[96].mxu1 }
0x13a1   :  { %v3221_v10 = vadd.f32 %v7745_v1, %v11040_v51  ;;  %v3212_v42 = vpop.f32.mrb[97].mxu1 }
0x13a2   :  { %v3213_v63 = vadd.f32 %v11040_v51, %v3212_v42  ;;  %v7746_v57 = vpop.f32.mrb[98].mxu1 }
0x13a3   :  { %v6733_v8 = vmul.f32 -1.442695, %v3221_v10  ;;  %v3224_v37 = vadd.f32 %v7746_v57, %v11040_v51  ;;  %v3215_v50 = vpop.f32.mrb[99].mxu1 }
0x13a4   :  { %v6731_v0 = vmul.f32 -1.442695, %v3213_v63  ;;  %v3216_v28 = vadd.f32 %v11040_v51, %v3215_v50 }
0x13a5   :  { %8589 = vpow2.f32 %v6733_v8  ;;  %v6734_v7 = vmul.f32 -1.442695, %v3224_v37 }
0x13a6   :  { %8591 = vpow2.f32 %v6731_v0  ;;  %v6732_v60 = vmul.f32 -1.442695, %v3216_v28 }
0x13a7   :  { %8593 = vpow2.f32 %v6734_v7 }
0x13a8   :  { %8595 = vpow2.f32 %v6732_v60  ;;  %v7749_v17 = vpop.f32.mrb[100].mxu1 }
0x13a9   :  { %v3237_v25 = vadd.f32 %v7749_v17, %v11040_v51  ;;  %v3228_v48 = vpop.f32.mrb[101].mxu1 }
0x13aa   :  { %v3229_v52 = vadd.f32 %v11040_v51, %v3228_v48  ;;  %v7750_v54 = vpop.f32.mrb[102].mxu1 }
0x13ab   :  { %v6737_v61 = vmul.f32 -1.442695, %v3237_v25  ;;  %v3240_v5 = vadd.f32 %v7750_v54, %v11040_v51  ;;  %v3231_v55 = vpop.f32.mrb[103].mxu1 }
0x13ac   :  { %v6735_v3 = vmul.f32 -1.442695, %v3229_v52  ;;  %v3232_v4 = vadd.f32 %v11040_v51, %v3231_v55  ;;  %v11058_v52 = vld [vmem:[#allocation22] sm:$0x7] }
0x13ad   :  { %8597 = vpow2.f32 %v6737_v61  ;;  %v6738_v6 = vmul.f32 -1.442695, %v3240_v5 }
0x13ae   :  { %8599 = vpow2.f32 %v6735_v3  ;;  %v6736_v59 = vmul.f32 -1.442695, %v3232_v4  ;;  %v12241_v4 = vld [vmem:[#allocation49_spill] sm:$0xff] }
0x13af   :  { %v8590_v9 = vpop.eup %8589  ;;  %8601 = vpow2.f32 %v6738_v6  ;;  %v12242_v6 = vsub.s32 0, %v12241_v4 }
0x13b0   :  { %v8592_v11 = vpop.eup %8591  ;;  %v3325_v45 = vadd.f32 1.0, %v8590_v9  ;;  %8603 = vpow2.f32 %v6736_v59  ;;  %v7753_v36 = vpop.f32.mrb[104].mxu1 }
0x13b1   :  { %v8594_v19 = vpop.eup %8593  ;;  %v3323_v47 = vadd.f32 1.0, %v8592_v11  ;;  %v3253_v53 = vadd.f32 %v7753_v36, %v11040_v51  ;;  %v3244_v29 = vpop.f32.mrb[105].mxu1  ;;  %v11065_v59 = vrot.slane %v11058_v52, %v12242_v6 }
0x13b2   :  { %v8596_v22 = vpop.eup %8595  ;;  %8605 = vrcp.f32 %v3325_v45  ;;  %v3326_v49 = vadd.f32 1.0, %v8594_v19  ;;  %v3245_v58 = vadd.f32 %v11040_v51, %v3244_v29  ;;  %v7754_v2 = vpop.f32.mrb[106].mxu1  ;;  %v12243_v45 = vsub.s32 1, %v12241_v4 }
0x13b3   :  { %v7725_v15 = vpop.f32.mrb[108].mxu0  ;;  %8607 = vrcp.f32 %v3323_v47  ;;  %v3324_v13 = vadd.f32 1.0, %v8596_v22  ;;  %v6741_v21 = vmul.f32 -1.442695, %v3253_v53  ;;  %v3256_v12 = vadd.f32 %v7754_v2, %v11040_v51  ;;  %v3247_v24 = vpop.f32.mrb[107].mxu1 }
0x13b4   :  { %v3084_v26 = vpop.f32.mrb[109].mxu0  ;;  %8609 = vrcp.f32 %v3326_v49  ;;  %v6739_v1 = vmul.f32 -1.442695, %v3245_v58  ;;  %v3248_v10 = vadd.f32 %v11040_v51, %v3247_v24  ;;  %v3093_v57 = vadd.f32 %v7725_v15, %v10950_v18  ;;  %v11081_v15 = vld [vmem:[#allocation21] ss:$12 sps:$4 sm:$0xff]  }
0x13b5   :  { %v7726_v42 = vpop.f32.mrb[110].mxu0  ;;  %8611 = vrcp.f32 %v3324_v13  ;;  %v6742_v63 = vmul.f32 -1.442695, %v3256_v12  ;;  %v3085_v0 = vadd.f32 %v10950_v18, %v3084_v26  ;;  %v11072_v36 = vrot.slane %v11058_v52, %v12243_v45 }
0x13b6   :  { %v3096_v8 = vadd.f32 %v7726_v42, %v10950_v18  ;;  %v3087_v37 = vpop.f32.mrb[111].mxu0  ;;  %8613 = vpow2.f32 %v6741_v21  ;;  %v6740_v50 = vmul.f32 -1.442695, %v3248_v10  ;;  %v11083_v21 = vld [vmem:[#allocation21 + $0x1c] ss:$12 sps:$4 sm:$0xff]  }
0x13b7   :  { %v3088_v28 = vadd.f32 %v10950_v18, %v3087_v37  ;;  %v8598_v7 = vpop.eup %8597  ;;  %8615 = vpow2.f32 %v6739_v1 }
0x13b8   :  { %v3106_v60 = vpack.c.bf16 %v3096_v8, %v3093_v57  ;;  %v8600_v17 = vpop.eup %8599  ;;  %v3329_v25 = vadd.f32 1.0, %v8598_v7  ;;  %8617 = vpow2.f32 %v6742_v63 }
0x13b9   :  { %v3105_v48 = vpack.c.bf16 %v3088_v28, %v3085_v0  ;;  %v8602_v54 = vpop.eup %8601  ;;  %v3327_v61 = vadd.f32 1.0, %v8600_v17  ;;  %8619 = vpow2.f32 %v6740_v50  ;;  %v11060_v3 = vpop.f32.mrb[112].mxu0  ;;  %v11094_v0 = vld [vmem:[#allocation21 + $0x18] ss:$12 sps:$4 sm:$0xff]  }
0x13ba   :  { %v8604_v5 = vpop.eup %8603  ;;  %8621 = vrcp.f32 %v3329_v25  ;;  %v3330_v55 = vadd.f32 1.0, %v8602_v54  ;;  %v11067_v9 = vpop.f32.mrb[113].mxu0  ;;  %v11109_v54 = vld [vmem:[#allocation21 + $0x4c] ss:$12 sps:$4 sm:$0xff]  }
0x13bb   :  { %7755 = vmatprep.mubr.bf16.mxu1 %v3105_v48  ;;  %8623 = vrcp.f32 %v3327_v61  ;;  %v3328_v18 = vadd.f32 1.0, %v8604_v5  ;;  %v3602_v19 = vpop.f32.mrb[114].mxu0  ;;  %v11106_v48 = vld [vmem:[#allocation21 + $0x30] ss:$12 sps:$4 sm:$0xff]  }
0x13bc   :  { %7756 = vmatmul.mubr.bf16.gmra.mrb[108].mxu1 %v3106_v60  ;;  %v8606_v11 = vpop.eup %8605  ;;  %8625 = vrcp.f32 %v3330_v55  ;;  %v11076_v53 = vadd.f32 %v3602_v19, %v11065_v59  ;;  %v3604_v29 = vpop.f32.mrb[115].mxu0  ;;  %v11100_v60 = vld [vmem:[#allocation21 + $0x34] ss:$12 sps:$4 sm:$0xff]  }
0x13bd   :  { %7775 = vmatprep.mubr.bf16.mxu1 %v10925_v44  ;;  %v8608_v47 = vpop.eup %8607  ;;  %3373 = vst [vmem:[#allocation34 + $0x10] sm:$0xff] %v8606_v11  ;;  %8627 = vrcp.f32 %v3328_v18  ;;  %v11079_v49 = vadd.f32 %v3604_v29, %v11072_v36  ;;  %v11120_v11 = vld [vmem:[#allocation21 + $0x48] ss:$12 sps:$4 sm:$0xff]   ;;  %v11126_v29 = vld [vmem:[#allocation21 + $0x64] ss:$12 sps:$4 sm:$0xff]  }
0x13be   :  { %v8610_v22 = vpop.eup %8609  ;;  %3371 = vst [vmem:[#allocation34] sm:$0xff] %v8608_v47 }
0x13bf   :  { %v8612_v58 = vpop.eup %8611  ;;  %3374 = vst [vmem:[#allocation34 + $0x18] sm:$0xff] %v8610_v22 }
0x13c0   :  { %v8614_v2 = vpop.eup %8613  ;;  %3372 = vst [vmem:[#allocation34 + $0x8] sm:$0xff] %v8612_v58 }
0x13c1   :  { %v8616_v13 = vpop.eup %8615  ;;  %v3333_v44 = vadd.f32 1.0, %v8614_v2  ;;  %v3608_v26 = vpop.f32.mrb[116].mxu0 }
0x13c2   :  { %v8618_v12 = vpop.eup %8617  ;;  %v3331_v24 = vadd.f32 1.0, %v8616_v13  ;;  %v11086_v42 = vadd.f32 %v3608_v26, %v11065_v59  ;;  %v3610_v63 = vpop.f32.mrb[117].mxu0  ;;  %v11135_v13 = vld [vmem:[#allocation21 + $0x7c] ss:$12 sps:$4 sm:$0xff]  }
0x13c3   :  { %v8620_v1 = vpop.eup %8619  ;;  %8629 = vrcp.f32 %v3333_v44  ;;  %v3334_v10 = vadd.f32 1.0, %v8618_v12  ;;  %v11090_v37 = vadd.f32 %v3610_v63, %v11072_v36  ;;  %v3612_v50 = vpop.f32.mrb[118].mxu0 }
0x13c4   :  { %7776 = vmatmul.mubr.bf16.vlgmr.msra.gmra.mrb[112].mxu1 %v10928_v62  ;;  %v8622_v57 = vpop.eup %8621  ;;  %8631 = vrcp.f32 %v3331_v24  ;;  %v3332_v8 = vadd.f32 1.0, %v8620_v1  ;;  %v11097_v7 = vadd.f32 %v3612_v50, %v11065_v59  ;;  %v3614_v62 = vpop.f32.mrb[119].mxu0  ;;  %v11158_v50 = vld [vmem:[#allocation21 + $0x90] ss:$12 sps:$4 sm:$0xff]  }
0x13c5   :  { %3995 = vmatpush1.bf16.msra.mxu1 %v11081_v15  ;;  %7779 = vmatprep.mubr.bf16.mxu1 %v10930_v39  ;;  %v8624_v28 = vpop.eup %8623  ;;  %3377 = vst [vmem:[#allocation34 + $0x30] sm:$0xff] %v8622_v57  ;;  %8633 = vrcp.f32 %v3334_v10  ;;  %v11103_v25 = vadd.f32 %v3614_v62, %v11072_v36  ;;  %v11146_v10 = vld [vmem:[#allocation21 + $0x78] ss:$12 sps:$4 sm:$0xff]  }
0x13c6   :  { %3996 = vmatprep.subr.bf16.mxu1 %v11083_v21  ;;  %v8626_v17 = vpop.eup %8625  ;;  %3375 = vst [vmem:[#allocation34 + $0x20] sm:$0xff] %v8624_v28  ;;  %8635 = vrcp.f32 %v3332_v8  ;;  %v11152_v8 = vld [vmem:[#allocation21 + $0x94] ss:$12 sps:$4 sm:$0xff]  }
0x13c7   :  { %v8628_v39 = vpop.eup %8627  ;;  %3378 = vst [vmem:[#allocation34 + $0x38] sm:$0xff] %v8626_v17 }
0x13c8   :  { %3376 = vst [vmem:[#allocation34 + $0x28] sm:$0xff] %v8628_v39 }
0x13c9   :  { %3997 = vmatpush1.bf16.msra.mxu1 %v11094_v0  ;;  %v3618_v61 = vpop.f32.mrb[120].mxu0 }
0x13ca   :  { %3998 = vmatprep.subr.bf16.mxu1 %v11100_v60  ;;  %v11112_v5 = vadd.f32 %v3618_v61, %v11065_v59  ;;  %v3620_v55 = vpop.f32.mrb[121].mxu0 }
0x13cb   :  { %v11116_v18 = vadd.f32 %v3620_v55, %v11072_v36  ;;  %v3622_v6 = vpop.f32.mrb[122].mxu0  ;;  %v11171_v55 = vld [vmem:[#allocation21 + $0xa8] ss:$12 sps:$4 sm:$0xff]  }
0x13cc   :  { %7780 = vmatmul.mubr.bf16.gmra.mrb[116].mxu1 %v10934_v40  ;;  %v11123_v19 = vadd.f32 %v3622_v6, %v11065_v59  ;;  %v3624_v47 = vpop.f32.mrb[123].mxu0 }
0x13cd   :  { %3999 = vmatpush1.bf16.msra.mxu1 %v11106_v48  ;;  %7783 = vmatprep.mubr.bf16.mxu1 %v10936_v33  ;;  %v8630_v45 = vpop.eup %8629  ;;  %v11129_v22 = vadd.f32 %v3624_v47, %v11072_v36  ;;  %v11132_v33 = vld [vmem:[#allocation21 + $0x60] ss:$12 sps:$4 sm:$0xff]  }
0x13ce   :  { %4000 = vmatprep.subr.bf16.mxu1 %v11109_v54  ;;  %v8632_v40 = vpop.eup %8631  ;;  %3381 = vst [vmem:[#allocation34 + $0x50] sm:$0xff] %v8630_v45 }
0x13cf   :  { %v8634_v58 = vpop.eup %8633  ;;  %3379 = vst [vmem:[#allocation34 + $0x40] sm:$0xff] %v8632_v40 }
0x13d0   :  { %v8636_v2 = vpop.eup %8635  ;;  %3382 = vst [vmem:[#allocation34 + $0x58] sm:$0xff] %v8634_v58 }
0x13d1   :  { %4001 = vmatpush1.bf16.msra.mxu1 %v11120_v11  ;;  %3380 = vst [vmem:[#allocation34 + $0x48] sm:$0xff] %v8636_v2  ;;  %v3628_v44 = vpop.f32.mrb[124].mxu0 }
0x13d2   :  { %4002 = vmatprep.subr.bf16.mxu1 %v11126_v29  ;;  %v11138_v12 = vadd.f32 %v3628_v44, %v11065_v59  ;;  %v3630_v24 = vpop.f32.mrb[125].mxu0 }
0x13d3   :  { %v11142_v26 = vadd.f32 %v3630_v24, %v11072_v36  ;;  %v3632_v1 = vpop.f32.mrb[126].mxu0 }
0x13d4   :  { %7784 = vmatmul.mubr.bf16.gmra.mrb[120].mxu1 %v10940_v41  ;;  %v11149_v63 = vadd.f32 %v3632_v1, %v11065_v59  ;;  %v3634_v57 = vpop.f32.mrb[127].mxu0 }
0x13d5   :  { %4003 = vmatpush1.bf16.msra.mxu1 %v11132_v33  ;;  %7787 = vmatprep.mubr.bf16.mxu1 %v10942_v34  ;;  %v11155_v41 = vadd.f32 %v3634_v57, %v11072_v36  ;;  %v11161_v34 = vld [vmem:[#allocation21 + $0xac] ss:$12 sps:$4 sm:$0xff]  }
0x13d6   :  { %12244 = vst [vmem:[#allocation57_spill] sm:$0xff] %v11149_v63  ;;  %4004 = vmatprep.subr.bf16.mxu1 %v11135_v13 }
0x13d7   :  { %12245 = vst [vmem:[#allocation50_spill] sm:$0xff] %v11155_v41 }
0x13d9   :  { %4005 = vmatpush1.bf16.msra.mxu1 %v11146_v10  ;;  %v3638_v28 = vpop.f32.mrb[128].mxu0 }
0x13da   :  { %4006 = vmatprep.subr.bf16.mxu1 %v11152_v8  ;;  %v11164_v62 = vadd.f32 %v3638_v28, %v11065_v59  ;;  %v3640_v17 = vpop.f32.mrb[129].mxu0 }
0x13db   :  { %v11168_v39 = vadd.f32 %v3640_v17, %v11072_v36  ;;  %v3642_v61 = vpop.f32.mrb[130].mxu0 }
0x13dc   :  { %12246 = vst [vmem:[#allocation60_spill] sm:$0xff] %v11164_v62  ;;  %7788 = vmatmul.mubr.bf16.gmra.mrb[124].mxu1 %v10965_v23  ;;  %v11175_v6 = vadd.f32 %v3642_v61, %v11065_v59  ;;  %v3644_v45 = vpop.f32.mrb[131].mxu0 }
0x13dd   :  { %12247 = vst [vmem:[#allocation61_spill] sm:$0xff] %v11168_v39  ;;  %4007 = vmatpush1.bf16.msra.mxu1 %v11158_v50  ;;  %4026 = vmatprep.mubr.bf16.mxu1 %v12213_v38  ;;  %v11179_v47 = vadd.f32 %v3644_v45, %v11072_v36 }
0x13de   :  { %12248 = vst [vmem:[#allocation52_spill] sm:$0xff] %v11175_v6  ;;  %4008 = vmatprep.subr.bf16.mxu1 %v11161_v34 }
0x13df   :  { %12249 = vst [vmem:[#allocation62_spill] sm:$0xff] %v11179_v47 }
0x13e1   :  { %4009 = vmatpush1.bf16.msra.mxu1 %v11171_v55  ;;  %v3648_v23 = vpop.f32.mrb[132].mxu0 }
0x13e2   :  { %4102 = vmatprep.subr.bf16.mxu1 %v10986_v31  ;;  %v11184_v40 = vadd.f32 %v3648_v23, %v11065_v59  ;;  %v3650_v58 = vpop.f32.mrb[133].mxu0 }
0x13e3   :  { %v11188_v2 = vadd.f32 %v3650_v58, %v11072_v36  ;;  %v3652_v44 = vpop.f32.mrb[134].mxu0 }
0x13e4   :  { %12250 = vst [vmem:[#allocation63_spill] sm:$0xff] %v11184_v40  ;;  %4027 = vmatmul.mubr.bf16.vlgmr.msra.gmra.mrb[128].mxu1 %v12240_v46  ;;  %v11193_v24 = vadd.f32 %v3652_v44, %v11065_v59  ;;  %v3654_v1 = vpop.f32.mrb[135].mxu0 }
0x13e5   :  { %12251 = vst [vmem:[#allocation54_spill] sm:$0xff] %v11188_v2  ;;  %4103 = vmatpush1.bf16.msra.mxu1 %v11081_v15  ;;  %4134 = vmatprep.mubr.bf16.mxu1 %v12213_v38  ;;  %v11197_v57 = vadd.f32 %v3654_v1, %v11072_v36 }
0x13e6   :  { %12252 = vst [vmem:[#allocation64_spill] sm:$0xff] %v11193_v24  ;;  %4104 = vmatprep.subr.bf16.mxu1 %v11083_v21 }
0x13e7   :  { %12253 = vst [vmem:[#allocation65_spill] sm:$0xff] %v11197_v57 }
0x13e9   :  { %4105 = vmatpush1.bf16.msra.mxu1 %v11094_v0  ;;  %v3658_v46 = vpop.f32.mrb[136].mxu0 }
0x13ea   :  { %4106 = vmatprep.subr.bf16.mxu1 %v11100_v60  ;;  %v11202_v28 = vadd.f32 %v3658_v46, %v11065_v59  ;;  %v3660_v17 = vpop.f32.mrb[137].mxu0 }
0x13eb   :  { %v11205_v61 = vadd.f32 %v3660_v17, %v11072_v36  ;;  %v3662_v45 = vpop.f32.mrb[138].mxu0 }
0x13ec   :  { %12254 = vst [vmem:[#allocation51_spill] sm:$0xff] %v11202_v28  ;;  %v11209_v23 = vadd.f32 %v3662_v45, %v11065_v59  ;;  %v3664_v58 = vpop.f32.mrb[139].mxu0 }
0x13ed   :  { %12255 = vst [vmem:[#allocation66_spill] sm:$0xff] %v11205_v61  ;;  %4107 = vmatpush1.bf16.msra.mxu1 %v11106_v48  ;;  %v11213_v44 = vadd.f32 %v3664_v58, %v11072_v36 }
0x13ee   :  { %12256 = vst [vmem:[#allocation67_spill] sm:$0xff] %v11209_v23  ;;  %4108 = vmatprep.subr.bf16.mxu1 %v11109_v54 }
0x13ef   :  { %12257 = vst [vmem:[#allocation53_spill] sm:$0xff] %v11213_v44 }
0x13f1   :  { %4109 = vmatpush1.bf16.msra.mxu1 %v11120_v11  ;;  %v3668_v1 = vpop.f32.mrb[140].mxu0 }
0x13f2   :  { %4110 = vmatprep.subr.bf16.mxu1 %v11126_v29  ;;  %v11218_v46 = vadd.f32 %v3668_v1, %v11065_v59  ;;  %v3670_v17 = vpop.f32.mrb[141].mxu0 }
0x13f3   :  { %v11221_v61 = vadd.f32 %v3670_v17, %v11072_v36  ;;  %v3672_v45 = vpop.f32.mrb[142].mxu0 }
0x13f4   :  { %12258 = vst [vmem:[#allocation68_spill] sm:$0xff] %v11218_v46  ;;  %v11225_v23 = vadd.f32 %v3672_v45, %v11065_v59  ;;  %v3674_v58 = vpop.f32.mrb[143].mxu0 }
0x13f5   :  { %12259 = vst [vmem:[#allocation69_spill] sm:$0xff] %v11221_v61  ;;  %4111 = vmatpush1.bf16.msra.mxu1 %v11132_v33  ;;  %v11229_v44 = vadd.f32 %v3674_v58, %v11072_v36 }
0x13f6   :  { %12260 = vst [vmem:[#allocation56_spill] sm:$0xff] %v11225_v23  ;;  %4112 = vmatprep.subr.bf16.mxu1 %v11135_v13 }
0x13f7   :  { %12261 = vst [vmem:[#allocation70_spill] sm:$0xff] %v11229_v44 }
0x13f9   :  { %4113 = vmatpush1.bf16.msra.mxu1 %v11146_v10  ;;  %v11237_v1 = vpop.f32.mrb[144].mxu0 }
0x13fa   :  { %4114 = vmatprep.subr.bf16.mxu1 %v11152_v8  ;;  %v7809_v17 = vpop.f32.mrb[145].mxu0 }
0x13fb   :  { %v4072_v45 = vpop.f32.mrb[146].mxu0  ;;  %v12262_v17 = vsub.s32 2, %v12241_v4 }
0x13fc   :  { %v7810_v23 = vpop.f32.mrb[147].mxu0 }
0x13fd   :  { %4115 = vmatpush1.bf16.msra.mxu1 %v11158_v50  ;;  %v11246_v23 = vrot.slane %v11058_v52, %v12262_v17 }
0x13fe   :  { %4116 = vmatprep.subr.bf16.mxu1 %v11161_v34 }
0x1401   :  { %4117 = vmatpush1.bf16.msra.mxu1 %v11171_v55 }
0x1402   :  { %4211 = vmatprep.subr.bf16.mxu1 %v10986_v31 }
0x148f   :  { %v7757_v61 = vpop.f32.mrb[108].mxu1 }
0x1490   :  { %v3269_v58 = vadd.f32 %v7757_v61, %v11040_v51  ;;  %v3260_v44 = vpop.f32.mrb[109].mxu1 }
0x1491   :  { %v3261_v46 = vadd.f32 %v11040_v51, %v3260_v44  ;;  %v7758_v28 = vpop.f32.mrb[110].mxu1 }
0x1492   :  { %v6745_v57 = vmul.f32 -1.442695, %v3269_v58  ;;  %v3272_v24 = vadd.f32 %v7758_v28, %v11040_v51  ;;  %v3263_v2 = vpop.f32.mrb[111].mxu1 }
0x1493   :  { %v6743_v40 = vmul.f32 -1.442695, %v3261_v46  ;;  %v3264_v47 = vadd.f32 %v11040_v51, %v3263_v2 }
0x1494   :  { %8637 = vpow2.f32 %v6745_v57  ;;  %v6746_v6 = vmul.f32 -1.442695, %v3272_v24 }
0x1495   :  { %8639 = vpow2.f32 %v6743_v40  ;;  %v6744_v61 = vmul.f32 -1.442695, %v3264_v47 }
0x1496   :  { %8641 = vpow2.f32 %v6746_v6 }
0x1497   :  { %8643 = vpow2.f32 %v6744_v61  ;;  %v7777_v44 = vpop.f32.mrb[112].mxu1 }
0x1498   :  { %v11249_v45 = vadd.f32 %v7777_v44, %v11246_v23  ;;  %v11251_v28 = vpop.f32.mrb[113].mxu1 }
0x1499   :  { %v7778_v46 = vpop.f32.mrb[114].mxu1 }
0x149a   :  { %v11254_v51 = vadd.f32 %v7778_v46, %v11246_v23  ;;  %v3714_v2 = vpop.f32.mrb[115].mxu1 }
0x149b   :  { %v11257_v4 = vadd.f32 %v3714_v2, %v11246_v23 }
0x149e   :  { %v8638_v52 = vpop.eup %8637 }
0x149f   :  { %v8640_v24 = vpop.eup %8639  ;;  %v3337_v40 = vadd.f32 1.0, %v8638_v52  ;;  %v7781_v47 = vpop.f32.mrb[116].mxu1 }
0x14a0   :  { %v8642_v6 = vpop.eup %8641  ;;  %v3335_v57 = vadd.f32 1.0, %v8640_v24  ;;  %v11260_v58 = vadd.f32 %v7781_v47, %v11246_v23  ;;  %v3727_v17 = vpop.f32.mrb[117].mxu1 }
0x14a1   :  { %v8644_v61 = vpop.eup %8643  ;;  %8645 = vrcp.f32 %v3337_v40  ;;  %v3338_v44 = vadd.f32 1.0, %v8642_v6  ;;  %v11263_v46 = vadd.f32 %v3727_v17, %v11246_v23  ;;  %v7782_v39 = vpop.f32.mrb[118].mxu1 }
0x14a2   :  { %12263 = vst [vmem:[#allocation71_spill] sm:$0xff] %v11260_v58  ;;  %8647 = vrcp.f32 %v3335_v57  ;;  %v3336_v2 = vadd.f32 1.0, %v8644_v61  ;;  %v11266_v62 = vadd.f32 %v7782_v39, %v11246_v23  ;;  %v3730_v52 = vpop.f32.mrb[119].mxu1 }
0x14a3   :  { %8649 = vrcp.f32 %v3338_v44  ;;  %v11269_v24 = vadd.f32 %v3730_v52, %v11246_v23 }
0x14a4   :  { %12264 = vst [vmem:[#allocation59_spill] sm:$0xff] %v11266_v62  ;;  %8651 = vrcp.f32 %v3336_v2 }
0x14a7   :  { %v7785_v47 = vpop.f32.mrb[120].mxu1 }
0x14a8   :  { %v11272_v41 = vadd.f32 %v7785_v47, %v11246_v23  ;;  %v3743_v40 = vpop.f32.mrb[121].mxu1 }
0x14a9   :  { %v11275_v6 = vadd.f32 %v3743_v40, %v11246_v23  ;;  %v7786_v17 = vpop.f32.mrb[122].mxu1 }
0x14aa   :  { %12265 = vst [vmem:[#allocation72_spill] sm:$0xff] %v11272_v41  ;;  %v11278_v57 = vadd.f32 %v7786_v17, %v11246_v23  ;;  %v3746_v39 = vpop.f32.mrb[123].mxu1 }
0x14ab   :  { %12266 = vst [vmem:[#allocation73_spill] sm:$0xff] %v11275_v6  ;;  %v8646_v61 = vpop.eup %8645  ;;  %v11281_v44 = vadd.f32 %v3746_v39, %v11246_v23 }
0x14ac   :  { %12267 = vst [vmem:[#allocation55_spill] sm:$0xff] %v11278_v57  ;;  %v8648_v52 = vpop.eup %8647  ;;  %3385 = vst [vmem:[#allocation34 + $0x70] sm:$0xff] %v8646_v61 }
0x14ad   :  { %12268 = vst [vmem:[#allocation74_spill] sm:$0xff] %v11281_v44  ;;  %v8650_v2 = vpop.eup %8649  ;;  %3383 = vst [vmem:[#allocation34 + $0x60] sm:$0xff] %v8648_v52  ;;  %v3599_v52 = vadd.f32 %v11060_v3, %v11065_v59 }
0x14ae   :  { %v8652_v62 = vpop.eup %8651  ;;  %3386 = vst [vmem:[#allocation34 + $0x78] sm:$0xff] %v8650_v2 }
0x14af   :  { %3384 = vst [vmem:[#allocation34 + $0x68] sm:$0xff] %v8652_v62  ;;  %v7789_v47 = vpop.f32.mrb[124].mxu1  ;;  %v3601_v62 = vadd.f32 %v11067_v9, %v11072_v36  ;;  %v3712_v36 = vadd.f32 %v11251_v28, %v11246_v23 }
0x14b0   :  { %v11284_v40 = vadd.f32 %v7789_v47, %v11246_v23  ;;  %v3759_v41 = vpop.f32.mrb[125].mxu1 }
0x14b1   :  { %v11287_v17 = vadd.f32 %v3759_v41, %v11246_v23  ;;  %v7790_v57 = vpop.f32.mrb[126].mxu1 }
0x14b2   :  { %12269 = vst [vmem:[#allocation75_spill] sm:$0xff] %v11284_v40  ;;  %v11290_v6 = vadd.f32 %v7790_v57, %v11246_v23  ;;  %v3762_v39 = vpop.f32.mrb[127].mxu1 }
0x14b3   :  { %12270 = vst [vmem:[#allocation58_spill] sm:$0xff] %v11287_v17  ;;  %v11293_v61 = vadd.f32 %v3762_v39, %v11246_v23 }
0x14b4   :  { %12271 = vst [vmem:[#allocation49_spill] sm:$0xff] %v11290_v6 }
0x14b5   :  { %12272 = vst [vmem:[#allocation76_spill] sm:$0xff] %v11293_v61  ;;  %v11299_v61 = vld [vmem:[#allocation24] ss:$0 sm:$0xff] }
0x14b6   :  { %v4089_v59 = vadd.f32 %v11299_v61, %v11237_v1 }
0x14b7   :  { %v4028_v2 = vpop.f32.mrb[128].mxu1 }
0x14b8   :  { %v4075_v47 = vadd.f32 %v4028_v2, %v3599_v52  ;;  %v4030_v40 = vpop.f32.mrb[129].mxu1 }
0x14b9   :  { %v4082_v44 = vadd.f32 %v4030_v40, %v3601_v62  ;;  %v4032_v41 = vpop.f32.mrb[130].mxu1 }
0x14ba   :  { %v6796_v17 = vmul.f32 -1.442695, %v4075_v47  ;;  %v4033_v63 = vpop.f32.mrb[131].mxu1 }
0x14bb   :  { %v6797_v57 = vmul.f32 -1.442695, %v4082_v44 }
0x14bc   :  { %8653 = vpow2.f32 %v6796_v17 }
0x14bd   :  { %8655 = vpow2.f32 %v6797_v57 }
0x14c6   :  { %v8654_v6 = vpop.eup %8653 }
0x14c7   :  { %v4079_v58 = vadd.f32 1.0, %v8654_v6  ;;  %v8656_v39 = vpop.eup %8655 }
0x14c8   :  { %v4086_v3 = vadd.f32 1.0, %v8656_v39 }
0x14c9   :  { %8657 = vrcp.f32 %v4079_v58 }
0x14ca   :  { %8659 = vrcp.f32 %v4086_v3 }
0x14d3   :  { %v8658_v9 = vpop.eup %8657 }
0x14d4   :  { %v4090_v40 = vmul.f32 %v8658_v9, %v4089_v59  ;;  %v8660_v44 = vpop.eup %8659 }
0x14d5   :  { %v4093_v17 = vsub.f32 1.0, %v8660_v44  ;;  %v4095_v58 = vmul.f32 0.0, %v8660_v44 }
0x14d6   :  { %v4091_v63 = vadd.f32 %v4090_v40, %v3712_v36 }
0x14d8   :  { %8661 = vtanh.f32 %v4091_v63 }
0x14e2   :  { %v8662_v52 = vpop.eup %8661 }
0x14e3   :  { %v4094_v6 = vmul.f32 %v8662_v52, %v4093_v17 }
0x14e5   :  { %v11305_v62 = vadd.f32 %v4095_v58, %v4094_v6 }
0x14e7   :  { %v4097_v2 = vpack.c.bf16 %v11305_v62, %v11305_v62 }
0x14e9   :  { %4098 = vst [vmem:[#allocation4] sm:$0xf] %v4097_v2  ;;  %4135 = vmatmul.mubr.bf16.vlgmr.msra.gmra.mrb[132].mxu1 %v4097_v2  ;;  %7828 = vmatmul.mubr.bf16.vlgmr.msra.gmra.mrb[148].mxu0 %v4097_v2 }
0x14ea   :  { %4212 = vmatpush1.bf16.msra.mxu1 %v11081_v15  ;;  %7832 = vmatpush3.bf16.msra.mxu0 %v10989_v32 }
0x14eb   :  { %4213 = vmatprep.subr.bf16.mxu1 %v11083_v21  ;;  %7833 = vmatprep.subr.bf16.mxu0 %v12212_v27 }
0x14ec   :  { %4243 = vmatprep.mubr.bf16.mxu1 %v12213_v38  ;;  %7847 = vmatprep.mubr.msk.bf16.mxu0 %vm9529_vm0, %v12212_v27 }
0x14ee   :  { %4214 = vmatpush1.bf16.msra.mxu1 %v11094_v0  ;;  %7834 = vmatpush3.bf16.msra.mxu0 %v10992_v35 }
0x14ef   :  { %4215 = vmatprep.subr.bf16.mxu1 %v11100_v60  ;;  %7835 = vmatprep.subr.bf16.mxu0 %v12212_v27 }
0x14f2   :  { %4216 = vmatpush1.bf16.msra.mxu1 %v11106_v48  ;;  %7836 = vmatpush3.bf16.msra.mxu0 %v10996_v20 }
0x14f3   :  { %4217 = vmatprep.subr.bf16.mxu1 %v11109_v54  ;;  %7837 = vmatprep.subr.bf16.mxu0 %v12212_v27 }
0x14f6   :  { %4218 = vmatpush1.bf16.msra.mxu1 %v11120_v11  ;;  %7838 = vmatpush3.bf16.msra.mxu0 %v11000_v14 }
0x14f7   :  { %4219 = vmatprep.subr.bf16.mxu1 %v11126_v29  ;;  %7839 = vmatprep.subr.bf16.mxu0 %v12212_v27 }
0x14fa   :  { %4220 = vmatpush1.bf16.msra.mxu1 %v11132_v33  ;;  %7840 = vmatpush3.bf16.msra.mxu0 %v11004_v56 }
0x14fb   :  { %4221 = vmatprep.subr.bf16.mxu1 %v11135_v13  ;;  %7841 = vmatprep.subr.bf16.mxu0 %v12212_v27 }
0x14fe   :  { %4222 = vmatpush1.bf16.msra.mxu1 %v11146_v10  ;;  %7842 = vmatpush3.bf16.msra.mxu0 %v11009_v16 }
0x14ff   :  { %4223 = vmatprep.subr.bf16.mxu1 %v11152_v8  ;;  %7843 = vmatprep.subr.bf16.mxu0 %v12212_v27 }
0x1502   :  { %4224 = vmatpush1.bf16.msra.mxu1 %v11158_v50  ;;  %7844 = vmatpush3.bf16.msra.mxu0 %v11013_v43 }
0x1503   :  { %4225 = vmatprep.subr.bf16.mxu1 %v11161_v34  ;;  %7845 = vmatprep.subr.bf16.mxu0 %v12212_v27 }
0x1506   :  { %4226 = vmatpush1.bf16.msra.mxu1 %v11171_v55  ;;  %7846 = vmatpush3.bf16.msra.mxu0 %v11017_v30 }
0x1507   :  { %4320 = vmatprep.subr.bf16.mxu1 %v10986_v31  ;;  %7851 = vmatprep.subr.bf16.mxu0 %v12212_v27 }
0x15bc   :  { %v4136_v1 = vpop.f32.mrb[132].mxu1  ;;  %v4177_v23 = vpop.f32.mrb[148].mxu0 }
0x15bd   :  { %v4183_v28 = vadd.f32 %v4136_v1, %v11076_v53  ;;  %v4138_v47 = vpop.f32.mrb[133].mxu1  ;;  %v7829_v41 = vpop.f32.mrb[149].mxu0  ;;  %v4197_v6 = vadd.f32 %v11299_v61, %v4177_v23 }
0x15be   :  { %v4190_v57 = vadd.f32 %v4138_v47, %v11079_v49  ;;  %v4140_v39 = vpop.f32.mrb[134].mxu1  ;;  %v4180_v3 = vpop.f32.mrb[150].mxu0 }
0x15bf   :  { %v6798_v59 = vmul.f32 -1.442695, %v4183_v28  ;;  %v4141_v9 = vpop.f32.mrb[135].mxu1  ;;  %v7830_v36 = vpop.f32.mrb[151].mxu0 }
0x15c0   :  { %v6799_v40 = vmul.f32 -1.442695, %v4190_v57 }
0x15c1   :  { %8663 = vpow2.f32 %v6798_v59 }
0x15c2   :  { %8665 = vpow2.f32 %v6799_v40 }
0x15cb   :  { %v8664_v63 = vpop.eup %8663 }
0x15cc   :  { %v4187_v44 = vadd.f32 1.0, %v8664_v63  ;;  %v8666_v17 = vpop.eup %8665 }
0x15cd   :  { %v4194_v52 = vadd.f32 1.0, %v8666_v17 }
0x15ce   :  { %8667 = vrcp.f32 %v4187_v44 }
0x15cf   :  { %8669 = vrcp.f32 %v4194_v52 }
0x15d8   :  { %v8668_v53 = vpop.eup %8667 }
0x15d9   :  { %v4198_v58 = vmul.f32 %v8668_v53, %v4197_v6  ;;  %v8670_v2 = vpop.eup %8669 }
0x15da   :  { %v4201_v1 = vsub.f32 1.0, %v8670_v2  ;;  %v4203_v41 = vmul.f32 %v8670_v2, %v11305_v62  ;;  %v11398_v2 = vld [vmem:[#allocation21 + $0x8] ss:$12 sps:$4 sm:$0xff]  }
0x15db   :  { %v4199_v49 = vadd.f32 %v4198_v58, %v11257_v4 }
0x15dd   :  { %8671 = vtanh.f32 %v4199_v49 }
0x15e7   :  { %v8672_v28 = vpop.eup %8671 }
0x15e8   :  { %v4202_v47 = vmul.f32 %v8672_v28, %v4201_v1  ;;  %v11413_v1 = vld [vmem:[#allocation21 + $0x38] ss:$12 sps:$4 sm:$0xff]   ;;  %v11419_v28 = vld [vmem:[#allocation21 + $0x50] ss:$12 sps:$4 sm:$0xff]  }
0x15ea   :  { %v11349_v57 = vadd.f32 %v4203_v41, %v4202_v47  ;;  %v11425_v47 = vld [vmem:[#allocation21 + $0x68] ss:$12 sps:$4 sm:$0xff]   ;;  %v11431_v41 = vld [vmem:[#allocation21 + $0x80] ss:$12 sps:$4 sm:$0xff]  }
0x15ec   :  { %v4205_v39 = vpack.c.bf16 %v11349_v57, %v11349_v57 }
0x15ee   :  { %4207 = vst [vmem:[#allocation4 + $0x4] sm:$0xf] %v4205_v39  ;;  %4244 = vmatmul.mubr.bf16.vlgmr.msra.gmra.mrb[136].mxu1 %v4205_v39  ;;  %7848 = vmatmul.mubr.bf16.vlgmr.msra.gmra.mrb[152].mxu0 %v4205_v39  ;;  %v11443_v39 = vld [vmem:[#allocation21 + $0xb0] ss:$12 sps:$4 sm:$0xff]  }
0x15ef   :  { %4321 = vmatpush1.bf16.msra.mxu1 %v11081_v15  ;;  %7852 = vmatpush3.bf16.msra.mxu0 %v10989_v32 }
0x15f0   :  { %4322 = vmatprep.subr.bf16.mxu1 %v11083_v21  ;;  %7853 = vmatprep.subr.bf16.mxu0 %v12212_v27 }
0x15f1   :  { %4352 = vmatprep.mubr.bf16.mxu1 %v12213_v38  ;;  %7867 = vmatprep.mubr.msk.bf16.mxu0 %vm9529_vm0, %v12212_v27 }
0x15f3   :  { %4323 = vmatpush1.bf16.msra.mxu1 %v11094_v0  ;;  %7854 = vmatpush3.bf16.msra.mxu0 %v10992_v35 }
0x15f4   :  { %4324 = vmatprep.subr.bf16.mxu1 %v11100_v60  ;;  %7855 = vmatprep.subr.bf16.mxu0 %v12212_v27 }
0x15f7   :  { %4325 = vmatpush1.bf16.msra.mxu1 %v11106_v48  ;;  %7856 = vmatpush3.bf16.msra.mxu0 %v10996_v20 }
0x15f8   :  { %4326 = vmatprep.subr.bf16.mxu1 %v11109_v54  ;;  %7857 = vmatprep.subr.bf16.mxu0 %v12212_v27 }
0x15fb   :  { %4327 = vmatpush1.bf16.msra.mxu1 %v11120_v11  ;;  %7858 = vmatpush3.bf16.msra.mxu0 %v11000_v14 }
0x15fc   :  { %4328 = vmatprep.subr.bf16.mxu1 %v11126_v29  ;;  %7859 = vmatprep.subr.bf16.mxu0 %v12212_v27 }
0x15ff   :  { %4329 = vmatpush1.bf16.msra.mxu1 %v11132_v33  ;;  %7860 = vmatpush3.bf16.msra.mxu0 %v11004_v56 }
0x1600   :  { %4330 = vmatprep.subr.bf16.mxu1 %v11135_v13  ;;  %7861 = vmatprep.subr.bf16.mxu0 %v12212_v27 }
0x1603   :  { %4331 = vmatpush1.bf16.msra.mxu1 %v11146_v10  ;;  %7862 = vmatpush3.bf16.msra.mxu0 %v11009_v16 }
0x1604   :  { %4332 = vmatprep.subr.bf16.mxu1 %v11152_v8  ;;  %7863 = vmatprep.subr.bf16.mxu0 %v12212_v27 }
0x1607   :  { %4333 = vmatpush1.bf16.msra.mxu1 %v11158_v50  ;;  %7864 = vmatpush3.bf16.msra.mxu0 %v11013_v43 }
0x1608   :  { %4334 = vmatprep.subr.bf16.mxu1 %v11161_v34  ;;  %7865 = vmatprep.subr.bf16.mxu0 %v12212_v27 }
0x160b   :  { %4335 = vmatpush1.bf16.msra.mxu1 %v11171_v55  ;;  %7866 = vmatpush3.bf16.msra.mxu0 %v11017_v30 }
0x160c   :  { %4429 = vmatprep.subr.bf16.mxu1 %v10986_v31  ;;  %7871 = vmatprep.subr.bf16.mxu0 %v12212_v27 }
0x16c1   :  { %v4245_v32 = vpop.f32.mrb[136].mxu1  ;;  %v4286_v35 = vpop.f32.mrb[152].mxu0 }
0x16c2   :  { %v4292_v20 = vadd.f32 %v4245_v32, %v11086_v42  ;;  %v4247_v14 = vpop.f32.mrb[137].mxu1  ;;  %v7849_v56 = vpop.f32.mrb[153].mxu0  ;;  %v4306_v40 = vadd.f32 %v11299_v61, %v4286_v35  ;;  %v11446_v32 = vld [vmem:[#allocation21 + $0x4] ss:$12 sps:$4 sm:$0xff]  }
0x16c3   :  { %v4299_v16 = vadd.f32 %v4247_v14, %v11090_v37  ;;  %v4249_v43 = vpop.f32.mrb[138].mxu1  ;;  %v4289_v4 = vpop.f32.mrb[154].mxu0 }
0x16c4   :  { %v6800_v62 = vmul.f32 -1.442695, %v4292_v20  ;;  %v4250_v23 = vpop.f32.mrb[139].mxu1  ;;  %v7850_v3 = vpop.f32.mrb[155].mxu0 }
0x16c5   :  { %v6801_v59 = vmul.f32 -1.442695, %v4299_v16 }
0x16c6   :  { %8673 = vpow2.f32 %v6800_v62 }
0x16c7   :  { %8675 = vpow2.f32 %v6801_v59 }
0x16d0   :  { %v8674_v30 = vpop.eup %8673 }
0x16d1   :  { %v4296_v31 = vadd.f32 1.0, %v8674_v30  ;;  %v8676_v9 = vpop.eup %8675 }
0x16d2   :  { %v4303_v36 = vadd.f32 1.0, %v8676_v9 }
0x16d3   :  { %8677 = vrcp.f32 %v4296_v31 }
0x16d4   :  { %8679 = vrcp.f32 %v4303_v36 }
0x16dd   :  { %v8678_v42 = vpop.eup %8677 }
0x16de   :  { %v4307_v63 = vmul.f32 %v8678_v42, %v4306_v40  ;;  %v8680_v44 = vpop.eup %8679 }
0x16df   :  { %v4310_v17 = vsub.f32 1.0, %v8680_v44  ;;  %v4312_v53 = vmul.f32 %v8680_v44, %v11349_v57  ;;  %v11437_v57 = vld [vmem:[#allocation21 + $0x98] ss:$12 sps:$4 sm:$0xff]  }
0x16e0   :  { %v4308_v37 = vadd.f32 %v4307_v63, %v11249_v45  ;;  %v11407_v45 = vld [vmem:[#allocation21 + $0x20] ss:$12 sps:$4 sm:$0xff]  }
0x16e2   :  { %8681 = vtanh.f32 %v4308_v37 }
0x16ec   :  { %v8682_v52 = vpop.eup %8681 }
0x16ed   :  { %v4311_v6 = vmul.f32 %v8682_v52, %v4310_v17 }
0x16ef   :  { %v11393_v58 = vadd.f32 %v4312_v53, %v4311_v6 }
0x16f1   :  { %v4314_v49 = vpack.c.bf16 %v11393_v58, %v11393_v58 }
0x16f3   :  { %4316 = vst [vmem:[#allocation4 + $0x8] sm:$0xf] %v4314_v49  ;;  %4353 = vmatmul.mubr.bf16.vlgmr.msra.gmra.mrb[140].mxu1 %v4314_v49  ;;  %7868 = vmatmul.mubr.bf16.vlgmr.msra.gmra.mrb[156].mxu0 %v4314_v49 }
0x16f4   :  { %4430 = vmatpush1.bf16.msra.mxu1 %v11081_v15  ;;  %7872 = vmatpush3.bf16.msra.mxu0 %v11398_v2 }
0x16f5   :  { %4431 = vmatprep.subr.bf16.mxu1 %v11083_v21  ;;  %7873 = vmatprep.subr.bf16.mxu0 %v12212_v27 }
0x16f6   :  { %4461 = vmatprep.mubr.bf16.mxu1 %v12213_v38  ;;  %7887 = vmatprep.mubr.msk.bf16.mxu0 %vm9529_vm0, %v12212_v27 }
0x16f8   :  { %4432 = vmatpush1.bf16.msra.mxu1 %v11094_v0  ;;  %7874 = vmatpush3.bf16.msra.mxu0 %v11407_v45 }
0x16f9   :  { %4433 = vmatprep.subr.bf16.mxu1 %v11100_v60  ;;  %7875 = vmatprep.subr.bf16.mxu0 %v12212_v27 }
0x16fc   :  { %4434 = vmatpush1.bf16.msra.mxu1 %v11106_v48  ;;  %7876 = vmatpush3.bf16.msra.mxu0 %v11413_v1 }
0x16fd   :  { %4435 = vmatprep.subr.bf16.mxu1 %v11109_v54  ;;  %7877 = vmatprep.subr.bf16.mxu0 %v12212_v27 }
0x1700   :  { %4436 = vmatpush1.bf16.msra.mxu1 %v11120_v11  ;;  %7878 = vmatpush3.bf16.msra.mxu0 %v11419_v28 }
0x1701   :  { %4437 = vmatprep.subr.bf16.mxu1 %v11126_v29  ;;  %7879 = vmatprep.subr.bf16.mxu0 %v12212_v27 }
0x1704   :  { %4438 = vmatpush1.bf16.msra.mxu1 %v11132_v33  ;;  %7880 = vmatpush3.bf16.msra.mxu0 %v11425_v47 }
0x1705   :  { %4439 = vmatprep.subr.bf16.mxu1 %v11135_v13  ;;  %7881 = vmatprep.subr.bf16.mxu0 %v12212_v27 }
0x1708   :  { %4440 = vmatpush1.bf16.msra.mxu1 %v11146_v10  ;;  %7882 = vmatpush3.bf16.msra.mxu0 %v11431_v41 }
0x1709   :  { %4441 = vmatprep.subr.bf16.mxu1 %v11152_v8  ;;  %7883 = vmatprep.subr.bf16.mxu0 %v12212_v27 }
0x170c   :  { %4442 = vmatpush1.bf16.msra.mxu1 %v11158_v50  ;;  %7884 = vmatpush3.bf16.msra.mxu0 %v11437_v57 }
0x170d   :  { %4443 = vmatprep.subr.bf16.mxu1 %v11161_v34  ;;  %7885 = vmatprep.subr.bf16.mxu0 %v12212_v27 }
0x1710   :  { %4444 = vmatpush1.bf16.msra.mxu1 %v11171_v55  ;;  %7886 = vmatpush3.bf16.msra.mxu0 %v11443_v39 }
0x1711   :  { %4538 = vmatprep.subr.bf16.mxu1 %v11446_v32  ;;  %7891 = vmatprep.subr.bf16.mxu0 %v12212_v27 }
0x17c6   :  { %v4354_v35 = vpop.f32.mrb[140].mxu1  ;;  %v4395_v20 = vpop.f32.mrb[156].mxu0 }
0x17c7   :  { %v4401_v14 = vadd.f32 %v4354_v35, %v11097_v7  ;;  %v4356_v56 = vpop.f32.mrb[141].mxu1  ;;  %v7869_v16 = vpop.f32.mrb[157].mxu0  ;;  %v4415_v42 = vadd.f32 %v11299_v61, %v4395_v20 }
0x17c8   :  { %v4408_v43 = vadd.f32 %v4356_v56, %v11103_v25  ;;  %v4358_v4 = vpop.f32.mrb[142].mxu1  ;;  %v4398_v62 = vpop.f32.mrb[158].mxu0 }
0x17c9   :  { %v6802_v23 = vmul.f32 -1.442695, %v4401_v14  ;;  %v4359_v3 = vpop.f32.mrb[143].mxu1  ;;  %v7870_v59 = vpop.f32.mrb[159].mxu0 }
0x17ca   :  { %v6803_v30 = vmul.f32 -1.442695, %v4408_v43 }
0x17cb   :  { %8683 = vpow2.f32 %v6802_v23 }
0x17cc   :  { %8685 = vpow2.f32 %v6803_v30 }
0x17d5   :  { %v8684_v31 = vpop.eup %8683 }
0x17d6   :  { %v4405_v9 = vadd.f32 1.0, %v8684_v31  ;;  %v8686_v36 = vpop.eup %8685 }
0x17d7   :  { %v4412_v40 = vadd.f32 1.0, %v8686_v36 }
0x17d8   :  { %8687 = vrcp.f32 %v4405_v9 }
0x17d9   :  { %8689 = vrcp.f32 %v4412_v40 }
0x17e2   :  { %v8688_v7 = vpop.eup %8687 }
0x17e3   :  { %v4416_v63 = vmul.f32 %v8688_v7, %v4415_v42  ;;  %v8690_v37 = vpop.eup %8689 }
0x17e4   :  { %v4419_v44 = vsub.f32 1.0, %v8690_v37  ;;  %v4421_v6 = vmul.f32 %v8690_v37, %v11393_v58  ;;  %v11503_v37 = vld [vmem:[#allocation21] ss:$12 sps:$4 sm:$0xff]  }
0x17e5   :  { %v4417_v25 = vadd.f32 %v4416_v63, %v11254_v51 }
0x17e7   :  { %8691 = vtanh.f32 %v4417_v25 }
0x17f1   :  { %v8692_v17 = vpop.eup %8691 }
0x17f2   :  { %v4420_v52 = vmul.f32 %v8692_v17, %v4419_v44  ;;  %v11514_v44 = vld [vmem:[#allocation21 + $0x18] ss:$12 sps:$4 sm:$0xff]  }
0x17f4   :  { %v11455_v53 = vadd.f32 %v4421_v6, %v4420_v52 }
0x17f6   :  { %v4423_v49 = vpack.c.bf16 %v11455_v53, %v11455_v53 }
0x17f8   :  { %4425 = vst [vmem:[#allocation4 + $0xc] sm:$0xf] %v4423_v49  ;;  %4462 = vmatmul.mubr.bf16.vlgmr.msra.gmra.mrb[144].mxu1 %v4423_v49  ;;  %7888 = vmatmul.mubr.bf16.vlgmr.msra.gmra.mrb[160].mxu0 %v4423_v49 }
0x17f9   :  { %4539 = vmatpush1.bf16.msra.mxu1 %v11081_v15  ;;  %7892 = vmatpush3.bf16.msra.mxu0 %v11398_v2 }
0x17fa   :  { %4540 = vmatprep.subr.bf16.mxu1 %v11083_v21  ;;  %7893 = vmatprep.subr.bf16.mxu0 %v12212_v27 }
0x17fb   :  { %4570 = vmatprep.mubr.bf16.mxu1 %v12213_v38  ;;  %7907 = vmatprep.mubr.msk.bf16.mxu0 %vm9529_vm0, %v12212_v27 }
0x17fd   :  { %4541 = vmatpush1.bf16.msra.mxu1 %v11094_v0  ;;  %7894 = vmatpush3.bf16.msra.mxu0 %v11407_v45 }
0x17fe   :  { %4542 = vmatprep.subr.bf16.mxu1 %v11100_v60  ;;  %7895 = vmatprep.subr.bf16.mxu0 %v12212_v27 }
0x1801   :  { %4543 = vmatpush1.bf16.msra.mxu1 %v11106_v48  ;;  %7896 = vmatpush3.bf16.msra.mxu0 %v11413_v1 }
0x1802   :  { %4544 = vmatprep.subr.bf16.mxu1 %v11109_v54  ;;  %7897 = vmatprep.subr.bf16.mxu0 %v12212_v27 }
0x1805   :  { %4545 = vmatpush1.bf16.msra.mxu1 %v11120_v11  ;;  %7898 = vmatpush3.bf16.msra.mxu0 %v11419_v28 }
0x1806   :  { %4546 = vmatprep.subr.bf16.mxu1 %v11126_v29  ;;  %7899 = vmatprep.subr.bf16.mxu0 %v12212_v27 }
0x1809   :  { %4547 = vmatpush1.bf16.msra.mxu1 %v11132_v33  ;;  %7900 = vmatpush3.bf16.msra.mxu0 %v11425_v47 }
0x180a   :  { %4548 = vmatprep.subr.bf16.mxu1 %v11135_v13  ;;  %7901 = vmatprep.subr.bf16.mxu0 %v12212_v27 }
0x180d   :  { %4549 = vmatpush1.bf16.msra.mxu1 %v11146_v10  ;;  %7902 = vmatpush3.bf16.msra.mxu0 %v11431_v41 }
0x180e   :  { %4550 = vmatprep.subr.bf16.mxu1 %v11152_v8  ;;  %7903 = vmatprep.subr.bf16.mxu0 %v12212_v27 }
0x1811   :  { %4551 = vmatpush1.bf16.msra.mxu1 %v11158_v50  ;;  %7904 = vmatpush3.bf16.msra.mxu0 %v11437_v57 }
0x1812   :  { %4552 = vmatprep.subr.bf16.mxu1 %v11161_v34  ;;  %7905 = vmatprep.subr.bf16.mxu0 %v12212_v27 }
0x1815   :  { %4553 = vmatpush1.bf16.msra.mxu1 %v11171_v55  ;;  %7906 = vmatpush3.bf16.msra.mxu0 %v11443_v39 }
0x1816   :  { %4647 = vmatprep.subr.bf16.mxu1 %v11446_v32  ;;  %7911 = vmatprep.subr.bf16.mxu0 %v12212_v27 }
0x18cb   :  { %v4463_v15 = vpop.f32.mrb[144].mxu1  ;;  %v4504_v21 = vpop.f32.mrb[160].mxu0 }
0x18cc   :  { %v4510_v0 = vadd.f32 %v4463_v15, %v11112_v5  ;;  %v4465_v51 = vpop.f32.mrb[145].mxu1  ;;  %v7889_v58 = vpop.f32.mrb[161].mxu0  ;;  %v4524_v30 = vadd.f32 %v11299_v61, %v4504_v21 }
0x18cd   :  { %v4517_v35 = vadd.f32 %v4465_v51, %v11116_v18  ;;  %v4467_v20 = vpop.f32.mrb[146].mxu1  ;;  %v4507_v14 = vpop.f32.mrb[162].mxu0 }
0x18ce   :  { %v6804_v56 = vmul.f32 -1.442695, %v4510_v0  ;;  %v4468_v16 = vpop.f32.mrb[147].mxu1  ;;  %v7890_v43 = vpop.f32.mrb[163].mxu0 }
0x18cf   :  { %v6805_v4 = vmul.f32 -1.442695, %v4517_v35  ;;  %v11570_v16 = vld [vmem:[#allocation21 + $0x4c] ss:$12 sps:$4 sm:$0xff]   ;;  %v11574_v43 = vld [vmem:[#allocation21 + $0x48] ss:$12 sps:$4 sm:$0xff]  }
0x18d0   :  { %8693 = vpow2.f32 %v6804_v56  ;;  %v11566_v56 = vld [vmem:[#allocation21 + $0x30] ss:$12 sps:$4 sm:$0xff]  }
0x18d1   :  { %8695 = vpow2.f32 %v6805_v4  ;;  %v11578_v4 = vld [vmem:[#allocation21 + $0x64] ss:$12 sps:$4 sm:$0xff]  }
0x18da   :  { %v8694_v62 = vpop.eup %8693 }
0x18db   :  { %v4514_v23 = vadd.f32 1.0, %v8694_v62  ;;  %v8696_v3 = vpop.eup %8695  ;;  %v11582_v62 = vld [vmem:[#allocation21 + $0x60] ss:$12 sps:$4 sm:$0xff]  }
0x18dc   :  { %v4521_v59 = vadd.f32 1.0, %v8696_v3  ;;  %v11590_v3 = vld [vmem:[#allocation21 + $0x78] ss:$12 sps:$4 sm:$0xff]  }
0x18dd   :  { %8697 = vrcp.f32 %v4514_v23  ;;  %v11586_v23 = vld [vmem:[#allocation21 + $0x7c] ss:$12 sps:$4 sm:$0xff]  }
0x18de   :  { %8699 = vrcp.f32 %v4521_v59  ;;  %v11594_v59 = vld [vmem:[#allocation21 + $0x94] ss:$12 sps:$4 sm:$0xff]  }
0x18e7   :  { %v8698_v5 = vpop.eup %8697 }
0x18e8   :  { %v4525_v31 = vmul.f32 %v8698_v5, %v4524_v30  ;;  %v8700_v9 = vpop.eup %8699  ;;  %v11598_v30 = vld [vmem:[#allocation21 + $0x90] ss:$12 sps:$4 sm:$0xff]   ;;  %v11602_v5 = vld [vmem:[#allocation21 + $0xac] ss:$12 sps:$4 sm:$0xff]  }
0x18e9   :  { %v4528_v36 = vsub.f32 1.0, %v8700_v9  ;;  %v4530_v7 = vmul.f32 %v8700_v9, %v11455_v53 }
0x18ea   :  { %v4526_v18 = vadd.f32 %v4525_v31, %v11263_v46  ;;  %v11507_v46 = vld [vmem:[#allocation21 + $0x1c] ss:$12 sps:$4 sm:$0xff]  }
0x18eb   :  { %v11606_v31 = vld [vmem:[#allocation21 + $0xa8] ss:$12 sps:$4 sm:$0xff]  }
0x18ec   :  { %8701 = vtanh.f32 %v4526_v18 }
0x18f6   :  { %v8702_v40 = vpop.eup %8701 }
0x18f7   :  { %v4529_v42 = vmul.f32 %v8702_v40, %v4528_v36 }
0x18f9   :  { %v11499_v63 = vadd.f32 %v4530_v7, %v4529_v42 }
0x18fb   :  { %v4532_v25 = vpack.c.bf16 %v11499_v63, %v11499_v63 }
0x18fd   :  { %4534 = vst [vmem:[#allocation4 + $0x10] sm:$0xf] %v4532_v25  ;;  %4571 = vmatmul.mubr.bf16.vlgmr.msra.gmra.mrb[148].mxu1 %v4532_v25  ;;  %7908 = vmatmul.mubr.bf16.vlgmr.msra.gmra.mrb[164].mxu0 %v4532_v25 }
0x18fe   :  { %4648 = vmatpush1.bf16.msra.mxu1 %v11503_v37  ;;  %7912 = vmatpush3.bf16.msra.mxu0 %v11398_v2 }
0x18ff   :  { %4649 = vmatprep.subr.bf16.mxu1 %v11507_v46  ;;  %7913 = vmatprep.subr.bf16.mxu0 %v12212_v27 }
0x1900   :  { %4679 = vmatprep.mubr.bf16.mxu1 %v12213_v38  ;;  %7927 = vmatprep.mubr.msk.bf16.mxu0 %vm9529_vm0, %v12212_v27 }
0x1902   :  { %4650 = vmatpush1.bf16.msra.mxu1 %v11514_v44  ;;  %7914 = vmatpush3.bf16.msra.mxu0 %v11407_v45 }
0x1903   :  { %4651 = vmatprep.subr.bf16.mxu1 %v11100_v60  ;;  %7915 = vmatprep.subr.bf16.mxu0 %v12212_v27 }
0x1906   :  { %4652 = vmatpush1.bf16.msra.mxu1 %v11106_v48  ;;  %7916 = vmatpush3.bf16.msra.mxu0 %v11413_v1 }
0x1907   :  { %4653 = vmatprep.subr.bf16.mxu1 %v11109_v54  ;;  %7917 = vmatprep.subr.bf16.mxu0 %v12212_v27 }
0x190a   :  { %4654 = vmatpush1.bf16.msra.mxu1 %v11120_v11  ;;  %7918 = vmatpush3.bf16.msra.mxu0 %v11419_v28 }
0x190b   :  { %4655 = vmatprep.subr.bf16.mxu1 %v11126_v29  ;;  %7919 = vmatprep.subr.bf16.mxu0 %v12212_v27 }
0x190e   :  { %4656 = vmatpush1.bf16.msra.mxu1 %v11132_v33  ;;  %7920 = vmatpush3.bf16.msra.mxu0 %v11425_v47 }
0x190f   :  { %4657 = vmatprep.subr.bf16.mxu1 %v11135_v13  ;;  %7921 = vmatprep.subr.bf16.mxu0 %v12212_v27 }
0x1912   :  { %4658 = vmatpush1.bf16.msra.mxu1 %v11146_v10  ;;  %7922 = vmatpush3.bf16.msra.mxu0 %v11431_v41 }
0x1913   :  { %4659 = vmatprep.subr.bf16.mxu1 %v11152_v8  ;;  %7923 = vmatprep.subr.bf16.mxu0 %v12212_v27 }
0x1916   :  { %4660 = vmatpush1.bf16.msra.mxu1 %v11158_v50  ;;  %7924 = vmatpush3.bf16.msra.mxu0 %v11437_v57 }
0x1917   :  { %4661 = vmatprep.subr.bf16.mxu1 %v11161_v34  ;;  %7925 = vmatprep.subr.bf16.mxu0 %v12212_v27 }
0x191a   :  { %4662 = vmatpush1.bf16.msra.mxu1 %v11171_v55  ;;  %7926 = vmatpush3.bf16.msra.mxu0 %v11443_v39 }
0x191b   :  { %4756 = vmatprep.subr.bf16.mxu1 %v11446_v32  ;;  %7931 = vmatprep.subr.bf16.mxu0 %v12212_v27 }
0x19d0   :  { %v4572_v60 = vpop.f32.mrb[148].mxu1  ;;  %v4613_v48 = vpop.f32.mrb[164].mxu0 }
0x19d1   :  { %v4619_v54 = vadd.f32 %v4572_v60, %v11123_v19  ;;  %v4574_v11 = vpop.f32.mrb[149].mxu1  ;;  %v7909_v29 = vpop.f32.mrb[165].mxu0  ;;  %v4633_v49 = vadd.f32 %v11299_v61, %v4613_v48 }
0x19d2   :  { %v4626_v33 = vadd.f32 %v4574_v11, %v11129_v22  ;;  %v4576_v13 = vpop.f32.mrb[150].mxu1  ;;  %v4616_v10 = vpop.f32.mrb[166].mxu0 }
0x19d3   :  { %v6806_v8 = vmul.f32 -1.442695, %v4619_v54  ;;  %v4577_v50 = vpop.f32.mrb[151].mxu1  ;;  %v7910_v34 = vpop.f32.mrb[167].mxu0 }
0x19d4   :  { %v6807_v55 = vmul.f32 -1.442695, %v4626_v33  ;;  %v12273_v34 = vld [vmem:[#allocation71_spill] sm:$0xff] }
0x19d5   :  { %8703 = vpow2.f32 %v6806_v8 }
0x19d6   :  { %8705 = vpow2.f32 %v6807_v55 }
0x19df   :  { %v8704_v17 = vpop.eup %8703 }
0x19e0   :  { %v4623_v52 = vadd.f32 1.0, %v8704_v17  ;;  %v8706_v6 = vpop.eup %8705 }
0x19e1   :  { %v4630_v53 = vadd.f32 1.0, %v8706_v6 }
0x19e2   :  { %8707 = vrcp.f32 %v4623_v52 }
0x19e3   :  { %8709 = vrcp.f32 %v4630_v53 }
0x19ec   :  { %v8708_v19 = vpop.eup %8707 }
0x19ed   :  { %v4634_v15 = vmul.f32 %v8708_v19, %v4633_v49  ;;  %v8710_v21 = vpop.eup %8709 }
0x19ee   :  { %v4637_v0 = vsub.f32 1.0, %v8710_v21  ;;  %v4639_v35 = vmul.f32 %v8710_v21, %v11499_v63  ;;  %v12274_v21 = vld [vmem:[#allocation57_spill] sm:$0xff] }
0x19ef   :  { %v4635_v22 = vadd.f32 %v4634_v15, %v11269_v24  ;;  %v11562_v24 = vld [vmem:[#allocation21 + $0x34] ss:$12 sps:$4 sm:$0xff]  }
0x19f1   :  { %8711 = vtanh.f32 %v4635_v22 }
0x19fb   :  { %v8712_v51 = vpop.eup %8711 }
0x19fc   :  { %v4638_v58 = vmul.f32 %v8712_v51, %v4637_v0 }
0x19fe   :  { %v11549_v20 = vadd.f32 %v4639_v35, %v4638_v58  ;;  %v12275_v35 = vld [vmem:[#allocation50_spill] sm:$0xff] }
0x1a00   :  { %v4641_v14 = vpack.c.bf16 %v11549_v20, %v11549_v20 }
0x1a02   :  { %4643 = vst [vmem:[#allocation4 + $0x14] sm:$0xf] %v4641_v14  ;;  %4680 = vmatmul.mubr.bf16.vlgmr.msra.gmra.mrb[152].mxu1 %v4641_v14  ;;  %7928 = vmatmul.mubr.bf16.vlgmr.msra.gmra.mrb[168].mxu0 %v4641_v14 }
0x1a03   :  { %4757 = vmatpush1.bf16.msra.mxu1 %v11503_v37  ;;  %7932 = vmatpush3.bf16.msra.mxu0 %v11398_v2 }
0x1a04   :  { %4758 = vmatprep.subr.bf16.mxu1 %v11507_v46  ;;  %7933 = vmatprep.subr.bf16.mxu0 %v12212_v27 }
0x1a05   :  { %4788 = vmatprep.mubr.bf16.mxu1 %v12213_v38  ;;  %7947 = vmatprep.mubr.msk.bf16.mxu0 %vm9529_vm0, %v12212_v27 }
0x1a07   :  { %4759 = vmatpush1.bf16.msra.mxu1 %v11514_v44  ;;  %7934 = vmatpush3.bf16.msra.mxu0 %v11407_v45 }
0x1a08   :  { %4760 = vmatprep.subr.bf16.mxu1 %v11562_v24  ;;  %7935 = vmatprep.subr.bf16.mxu0 %v12212_v27 }
0x1a0b   :  { %4761 = vmatpush1.bf16.msra.mxu1 %v11566_v56  ;;  %7936 = vmatpush3.bf16.msra.mxu0 %v11413_v1 }
0x1a0c   :  { %4762 = vmatprep.subr.bf16.mxu1 %v11570_v16  ;;  %7937 = vmatprep.subr.bf16.mxu0 %v12212_v27 }
0x1a0f   :  { %4763 = vmatpush1.bf16.msra.mxu1 %v11574_v43  ;;  %7938 = vmatpush3.bf16.msra.mxu0 %v11419_v28 }
0x1a10   :  { %4764 = vmatprep.subr.bf16.mxu1 %v11578_v4  ;;  %7939 = vmatprep.subr.bf16.mxu0 %v12212_v27 }
0x1a13   :  { %4765 = vmatpush1.bf16.msra.mxu1 %v11582_v62  ;;  %7940 = vmatpush3.bf16.msra.mxu0 %v11425_v47 }
0x1a14   :  { %4766 = vmatprep.subr.bf16.mxu1 %v11586_v23  ;;  %7941 = vmatprep.subr.bf16.mxu0 %v12212_v27 }
0x1a17   :  { %4767 = vmatpush1.bf16.msra.mxu1 %v11590_v3  ;;  %7942 = vmatpush3.bf16.msra.mxu0 %v11431_v41 }
0x1a18   :  { %4768 = vmatprep.subr.bf16.mxu1 %v11594_v59  ;;  %7943 = vmatprep.subr.bf16.mxu0 %v12212_v27 }
0x1a1b   :  { %4769 = vmatpush1.bf16.msra.mxu1 %v11598_v30  ;;  %7944 = vmatpush3.bf16.msra.mxu0 %v11437_v57 }
0x1a1c   :  { %4770 = vmatprep.subr.bf16.mxu1 %v11602_v5  ;;  %7945 = vmatprep.subr.bf16.mxu0 %v12212_v27 }
0x1a1f   :  { %4771 = vmatpush1.bf16.msra.mxu1 %v11606_v31  ;;  %7946 = vmatpush3.bf16.msra.mxu0 %v11443_v39 }
0x1a20   :  { %4865 = vmatprep.subr.bf16.mxu1 %v11446_v32  ;;  %7951 = vmatprep.subr.bf16.mxu0 %v12212_v27 }
0x1ad5   :  { %v4681_v18 = vpop.f32.mrb[152].mxu1  ;;  %v4722_v9 = vpop.f32.mrb[168].mxu0 }
0x1ad6   :  { %v4728_v36 = vadd.f32 %v4681_v18, %v11138_v12  ;;  %v4683_v40 = vpop.f32.mrb[153].mxu1  ;;  %v7929_v42 = vpop.f32.mrb[169].mxu0  ;;  %v4742_v8 = vadd.f32 %v11299_v61, %v4722_v9 }
0x1ad7   :  { %v4735_v7 = vadd.f32 %v4683_v40, %v11142_v26  ;;  %v4685_v63 = vpop.f32.mrb[154].mxu1  ;;  %v4725_v25 = vpop.f32.mrb[170].mxu0 }
0x1ad8   :  { %v6808_v60 = vmul.f32 -1.442695, %v4728_v36  ;;  %v4686_v48 = vpop.f32.mrb[155].mxu1  ;;  %v7930_v54 = vpop.f32.mrb[171].mxu0 }
0x1ad9   :  { %v6809_v11 = vmul.f32 -1.442695, %v4735_v7 }
0x1ada   :  { %8713 = vpow2.f32 %v6808_v60 }
0x1adb   :  { %8715 = vpow2.f32 %v6809_v11 }
0x1ae4   :  { %v8714_v29 = vpop.eup %8713 }
0x1ae5   :  { %v4732_v33 = vadd.f32 1.0, %v8714_v29  ;;  %v8716_v13 = vpop.eup %8715  ;;  %v12276_v29 = vld [vmem:[#allocation59_spill] sm:$0xff] }
0x1ae6   :  { %v4739_v10 = vadd.f32 1.0, %v8716_v13 }
0x1ae7   :  { %8717 = vrcp.f32 %v4732_v33 }
0x1ae8   :  { %8719 = vrcp.f32 %v4739_v10 }
0x1af1   :  { %v8718_v12 = vpop.eup %8717 }
0x1af2   :  { %v4743_v50 = vmul.f32 %v8718_v12, %v4742_v8  ;;  %v8720_v55 = vpop.eup %8719 }
0x1af3   :  { %v4746_v17 = vsub.f32 1.0, %v8720_v55  ;;  %v4748_v53 = vmul.f32 %v8720_v55, %v11549_v20 }
0x1af4   :  { %v4744_v26 = vadd.f32 %v4743_v50, %v12273_v34 }
0x1af6   :  { %8721 = vtanh.f32 %v4744_v26 }
0x1b00   :  { %v8722_v52 = vpop.eup %8721 }
0x1b01   :  { %v4747_v6 = vmul.f32 %v8722_v52, %v4746_v17  ;;  %v12277_v17 = vld [vmem:[#allocation60_spill] sm:$0xff] }
0x1b03   :  { %v11617_v49 = vadd.f32 %v4748_v53, %v4747_v6 }
0x1b05   :  { %v4750_v19 = vpack.c.bf16 %v11617_v49, %v11617_v49 }
0x1b07   :  { %4752 = vst [vmem:[#allocation4 + $0x18] sm:$0xf] %v4750_v19  ;;  %4789 = vmatmul.mubr.bf16.vlgmr.msra.gmra.mrb[156].mxu1 %v4750_v19  ;;  %7948 = vmatmul.mubr.bf16.vlgmr.msra.gmra.mrb[172].mxu0 %v4750_v19 }
0x1b08   :  { %4866 = vmatpush1.bf16.msra.mxu1 %v11503_v37  ;;  %7952 = vmatpush3.bf16.msra.mxu0 %v11398_v2 }
0x1b09   :  { %4867 = vmatprep.subr.bf16.mxu1 %v11507_v46  ;;  %7953 = vmatprep.subr.bf16.mxu0 %v12212_v27 }
0x1b0a   :  { %4897 = vmatprep.mubr.bf16.mxu1 %v12213_v38  ;;  %7967 = vmatprep.mubr.msk.bf16.mxu0 %vm9529_vm0, %v12212_v27 }
0x1b0c   :  { %4868 = vmatpush1.bf16.msra.mxu1 %v11514_v44  ;;  %7954 = vmatpush3.bf16.msra.mxu0 %v11407_v45 }
0x1b0d   :  { %4869 = vmatprep.subr.bf16.mxu1 %v11562_v24  ;;  %7955 = vmatprep.subr.bf16.mxu0 %v12212_v27 }
0x1b10   :  { %4870 = vmatpush1.bf16.msra.mxu1 %v11566_v56  ;;  %7956 = vmatpush3.bf16.msra.mxu0 %v11413_v1 }
0x1b11   :  { %4871 = vmatprep.subr.bf16.mxu1 %v11570_v16  ;;  %7957 = vmatprep.subr.bf16.mxu0 %v12212_v27 }
0x1b14   :  { %4872 = vmatpush1.bf16.msra.mxu1 %v11574_v43  ;;  %7958 = vmatpush3.bf16.msra.mxu0 %v11419_v28 }
0x1b15   :  { %4873 = vmatprep.subr.bf16.mxu1 %v11578_v4  ;;  %7959 = vmatprep.subr.bf16.mxu0 %v12212_v27 }
0x1b18   :  { %4874 = vmatpush1.bf16.msra.mxu1 %v11582_v62  ;;  %7960 = vmatpush3.bf16.msra.mxu0 %v11425_v47 }
0x1b19   :  { %4875 = vmatprep.subr.bf16.mxu1 %v11586_v23  ;;  %7961 = vmatprep.subr.bf16.mxu0 %v12212_v27 }
0x1b1c   :  { %4876 = vmatpush1.bf16.msra.mxu1 %v11590_v3  ;;  %7962 = vmatpush3.bf16.msra.mxu0 %v11431_v41 }
0x1b1d   :  { %4877 = vmatprep.subr.bf16.mxu1 %v11594_v59  ;;  %7963 = vmatprep.subr.bf16.mxu0 %v12212_v27 }
0x1b20   :  { %4878 = vmatpush1.bf16.msra.mxu1 %v11598_v30  ;;  %7964 = vmatpush3.bf16.msra.mxu0 %v11437_v57 }
0x1b21   :  { %4879 = vmatprep.subr.bf16.mxu1 %v11602_v5  ;;  %7965 = vmatprep.subr.bf16.mxu0 %v12212_v27 }
0x1b24   :  { %4880 = vmatpush1.bf16.msra.mxu1 %v11606_v31  ;;  %7966 = vmatpush3.bf16.msra.mxu0 %v11443_v39 }
0x1b25   :  { %4974 = vmatprep.subr.bf16.mxu1 %v11446_v32  ;;  %7971 = vmatprep.subr.bf16.mxu0 %v12212_v27 }
0x1bda   :  { %v4790_v15 = vpop.f32.mrb[156].mxu1  ;;  %v4831_v22 = vpop.f32.mrb[172].mxu0 }
0x1bdb   :  { %v4837_v0 = vadd.f32 %v4790_v15, %v12274_v21  ;;  %v4792_v51 = vpop.f32.mrb[157].mxu1  ;;  %v7949_v58 = vpop.f32.mrb[173].mxu0  ;;  %v4851_v48 = vadd.f32 %v11299_v61, %v4831_v22 }
0x1bdc   :  { %v4844_v20 = vadd.f32 %v4792_v51, %v12275_v35  ;;  %v4794_v14 = vpop.f32.mrb[158].mxu1  ;;  %v4834_v18 = vpop.f32.mrb[174].mxu0 }
0x1bdd   :  { %v6810_v9 = vmul.f32 -1.442695, %v4837_v0  ;;  %v4795_v36 = vpop.f32.mrb[159].mxu1  ;;  %v7950_v40 = vpop.f32.mrb[175].mxu0 }
0x1bde   :  { %v6811_v42 = vmul.f32 -1.442695, %v4844_v20 }
0x1bdf   :  { %8723 = vpow2.f32 %v6810_v9  ;;  %v11702_v9 = vld [vmem:[#allocation24] ss:$0 sm:$0xff] }
0x1be0   :  { %8725 = vpow2.f32 %v6811_v42 }
0x1be9   :  { %v8724_v7 = vpop.eup %8723 }
0x1bea   :  { %v4841_v63 = vadd.f32 1.0, %v8724_v7  ;;  %v8726_v25 = vpop.eup %8725  ;;  %v12279_v7 = vld [vmem:[#allocation73_spill] sm:$0xff] }
0x1beb   :  { %v4848_v60 = vadd.f32 1.0, %v8726_v25 }
0x1bec   :  { %8727 = vrcp.f32 %v4841_v63 }
0x1bed   :  { %8729 = vrcp.f32 %v4848_v60 }
0x1bf6   :  { %v8728_v54 = vpop.eup %8727 }
0x1bf7   :  { %v4852_v11 = vmul.f32 %v8728_v54, %v4851_v48  ;;  %v8730_v13 = vpop.eup %8729 }
0x1bf8   :  { %v4855_v10 = vsub.f32 1.0, %v8730_v13  ;;  %v4857_v50 = vmul.f32 %v8730_v13, %v11617_v49  ;;  %v12278_v49 = vld [vmem:[#allocation61_spill] sm:$0xff] }
0x1bf9   :  { %v4853_v33 = vadd.f32 %v4852_v11, %v12276_v29 }
0x1bfb   :  { %8731 = vtanh.f32 %v4853_v33 }
0x1c05   :  { %v8732_v8 = vpop.eup %8731 }
0x1c06   :  { %v4856_v12 = vmul.f32 %v8732_v8, %v4855_v10  ;;  %v12280_v8 = vld [vmem:[#allocation52_spill] sm:$0xff] }
0x1c08   :  { %v11661_v34 = vadd.f32 %v4857_v50, %v4856_v12 }
0x1c0a   :  { %v4859_v26 = vpack.c.bf16 %v11661_v34, %v11661_v34 }
0x1c0c   :  { %4861 = vst [vmem:[#allocation4 + $0x1c] sm:$0xf] %v4859_v26  ;;  %4898 = vmatmul.mubr.bf16.vlgmr.msra.gmra.mrb[160].mxu1 %v4859_v26  ;;  %7968 = vmatmul.mubr.bf16.vlgmr.msra.gmra.mrb[176].mxu0 %v4859_v26  ;;  %v12281_v26 = vld [vmem:[#allocation62_spill] sm:$0xff] }
0x1c0d   :  { %4975 = vmatpush1.bf16.msra.mxu1 %v11503_v37  ;;  %7972 = vmatpush3.bf16.msra.mxu0 %v11398_v2 }
0x1c0e   :  { %4976 = vmatprep.subr.bf16.mxu1 %v11507_v46  ;;  %7973 = vmatprep.subr.bf16.mxu0 %v12212_v27 }
0x1c0f   :  { %5006 = vmatprep.mubr.bf16.mxu1 %v12213_v38  ;;  %7987 = vmatprep.mubr.msk.bf16.mxu0 %vm9529_vm0, %v12212_v27 }
0x1c11   :  { %4977 = vmatpush1.bf16.msra.mxu1 %v11514_v44  ;;  %7974 = vmatpush3.bf16.msra.mxu0 %v11407_v45 }
0x1c12   :  { %4978 = vmatprep.subr.bf16.mxu1 %v11562_v24  ;;  %7975 = vmatprep.subr.bf16.mxu0 %v12212_v27 }
0x1c15   :  { %4979 = vmatpush1.bf16.msra.mxu1 %v11566_v56  ;;  %7976 = vmatpush3.bf16.msra.mxu0 %v11413_v1 }
0x1c16   :  { %4980 = vmatprep.subr.bf16.mxu1 %v11570_v16  ;;  %7977 = vmatprep.subr.bf16.mxu0 %v12212_v27 }
0x1c19   :  { %4981 = vmatpush1.bf16.msra.mxu1 %v11574_v43  ;;  %7978 = vmatpush3.bf16.msra.mxu0 %v11419_v28 }
0x1c1a   :  { %4982 = vmatprep.subr.bf16.mxu1 %v11578_v4  ;;  %7979 = vmatprep.subr.bf16.mxu0 %v12212_v27 }
0x1c1d   :  { %4983 = vmatpush1.bf16.msra.mxu1 %v11582_v62  ;;  %7980 = vmatpush3.bf16.msra.mxu0 %v11425_v47 }
0x1c1e   :  { %4984 = vmatprep.subr.bf16.mxu1 %v11586_v23  ;;  %7981 = vmatprep.subr.bf16.mxu0 %v12212_v27 }
0x1c21   :  { %4985 = vmatpush1.bf16.msra.mxu1 %v11590_v3  ;;  %7982 = vmatpush3.bf16.msra.mxu0 %v11431_v41 }
0x1c22   :  { %4986 = vmatprep.subr.bf16.mxu1 %v11594_v59  ;;  %7983 = vmatprep.subr.bf16.mxu0 %v12212_v27 }
0x1c25   :  { %4987 = vmatpush1.bf16.msra.mxu1 %v11598_v30  ;;  %7984 = vmatpush3.bf16.msra.mxu0 %v11437_v57 }
0x1c26   :  { %4988 = vmatprep.subr.bf16.mxu1 %v11602_v5  ;;  %7985 = vmatprep.subr.bf16.mxu0 %v12212_v27 }
0x1c29   :  { %4989 = vmatpush1.bf16.msra.mxu1 %v11606_v31  ;;  %7986 = vmatpush3.bf16.msra.mxu0 %v11443_v39 }
0x1c2a   :  { %5083 = vmatprep.subr.bf16.mxu1 %v11446_v32  ;;  %7991 = vmatprep.subr.bf16.mxu0 %v12212_v27 }
0x1cdf   :  { %v4899_v61 = vpop.f32.mrb[160].mxu1  ;;  %v4940_v55 = vpop.f32.mrb[176].mxu0 }
0x1ce0   :  { %v4946_v52 = vadd.f32 %v4899_v61, %v12277_v17  ;;  %v4901_v6 = vpop.f32.mrb[161].mxu1  ;;  %v7969_v53 = vpop.f32.mrb[177].mxu0  ;;  %v4960_v36 = vadd.f32 %v11702_v9, %v4940_v55 }
0x1ce1   :  { %v4953_v19 = vadd.f32 %v4901_v6, %v12278_v49  ;;  %v4903_v15 = vpop.f32.mrb[162].mxu1  ;;  %v4943_v22 = vpop.f32.mrb[178].mxu0 }
0x1ce2   :  { %v6812_v21 = vmul.f32 -1.442695, %v4946_v52  ;;  %v4904_v0 = vpop.f32.mrb[163].mxu1  ;;  %v7970_v51 = vpop.f32.mrb[179].mxu0 }
0x1ce3   :  { %v6813_v58 = vmul.f32 -1.442695, %v4953_v19 }
0x1ce4   :  { %8733 = vpow2.f32 %v6812_v21 }
0x1ce5   :  { %8735 = vpow2.f32 %v6813_v58 }
0x1cee   :  { %v8734_v35 = vpop.eup %8733 }
0x1cef   :  { %v4950_v20 = vadd.f32 1.0, %v8734_v35  ;;  %v8736_v14 = vpop.eup %8735  ;;  %v12282_v35 = vld [vmem:[#allocation74_spill] sm:$0xff] }
0x1cf0   :  { %v4957_v18 = vadd.f32 1.0, %v8736_v14 }
0x1cf1   :  { %8737 = vrcp.f32 %v4950_v20 }
0x1cf2   :  { %8739 = vrcp.f32 %v4957_v18 }
0x1cfb   :  { %v8738_v40 = vpop.eup %8737 }
0x1cfc   :  { %v4961_v42 = vmul.f32 %v8738_v40, %v4960_v36  ;;  %v8740_v25 = vpop.eup %8739 }
0x1cfd   :  { %v4964_v60 = vsub.f32 1.0, %v8740_v25  ;;  %v4966_v11 = vmul.f32 %v8740_v25, %v11661_v34  ;;  %v12284_v25 = vld [vmem:[#allocation54_spill] sm:$0xff] }
0x1cfe   :  { %v4962_v63 = vadd.f32 %v4961_v42, %v12279_v7 }
0x1d00   :  { %8741 = vtanh.f32 %v4962_v63 }
0x1d0a   :  { %v8742_v48 = vpop.eup %8741 }
0x1d0b   :  { %v4965_v54 = vmul.f32 %v8742_v48, %v4964_v60 }
0x1d0d   :  { %v11707_v29 = vadd.f32 %v4966_v11, %v4965_v54 }
0x1d0f   :  { %v4968_v33 = vpack.c.bf16 %v11707_v29, %v11707_v29 }
0x1d11   :  { %4970 = vst [vmem:[#allocation4 + $0x20] sm:$0xf] %v4968_v33  ;;  %5007 = vmatmul.mubr.bf16.vlgmr.msra.gmra.mrb[164].mxu1 %v4968_v33  ;;  %7988 = vmatmul.mubr.bf16.vlgmr.msra.gmra.mrb[180].mxu0 %v4968_v33 }
0x1d12   :  { %5084 = vmatpush1.bf16.msra.mxu1 %v11503_v37  ;;  %7992 = vmatpush3.bf16.msra.mxu0 %v11398_v2 }
0x1d13   :  { %5085 = vmatprep.subr.bf16.mxu1 %v11507_v46  ;;  %7993 = vmatprep.subr.bf16.mxu0 %v12212_v27 }
0x1d14   :  { %5115 = vmatprep.mubr.bf16.mxu1 %v12213_v38  ;;  %8007 = vmatprep.mubr.msk.bf16.mxu0 %vm9529_vm0, %v12212_v27 }
0x1d16   :  { %5086 = vmatpush1.bf16.msra.mxu1 %v11514_v44  ;;  %7994 = vmatpush3.bf16.msra.mxu0 %v11407_v45 }
0x1d17   :  { %5087 = vmatprep.subr.bf16.mxu1 %v11562_v24  ;;  %7995 = vmatprep.subr.bf16.mxu0 %v12212_v27 }
0x1d1a   :  { %5088 = vmatpush1.bf16.msra.mxu1 %v11566_v56  ;;  %7996 = vmatpush3.bf16.msra.mxu0 %v11413_v1 }
0x1d1b   :  { %5089 = vmatprep.subr.bf16.mxu1 %v11570_v16  ;;  %7997 = vmatprep.subr.bf16.mxu0 %v12212_v27 }
0x1d1e   :  { %5090 = vmatpush1.bf16.msra.mxu1 %v11574_v43  ;;  %7998 = vmatpush3.bf16.msra.mxu0 %v11419_v28 }
0x1d1f   :  { %5091 = vmatprep.subr.bf16.mxu1 %v11578_v4  ;;  %7999 = vmatprep.subr.bf16.mxu0 %v12212_v27 }
0x1d22   :  { %5092 = vmatpush1.bf16.msra.mxu1 %v11582_v62  ;;  %8000 = vmatpush3.bf16.msra.mxu0 %v11425_v47 }
0x1d23   :  { %5093 = vmatprep.subr.bf16.mxu1 %v11586_v23  ;;  %8001 = vmatprep.subr.bf16.mxu0 %v12212_v27 }
0x1d26   :  { %5094 = vmatpush1.bf16.msra.mxu1 %v11590_v3  ;;  %8002 = vmatpush3.bf16.msra.mxu0 %v11431_v41 }
0x1d27   :  { %5095 = vmatprep.subr.bf16.mxu1 %v11594_v59  ;;  %8003 = vmatprep.subr.bf16.mxu0 %v12212_v27 }
0x1d2a   :  { %5096 = vmatpush1.bf16.msra.mxu1 %v11598_v30  ;;  %8004 = vmatpush3.bf16.msra.mxu0 %v11437_v57 }
0x1d2b   :  { %5097 = vmatprep.subr.bf16.mxu1 %v11602_v5  ;;  %8005 = vmatprep.subr.bf16.mxu0 %v12212_v27 }
0x1d2e   :  { %5098 = vmatpush1.bf16.msra.mxu1 %v11606_v31  ;;  %8006 = vmatpush3.bf16.msra.mxu0 %v11443_v39 }
0x1d2f   :  { %5192 = vmatprep.subr.bf16.mxu1 %v11446_v32  ;;  %8011 = vmatprep.subr.bf16.mxu0 %v12212_v27 }
0x1de4   :  { %v5008_v13 = vpop.f32.mrb[164].mxu1  ;;  %v5049_v10 = vpop.f32.mrb[180].mxu0 }
0x1de5   :  { %v5055_v12 = vadd.f32 %v5008_v13, %v12280_v8  ;;  %v5010_v50 = vpop.f32.mrb[165].mxu1  ;;  %v7989_v34 = vpop.f32.mrb[181].mxu0  ;;  %v5069_v0 = vadd.f32 %v11702_v9, %v5049_v10 }
0x1de6   :  { %v5062_v61 = vadd.f32 %v5010_v50, %v12281_v26  ;;  %v5012_v55 = vpop.f32.mrb[166].mxu1  ;;  %v5052_v17 = vpop.f32.mrb[182].mxu0  ;;  %v12285_v34 = vld [vmem:[#allocation72_spill] sm:$0xff] }
0x1de7   :  { %v6814_v52 = vmul.f32 -1.442695, %v5055_v12  ;;  %v5013_v6 = vpop.f32.mrb[167].mxu1  ;;  %v7990_v53 = vpop.f32.mrb[183].mxu0 }
0x1de8   :  { %v6815_v49 = vmul.f32 -1.442695, %v5062_v61 }
0x1de9   :  { %8743 = vpow2.f32 %v6814_v52 }
0x1dea   :  { %8745 = vpow2.f32 %v6815_v49 }
0x1df3   :  { %v8744_v19 = vpop.eup %8743 }
0x1df4   :  { %v5059_v15 = vadd.f32 1.0, %v8744_v19  ;;  %v8746_v22 = vpop.eup %8745  ;;  %v11800_v19 = vld [vmem:[#allocation21 + $0x8] ss:$12 sps:$4 sm:$0xff]  }
0x1df5   :  { %v5066_v21 = vadd.f32 1.0, %v8746_v22  ;;  %v11815_v22 = vld [vmem:[#allocation21 + $0x38] ss:$12 sps:$4 sm:$0xff]  }
0x1df6   :  { %8747 = vrcp.f32 %v5059_v15  ;;  %v11809_v15 = vld [vmem:[#allocation21 + $0x20] ss:$12 sps:$4 sm:$0xff]  }
0x1df7   :  { %8749 = vrcp.f32 %v5066_v21  ;;  %v11821_v21 = vld [vmem:[#allocation21 + $0x50] ss:$12 sps:$4 sm:$0xff]  }
0x1e00   :  { %v8748_v51 = vpop.eup %8747 }
0x1e01   :  { %v5070_v58 = vmul.f32 %v8748_v51, %v5069_v0  ;;  %v8750_v14 = vpop.eup %8749  ;;  %v11827_v0 = vld [vmem:[#allocation21 + $0x68] ss:$12 sps:$4 sm:$0xff]   ;;  %v11833_v51 = vld [vmem:[#allocation21 + $0x80] ss:$12 sps:$4 sm:$0xff]  }
0x1e02   :  { %v5073_v18 = vsub.f32 1.0, %v8750_v14  ;;  %v5075_v42 = vmul.f32 %v8750_v14, %v11707_v29 }
0x1e03   :  { %v5071_v20 = vadd.f32 %v5070_v58, %v12282_v35  ;;  %v11839_v58 = vld [vmem:[#allocation21 + $0x98] ss:$12 sps:$4 sm:$0xff]   ;;  %v11845_v35 = vld [vmem:[#allocation21 + $0xb0] ss:$12 sps:$4 sm:$0xff]  }
0x1e05   :  { %8751 = vtanh.f32 %v5071_v20  ;;  %v11848_v20 = vld [vmem:[#allocation21 + $0x4] ss:$12 sps:$4 sm:$0xff]  }
0x1e0f   :  { %v8752_v36 = vpop.eup %8751 }
0x1e10   :  { %v5074_v40 = vmul.f32 %v8752_v36, %v5073_v18  ;;  %v12286_v36 = vld [vmem:[#allocation64_spill] sm:$0xff] }
0x1e12   :  { %v11751_v7 = vadd.f32 %v5075_v42, %v5074_v40 }
0x1e14   :  { %v5077_v63 = vpack.c.bf16 %v11751_v7, %v11751_v7 }
0x1e16   :  { %5079 = vst [vmem:[#allocation4 + $0x24] sm:$0xf] %v5077_v63  ;;  %5116 = vmatmul.mubr.bf16.vlgmr.msra.gmra.mrb[168].mxu1 %v5077_v63  ;;  %8008 = vmatmul.mubr.bf16.vlgmr.msra.gmra.mrb[184].mxu0 %v5077_v63  ;;  %v12287_v63 = vld [vmem:[#allocation65_spill] sm:$0xff] }
0x1e17   :  { %5193 = vmatpush1.bf16.msra.mxu1 %v11503_v37  ;;  %8012 = vmatpush3.bf16.msra.mxu0 %v11398_v2 }
0x1e18   :  { %5194 = vmatprep.subr.bf16.mxu1 %v11507_v46  ;;  %8013 = vmatprep.subr.bf16.mxu0 %v12212_v27 }
0x1e19   :  { %5224 = vmatprep.mubr.bf16.mxu1 %v12213_v38  ;;  %8027 = vmatprep.mubr.msk.bf16.mxu0 %vm9529_vm0, %v12212_v27 }
0x1e1b   :  { %5195 = vmatpush1.bf16.msra.mxu1 %v11514_v44  ;;  %8014 = vmatpush3.bf16.msra.mxu0 %v11407_v45 }
0x1e1c   :  { %5196 = vmatprep.subr.bf16.mxu1 %v11562_v24  ;;  %8015 = vmatprep.subr.bf16.mxu0 %v12212_v27 }
0x1e1f   :  { %5197 = vmatpush1.bf16.msra.mxu1 %v11566_v56  ;;  %8016 = vmatpush3.bf16.msra.mxu0 %v11413_v1  ;;  %v12283_v1 = vld [vmem:[#allocation63_spill] sm:$0xff] }
0x1e20   :  { %5198 = vmatprep.subr.bf16.mxu1 %v11570_v16  ;;  %8017 = vmatprep.subr.bf16.mxu0 %v12212_v27 }
0x1e23   :  { %5199 = vmatpush1.bf16.msra.mxu1 %v11574_v43  ;;  %8018 = vmatpush3.bf16.msra.mxu0 %v11419_v28 }
0x1e24   :  { %5200 = vmatprep.subr.bf16.mxu1 %v11578_v4  ;;  %8019 = vmatprep.subr.bf16.mxu0 %v12212_v27 }
0x1e27   :  { %5201 = vmatpush1.bf16.msra.mxu1 %v11582_v62  ;;  %8020 = vmatpush3.bf16.msra.mxu0 %v11425_v47 }
0x1e28   :  { %5202 = vmatprep.subr.bf16.mxu1 %v11586_v23  ;;  %8021 = vmatprep.subr.bf16.mxu0 %v12212_v27 }
0x1e2b   :  { %5203 = vmatpush1.bf16.msra.mxu1 %v11590_v3  ;;  %8022 = vmatpush3.bf16.msra.mxu0 %v11431_v41 }
0x1e2c   :  { %5204 = vmatprep.subr.bf16.mxu1 %v11594_v59  ;;  %8023 = vmatprep.subr.bf16.mxu0 %v12212_v27 }
0x1e2f   :  { %5205 = vmatpush1.bf16.msra.mxu1 %v11598_v30  ;;  %8024 = vmatpush3.bf16.msra.mxu0 %v11437_v57 }
0x1e30   :  { %5206 = vmatprep.subr.bf16.mxu1 %v11602_v5  ;;  %8025 = vmatprep.subr.bf16.mxu0 %v12212_v27 }
0x1e33   :  { %5207 = vmatpush1.bf16.msra.mxu1 %v11606_v31  ;;  %8026 = vmatpush3.bf16.msra.mxu0 %v11443_v39 }
0x1e34   :  { %5301 = vmatprep.subr.bf16.mxu1 %v11446_v32  ;;  %8031 = vmatprep.subr.bf16.mxu0 %v12212_v27 }
0x1ee9   :  { %v5117_v2 = vpop.f32.mrb[168].mxu1  ;;  %v5158_v45 = vpop.f32.mrb[184].mxu0 }
0x1eea   :  { %v5164_v28 = vadd.f32 %v5117_v2, %v12283_v1  ;;  %v5119_v47 = vpop.f32.mrb[169].mxu1  ;;  %v8009_v41 = vpop.f32.mrb[185].mxu0  ;;  %v5178_v8 = vadd.f32 %v11702_v9, %v5158_v45 }
0x1eeb   :  { %v5171_v57 = vadd.f32 %v5119_v47, %v12284_v25  ;;  %v5121_v60 = vpop.f32.mrb[170].mxu1  ;;  %v5161_v48 = vpop.f32.mrb[186].mxu0 }
0x1eec   :  { %v6816_v54 = vmul.f32 -1.442695, %v5164_v28  ;;  %v5122_v11 = vpop.f32.mrb[171].mxu1  ;;  %v8010_v29 = vpop.f32.mrb[187].mxu0 }
0x1eed   :  { %v6817_v33 = vmul.f32 -1.442695, %v5171_v57 }
0x1eee   :  { %8753 = vpow2.f32 %v6816_v54 }
0x1eef   :  { %8755 = vpow2.f32 %v6817_v33 }
0x1ef8   :  { %v8754_v39 = vpop.eup %8753 }
0x1ef9   :  { %v5168_v32 = vadd.f32 1.0, %v8754_v39  ;;  %v8756_v13 = vpop.eup %8755  ;;  %v12288_v39 = vld [vmem:[#allocation55_spill] sm:$0xff] }
0x1efa   :  { %v5175_v10 = vadd.f32 1.0, %v8756_v13 }
0x1efb   :  { %8757 = vrcp.f32 %v5168_v32 }
0x1efc   :  { %8759 = vrcp.f32 %v5175_v10 }
0x1f05   :  { %v8758_v12 = vpop.eup %8757 }
0x1f06   :  { %v5179_v50 = vmul.f32 %v8758_v12, %v5178_v8  ;;  %v8760_v61 = vpop.eup %8759 }
0x1f07   :  { %v5182_v55 = vsub.f32 1.0, %v8760_v61  ;;  %v5184_v6 = vmul.f32 %v8760_v61, %v11751_v7 }
0x1f08   :  { %v5180_v26 = vadd.f32 %v5179_v50, %v12285_v34 }
0x1f0a   :  { %8761 = vtanh.f32 %v5180_v26 }
0x1f14   :  { %v8762_v17 = vpop.eup %8761 }
0x1f15   :  { %v5183_v52 = vmul.f32 %v8762_v17, %v5182_v55 }
0x1f17   :  { %v11795_v53 = vadd.f32 %v5184_v6, %v5183_v52  ;;  %v12290_v52 = vld [vmem:[#allocation66_spill] sm:$0xff] }
0x1f19   :  { %v5186_v49 = vpack.c.bf16 %v11795_v53, %v11795_v53 }
0x1f1b   :  { %5188 = vst [vmem:[#allocation4 + $0x28] sm:$0xf] %v5186_v49  ;;  %5225 = vmatmul.mubr.bf16.vlgmr.msra.gmra.mrb[172].mxu1 %v5186_v49  ;;  %8028 = vmatmul.mubr.bf16.vlgmr.msra.gmra.mrb[188].mxu0 %v5186_v49 }
0x1f1c   :  { %5302 = vmatpush1.bf16.msra.mxu1 %v11503_v37  ;;  %8032 = vmatpush3.bf16.msra.mxu0 %v11800_v19 }
0x1f1d   :  { %5303 = vmatprep.subr.bf16.mxu1 %v11507_v46  ;;  %8033 = vmatprep.subr.bf16.mxu0 %v12212_v27 }
0x1f1e   :  { %5333 = vmatprep.mubr.bf16.mxu1 %v12213_v38  ;;  %8047 = vmatprep.mubr.msk.bf16.mxu0 %vm9529_vm0, %v12212_v27 }
0x1f20   :  { %5304 = vmatpush1.bf16.msra.mxu1 %v11514_v44  ;;  %8034 = vmatpush3.bf16.msra.mxu0 %v11809_v15 }
0x1f21   :  { %5305 = vmatprep.subr.bf16.mxu1 %v11562_v24  ;;  %8035 = vmatprep.subr.bf16.mxu0 %v12212_v27 }
0x1f24   :  { %5306 = vmatpush1.bf16.msra.mxu1 %v11566_v56  ;;  %8036 = vmatpush3.bf16.msra.mxu0 %v11815_v22 }
0x1f25   :  { %5307 = vmatprep.subr.bf16.mxu1 %v11570_v16  ;;  %8037 = vmatprep.subr.bf16.mxu0 %v12212_v27 }
0x1f28   :  { %5308 = vmatpush1.bf16.msra.mxu1 %v11574_v43  ;;  %8038 = vmatpush3.bf16.msra.mxu0 %v11821_v21 }
0x1f29   :  { %5309 = vmatprep.subr.bf16.mxu1 %v11578_v4  ;;  %8039 = vmatprep.subr.bf16.mxu0 %v12212_v27 }
0x1f2c   :  { %5310 = vmatpush1.bf16.msra.mxu1 %v11582_v62  ;;  %8040 = vmatpush3.bf16.msra.mxu0 %v11827_v0 }
0x1f2d   :  { %5311 = vmatprep.subr.bf16.mxu1 %v11586_v23  ;;  %8041 = vmatprep.subr.bf16.mxu0 %v12212_v27 }
0x1f30   :  { %5312 = vmatpush1.bf16.msra.mxu1 %v11590_v3  ;;  %8042 = vmatpush3.bf16.msra.mxu0 %v11833_v51 }
0x1f31   :  { %5313 = vmatprep.subr.bf16.mxu1 %v11594_v59  ;;  %8043 = vmatprep.subr.bf16.mxu0 %v12212_v27 }
0x1f34   :  { %5314 = vmatpush1.bf16.msra.mxu1 %v11598_v30  ;;  %8044 = vmatpush3.bf16.msra.mxu0 %v11839_v58 }
0x1f35   :  { %5315 = vmatprep.subr.bf16.mxu1 %v11602_v5  ;;  %8045 = vmatprep.subr.bf16.mxu0 %v12212_v27 }
0x1f38   :  { %5316 = vmatpush1.bf16.msra.mxu1 %v11606_v31  ;;  %8046 = vmatpush3.bf16.msra.mxu0 %v11845_v35 }
0x1f39   :  { %5410 = vmatprep.subr.bf16.mxu1 %v11848_v20  ;;  %8051 = vmatprep.subr.bf16.mxu0 %v12212_v27 }
0x1fee   :  { %v5226_v14 = vpop.f32.mrb[172].mxu1  ;;  %v5267_v18 = vpop.f32.mrb[188].mxu0 }
0x1fef   :  { %v5273_v40 = vadd.f32 %v5226_v14, %v12286_v36  ;;  %v5228_v42 = vpop.f32.mrb[173].mxu1  ;;  %v8029_v7 = vpop.f32.mrb[189].mxu0  ;;  %v5287_v11 = vadd.f32 %v11702_v9, %v5267_v18 }
0x1ff0   :  { %v5280_v2 = vadd.f32 %v5228_v42, %v12287_v63  ;;  %v5230_v45 = vpop.f32.mrb[174].mxu1  ;;  %v5270_v1 = vpop.f32.mrb[190].mxu0 }
0x1ff1   :  { %v6818_v28 = vmul.f32 -1.442695, %v5273_v40  ;;  %v5231_v47 = vpop.f32.mrb[175].mxu1  ;;  %v8030_v41 = vpop.f32.mrb[191].mxu0 }
0x1ff2   :  { %v6819_v25 = vmul.f32 -1.442695, %v5280_v2  ;;  %v12291_v47 = vld [vmem:[#allocation58_spill] sm:$0xff] }
0x1ff3   :  { %8763 = vpow2.f32 %v6818_v28 }
0x1ff4   :  { %8765 = vpow2.f32 %v6819_v25 }
0x1ffd   :  { %v8764_v57 = vpop.eup %8763 }
0x1ffe   :  { %v5277_v60 = vadd.f32 1.0, %v8764_v57  ;;  %v8766_v48 = vpop.eup %8765 }
0x1fff   :  { %v5284_v54 = vadd.f32 1.0, %v8766_v48 }
0x2000   :  { %8767 = vrcp.f32 %v5277_v60 }
0x2001   :  { %8769 = vrcp.f32 %v5284_v54 }
0x200a   :  { %v8768_v29 = vpop.eup %8767 }
0x200b   :  { %v5288_v33 = vmul.f32 %v8768_v29, %v5287_v11  ;;  %v8770_v13 = vpop.eup %8769 }
0x200c   :  { %v5291_v10 = vsub.f32 1.0, %v8770_v13  ;;  %v5293_v50 = vmul.f32 %v8770_v13, %v11795_v53 }
0x200d   :  { %v5289_v32 = vadd.f32 %v5288_v33, %v12288_v39  ;;  %v11905_v33 = vld [vmem:[#allocation21] ss:$12 sps:$4 sm:$0xff]   ;;  %v11909_v39 = vld [vmem:[#allocation21 + $0x1c] ss:$12 sps:$4 sm:$0xff]  }
0x200f   :  { %8771 = vtanh.f32 %v5289_v32  ;;  %v11916_v32 = vld [vmem:[#allocation21 + $0x18] ss:$12 sps:$4 sm:$0xff]  }
0x2019   :  { %v8772_v8 = vpop.eup %8771 }
0x201a   :  { %v5292_v12 = vmul.f32 %v8772_v8, %v5291_v10 }
0x201c   :  { %v11857_v34 = vadd.f32 %v5293_v50, %v5292_v12 }
0x201e   :  { %v5295_v26 = vpack.c.bf16 %v11857_v34, %v11857_v34 }
0x2020   :  { %5297 = vst [vmem:[#allocation4 + $0x2c] sm:$0xf] %v5295_v26  ;;  %5334 = vmatmul.mubr.bf16.vlgmr.msra.gmra.mrb[176].mxu1 %v5295_v26  ;;  %8048 = vmatmul.mubr.bf16.vlgmr.msra.gmra.mrb[192].mxu0 %v5295_v26 }
0x2021   :  { %5411 = vmatpush1.bf16.msra.mxu1 %v11503_v37  ;;  %8052 = vmatpush3.bf16.msra.mxu0 %v11800_v19 }
0x2022   :  { %5412 = vmatprep.subr.bf16.mxu1 %v11507_v46  ;;  %8053 = vmatprep.subr.bf16.mxu0 %v12212_v27 }
0x2023   :  { %5442 = vmatprep.mubr.bf16.mxu1 %v12213_v38  ;;  %8067 = vmatprep.mubr.msk.bf16.mxu0 %vm9529_vm0, %v12212_v27 }
0x2025   :  { %5413 = vmatpush1.bf16.msra.mxu1 %v11514_v44  ;;  %8054 = vmatpush3.bf16.msra.mxu0 %v11809_v15  ;;  %v12289_v44 = vld [vmem:[#allocation51_spill] sm:$0xff] }
0x2026   :  { %5414 = vmatprep.subr.bf16.mxu1 %v11562_v24  ;;  %8055 = vmatprep.subr.bf16.mxu0 %v12212_v27 }
0x2029   :  { %5415 = vmatpush1.bf16.msra.mxu1 %v11566_v56  ;;  %8056 = vmatpush3.bf16.msra.mxu0 %v11815_v22 }
0x202a   :  { %5416 = vmatprep.subr.bf16.mxu1 %v11570_v16  ;;  %8057 = vmatprep.subr.bf16.mxu0 %v12212_v27 }
0x202d   :  { %5417 = vmatpush1.bf16.msra.mxu1 %v11574_v43  ;;  %8058 = vmatpush3.bf16.msra.mxu0 %v11821_v21 }
0x202e   :  { %5418 = vmatprep.subr.bf16.mxu1 %v11578_v4  ;;  %8059 = vmatprep.subr.bf16.mxu0 %v12212_v27 }
0x2031   :  { %5419 = vmatpush1.bf16.msra.mxu1 %v11582_v62  ;;  %8060 = vmatpush3.bf16.msra.mxu0 %v11827_v0 }
0x2032   :  { %5420 = vmatprep.subr.bf16.mxu1 %v11586_v23  ;;  %8061 = vmatprep.subr.bf16.mxu0 %v12212_v27 }
0x2035   :  { %5421 = vmatpush1.bf16.msra.mxu1 %v11590_v3  ;;  %8062 = vmatpush3.bf16.msra.mxu0 %v11833_v51 }
0x2036   :  { %5422 = vmatprep.subr.bf16.mxu1 %v11594_v59  ;;  %8063 = vmatprep.subr.bf16.mxu0 %v12212_v27 }
0x2039   :  { %5423 = vmatpush1.bf16.msra.mxu1 %v11598_v30  ;;  %8064 = vmatpush3.bf16.msra.mxu0 %v11839_v58 }
0x203a   :  { %5424 = vmatprep.subr.bf16.mxu1 %v11602_v5  ;;  %8065 = vmatprep.subr.bf16.mxu0 %v12212_v27 }
0x203d   :  { %5425 = vmatpush1.bf16.msra.mxu1 %v11606_v31  ;;  %8066 = vmatpush3.bf16.msra.mxu0 %v11845_v35 }
0x203e   :  { %5519 = vmatprep.subr.bf16.mxu1 %v11848_v20  ;;  %8071 = vmatprep.subr.bf16.mxu0 %v12212_v27 }
0x20f3   :  { %v5335_v37 = vpop.f32.mrb[176].mxu1  ;;  %v5376_v46 = vpop.f32.mrb[192].mxu0 }
0x20f4   :  { %v5382_v61 = vadd.f32 %v5335_v37, %v12289_v44  ;;  %v5337_v55 = vpop.f32.mrb[177].mxu1  ;;  %v8049_v17 = vpop.f32.mrb[193].mxu0  ;;  %v5396_v45 = vadd.f32 %v11702_v9, %v5376_v46  ;;  %v12294_v46 = vld [vmem:[#allocation76_spill] sm:$0xff] }
0x20f5   :  { %v5389_v6 = vadd.f32 %v5337_v55, %v12290_v52  ;;  %v5339_v53 = vpop.f32.mrb[178].mxu1  ;;  %v5379_v49 = vpop.f32.mrb[194].mxu0 }
0x20f6   :  { %v6820_v14 = vmul.f32 -1.442695, %v5382_v61  ;;  %v5340_v18 = vpop.f32.mrb[179].mxu1  ;;  %v8050_v36 = vpop.f32.mrb[195].mxu0 }
0x20f7   :  { %v6821_v40 = vmul.f32 -1.442695, %v5389_v6  ;;  %v9029_v18 = vld [vmem:[#allocation21 + $0x30] ss:$12 sps:$4 sm:$0xff]  }
0x20f8   :  { %8773 = vpow2.f32 %v6820_v14  ;;  %v9028_v14 = vld [vmem:[#allocation21 + $0x34] ss:$12 sps:$4 sm:$0xff]   ;;  %v9032_v36 = vld [vmem:[#allocation21 + $0x64] ss:$12 sps:$4 sm:$0xff]  }
0x20f9   :  { %8775 = vpow2.f32 %v6821_v40  ;;  %v9034_v40 = vld [vmem:[#allocation21 + $0x7c] ss:$12 sps:$4 sm:$0xff]  }
0x2102   :  { %v8774_v42 = vpop.eup %8773 }
0x2103   :  { %v5386_v7 = vadd.f32 1.0, %v8774_v42  ;;  %v8776_v63 = vpop.eup %8775  ;;  %v9036_v42 = vld [vmem:[#allocation21 + $0x94] ss:$12 sps:$4 sm:$0xff]  }
0x2104   :  { %v5393_v2 = vadd.f32 1.0, %v8776_v63  ;;  %v8397_v63 = vld [vmem:[#allocation25] sm:$0xff]  }
0x2105   :  { %8777 = vrcp.f32 %v5386_v7  ;;  %v9038_v7 = vld [vmem:[#allocation21 + $0xac] ss:$12 sps:$4 sm:$0xff]  }
0x2106   :  { %8779 = vrcp.f32 %v5393_v2 }
0x210f   :  { %v8778_v1 = vpop.eup %8777 }
0x2110   :  { %v5397_v28 = vmul.f32 %v8778_v1, %v5396_v45  ;;  %v8780_v25 = vpop.eup %8779  ;;  %v12295_v45 = vld [vmem:[#allocation68_spill] sm:$0xff] }
0x2111   :  { %v5400_v57 = vsub.f32 1.0, %v8780_v25  ;;  %v5402_v54 = vmul.f32 %v8780_v25, %v11857_v34 }
0x2112   :  { %v5398_v41 = vadd.f32 %v5397_v28, %v12291_v47 }
0x2114   :  { %8781 = vtanh.f32 %v5398_v41  ;;  %v12296_v41 = vld [vmem:[#allocation69_spill] sm:$0xff] }
0x211e   :  { %v8782_v60 = vpop.eup %8781 }
0x211f   :  { %v5401_v48 = vmul.f32 %v8782_v60, %v5400_v57 }
0x2121   :  { %v11901_v11 = vadd.f32 %v5402_v54, %v5401_v48 }
0x2123   :  { %v5404_v29 = vpack.c.bf16 %v11901_v11, %v11901_v11 }
0x2125   :  { %5406 = vst [vmem:[#allocation4 + $0x30] sm:$0xf] %v5404_v29  ;;  %5443 = vmatmul.mubr.bf16.vlgmr.msra.gmra.mrb[180].mxu1 %v5404_v29  ;;  %8068 = vmatmul.mubr.bf16.vlgmr.msra.gmra.mrb[196].mxu0 %v5404_v29 }
0x2126   :  { %5520 = vmatpush1.bf16.msra.mxu1 %v11905_v33  ;;  %8072 = vmatpush3.bf16.msra.mxu0 %v11800_v19 }
0x2127   :  { %5521 = vmatprep.subr.bf16.mxu1 %v11909_v39  ;;  %8073 = vmatprep.subr.bf16.mxu0 %v12212_v27 }
0x2128   :  { %5551 = vmatprep.mubr.bf16.mxu1 %v12213_v38  ;;  %8087 = vmatprep.mubr.msk.bf16.mxu0 %vm9529_vm0, %v12212_v27 }
0x212a   :  { %5522 = vmatpush1.bf16.msra.mxu1 %v11916_v32  ;;  %8074 = vmatpush3.bf16.msra.mxu0 %v11809_v15 }
0x212b   :  { %5523 = vmatprep.subr.bf16.mxu1 %v11562_v24  ;;  %8075 = vmatprep.subr.bf16.mxu0 %v12212_v27 }
0x212e   :  { %5524 = vmatpush1.bf16.msra.mxu1 %v11566_v56  ;;  %8076 = vmatpush3.bf16.msra.mxu0 %v11815_v22 }
0x212f   :  { %5525 = vmatprep.subr.bf16.mxu1 %v11570_v16  ;;  %8077 = vmatprep.subr.bf16.mxu0 %v12212_v27  ;;  %v12292_v16 = vld [vmem:[#allocation67_spill] sm:$0xff] }
0x2132   :  { %5526 = vmatpush1.bf16.msra.mxu1 %v11574_v43  ;;  %8078 = vmatpush3.bf16.msra.mxu0 %v11821_v21 }
0x2133   :  { %5527 = vmatprep.subr.bf16.mxu1 %v11578_v4  ;;  %8079 = vmatprep.subr.bf16.mxu0 %v12212_v27 }
0x2136   :  { %5528 = vmatpush1.bf16.msra.mxu1 %v11582_v62  ;;  %8080 = vmatpush3.bf16.msra.mxu0 %v11827_v0 }
0x2137   :  { %5529 = vmatprep.subr.bf16.mxu1 %v11586_v23  ;;  %8081 = vmatprep.subr.bf16.mxu0 %v12212_v27  ;;  %v12293_v23 = vld [vmem:[#allocation53_spill] sm:$0xff] }
0x213a   :  { %5530 = vmatpush1.bf16.msra.mxu1 %v11590_v3  ;;  %8082 = vmatpush3.bf16.msra.mxu0 %v11833_v51 }
0x213b   :  { %5531 = vmatprep.subr.bf16.mxu1 %v11594_v59  ;;  %8083 = vmatprep.subr.bf16.mxu0 %v12212_v27 }
0x213e   :  { %5532 = vmatpush1.bf16.msra.mxu1 %v11598_v30  ;;  %8084 = vmatpush3.bf16.msra.mxu0 %v11839_v58 }
0x213f   :  { %5533 = vmatprep.subr.bf16.mxu1 %v11602_v5  ;;  %8085 = vmatprep.subr.bf16.mxu0 %v12212_v27 }
0x2142   :  { %5534 = vmatpush1.bf16.msra.mxu1 %v11606_v31  ;;  %8086 = vmatpush3.bf16.msra.mxu0 %v11845_v35 }
0x2143   :  { %5628 = vmatprep.subr.bf16.mxu1 %v11848_v20  ;;  %8091 = vmatprep.subr.bf16.mxu0 %v12212_v27 }
0x21f8   :  { %v5444_v24 = vpop.f32.mrb[180].mxu1  ;;  %v5485_v56 = vpop.f32.mrb[196].mxu0 }
0x21f9   :  { %v5491_v43 = vadd.f32 %v5444_v24, %v12292_v16  ;;  %v5446_v4 = vpop.f32.mrb[181].mxu1  ;;  %v8069_v62 = vpop.f32.mrb[197].mxu0  ;;  %v5505_v34 = vadd.f32 %v11702_v9, %v5485_v56  ;;  %v12297_v56 = vld [vmem:[#allocation75_spill] sm:$0xff] }
0x21fa   :  { %v5498_v3 = vadd.f32 %v5446_v4, %v12293_v23  ;;  %v5448_v59 = vpop.f32.mrb[182].mxu1  ;;  %v5488_v30 = vpop.f32.mrb[198].mxu0 }
0x21fb   :  { %v6822_v5 = vmul.f32 -1.442695, %v5491_v43  ;;  %v5449_v13 = vpop.f32.mrb[183].mxu1  ;;  %v8070_v10 = vpop.f32.mrb[199].mxu0 }
0x21fc   :  { %v6823_v31 = vmul.f32 -1.442695, %v5498_v3  ;;  %v8398_v13 = vld [vmem:[#allocation4] sm:$0xff]  }
0x21fd   :  { %8783 = vpow2.f32 %v6822_v5  ;;  %v8399_v5 = vld [vmem:[#allocation25 + $0x8] sm:$0xff]   ;;  %v8401_v10 = vld [vmem:[#allocation25 + $0x18] sm:$0xff]  }
0x21fe   :  { %8785 = vpow2.f32 %v6823_v31  ;;  %v8402_v31 = vld [vmem:[#allocation25 + $0x20] sm:$0xff]  }
0x2207   :  { %v8784_v8 = vpop.eup %8783 }
0x2208   :  { %v5495_v20 = vadd.f32 1.0, %v8784_v8  ;;  %v8786_v12 = vpop.eup %8785  ;;  %v8403_v8 = vld [vmem:[#allocation25 + $0x28] sm:$0xff]  }
0x2209   :  { %v5502_v50 = vadd.f32 1.0, %v8786_v12  ;;  %v8405_v12 = vld [vmem:[#allocation25 + $0x38] sm:$0xff]  }
0x220a   :  { %8787 = vrcp.f32 %v5495_v20  ;;  %v8404_v20 = vld [vmem:[#allocation25 + $0x30] sm:$0xff]  }
0x220b   :  { %8789 = vrcp.f32 %v5502_v50  ;;  %v8406_v50 = vld [vmem:[#allocation4 + $0x8] sm:$0xff]  }
0x2214   :  { %v8788_v26 = vpop.eup %8787 }
0x2215   :  { %v5506_v37 = vmul.f32 %v8788_v26, %v5505_v34  ;;  %v8790_v61 = vpop.eup %8789  ;;  %v8407_v34 = vld [vmem:[#allocation4 + $0x10] sm:$0xff]   ;;  %v8408_v26 = vld [vmem:[#allocation4 + $0x18] sm:$0xff]  }
0x2216   :  { %v5509_v55 = vsub.f32 1.0, %v8790_v61  ;;  %v5511_v6 = vmul.f32 %v8790_v61, %v11901_v11  ;;  %v8412_v61 = vld [vmem:[#allocation31] sm:$0xff]  }
0x2217   :  { %v5507_v44 = vadd.f32 %v5506_v37, %v12294_v46  ;;  %v8409_v37 = vld [vmem:[#allocation4 + $0x20] sm:$0xff]   ;;  %v8410_v46 = vld [vmem:[#allocation4 + $0x28] sm:$0xff]  }
0x2219   :  { %8791 = vtanh.f32 %v5507_v44 }
0x2223   :  { %v8792_v17 = vpop.eup %8791 }
0x2224   :  { %v5510_v52 = vmul.f32 %v8792_v17, %v5509_v55  ;;  %v8413_v55 = vld [vmem:[#allocation31 + $0x8] sm:$0xff]   ;;  %v8414_v17 = vld [vmem:[#allocation31 + $0x10] sm:$0xff]  }
0x2226   :  { %v11951_v53 = vadd.f32 %v5511_v6, %v5510_v52  ;;  %v8415_v52 = vld [vmem:[#allocation31 + $0x18] sm:$0xff]   ;;  %v8416_v6 = vld [vmem:[#allocation31 + $0x20] sm:$0xff]  }
0x2228   :  { %v5513_v49 = vpack.c.bf16 %v11951_v53, %v11951_v53 }
0x222a   :  { %5515 = vst [vmem:[#allocation4 + $0x34] sm:$0xf] %v5513_v49  ;;  %5552 = vmatmul.mubr.bf16.vlgmr.msra.gmra.mrb[184].mxu1 %v5513_v49  ;;  %8088 = vmatmul.mubr.bf16.vlgmr.msra.gmra.mrb[200].mxu0 %v5513_v49  ;;  %v8418_v49 = vld [vmem:[#allocation31 + $0x30] sm:$0xff]  }
0x222b   :  { %5629 = vmatpush1.bf16.msra.mxu1 %v11905_v33  ;;  %8092 = vmatpush3.bf16.msra.mxu0 %v11800_v19  ;;  %v9030_v19 = vld [vmem:[#allocation21 + $0x4c] ss:$12 sps:$4 sm:$0xff]  }
0x222c   :  { %5630 = vmatprep.subr.bf16.mxu1 %v11909_v39  ;;  %8093 = vmatprep.subr.bf16.mxu0 %v12212_v27 }
0x222d   :  { %5660 = vmatprep.mubr.bf16.mxu1 %v12213_v38  ;;  %8107 = vmatprep.mubr.msk.bf16.mxu0 %vm9529_vm0, %v12212_v27  ;;  %v9031_v38 = vld [vmem:[#allocation21 + $0x48] ss:$12 sps:$4 sm:$0xff]  }
0x222f   :  { %5631 = vmatpush1.bf16.msra.mxu1 %v11916_v32  ;;  %8094 = vmatpush3.bf16.msra.mxu0 %v11809_v15  ;;  %v9033_v15 = vld [vmem:[#allocation21 + $0x60] ss:$12 sps:$4 sm:$0xff]  }
0x2230   :  { %5632 = vmatprep.subr.bf16.mxu1 %v9028_v14  ;;  %8095 = vmatprep.subr.bf16.mxu0 %v12212_v27  ;;  %v8420_v14 = vld [vmem:[%s12139_s17] sm:$0xff]  }
0x2231   :  { %v8411_v44 = vld [vmem:[#allocation4 + $0x30] sm:$0xff]  }
0x2233   :  { %5633 = vmatpush1.bf16.msra.mxu1 %v9029_v18  ;;  %8096 = vmatpush3.bf16.msra.mxu0 %v11815_v22  ;;  %v9035_v22 = vld [vmem:[#allocation21 + $0x78] ss:$12 sps:$4 sm:$0xff]  }
0x2234   :  { %5634 = vmatprep.subr.bf16.mxu1 %v9030_v19  ;;  %8097 = vmatprep.subr.bf16.mxu0 %v12212_v27  ;;  %v8419_v18 = vld [vmem:[#allocation31 + $0x38] sm:$0xff]  }
0x2235   :  { %v8421_v19 = vld [vmem:[%s12139_s17 + $0x8] sm:$0xff]  }
0x2237   :  { %5635 = vmatpush1.bf16.msra.mxu1 %v9031_v38  ;;  %8098 = vmatpush3.bf16.msra.mxu0 %v11821_v21  ;;  %v9037_v21 = vld [vmem:[#allocation21 + $0x90] ss:$12 sps:$4 sm:$0xff]   ;;  %v8422_v38 = vld [vmem:[%s12139_s17 + $0x10] sm:$0xff]  }
0x2238   :  { %5636 = vmatprep.subr.bf16.mxu1 %v9032_v36  ;;  %8099 = vmatprep.subr.bf16.mxu0 %v12212_v27  ;;  %v8423_v36 = vld [vmem:[%s12139_s17 + $0x18] sm:$0xff]  }
0x223b   :  { %5637 = vmatpush1.bf16.msra.mxu1 %v9033_v15  ;;  %8100 = vmatpush3.bf16.msra.mxu0 %v11827_v0  ;;  %v9039_v0 = vld [vmem:[#allocation21 + $0xa8] ss:$12 sps:$4 sm:$0xff]   ;;  %v8424_v15 = vld [vmem:[%s12139_s17 + $0x20] sm:$0xff]  }
0x223c   :  { %5638 = vmatprep.subr.bf16.mxu1 %v9034_v40  ;;  %8101 = vmatprep.subr.bf16.mxu0 %v12212_v27  ;;  %v8425_v40 = vld [vmem:[%s12139_s17 + $0x28] sm:$0xff]  }
0x223f   :  { %5639 = vmatpush1.bf16.msra.mxu1 %v9035_v22  ;;  %8102 = vmatpush3.bf16.msra.mxu0 %v11833_v51  ;;  %v8427_v22 = vld [vmem:[%s12139_s17 + $0x30] sm:$0xff]  }
0x2240   :  { %5640 = vmatprep.subr.bf16.mxu1 %v9036_v42  ;;  %8103 = vmatprep.subr.bf16.mxu0 %v12212_v27  ;;  %v8428_v42 = vld [vmem:[%s12139_s17 + $0x38] sm:$0xff]  }
0x2243   :  { %5641 = vmatpush1.bf16.msra.mxu1 %v9037_v21  ;;  %8104 = vmatpush3.bf16.msra.mxu0 %v11839_v58 }
0x2244   :  { %5642 = vmatprep.subr.bf16.mxu1 %v9038_v7  ;;  %8105 = vmatprep.subr.bf16.mxu0 %v12212_v27 }
0x2247   :  { %5643 = vmatpush1.bf16.msra.mxu1 %v9039_v0  ;;  %8106 = vmatpush3.bf16.msra.mxu0 %v11845_v35  ;;  %v12298_v0 = vld [vmem:[#allocation56_spill] sm:$0xff] }
0x2248   :  { %8111 = vmatprep.subr.bf16.mxu1 %v8397_v63  ;;  %8143 = vmatprep.subr.bf16.mxu0 %v8412_v61 }
0x22fd   :  { %v5553_v2 = vpop.f32.mrb[184].mxu1  ;;  %v5594_v51 = vpop.f32.mrb[200].mxu0 }
0x22fe   :  { %v5600_v1 = vadd.f32 %v5553_v2, %v12295_v45  ;;  %v5555_v28 = vpop.f32.mrb[185].mxu1  ;;  %v8089_v47 = vpop.f32.mrb[201].mxu0  ;;  %v5614_v39 = vadd.f32 %v11702_v9, %v5594_v51  ;;  %v8400_v9 = vld [vmem:[#allocation25 + $0x10] sm:$0xff]  }
0x22ff   :  { %v5607_v25 = vadd.f32 %v5555_v28, %v12296_v41  ;;  %v5557_v57 = vpop.f32.mrb[186].mxu1  ;;  %v5597_v58 = vpop.f32.mrb[202].mxu0  ;;  %v12299_v45 = vld [vmem:[#allocation70_spill] sm:$0xff] }
0x2300   :  { %v6824_v60 = vmul.f32 -1.442695, %v5600_v1  ;;  %v5558_v48 = vpop.f32.mrb[187].mxu1  ;;  %v8090_v54 = vpop.f32.mrb[203].mxu0 }
0x2301   :  { %v6825_v27 = vmul.f32 -1.442695, %v5607_v25 }
0x2302   :  { %8793 = vpow2.f32 %v6824_v60 }
0x2303   :  { %8795 = vpow2.f32 %v6825_v27 }
0x230c   :  { %v8794_v11 = vpop.eup %8793 }
0x230d   :  { %v5604_v35 = vadd.f32 1.0, %v8794_v11  ;;  %v8796_v29 = vpop.eup %8795  ;;  %v9040_v11 = vld [vmem:[#allocation24] ss:$0 sm:$0xff] }
0x230e   :  { %v5611_v33 = vadd.f32 1.0, %v8796_v29 }
0x230f   :  { %8797 = vrcp.f32 %v5604_v35 }
0x2310   :  { %8799 = vrcp.f32 %v5611_v33 }
0x2319   :  { %v8798_v32 = vpop.eup %8797 }
0x231a   :  { %v5615_v24 = vmul.f32 %v8798_v32, %v5614_v39  ;;  %v8800_v43 = vpop.eup %8799  ;;  %v12011_v39 = vld [vmem:[#allocation27] ss:$0 sm:$0xff]  ;;  %v12300_v32 = vld [vmem:[#allocation49_spill] sm:$0xff] }
0x231b   :  { %v5618_v4 = vsub.f32 1.0, %v8800_v43  ;;  %v5620_v3 = vmul.f32 %v8800_v43, %v11951_v53  ;;  %v8417_v53 = vld [vmem:[#allocation31 + $0x28] sm:$0xff]  }
0x231c   :  { %v5616_v16 = vadd.f32 %v5615_v24, %v12297_v56 }
0x231e   :  { %8801 = vtanh.f32 %v5616_v16 }
0x2328   :  { %v8802_v62 = vpop.eup %8801 }
0x2329   :  { %v5619_v23 = vmul.f32 %v8802_v62, %v5618_v4 }
0x232b   :  { %v11981_v59 = vadd.f32 %v5620_v3, %v5619_v23 }
0x232d   :  { %v5622_v30 = vpack.c.bf16 %v11981_v59, %v11981_v59 }
0x232f   :  { %5624 = vst [vmem:[#allocation4 + $0x38] sm:$0xf] %v5622_v30  ;;  %5661 = vmatmul.mubr.bf16.vlgmr.msra.gmra.mrb[188].mxu1 %v5622_v30  ;;  %8108 = vmatmul.mubr.bf16.vlgmr.msra.gmra.mrb[204].mxu0 %v5622_v30 }
0x2330   :  { %8112 = vmatpush3.bf16.msra.mxu1 %v8397_v63  ;;  %8127 = vmatprep.mubr.bf16.mxu1 %v8398_v13 }
0x2331   :  { %8113 = vmatprep.subr.bf16.mxu1 %v8399_v5  ;;  %8144 = vmatpush3.bf16.msra.mxu0 %v8412_v61 }
0x2332   :  { %8145 = vmatprep.subr.bf16.mxu0 %v8413_v55 }
0x2334   :  { %8114 = vmatpush3.bf16.msra.mxu1 %v8399_v5 }
0x2335   :  { %8115 = vmatprep.subr.bf16.mxu1 %v8400_v9  ;;  %8146 = vmatpush3.bf16.msra.mxu0 %v8413_v55 }
0x2336   :  { %8147 = vmatprep.subr.bf16.mxu0 %v8414_v17 }
0x2338   :  { %8116 = vmatpush3.bf16.msra.mxu1 %v8400_v9 }
0x2339   :  { %8117 = vmatprep.subr.bf16.mxu1 %v8401_v10  ;;  %8148 = vmatpush3.bf16.msra.mxu0 %v8414_v17 }
0x233a   :  { %8149 = vmatprep.subr.bf16.mxu0 %v8415_v52 }
0x233c   :  { %8118 = vmatpush3.bf16.msra.mxu1 %v8401_v10 }
0x233d   :  { %8119 = vmatprep.subr.bf16.mxu1 %v8402_v31  ;;  %8150 = vmatpush3.bf16.msra.mxu0 %v8415_v52 }
0x233e   :  { %8151 = vmatprep.subr.bf16.mxu0 %v8416_v6 }
0x2340   :  { %8120 = vmatpush3.bf16.msra.mxu1 %v8402_v31 }
0x2341   :  { %8121 = vmatprep.subr.bf16.mxu1 %v8403_v8  ;;  %8152 = vmatpush3.bf16.msra.mxu0 %v8416_v6 }
0x2342   :  { %8153 = vmatprep.subr.bf16.mxu0 %v8417_v53 }
0x2344   :  { %8122 = vmatpush3.bf16.msra.mxu1 %v8403_v8 }
0x2345   :  { %8123 = vmatprep.subr.bf16.mxu1 %v8404_v20  ;;  %8154 = vmatpush3.bf16.msra.mxu0 %v8417_v53 }
0x2346   :  { %8155 = vmatprep.subr.bf16.mxu0 %v8418_v49 }
0x2348   :  { %8124 = vmatpush3.bf16.msra.mxu1 %v8404_v20 }
0x2349   :  { %8125 = vmatprep.subr.bf16.mxu1 %v8405_v12  ;;  %8156 = vmatpush3.bf16.msra.mxu0 %v8418_v49 }
0x234a   :  { %8157 = vmatprep.subr.bf16.mxu0 %v8419_v18 }
0x234c   :  { %8126 = vmatpush3.bf16.msra.mxu1 %v8405_v12 }
0x234d   :  { %8175 = vmatprep.subr.bf16.mxu1 %v8420_v14  ;;  %8158 = vmatpush3.bf16.msra.mxu0 %v8419_v18 }
0x234f   :  { %8128 = vmatmul.mubr.bf16.vlgmr.msra.gmra.mrb[192].mxu1 %v8406_v50 }
0x2350   :  { %8131 = vmatprep.mubr.bf16.mxu1 %v8407_v34  ;;  %8176 = vmatpush3.bf16.msra.mxu1 %v8420_v14 }
0x2351   :  { %8177 = vmatprep.subr.bf16.mxu1 %v8421_v19 }
0x2354   :  { %8178 = vmatpush3.bf16.msra.mxu1 %v8421_v19 }
0x2355   :  { %8179 = vmatprep.subr.bf16.mxu1 %v8422_v38 }
0x2357   :  { %8132 = vmatmul.mubr.bf16.gmra.mrb[196].mxu1 %v8408_v26 }
0x2358   :  { %8135 = vmatprep.mubr.bf16.mxu1 %v8409_v37  ;;  %8180 = vmatpush3.bf16.msra.mxu1 %v8422_v38 }
0x2359   :  { %8181 = vmatprep.subr.bf16.mxu1 %v8423_v36 }
0x235c   :  { %8182 = vmatpush3.bf16.msra.mxu1 %v8423_v36 }
0x235d   :  { %8183 = vmatprep.subr.bf16.mxu1 %v8424_v15 }
0x235f   :  { %8136 = vmatmul.mubr.bf16.gmra.mrb[200].mxu1 %v8410_v46 }
0x2360   :  { %8139 = vmatprep.mubr.bf16.mxu1 %v8411_v44  ;;  %8184 = vmatpush3.bf16.msra.mxu1 %v8424_v15 }
0x2361   :  { %8185 = vmatprep.subr.bf16.mxu1 %v8425_v40 }
0x2364   :  { %8186 = vmatpush3.bf16.msra.mxu1 %v8425_v40 }
0x2365   :  { %8187 = vmatprep.subr.bf16.mxu1 %v8427_v22 }
0x2368   :  { %8188 = vmatpush3.bf16.msra.mxu1 %v8427_v22 }
0x2369   :  { %8189 = vmatprep.subr.bf16.mxu1 %v8428_v42 }
0x236c   :  { %8190 = vmatpush3.bf16.msra.mxu1 %v8428_v42 }
0x2402   :  { %v5662_v21 = vpop.f32.mrb[188].mxu1  ;;  %v5703_v7 = vpop.f32.mrb[204].mxu0 }
0x2403   :  { %v5709_v63 = vadd.f32 %v5662_v21, %v12298_v0  ;;  %v5664_v2 = vpop.f32.mrb[189].mxu1  ;;  %v8109_v51 = vpop.f32.mrb[205].mxu0  ;;  %v5723_v35 = vadd.f32 %v9040_v11, %v5703_v7 }
0x2404   :  { %v5716_v1 = vadd.f32 %v5664_v2, %v12299_v45  ;;  %v5666_v28 = vpop.f32.mrb[190].mxu1  ;;  %v5706_v47 = vpop.f32.mrb[206].mxu0 }
0x2405   :  { %v6826_v41 = vmul.f32 -1.442695, %v5709_v63  ;;  %v5667_v25 = vpop.f32.mrb[191].mxu1  ;;  %v8110_v57 = vpop.f32.mrb[207].mxu0 }
0x2406   :  { %v6827_v58 = vmul.f32 -1.442695, %v5716_v1 }
0x2407   :  { %8803 = vpow2.f32 %v6826_v41 }
0x2408   :  { %8805 = vpow2.f32 %v6827_v58 }
0x2411   :  { %v8804_v60 = vpop.eup %8803 }
0x2412   :  { %v5713_v48 = vadd.f32 1.0, %v8804_v60  ;;  %v8806_v54 = vpop.eup %8805 }
0x2413   :  { %v5720_v27 = vadd.f32 1.0, %v8806_v54 }
0x2414   :  { %8807 = vrcp.f32 %v5713_v48 }
0x2415   :  { %8809 = vrcp.f32 %v5720_v27  ;;  %v12027_v27 = vld [vmem:[#allocation33] ss:$0 sm:$0xff] }
0x241e   :  { %v8808_v29 = vpop.eup %8807 }
0x241f   :  { %v5724_v33 = vmul.f32 %v8808_v29, %v5723_v35  ;;  %v8810_v20 = vpop.eup %8809 }
0x2420   :  { %v5727_v46 = vsub.f32 1.0, %v8810_v20  ;;  %v5729_v53 = vmul.f32 %v8810_v20, %v11981_v59 }
0x2421   :  { %v5725_v24 = vadd.f32 %v5724_v33, %v12300_v32 }
0x2422   :  { %v8129_v56 = vpop.f32.mrb[192].mxu1 }
0x2423   :  { %8811 = vtanh.f32 %v5725_v24  ;;  %v5913_v16 = vadd.f32 %v8129_v56, %v12011_v39  ;;  %v5904_v43 = vpop.f32.mrb[193].mxu1 }
0x2424   :  { %v5905_v4 = vadd.f32 %v12011_v39, %v5904_v43  ;;  %v8130_v62 = vpop.f32.mrb[194].mxu1 }
0x2425   :  { %v5916_v23 = vadd.f32 %v8130_v62, %v12011_v39  ;;  %v5907_v3 = vpop.f32.mrb[195].mxu1  ;;  %v6257_v5 = vmax.f32 %v5913_v16, 0.0 }
0x2426   :  { %v5908_v30 = vadd.f32 %v12011_v39, %v5907_v3  ;;  %v6255_v10 = vmax.f32 %v5905_v4, 0.0 }
0x2427   :  { %v5968_v13 = vpack.c.bf16 %v5916_v23, %v5913_v16  ;;  %v6258_v9 = vmax.f32 %v5916_v23, 0.0 }
0x2428   :  { %v5967_v31 = vpack.c.bf16 %v5908_v30, %v5905_v4  ;;  %v6256_v8 = vmax.f32 %v5908_v30, 0.0 }
0x2429   :  { %v6272_v12 = vpack.c.bf16 %v6258_v9, %v6257_v5 }
0x242a   :  { %v8133_v50 = vpop.f32.mrb[196].mxu1  ;;  %8159 = vmatprep.mubr.bf16.mxu0 %v5967_v31  ;;  %v6271_v34 = vpack.c.bf16 %v6256_v8, %v6255_v10 }
0x242b   :  { %v5929_v26 = vadd.f32 %v8133_v50, %v12011_v39  ;;  %v5920_v37 = vpop.f32.mrb[197].mxu1  ;;  %8160 = vmatmul.mubr.bf16.vlgmr.msra.gmra.mrb[208].mxu0 %v5968_v13 }
0x242c   :  { %v5921_v44 = vadd.f32 %v12011_v39, %v5920_v37  ;;  %v8134_v61 = vpop.f32.mrb[198].mxu1 }
0x242d   :  { %v8812_v55 = vpop.eup %8811  ;;  %v5932_v17 = vadd.f32 %v8134_v61, %v12011_v39  ;;  %v5923_v52 = vpop.f32.mrb[199].mxu1  ;;  %v6261_v14 = vmax.f32 %v5929_v26, 0.0 }
0x242e   :  { %v5728_v6 = vmul.f32 %v8812_v55, %v5727_v46  ;;  %v5924_v49 = vadd.f32 %v12011_v39, %v5923_v52  ;;  %v6259_v36 = vmax.f32 %v5921_v44, 0.0 }
0x242f   :  { %v5970_v18 = vpack.c.bf16 %v5932_v17, %v5929_v26  ;;  %v6262_v19 = vmax.f32 %v5932_v17, 0.0 }
0x2430   :  { %v5730_v38 = vadd.f32 %v5729_v53, %v5728_v6  ;;  %v5969_v15 = vpack.c.bf16 %v5924_v49, %v5921_v44  ;;  %v6260_v40 = vmax.f32 %v5924_v49, 0.0 }
0x2431   :  { %v6274_v22 = vpack.c.bf16 %v6262_v19, %v6261_v14 }
0x2432   :  { %v5731_v42 = vpack.c.bf16 %v5730_v38, %v5730_v38  ;;  %v8137_v21 = vpop.f32.mrb[200].mxu1  ;;  %8163 = vmatprep.mubr.bf16.mxu0 %v5969_v15  ;;  %v6273_v7 = vpack.c.bf16 %v6260_v40, %v6259_v36 }
0x2433   :  { %v5945_v0 = vadd.f32 %v8137_v21, %v12011_v39  ;;  %v5936_v63 = vpop.f32.mrb[201].mxu1  ;;  %8164 = vmatmul.mubr.bf16.gmra.mrb[212].mxu0 %v5970_v18 }
0x2434   :  { %5733 = vst [vmem:[#allocation4 + $0x3c] sm:$0xf] %v5731_v42  ;;  %v5937_v59 = vadd.f32 %v12011_v39, %v5936_v63  ;;  %v8138_v2 = vpop.f32.mrb[202].mxu1 }
0x2435   :  { %v5948_v51 = vadd.f32 %v8138_v2, %v12011_v39  ;;  %v5939_v45 = vpop.f32.mrb[203].mxu1  ;;  %v6265_v28 = vmax.f32 %v5945_v0, 0.0 }
0x2436   :  { %v5940_v1 = vadd.f32 %v12011_v39, %v5939_v45  ;;  %v6263_v25 = vmax.f32 %v5937_v59, 0.0 }
0x2437   :  { %v5972_v47 = vpack.c.bf16 %v5948_v51, %v5945_v0  ;;  %v6266_v41 = vmax.f32 %v5948_v51, 0.0 }
0x2438   :  { %v5971_v57 = vpack.c.bf16 %v5940_v1, %v5937_v59  ;;  %v6264_v58 = vmax.f32 %v5940_v1, 0.0 }
0x2439   :  { %v6276_v60 = vpack.c.bf16 %v6266_v41, %v6265_v28 }
0x243a   :  { %8167 = vmatprep.mubr.bf16.mxu0 %v5971_v57  ;;  %v6275_v48 = vpack.c.bf16 %v6264_v58, %v6263_v25 }
0x243b   :  { %8168 = vmatmul.mubr.bf16.gmra.mrb[216].mxu0 %v5972_v47  ;;  %v8426_v54 = vld [vmem:[#allocation4 + $0x38] sm:$0xff]  }
0x243c   :  { %8140 = vmatmul.mubr.bf16.gmra.mrb[204].mxu1 %v8426_v54  ;;  %v12048_v54 = vld [vmem:[%s12140_s18] ss:$0 sm:$0xff]  ;;  %s9530_s18 = smov [#allocation34]  }
0x243d   :  { %8191 = vmatprep.mubr.bf16.mxu1 %v6271_v34  ;;  %s6564_s1 = sshll.u32 %s9530_s18, 4  ;;  %s6565_s1 = int_to_ptr.vmem [resolvable:$true] %s6564_s1 }
0x243e   :  { %s9415_s27 = scalar_lea.vmem %s6565_s1, 2048  ;;  %p9420_p11 = scmp.lt.s32.totalorder %s6565_s1, %s6565_s1 }
0x243f   :  { %p9416_p10 = scmp.ne.s32.totalorder %s6565_s1, %s9415_s27  ;;  %p9421_p12 = scmp.lt.s32.totalorder %s9415_s27, %s9415_s27 }
0x2441   :  { %p9422_p13 = por %p9421_p12, %p9420_p11 }
0x2443   :  { %p9423_p0 = pnand %p9422_p13, %p9416_p10 }
0x2444   :  { %8192 = vmatmul.mubr.bf16.vlgmr.msra.gmra.mrb[208].mxu1 %v6272_v12 }
0x2445   :  { %8195 = vmatprep.mubr.bf16.mxu1 %v6273_v7 }
0x244c   :  { %8196 = vmatmul.mubr.bf16.gmra.mrb[212].mxu1 %v6274_v22 }
0x244d   :  { %8199 = vmatprep.mubr.bf16.mxu1 %v6275_v48 }
0x2454   :  { %8200 = vmatmul.mubr.bf16.gmra.mrb[216].mxu1 %v6276_v60 }
0x24fe   :  { %v8161_v11 = vpop.f32.mrb[208].mxu0 }
0x24ff   :  { %v6089_v35 = vadd.f32 %v8161_v11, %v12027_v27  ;;  %v6080_v29 = vpop.f32.mrb[209].mxu0 }
0x2500   :  { %v6081_v33 = vadd.f32 %v12027_v27, %v6080_v29  ;;  %v8162_v32 = vpop.f32.mrb[210].mxu0 }
0x2501   :  { %v6856_v24 = vmul.f32 -1.442695, %v6089_v35  ;;  %v6092_v56 = vadd.f32 %v8162_v32, %v12027_v27  ;;  %v6083_v16 = vpop.f32.mrb[211].mxu0 }
0x2502   :  { %v6854_v43 = vmul.f32 -1.442695, %v6081_v33  ;;  %v6084_v4 = vadd.f32 %v12027_v27, %v6083_v16 }
0x2503   :  { %8813 = vpow2.f32 %v6856_v24  ;;  %v6857_v62 = vmul.f32 -1.442695, %v6092_v56 }
0x2504   :  { %8815 = vpow2.f32 %v6854_v43  ;;  %v6855_v23 = vmul.f32 -1.442695, %v6084_v4 }
0x2505   :  { %8817 = vpow2.f32 %v6857_v62 }
0x2506   :  { %8819 = vpow2.f32 %v6855_v23  ;;  %v8165_v3 = vpop.f32.mrb[212].mxu0 }
0x2507   :  { %v6105_v30 = vadd.f32 %v8165_v3, %v12027_v27  ;;  %v6096_v5 = vpop.f32.mrb[213].mxu0 }
0x2508   :  { %v6097_v13 = vadd.f32 %v12027_v27, %v6096_v5  ;;  %v8166_v9 = vpop.f32.mrb[214].mxu0 }
0x2509   :  { %v6860_v10 = vmul.f32 -1.442695, %v6105_v30  ;;  %v6108_v31 = vadd.f32 %v8166_v9, %v12027_v27  ;;  %v6099_v8 = vpop.f32.mrb[215].mxu0 }
0x250a   :  { %v6858_v20 = vmul.f32 -1.442695, %v6097_v13  ;;  %v6100_v12 = vadd.f32 %v12027_v27, %v6099_v8 }
0x250b   :  { %8821 = vpow2.f32 %v6860_v10  ;;  %v6861_v50 = vmul.f32 -1.442695, %v6108_v31 }
0x250c   :  { %8823 = vpow2.f32 %v6858_v20  ;;  %v6859_v34 = vmul.f32 -1.442695, %v6100_v12 }
0x250d   :  { %v8814_v26 = vpop.eup %8813  ;;  %8825 = vpow2.f32 %v6861_v50 }
0x250e   :  { %v8816_v37 = vpop.eup %8815  ;;  %v6193_v46 = vadd.f32 1.0, %v8814_v26  ;;  %8827 = vpow2.f32 %v6859_v34  ;;  %v8169_v44 = vpop.f32.mrb[216].mxu0 }
0x250f   :  { %v8818_v61 = vpop.eup %8817  ;;  %v6191_v55 = vadd.f32 1.0, %v8816_v37  ;;  %v6121_v17 = vadd.f32 %v8169_v44, %v12027_v27  ;;  %v6112_v52 = vpop.f32.mrb[217].mxu0 }
0x2510   :  { %v8820_v6 = vpop.eup %8819  ;;  %8829 = vrcp.f32 %v6193_v46  ;;  %v6194_v53 = vadd.f32 1.0, %v8818_v61  ;;  %v6113_v49 = vadd.f32 %v12027_v27, %v6112_v52  ;;  %v8170_v14 = vpop.f32.mrb[218].mxu0 }
0x2511   :  { %v8141_v18 = vpop.f32.mrb[204].mxu1  ;;  %8831 = vrcp.f32 %v6191_v55  ;;  %v6192_v19 = vadd.f32 1.0, %v8820_v6  ;;  %v6864_v38 = vmul.f32 -1.442695, %v6121_v17  ;;  %v6124_v36 = vadd.f32 %v8170_v14, %v12027_v27  ;;  %v6115_v15 = vpop.f32.mrb[219].mxu0 }
0x2512   :  { %v5952_v40 = vpop.f32.mrb[205].mxu1  ;;  %8833 = vrcp.f32 %v6194_v53  ;;  %v6862_v22 = vmul.f32 -1.442695, %v6113_v49  ;;  %v6116_v42 = vadd.f32 %v12027_v27, %v6115_v15  ;;  %v5961_v21 = vadd.f32 %v8141_v18, %v12011_v39 }
0x2513   :  { %v8142_v7 = vpop.f32.mrb[206].mxu1  ;;  %8835 = vrcp.f32 %v6192_v19  ;;  %v6865_v0 = vmul.f32 -1.442695, %v6124_v36  ;;  %v5953_v63 = vadd.f32 %v12011_v39, %v5952_v40 }
0x2514   :  { %v5964_v59 = vadd.f32 %v8142_v7, %v12011_v39  ;;  %v5955_v2 = vpop.f32.mrb[207].mxu1  ;;  %8837 = vpow2.f32 %v6864_v38  ;;  %v6863_v51 = vmul.f32 -1.442695, %v6116_v42  ;;  %v6269_v45 = vmax.f32 %v5961_v21, 0.0 }
0x2515   :  { %v5956_v1 = vadd.f32 %v12011_v39, %v5955_v2  ;;  %v8822_v28 = vpop.eup %8821  ;;  %8839 = vpow2.f32 %v6862_v22  ;;  %v6267_v47 = vmax.f32 %v5953_v63, 0.0 }
0x2516   :  { %v5974_v41 = vpack.c.bf16 %v5964_v59, %v5961_v21  ;;  %v6270_v25 = vmax.f32 %v5964_v59, 0.0  ;;  %v8824_v57 = vpop.eup %8823  ;;  %v6197_v58 = vadd.f32 1.0, %v8822_v28  ;;  %8841 = vpow2.f32 %v6865_v0 }
0x2517   :  { %v5973_v60 = vpack.c.bf16 %v5956_v1, %v5953_v63  ;;  %v6268_v48 = vmax.f32 %v5956_v1, 0.0  ;;  %v8826_v11 = vpop.eup %8825  ;;  %v6195_v35 = vadd.f32 1.0, %v8824_v57  ;;  %8843 = vpow2.f32 %v6863_v51  ;;  %v8193_v32 = vpop.f32.mrb[208].mxu1 }
0x2518   :  { %v6278_v29 = vpack.c.bf16 %v6270_v25, %v6269_v45  ;;  %v8828_v39 = vpop.eup %8827  ;;  %8845 = vrcp.f32 %v6197_v58  ;;  %v6198_v33 = vadd.f32 1.0, %v8826_v11  ;;  %v6393_v16 = vadd.f32 %v8193_v32, %v12048_v54  ;;  %v6384_v43 = vpop.f32.mrb[209].mxu1 }
0x2519   :  { %8171 = vmatprep.mubr.bf16.mxu0 %v5973_v60  ;;  %v6277_v24 = vpack.c.bf16 %v6268_v48, %v6267_v47  ;;  %8847 = vrcp.f32 %v6195_v35  ;;  %v6196_v56 = vadd.f32 1.0, %v8828_v39  ;;  %v6385_v62 = vadd.f32 %v12048_v54, %v6384_v43  ;;  %v8194_v23 = vpop.f32.mrb[210].mxu1 }
0x251a   :  { %8172 = vmatmul.mubr.bf16.gmra.mrb[220].mxu0 %v5974_v41  ;;  %v8830_v4 = vpop.eup %8829  ;;  %8849 = vrcp.f32 %v6198_v33  ;;  %v6881_v30 = vmul.f32 -1.442695, %v6393_v16  ;;  %v6396_v5 = vadd.f32 %v8194_v23, %v12048_v54  ;;  %v6387_v13 = vpop.f32.mrb[211].mxu1 }
0x251b   :  { %8203 = vmatprep.mubr.bf16.mxu1 %v6277_v24  ;;  %v8832_v3 = vpop.eup %8831  ;;  %6241 = vst [vmem:[#allocation35 + $0x10] sm:$0xff] %v8830_v4  ;;  %8851 = vrcp.f32 %v6196_v56  ;;  %v6879_v10 = vmul.f32 -1.442695, %v6385_v62  ;;  %v6388_v31 = vadd.f32 %v12048_v54, %v6387_v13 }
0x251c   :  { %8204 = vmatmul.mubr.bf16.gmra.mrb[220].mxu1 %v6278_v29  ;;  %v8834_v9 = vpop.eup %8833  ;;  %6239 = vst [vmem:[#allocation35] sm:$0xff] %v8832_v3  ;;  %8853 = vpow2.f32 %v6881_v30  ;;  %v6882_v20 = vmul.f32 -1.442695, %v6396_v5 }
0x251d   :  { %v8836_v8 = vpop.eup %8835  ;;  %6242 = vst [vmem:[#allocation35 + $0x18] sm:$0xff] %v8834_v9  ;;  %8855 = vpow2.f32 %v6879_v10  ;;  %v6880_v50 = vmul.f32 -1.442695, %v6388_v31 }
0x251e   :  { %v8838_v12 = vpop.eup %8837  ;;  %6240 = vst [vmem:[#allocation35 + $0x8] sm:$0xff] %v8836_v8  ;;  %8857 = vpow2.f32 %v6882_v20 }
0x251f   :  { %v8840_v34 = vpop.eup %8839  ;;  %v6201_v26 = vadd.f32 1.0, %v8838_v12  ;;  %8859 = vpow2.f32 %v6880_v50  ;;  %v8197_v44 = vpop.f32.mrb[212].mxu1 }
0x2520   :  { %v8842_v37 = vpop.eup %8841  ;;  %v6199_v46 = vadd.f32 1.0, %v8840_v34  ;;  %v6409_v17 = vadd.f32 %v8197_v44, %v12048_v54  ;;  %v6400_v52 = vpop.f32.mrb[213].mxu1 }
0x2521   :  { %v8844_v61 = vpop.eup %8843  ;;  %8861 = vrcp.f32 %v6201_v26  ;;  %v6202_v55 = vadd.f32 1.0, %v8842_v37  ;;  %v6401_v49 = vadd.f32 %v12048_v54, %v6400_v52  ;;  %v8198_v14 = vpop.f32.mrb[214].mxu1 }
0x2522   :  { %v8846_v6 = vpop.eup %8845  ;;  %8863 = vrcp.f32 %v6199_v46  ;;  %v6200_v53 = vadd.f32 1.0, %v8844_v61  ;;  %v6885_v19 = vmul.f32 -1.442695, %v6409_v17  ;;  %v6412_v38 = vadd.f32 %v8198_v14, %v12048_v54  ;;  %v6403_v36 = vpop.f32.mrb[215].mxu1 }
0x2523   :  { %v8848_v18 = vpop.eup %8847  ;;  %6245 = vst [vmem:[#allocation35 + $0x30] sm:$0xff] %v8846_v6  ;;  %8865 = vrcp.f32 %v6202_v55  ;;  %v6883_v40 = vmul.f32 -1.442695, %v6401_v49  ;;  %v6404_v22 = vadd.f32 %v12048_v54, %v6403_v36 }
0x2524   :  { %v8850_v15 = vpop.eup %8849  ;;  %6243 = vst [vmem:[#allocation35 + $0x20] sm:$0xff] %v8848_v18  ;;  %8867 = vrcp.f32 %v6200_v53  ;;  %v6886_v21 = vmul.f32 -1.442695, %v6412_v38 }
0x2525   :  { %v8852_v42 = vpop.eup %8851  ;;  %6246 = vst [vmem:[#allocation35 + $0x38] sm:$0xff] %v8850_v15  ;;  %8869 = vpow2.f32 %v6885_v19  ;;  %v6884_v7 = vmul.f32 -1.442695, %v6404_v22 }
0x2526   :  { %6244 = vst [vmem:[#allocation35 + $0x28] sm:$0xff] %v8852_v42  ;;  %8871 = vpow2.f32 %v6883_v40  ;;  %v8854_v0 = vpop.eup %8853 }
0x2527   :  { %8873 = vpow2.f32 %v6886_v21  ;;  %v8856_v63 = vpop.eup %8855  ;;  %v6497_v59 = vadd.f32 1.0, %v8854_v0  ;;  %v8201_v2 = vpop.f32.mrb[216].mxu1 }
0x2528   :  { %8875 = vpow2.f32 %v6884_v7  ;;  %v8858_v51 = vpop.eup %8857  ;;  %v6495_v45 = vadd.f32 1.0, %v8856_v63  ;;  %v6425_v1 = vadd.f32 %v8201_v2, %v12048_v54  ;;  %v6416_v28 = vpop.f32.mrb[217].mxu1 }
0x2529   :  { %v8860_v47 = vpop.eup %8859  ;;  %8877 = vrcp.f32 %v6497_v59  ;;  %v6498_v41 = vadd.f32 1.0, %v8858_v51  ;;  %v6417_v25 = vadd.f32 %v12048_v54, %v6416_v28  ;;  %v8202_v57 = vpop.f32.mrb[218].mxu1 }
0x252a   :  { %8879 = vrcp.f32 %v6495_v45  ;;  %v6496_v60 = vadd.f32 1.0, %v8860_v47  ;;  %v6889_v48 = vmul.f32 -1.442695, %v6425_v1  ;;  %v6428_v11 = vadd.f32 %v8202_v57, %v12048_v54  ;;  %v6419_v35 = vpop.f32.mrb[219].mxu1 }
0x252b   :  { %v8862_v58 = vpop.eup %8861  ;;  %8881 = vrcp.f32 %v6498_v41  ;;  %v6887_v39 = vmul.f32 -1.442695, %v6417_v25  ;;  %v6420_v33 = vadd.f32 %v12048_v54, %v6419_v35 }
0x252c   :  { %v8864_v29 = vpop.eup %8863  ;;  %6249 = vst [vmem:[#allocation35 + $0x50] sm:$0xff] %v8862_v58  ;;  %8883 = vrcp.f32 %v6496_v60  ;;  %v6890_v24 = vmul.f32 -1.442695, %v6428_v11 }
0x252d   :  { %v8866_v32 = vpop.eup %8865  ;;  %6247 = vst [vmem:[#allocation35 + $0x40] sm:$0xff] %v8864_v29  ;;  %8885 = vpow2.f32 %v6889_v48  ;;  %v6888_v16 = vmul.f32 -1.442695, %v6420_v33 }
0x252e   :  { %v8868_v56 = vpop.eup %8867  ;;  %6250 = vst [vmem:[#allocation35 + $0x58] sm:$0xff] %v8866_v32  ;;  %8887 = vpow2.f32 %v6887_v39 }
0x252f   :  { %v8870_v43 = vpop.eup %8869  ;;  %6248 = vst [vmem:[#allocation35 + $0x48] sm:$0xff] %v8868_v56  ;;  %8889 = vpow2.f32 %v6890_v24 }
0x2530   :  { %v8872_v4 = vpop.eup %8871  ;;  %v6501_v62 = vadd.f32 1.0, %v8870_v43  ;;  %8891 = vpow2.f32 %v6888_v16 }
0x2531   :  { %v8874_v23 = vpop.eup %8873  ;;  %v6499_v3 = vadd.f32 1.0, %v8872_v4 }
0x2532   :  { %v8876_v30 = vpop.eup %8875  ;;  %8893 = vrcp.f32 %v6501_v62  ;;  %v6502_v5 = vadd.f32 1.0, %v8874_v23 }
0x2533   :  { %8895 = vrcp.f32 %v6499_v3  ;;  %v6500_v13 = vadd.f32 1.0, %v8876_v30  ;;  %v8878_v9 = vpop.eup %8877 }
0x2534   :  { %8897 = vrcp.f32 %v6502_v5  ;;  %v8880_v10 = vpop.eup %8879  ;;  %6545 = vst [vmem:[#allocation37 + $0x10] sm:$0xff] %v8878_v9 }
0x2535   :  { %8899 = vrcp.f32 %v6500_v13  ;;  %v8882_v31 = vpop.eup %8881  ;;  %6543 = vst [vmem:[#allocation37] sm:$0xff] %v8880_v10 }
0x2536   :  { %v8884_v8 = vpop.eup %8883  ;;  %6546 = vst [vmem:[#allocation37 + $0x18] sm:$0xff] %v8882_v31 }
0x2537   :  { %v8886_v20 = vpop.eup %8885  ;;  %6544 = vst [vmem:[#allocation37 + $0x8] sm:$0xff] %v8884_v8 }
0x2538   :  { %v8888_v12 = vpop.eup %8887  ;;  %v6505_v50 = vadd.f32 1.0, %v8886_v20 }
0x2539   :  { %v8890_v34 = vpop.eup %8889  ;;  %v6503_v26 = vadd.f32 1.0, %v8888_v12 }
0x253a   :  { %v8892_v37 = vpop.eup %8891  ;;  %8901 = vrcp.f32 %v6505_v50  ;;  %v6506_v46 = vadd.f32 1.0, %v8890_v34 }
0x253b   :  { %8903 = vrcp.f32 %v6503_v26  ;;  %v6504_v61 = vadd.f32 1.0, %v8892_v37 }
0x253c   :  { %v8894_v44 = vpop.eup %8893  ;;  %8905 = vrcp.f32 %v6506_v46 }
0x253d   :  { %v8896_v55 = vpop.eup %8895  ;;  %6549 = vst [vmem:[#allocation37 + $0x30] sm:$0xff] %v8894_v44  ;;  %8907 = vrcp.f32 %v6504_v61 }
0x253e   :  { %v8898_v17 = vpop.eup %8897  ;;  %6547 = vst [vmem:[#allocation37 + $0x20] sm:$0xff] %v8896_v55 }
0x253f   :  { %v8900_v52 = vpop.eup %8899  ;;  %6550 = vst [vmem:[#allocation37 + $0x38] sm:$0xff] %v8898_v17 }
0x2540   :  { %6548 = vst [vmem:[#allocation37 + $0x28] sm:$0xff] %v8900_v52 }
0x2544   :  { %v8902_v6 = vpop.eup %8901 }
0x2545   :  { %v8904_v53 = vpop.eup %8903  ;;  %6553 = vst [vmem:[#allocation37 + $0x50] sm:$0xff] %v8902_v6 }
0x2546   :  { %v8906_v49 = vpop.eup %8905  ;;  %6551 = vst [vmem:[#allocation37 + $0x40] sm:$0xff] %v8904_v53 }
0x2547   :  { %v8908_v14 = vpop.eup %8907  ;;  %6554 = vst [vmem:[#allocation37 + $0x58] sm:$0xff] %v8906_v49 }
0x2548   :  { %6552 = vst [vmem:[#allocation37 + $0x48] sm:$0xff] %v8908_v14 }
0x2549   :  { %9426 = shalt.err (!%p9423_p0)
}
0x254a   :  { %s12301_s6 = sld [smem:[#allocation83_spill]] }
0x2550   :  { %s9427_s21 = scalar_lea.hbm %s12301_s6, 2048 }
0x2551   :  { %p9428_p1 = scmp.ne.s32.totalorder %s12301_s6, %s9427_s21  ;;  %p9431_p2 = scmp.lt.u32.totalorder %s9427_s21, %s12301_s6 }
0x2553   :  { %p9433_p3 = pnand %p9431_p2, %p9428_p1 }
0x2555   :  { %9436 = shalt.err (!%p9433_p3)
}
0x2556   :  { %6570 = dma.vmem_to_hbm [thread:$0]  %s6565_s1, 2048, %s12301_s6, [#allocation9], %s9516_s15, %s9516_s15, %s9517_s9  }
0x2557   :  { %s9531_s2 = smov [#allocation35]   ;;  %s9532_s0 = smov [#allocation37]  }
0x2558   :  { %s6576_s4 = sshll.u32 %s9531_s2, 4  ;;  %s6588_s13 = sshll.u32 %s9532_s0, 4  ;;  %s6577_s4 = int_to_ptr.vmem [resolvable:$true] %s6576_s4  ;;  %s12085_s13 = int_to_ptr.vmem [resolvable:$true] %s6588_s13 }
0x2559   :  { %s9437_s7 = scalar_lea.vmem %s6577_s4, 2048  ;;  %p9442_p5 = scmp.lt.s32.totalorder %s6577_s4, %s6577_s4 }
0x255a   :  { %p9438_p4 = scmp.ne.s32.totalorder %s6577_s4, %s9437_s7  ;;  %p9443_p6 = scmp.lt.s32.totalorder %s9437_s7, %s9437_s7 }
0x255c   :  { %p9444_p7 = por %p9443_p6, %p9442_p5 }
0x255e   :  { %p9445_p8 = pnand %p9444_p7, %p9438_p4 }
0x25ed   :  { %v8173_v18 = vpop.f32.mrb[220].mxu0 }
0x25ee   :  { %v6137_v19 = vadd.f32 %v8173_v18, %v12027_v27  ;;  %v6128_v38 = vpop.f32.mrb[221].mxu0 }
0x25ef   :  { %v6129_v36 = vadd.f32 %v12027_v27, %v6128_v38  ;;  %v8174_v15 = vpop.f32.mrb[222].mxu0  ;;  %v8205_v40 = vpop.f32.mrb[220].mxu1 }
0x25f0   :  { %v6868_v22 = vmul.f32 -1.442695, %v6137_v19  ;;  %v6140_v42 = vadd.f32 %v8174_v15, %v12027_v27  ;;  %v6441_v21 = vadd.f32 %v8205_v40, %v12048_v54  ;;  %v6131_v7 = vpop.f32.mrb[223].mxu0  ;;  %v6432_v0 = vpop.f32.mrb[221].mxu1 }
0x25f1   :  { %v6866_v63 = vmul.f32 -1.442695, %v6129_v36  ;;  %v6132_v59 = vadd.f32 %v12027_v27, %v6131_v7  ;;  %v6433_v2 = vadd.f32 %v12048_v54, %v6432_v0  ;;  %v8206_v51 = vpop.f32.mrb[222].mxu1 }
0x25f2   :  { %8909 = vpow2.f32 %v6868_v22  ;;  %v6869_v45 = vmul.f32 -1.442695, %v6140_v42  ;;  %v6893_v1 = vmul.f32 -1.442695, %v6441_v21  ;;  %v6444_v28 = vadd.f32 %v8206_v51, %v12048_v54  ;;  %v6435_v47 = vpop.f32.mrb[223].mxu1 }
0x25f3   :  { %8911 = vpow2.f32 %v6866_v63  ;;  %v6867_v41 = vmul.f32 -1.442695, %v6132_v59  ;;  %v6891_v25 = vmul.f32 -1.442695, %v6433_v2  ;;  %v6436_v57 = vadd.f32 %v12048_v54, %v6435_v47 }
0x25f4   :  { %8913 = vpow2.f32 %v6869_v45  ;;  %v6894_v58 = vmul.f32 -1.442695, %v6444_v28 }
0x25f5   :  { %8915 = vpow2.f32 %v6893_v1  ;;  %v6892_v60 = vmul.f32 -1.442695, %v6436_v57 }
0x25f6   :  { %8917 = vpow2.f32 %v6867_v41 }
0x25f7   :  { %8919 = vpow2.f32 %v6891_v25 }
0x25f8   :  { %8921 = vpow2.f32 %v6894_v58 }
0x25f9   :  { %8923 = vpow2.f32 %v6892_v60 }
0x25fc   :  { %v8910_v27 = vpop.eup %8909 }
0x25fd   :  { %v8912_v48 = vpop.eup %8911  ;;  %v6205_v11 = vadd.f32 1.0, %v8910_v27 }
0x25fe   :  { %v8914_v35 = vpop.eup %8913  ;;  %v6203_v29 = vadd.f32 1.0, %v8912_v48 }
0x25ff   :  { %v8916_v39 = vpop.eup %8915  ;;  %8925 = vrcp.f32 %v6205_v11  ;;  %v6206_v33 = vadd.f32 1.0, %v8914_v35 }
0x2600   :  { %v8918_v32 = vpop.eup %8917  ;;  %8927 = vrcp.f32 %v6203_v29  ;;  %v6509_v24 = vadd.f32 1.0, %v8916_v39 }
0x2601   :  { %v8920_v54 = vpop.eup %8919  ;;  %8929 = vrcp.f32 %v6206_v33  ;;  %v6204_v56 = vadd.f32 1.0, %v8918_v32 }
0x2602   :  { %v8922_v16 = vpop.eup %8921  ;;  %8931 = vrcp.f32 %v6509_v24  ;;  %v6507_v43 = vadd.f32 1.0, %v8920_v54 }
0x2603   :  { %v8924_v4 = vpop.eup %8923  ;;  %8933 = vrcp.f32 %v6204_v56  ;;  %v6510_v62 = vadd.f32 1.0, %v8922_v16 }
0x2604   :  { %8935 = vrcp.f32 %v6507_v43  ;;  %v6508_v23 = vadd.f32 1.0, %v8924_v4 }
0x2605   :  { %8937 = vrcp.f32 %v6510_v62 }
0x2606   :  { %8939 = vrcp.f32 %v6508_v23 }
0x2609   :  { %v8926_v3 = vpop.eup %8925 }
0x260a   :  { %v8928_v30 = vpop.eup %8927  ;;  %6253 = vst [vmem:[#allocation35 + $0x70] sm:$0xff] %v8926_v3 }
0x260b   :  { %v8930_v5 = vpop.eup %8929  ;;  %6251 = vst [vmem:[#allocation35 + $0x60] sm:$0xff] %v8928_v30 }
0x260c   :  { %v8932_v13 = vpop.eup %8931  ;;  %6254 = vst [vmem:[#allocation35 + $0x78] sm:$0xff] %v8930_v5 }
0x260d   :  { %v8934_v9 = vpop.eup %8933  ;;  %6557 = vst [vmem:[#allocation37 + $0x70] sm:$0xff] %v8932_v13 }
0x260e   :  { %v8936_v10 = vpop.eup %8935  ;;  %6252 = vst [vmem:[#allocation35 + $0x68] sm:$0xff] %v8934_v9 }
0x260f   :  { %v8938_v31 = vpop.eup %8937  ;;  %6555 = vst [vmem:[#allocation37 + $0x60] sm:$0xff] %v8936_v10 }
0x2610   :  { %9448 = shalt.err (!%p9445_p8)
}
0x2611   :  { %s12302_s8 = sld [smem:[#allocation84_spill]] }
0x2617   :  { %s9449_s25 = scalar_lea.hbm %s12302_s8, 2048 }
0x2618   :  { %p9450_p9 = scmp.ne.s32.totalorder %s12302_s8, %s9449_s25  ;;  %p9453_p10 = scmp.lt.u32.totalorder %s9449_s25, %s12302_s8 }
0x261a   :  { %p9455_p11 = pnand %p9453_p10, %p9450_p9 }
0x261c   :  { %9458 = shalt.err (!%p9455_p11)
}
0x261d   :  { %6582 = dma.vmem_to_hbm [thread:$0]  %s6577_s4, 2048, %s12302_s8, [#allocation36], %s9516_s15, %s9516_s15, %s9517_s9   ;;  %v8940_v8 = vpop.eup %8939  ;;  %6558 = vst [vmem:[#allocation37 + $0x78] sm:$0xff] %v8938_v31 }
0x261e   :  { %6556 = vst [vmem:[#allocation37 + $0x68] sm:$0xff] %v8940_v8  ;;  %s9459_s5 = scalar_lea.vmem %s12085_s13, 2048  ;;  %p9464_p13 = scmp.lt.s32.totalorder %s12085_s13, %s12085_s13 }
0x261f   :  { %p9460_p12 = scmp.ne.s32.totalorder %s12085_s13, %s9459_s5  ;;  %p9465_p0 = scmp.lt.s32.totalorder %s9459_s5, %s9459_s5 }
0x2621   :  { %p9466_p1 = por %p9465_p0, %p9464_p13 }
0x2623   :  { %p9467_p2 = pnand %p9466_p1, %p9460_p12 }
0x2625   :  { %9470 = shalt.err (!%p9467_p2)
}
0x2626   :  { %s12303_s27 = sld [smem:[#allocation85_spill]] }
0x262c   :  { %s9471_s11 = scalar_lea.hbm %s12303_s27, 2048 }
0x262d   :  { %p9472_p3 = scmp.ne.s32.totalorder %s12303_s27, %s9471_s11  ;;  %p9475_p4 = scmp.lt.u32.totalorder %s9471_s11, %s12303_s27 }
0x262f   :  { %p9477_p5 = pnand %p9475_p4, %p9472_p3 }
0x2631   :  { %9480 = shalt.err (!%p9477_p5)
}
0x2632   :  { %6594 = dma.vmem_to_hbm [thread:$0]  %s12085_s13, 2048, %s12303_s27, [#allocation36], %s9516_s15, %s9516_s15, %s9517_s9  }
0x2633   :  { %9499 = dma.done.wait [#allocation9], 2048  }
0x2634   :  { %9500 = vsyncadd [#allocation9], 4294965248 }
0x2635   :  { %9501 = dma.done.wait [#allocation36], 4096  }
0x2636   :  { %9502 = vsyncadd [#allocation36], 4294963200 }
0x2637   :  { %6604 = vsyncpa [#allocation8], 1 }
0x2638   :  { %6605 = vsyncpa [#allocation11], 1 }
0x2639   :  { %6606 = vsyncpa [#allocation14], 1 }
0x263a   :  { %6607 = vsyncpa [#allocation17], 1 }
0x263b   :  { %6608 = vsyncpa [#allocation20], 1 }
0x263c   :  { %6609 = vsyncpa [#allocation23], 1 }
0x263d   :  { %6610 = vsyncpa [#allocation26], 1 }
0x263e   :  { %6611 = vsyncpa [#allocation29], 1 }
0x263f   :  { %6612 = vsyncpa [#allocation32], 1 }
0x2640   :  { %6613 = vsyncpa [#allocation9], 1 }
0x2641   :  { %6614 = vsyncpa [#allocation36], 1 }

</bundles_post_ra>
